<compile_context>
chip_gen: v6e
topology: v6e:2x2x1
jax: 0.10.0
libtpu: 0.0.40
codegen_flags: <defaults>
</compile_context>

<pallas_src>
import jax
import jax.numpy as jnp
from jax.experimental import pallas as pl
from jax.experimental.pallas import tpu as pltpu

NUM_EMBEDDINGS = 8
EMBEDDING_DIM = 128 * 5          # 640
VIEW_FEAT = 128
COMMITMENT_COST = 10.0
BETA = 0.25
RECON_WEIGHT = 1.0


def _full_spec(shape):
    nd = len(shape)
    return pl.BlockSpec(shape, lambda i, _n=nd: (0,) * _n)


# --------------------------------------------------------------------------- #
# Fused kernel: MultiViewEncoder (stand-in) + VectorQuantizerEMA.forward +
#               TaskModel post-processing (softmax, loss.mean()).
# --------------------------------------------------------------------------- #
def _task_model_kernel(obs_ref, w_enc_ref, b_enc_ref, emb_ref, b0_ref, b1_ref,
                       w0_hbm, w1_hbm, ws_hbm,
                       scalars_ref, quant_ref, label_ref, final_out_ref,
                       w0_buf, w1_buf, ws_buf, dma_sem):
    # ---- kick off the ~4 MiB decode-weight fetch; overlap with encoder + VQ -------
    cp0 = pltpu.make_async_copy(w0_hbm, w0_buf, dma_sem.at[0])
    cp1 = pltpu.make_async_copy(w1_hbm, w1_buf, dma_sem.at[1])
    cps = pltpu.make_async_copy(ws_hbm, ws_buf, dma_sem.at[2])
    cp0.start(); cp1.start(); cps.start()

    bs, d = quant_ref.shape
    m2 = 2 * bs
    n_views = obs_ref.shape[0] // m2

    # ---- stand-in multi-view encoder: ONE (V*2*bs, CHW) x (CHW, 128) bf16 matmul --
    enc_flat = (jnp.dot(obs_ref[...], w_enc_ref[...],
                        preferred_element_type=jnp.float32)
                + b_enc_ref[...])                               # (V*2*bs, 128) f32
    # re-assemble per-view features: contiguous sublane slices + lane concat
    enc = jnp.concatenate(
        [enc_flat[v * m2:(v + 1) * m2, :] for v in range(n_views)],
        axis=-1)                                                # (2*bs, 640) f32
    c = enc[:bs, :]                                             # curr_x ("cond_x")
    x = enc[bs:, :]                                             # final_x ("inputs")

    # ---- VQ: distances  ||x||^2 + ||e||^2 - 2 x e^T -------------------------------
    e = emb_ref[...]                                            # codebook (K, 640) f32
    k_num = e.shape[0]
    x2 = jnp.sum(x * x, axis=1, keepdims=True)                  # (bs, 1)
    e2 = jnp.sum(e * e, axis=1)[None, :]                        # (1, K)
    xe = jnp.dot(x, e.T, preferred_element_type=jnp.float32)    # (bs, K)
    dist = x2 + e2 - 2.0 * xe

    # ---- argmin (first-index tie-break, matches torch.argmin) -> one-hot ----------
    iota = jax.lax.broadcasted_iota(jnp.int32, (bs, k_num), 1)
    min_d = jnp.min(dist, axis=1, keepdims=True)
    idx = jnp.min(jnp.where(dist <= min_d, iota, k_num), axis=1, keepdims=True)
    encodings = (iota == idx).astype(jnp.float32)               # (bs, K)
    quantized = jnp.dot(encodings, e, preferred_element_type=jnp.float32)

    # ---- reconstruction loss scalar (detach only affects grads) -------------------
    diff = quantized - x
    recon = (1.0 + BETA) * jnp.mean(diff * diff, axis=(0, 1), keepdims=True)  # (1,1)

    # ---- cond_decode = ResnetBlockFC(2D -> D) on cat(quantized, cond_x) -----------
    cp0.wait(); cp1.wait(); cps.wait()                          # weights now in VMEM
    cat_bf = jnp.concatenate([quantized, c], axis=-1).astype(jnp.bfloat16)  # (bs, 2D)
    cat_relu = jnp.maximum(cat_bf, 0)                           # relu commutes w/ cast
    net = (jnp.dot(cat_relu, w0_buf[...], preferred_element_type=jnp.float32)
           + b0_ref[...])
    dx = (jnp.dot(jnp.maximum(net, 0.0).astype(jnp.bfloat16), w1_buf[...],
                  preferred_element_type=jnp.float32)
          + b1_ref[...])
    x_s = jnp.dot(cat_bf, ws_buf[...], preferred_element_type=jnp.float32)
    task_embed = x_s + dx                                       # (bs, D)

    # ---- losses (folded to scalars: loss.mean() only is returned) -----------------
    task_label = x - c
    e_latent = (task_embed - task_label) ** 2                   # MSE 'none'
    loss_s = (COMMITMENT_COST * jnp.mean(e_latent, axis=(0, 1), keepdims=True)
              + RECON_WEIGHT * recon)                           # (1, 1)

    # ---- perplexity ----------------------------------------------------------------
    avg_probs = jnp.mean(encodings, axis=0, keepdims=True)      # (1, K)
    ent = jnp.sum(avg_probs * jnp.log(avg_probs + 1e-10), axis=1, keepdims=True)
    perp_s = jnp.exp(-ent)                                      # (1, 1)

    # pack the two scalars into one lane-dense row: [loss, perplexity, 0, ...]
    lane = jax.lax.broadcasted_iota(jnp.int32, (1, 128), 1)
    scalars_ref[...] = jnp.where(lane == 0, loss_s,
                                 jnp.where(lane == 1, perp_s, 0.0))

    # ---- straight-through forward value == task_embed; softmax over dim=1 ---------
    m = jnp.max(task_embed, axis=1, keepdims=True)
    ex = jnp.exp(task_embed - m)
    quant_ref[...] = ex / jnp.sum(ex, axis=1, keepdims=True)

    label_ref[...] = task_label
    final_out_ref[...] = x


def _task_model_pallas(obs, params, bs):
    d = EMBEDDING_DIM
    k_num = params["embedding"].shape[0]
    chw = params["w_enc"].shape[0]
    m_rows = obs.shape[0]                                       # V * 2 * bs
    n_views = m_rows // (2 * bs)

    # Advisory cost estimate (lets XLA schedule around the small custom call).
    flops = int(2 * m_rows * chw * VIEW_FEAT                    # encoder matmul
                + 2 * bs * d * k_num * 2                        # distances + quantize
                + 2 * bs * (2 * d) * d * 2                      # fc_0 + shortcut
                + 2 * bs * d * d)                               # fc_1
    transcendentals = int(bs * d + 2 * k_num + 1)
    in_bytes = sum(int(a.size) * int(a.dtype.itemsize) for a in
                   (obs, params["w_enc"], params["b_enc"], params["embedding"],
                    params["b0"], params["b1"], params["w0"], params["w1"],
                    params["ws"]))
    out_bytes = 4 * (128 + 3 * bs * d)

    outs = pl.pallas_call(
        _task_model_kernel,
        out_shape=(
            jax.ShapeDtypeStruct((1, 128), jnp.float32),   # [loss.mean(), perplexity]
            jax.ShapeDtypeStruct((bs, d), jnp.float32),    # softmax(task_embed)
            jax.ShapeDtypeStruct((bs, d), jnp.float32),    # task_label
            jax.ShapeDtypeStruct((bs, d), jnp.float32),    # final_x.view(bs, -1)
        ),
        grid=(1,),
        in_specs=[
            _full_spec((m_rows, chw)),                     # obs (bf16)
            _full_spec((chw, VIEW_FEAT)),                  # w_enc (bf16)
            _full_spec((1, VIEW_FEAT)),                    # b_enc
            _full_spec((k_num, d)),                        # codebook
            _full_spec((1, d)),                            # b0
            _full_spec((1, d)),                            # b1
            pl.BlockSpec(memory_space=pl.ANY),             # w0  (manual DMA)
            pl.BlockSpec(memory_space=pl.ANY),             # w1  (manual DMA)
            pl.BlockSpec(memory_space=pl.ANY),             # ws  (manual DMA)
        ],
        out_specs=(
            _full_spec((1, 128)), _full_spec((bs, d)),
            _full_spec((bs, d)), _full_spec((bs, d)),
        ),
        scratch_shapes=[
            pltpu.VMEM((2 * d, d), jnp.bfloat16),          # w0 buffer
            pltpu.VMEM((d, d), jnp.bfloat16),              # w1 buffer
            pltpu.VMEM((2 * d, d), jnp.bfloat16),          # ws buffer
            pltpu.SemaphoreType.DMA((3,)),
        ],
        compiler_params=pltpu.CompilerParams(
            dimension_semantics=("arbitrary",),
            vmem_limit_bytes=16 * 1024 * 1024),            # footprint is ~6 MiB
        cost_estimate=pl.CostEstimate(
            flops=flops, transcendentals=transcendentals,
            bytes_accessed=in_bytes + out_bytes),
    )(obs, params["w_enc"], params["b_enc"], params["embedding"],
      params["b0"], params["b1"], params["w0"], params["w1"], params["ws"])
    return outs


# --------------------------------------------------------------------------- #
# Glue (plain JAX): parameter setup and TaskModel.forward orchestration
# --------------------------------------------------------------------------- #
def init_params(key, obs_feat_dim, view_feat_dim=VIEW_FEAT):
    d = EMBEDDING_DIM
    h = EMBEDDING_DIM                                     # ResnetBlockFC hidden
    ks = jax.random.split(key, 8)
    emb = jax.random.normal(ks[0], (NUM_EMBEDDINGS, d), jnp.float32)   # .normal_()
    # ResnetBlockFC(2D, D): fc_0 (2D->H), fc_1 (H->D), shortcut (2D->D, no bias).
    # Large weights stored in bf16 (halves HBM weight DMA); biases/codebook stay f32.
    w0 = (jax.random.normal(ks[1], (2 * d, h), jnp.float32) * 0.02).astype(jnp.bfloat16)
    b0 = jax.random.normal(ks[2], (1, h), jnp.float32) * 0.02
    w1 = (jax.random.normal(ks[3], (h, d), jnp.float32) * 0.02).astype(jnp.bfloat16)
    b1 = jax.random.normal(ks[4], (1, d), jnp.float32) * 0.02
    ws = (jax.random.normal(ks[5], (2 * d, d), jnp.float32) * 0.02).astype(jnp.bfloat16)
    # stand-in MultiViewEncoder: per-view linear projection (shared) to 128 dims
    w_enc = (jax.random.normal(ks[6], (obs_feat_dim, view_feat_dim),
                               jnp.float32) * 0.02).astype(jnp.bfloat16)
    b_enc = jax.random.normal(ks[7], (1, view_feat_dim), jnp.float32) * 0.02
    return dict(embedding=emb, w0=w0, b0=b0, w1=w1, b1=b1, ws=ws,
                w_enc=w_enc, b_enc=b_enc)


@jax.jit
def task_model_forward(curr_obs, final_obs, params):
    bs, n_views = curr_obs.shape[0], curr_obs.shape[1]
    chw = 1
    for s in curr_obs.shape[2:]:
        chw *= s
    # Stack curr+final and lay the views out view-major so the kernel's encoder is a
    # single (V*2*bs, CHW) matmul with contiguous per-view output row blocks.
    # XLA fuses this transpose with the bf16 cast (~160 KiB, outside the kernel).
    obs = jnp.concatenate([curr_obs.reshape(bs, n_views, chw),
                           final_obs.reshape(bs, n_views, chw)], axis=0)  # (2bs, V, chw)
    obs = jnp.transpose(obs, (1, 0, 2)).reshape(n_views * 2 * bs, chw)
    obs = obs.astype(jnp.bfloat16)

    scalars, quant_soft, task_label, final_flat_x = _task_model_pallas(obs, params, bs)
    # matches: (loss.mean(), softmax(quantized), perplexity, task_label,
    #           final_x.view(bs, -1))
    return scalars[0, 0], quant_soft, scalars[0, 1], task_label, final_flat_x


if __name__ == "__main__":
    bs, views, chans, hh, ww = 8, 5, 4, 16, 16              # 5 views x 128 = 640
    key = jax.random.PRNGKey(0)
    k_p, k_a, k_b = jax.random.split(key, 3)

    params = init_params(k_p, obs_feat_dim=chans * hh * ww)
    curr_obs = jax.random.normal(k_a, (bs, views, chans, hh, ww), jnp.float32)
    final_obs = jax.random.normal(k_b, (bs, views, chans, hh, ww), jnp.float32)

    outs = task_model_forward(curr_obs, final_obs, params)
    outs = jax.block_until_ready(outs)

    loss_mean, quant_soft, perp, task_label, final_flat = outs
    assert loss_mean.shape == ()
    assert quant_soft.shape == (bs, EMBEDDING_DIM)
    assert perp.shape == ()
    assert task_label.shape == (bs, EMBEDDING_DIM)
    assert final_flat.shape == (bs, EMBEDDING_DIM)
    assert bool(jnp.isfinite(loss_mean)) and bool(jnp.isfinite(perp))
    # softmax rows should sum to ~1
    assert bool(jnp.all(jnp.abs(jnp.sum(quant_soft, axis=1) - 1.0) < 1e-3))
    print("KERNEL_OK")
</pallas_src>

<mosaic_0001>
module attributes {stable_mosaic.version = 11 : i64} {
  func.func @_task_model_kernel(%arg0: i32, %arg1: memref<80x1024xbf16, #tpu.memory_space<vmem>>, %arg2: memref<1024x128xbf16, #tpu.memory_space<vmem>>, %arg3: memref<1x128xf32, #tpu.memory_space<vmem>>, %arg4: memref<8x640xf32, #tpu.memory_space<vmem>>, %arg5: memref<1x640xf32, #tpu.memory_space<vmem>>, %arg6: memref<1x640xf32, #tpu.memory_space<vmem>>, %arg7: memref<1280x640xbf16, #tpu.memory_space<any>>, %arg8: memref<640x640xbf16, #tpu.memory_space<any>>, %arg9: memref<1280x640xbf16, #tpu.memory_space<any>>, %arg10: memref<1x128xf32, #tpu.memory_space<vmem>>, %arg11: memref<8x640xf32, #tpu.memory_space<vmem>>, %arg12: memref<8x640xf32, #tpu.memory_space<vmem>>, %arg13: memref<8x640xf32, #tpu.memory_space<vmem>>, %arg14: memref<1280x640xbf16, #tpu.memory_space<vmem>>, %arg15: memref<640x640xbf16, #tpu.memory_space<vmem>>, %arg16: memref<1280x640xbf16, #tpu.memory_space<vmem>>, %arg17: memref<3x!tpu.dma_semaphore, #tpu.memory_space<semaphore_mem>>) attributes {dimension_semantics = [#tpu.dimension_semantics<arbitrary>], iteration_bounds = array<i64: 1>, scalar_prefetch = 0 : i64, scratch_operands = 4 : i64, tpu.core_type = #tpu.core_type<tc>, window_params = [{pipeline_mode = #tpu.pipeline_mode<synchronous>, transform_indices = @transform_0, window_bounds = array<i64: 80, 1024>}, {pipeline_mode = #tpu.pipeline_mode<synchronous>, transform_indices = @transform_1, window_bounds = array<i64: 1024, 128>}, {pipeline_mode = #tpu.pipeline_mode<synchronous>, transform_indices = @transform_2, window_bounds = array<i64: 1, 128>}, {pipeline_mode = #tpu.pipeline_mode<synchronous>, transform_indices = @transform_3, window_bounds = array<i64: 8, 640>}, {pipeline_mode = #tpu.pipeline_mode<synchronous>, transform_indices = @transform_4, window_bounds = array<i64: 1, 640>}, {pipeline_mode = #tpu.pipeline_mode<synchronous>, transform_indices = @transform_5, window_bounds = array<i64: 1, 640>}, {}, {}, {}, {pipeline_mode = #tpu.pipeline_mode<synchronous>, transform_indices = @transform_9, window_bounds = array<i64: 1, 128>}, {pipeline_mode = #tpu.pipeline_mode<synchronous>, transform_indices = @transform_10, window_bounds = array<i64: 8, 640>}, {pipeline_mode = #tpu.pipeline_mode<synchronous>, transform_indices = @transform_11, window_bounds = array<i64: 8, 640>}, {pipeline_mode = #tpu.pipeline_mode<synchronous>, transform_indices = @transform_12, window_bounds = array<i64: 8, 640>}]} {
    %c0_i32 = arith.constant 0 : i32
    %0 = tpu.memref_slice %arg17[%c0_i32] : memref<3x!tpu.dma_semaphore, #tpu.memory_space<semaphore_mem>> -> memref<1x!tpu.dma_semaphore, #tpu.memory_space<semaphore_mem>>
    %1 = tpu.memref_squeeze %0 : memref<1x!tpu.dma_semaphore, #tpu.memory_space<semaphore_mem>> -> memref<!tpu.dma_semaphore, #tpu.memory_space<semaphore_mem>>
    tpu.enqueue_dma source(%arg7 : memref<1280x640xbf16, #tpu.memory_space<any>>) target(%arg14 : memref<1280x640xbf16, #tpu.memory_space<vmem>>) target_semaphore(%1 : memref<!tpu.dma_semaphore, #tpu.memory_space<semaphore_mem>>)
    %c1_i32 = arith.constant 1 : i32
    %2 = tpu.memref_slice %arg17[%c1_i32] : memref<3x!tpu.dma_semaphore, #tpu.memory_space<semaphore_mem>> -> memref<1x!tpu.dma_semaphore, #tpu.memory_space<semaphore_mem>>
    %3 = tpu.memref_squeeze %2 : memref<1x!tpu.dma_semaphore, #tpu.memory_space<semaphore_mem>> -> memref<!tpu.dma_semaphore, #tpu.memory_space<semaphore_mem>>
    tpu.enqueue_dma source(%arg8 : memref<640x640xbf16, #tpu.memory_space<any>>) target(%arg15 : memref<640x640xbf16, #tpu.memory_space<vmem>>) target_semaphore(%3 : memref<!tpu.dma_semaphore, #tpu.memory_space<semaphore_mem>>)
    %c2_i32 = arith.constant 2 : i32
    %4 = tpu.memref_slice %arg17[%c2_i32] : memref<3x!tpu.dma_semaphore, #tpu.memory_space<semaphore_mem>> -> memref<1x!tpu.dma_semaphore, #tpu.memory_space<semaphore_mem>>
    %5 = tpu.memref_squeeze %4 : memref<1x!tpu.dma_semaphore, #tpu.memory_space<semaphore_mem>> -> memref<!tpu.dma_semaphore, #tpu.memory_space<semaphore_mem>>
    tpu.enqueue_dma source(%arg9 : memref<1280x640xbf16, #tpu.memory_space<any>>) target(%arg16 : memref<1280x640xbf16, #tpu.memory_space<vmem>>) target_semaphore(%5 : memref<!tpu.dma_semaphore, #tpu.memory_space<semaphore_mem>>)
    %c0 = arith.constant 0 : index
    %c0_0 = arith.constant 0 : index
    %6 = vector.load %arg1[%c0, %c0_0] : memref<80x1024xbf16, #tpu.memory_space<vmem>>, vector<80x1024xbf16>
    %c0_1 = arith.constant 0 : index
    %c0_2 = arith.constant 0 : index
    %7 = vector.load %arg2[%c0_1, %c0_2] : memref<1024x128xbf16, #tpu.memory_space<vmem>>, vector<1024x128xbf16>
    %cst = arith.constant dense<0.000000e+00> : vector<80x128xf32>
    %8 = tpu.matmul %6, %7, %cst {dimension_numbers = #tpu.dot_dimension_numbers<[1], [0], [0], [1], [0, 0, 1, 1], [], []>} : vector<80x1024xbf16>, vector<1024x128xbf16>, vector<80x128xf32> -> vector<80x128xf32>
    %c0_3 = arith.constant 0 : index
    %c0_4 = arith.constant 0 : index
    %9 = vector.load %arg3[%c0_3, %c0_4] : memref<1x128xf32, #tpu.memory_space<vmem>>, vector<1x128xf32>
    %10 = vector.broadcast %9 : vector<1x128xf32> to vector<80x128xf32>
    %11 = arith.addf %8, %10 : vector<80x128xf32>
    %12 = vector.extract_strided_slice %11 {offsets = [0, 0], sizes = [16, 128], strides = [1, 1]} : vector<80x128xf32> to vector<16x128xf32>
    %13 = vector.extract_strided_slice %11 {offsets = [16, 0], sizes = [16, 128], strides = [1, 1]} : vector<80x128xf32> to vector<16x128xf32>
    %14 = vector.extract_strided_slice %11 {offsets = [32, 0], sizes = [16, 128], strides = [1, 1]} : vector<80x128xf32> to vector<16x128xf32>
    %15 = vector.extract_strided_slice %11 {offsets = [48, 0], sizes = [16, 128], strides = [1, 1]} : vector<80x128xf32> to vector<16x128xf32>
    %16 = vector.extract_strided_slice %11 {offsets = [64, 0], sizes = [16, 128], strides = [1, 1]} : vector<80x128xf32> to vector<16x128xf32>
    %17 = tpu.concatenate %12, %13, %14, %15, %16 in 1 : vector<16x128xf32>, vector<16x128xf32>, vector<16x128xf32>, vector<16x128xf32>, vector<16x128xf32> -> vector<16x640xf32>
    %18 = vector.extract_strided_slice %17 {offsets = [0, 0], sizes = [8, 640], strides = [1, 1]} : vector<16x640xf32> to vector<8x640xf32>
    %19 = vector.extract_strided_slice %17 {offsets = [8, 0], sizes = [8, 640], strides = [1, 1]} : vector<16x640xf32> to vector<8x640xf32>
    %c0_5 = arith.constant 0 : index
    %c0_6 = arith.constant 0 : index
    %20 = vector.load %arg4[%c0_5, %c0_6] : memref<8x640xf32, #tpu.memory_space<vmem>>, vector<8x640xf32>
    %21 = arith.mulf %19, %19 : vector<8x640xf32>
    %cst_7 = arith.constant dense<0.000000e+00> : vector<8xf32>
    %22 = vector.multi_reduction <add>, %21, %cst_7 [1] : vector<8x640xf32> to vector<8xf32>
    %23 = vector.shape_cast %22 : vector<8xf32> to vector<8x1xf32>
    %24 = arith.mulf %20, %20 : vector<8x640xf32>
    %cst_8 = arith.constant dense<0.000000e+00> : vector<8xf32>
    %25 = vector.multi_reduction <add>, %24, %cst_8 [1] : vector<8x640xf32> to vector<8xf32>
    %26 = vector.shape_cast %25 : vector<8xf32> to vector<1x8xf32>
    %27 = tpu.transpose %20, [1, 0] : vector<8x640xf32> -> vector<640x8xf32>
    %cst_9 = arith.constant dense<0.000000e+00> : vector<8x8xf32>
    %28 = tpu.matmul %19, %27, %cst_9 {dimension_numbers = #tpu.dot_dimension_numbers<[1], [0], [0], [1], [0, 0, 1, 1], [], []>} : vector<8x640xf32>, vector<640x8xf32>, vector<8x8xf32> -> vector<8x8xf32>
    %29 = vector.broadcast %23 : vector<8x1xf32> to vector<8x8xf32>
    %30 = vector.broadcast %26 : vector<1x8xf32> to vector<8x8xf32>
    %31 = arith.addf %29, %30 : vector<8x8xf32>
    %cst_10 = arith.constant 2.000000e+00 : f32
    %32 = vector.broadcast %cst_10 : f32 to vector<8x8xf32>
    %33 = arith.mulf %32, %28 : vector<8x8xf32>
    %34 = arith.subf %31, %33 : vector<8x8xf32>
    %35 = tpu.iota {dimensions = array<i32: 1>} : vector<8x8xi32>
    %cst_11 = arith.constant dense<0x7F800000> : vector<8xf32>
    %36 = vector.multi_reduction <minimumf>, %34, %cst_11 [1] : vector<8x8xf32> to vector<8xf32>
    %37 = vector.shape_cast %36 : vector<8xf32> to vector<8x1xf32>
    %38 = vector.broadcast %37 : vector<8x1xf32> to vector<8x8xf32>
    %39 = arith.cmpf ole, %34, %38 : vector<8x8xf32>
    %c8_i32 = arith.constant 8 : i32
    %40 = vector.broadcast %c8_i32 : i32 to vector<8x8xi32>
    %41 = arith.select %39, %35, %40 : vector<8x8xi1>, vector<8x8xi32>
    %cst_12 = arith.constant dense<2147483647> : vector<8xi32>
    %42 = vector.multi_reduction <minsi>, %41, %cst_12 [1] : vector<8x8xi32> to vector<8xi32>
    %43 = vector.shape_cast %42 : vector<8xi32> to vector<8x1xi32>
    %44 = vector.broadcast %43 : vector<8x1xi32> to vector<8x8xi32>
    %45 = arith.cmpi eq, %35, %44 : vector<8x8xi32>
    %46 = arith.extui %45 : vector<8x8xi1> to vector<8x8xi32>
    %47 = arith.sitofp %46 : vector<8x8xi32> to vector<8x8xf32>
    %cst_13 = arith.constant dense<0.000000e+00> : vector<8x640xf32>
    %48 = tpu.matmul %47, %20, %cst_13 {dimension_numbers = #tpu.dot_dimension_numbers<[1], [0], [0], [1], [0, 0, 1, 1], [], []>} : vector<8x8xf32>, vector<8x640xf32>, vector<8x640xf32> -> vector<8x640xf32>
    %49 = arith.subf %48, %19 : vector<8x640xf32>
    %50 = arith.mulf %49, %49 : vector<8x640xf32>
    %51 = vector.shape_cast %50 : vector<8x640xf32> to vector<1x8x640xf32>
    %cst_14 = arith.constant dense<0.000000e+00> : vector<1xf32>
    %52 = vector.multi_reduction <add>, %51, %cst_14 [1, 2] : vector<1x8x640xf32> to vector<1xf32>
    %53 = vector.shape_cast %52 : vector<1xf32> to vector<1x1x1xf32>
    %54 = vector.extract %53[0, 0, 0] : f32 from vector<1x1x1xf32>
    %55 = vector.broadcast %54 : f32 to vector<1x1xf32>
    %cst_15 = arith.constant 5.120000e+03 : f32
    %56 = vector.broadcast %cst_15 : f32 to vector<1x1xf32>
    %57 = arith.divf %55, %56 : vector<1x1xf32>
    %cst_16 = arith.constant 1.250000e+00 : f32
    %58 = vector.broadcast %cst_16 : f32 to vector<1x1xf32>
    %59 = arith.mulf %58, %57 : vector<1x1xf32>
    %c0_i32_17 = arith.constant 0 : i32
    %60 = tpu.memref_slice %arg17[%c0_i32_17] : memref<3x!tpu.dma_semaphore, #tpu.memory_space<semaphore_mem>> -> memref<1x!tpu.dma_semaphore, #tpu.memory_space<semaphore_mem>>
    %61 = tpu.memref_squeeze %60 : memref<1x!tpu.dma_semaphore, #tpu.memory_space<semaphore_mem>> -> memref<!tpu.dma_semaphore, #tpu.memory_space<semaphore_mem>>
    tpu.wait_dma2 semaphore(%61 : memref<!tpu.dma_semaphore, #tpu.memory_space<semaphore_mem>>) src(%arg7 : memref<1280x640xbf16, #tpu.memory_space<any>>) dst(%arg14 : memref<1280x640xbf16, #tpu.memory_space<vmem>>)
    %c1_i32_18 = arith.constant 1 : i32
    %62 = tpu.memref_slice %arg17[%c1_i32_18] : memref<3x!tpu.dma_semaphore, #tpu.memory_space<semaphore_mem>> -> memref<1x!tpu.dma_semaphore, #tpu.memory_space<semaphore_mem>>
    %63 = tpu.memref_squeeze %62 : memref<1x!tpu.dma_semaphore, #tpu.memory_space<semaphore_mem>> -> memref<!tpu.dma_semaphore, #tpu.memory_space<semaphore_mem>>
    tpu.wait_dma2 semaphore(%63 : memref<!tpu.dma_semaphore, #tpu.memory_space<semaphore_mem>>) src(%arg8 : memref<640x640xbf16, #tpu.memory_space<any>>) dst(%arg15 : memref<640x640xbf16, #tpu.memory_space<vmem>>)
    %c2_i32_19 = arith.constant 2 : i32
    %64 = tpu.memref_slice %arg17[%c2_i32_19] : memref<3x!tpu.dma_semaphore, #tpu.memory_space<semaphore_mem>> -> memref<1x!tpu.dma_semaphore, #tpu.memory_space<semaphore_mem>>
    %65 = tpu.memref_squeeze %64 : memref<1x!tpu.dma_semaphore, #tpu.memory_space<semaphore_mem>> -> memref<!tpu.dma_semaphore, #tpu.memory_space<semaphore_mem>>
    tpu.wait_dma2 semaphore(%65 : memref<!tpu.dma_semaphore, #tpu.memory_space<semaphore_mem>>) src(%arg9 : memref<1280x640xbf16, #tpu.memory_space<any>>) dst(%arg16 : memref<1280x640xbf16, #tpu.memory_space<vmem>>)
    %66 = tpu.concatenate %48, %18 in 1 : vector<8x640xf32>, vector<8x640xf32> -> vector<8x1280xf32>
    %67 = arith.truncf %66 : vector<8x1280xf32> to vector<8x1280xbf16>
    %cst_20 = arith.constant 0.000000e+00 : bf16
    %68 = vector.broadcast %cst_20 : bf16 to vector<8x1280xbf16>
    %69 = arith.maximumf %67, %68 : vector<8x1280xbf16>
    %c0_21 = arith.constant 0 : index
    %c0_22 = arith.constant 0 : index
    %70 = vector.load %arg14[%c0_21, %c0_22] : memref<1280x640xbf16, #tpu.memory_space<vmem>>, vector<1280x640xbf16>
    %cst_23 = arith.constant dense<0.000000e+00> : vector<8x640xf32>
    %71 = tpu.matmul %69, %70, %cst_23 {dimension_numbers = #tpu.dot_dimension_numbers<[1], [0], [0], [1], [0, 0, 1, 1], [], []>} : vector<8x1280xbf16>, vector<1280x640xbf16>, vector<8x640xf32> -> vector<8x640xf32>
    %c0_24 = arith.constant 0 : index
    %c0_25 = arith.constant 0 : index
    %72 = vector.load %arg5[%c0_24, %c0_25] : memref<1x640xf32, #tpu.memory_space<vmem>>, vector<1x640xf32>
    %73 = vector.broadcast %72 : vector<1x640xf32> to vector<8x640xf32>
    %74 = arith.addf %71, %73 : vector<8x640xf32>
    %cst_26 = arith.constant 0.000000e+00 : f32
    %75 = vector.broadcast %cst_26 : f32 to vector<8x640xf32>
    %76 = arith.maximumf %74, %75 : vector<8x640xf32>
    %77 = arith.truncf %76 : vector<8x640xf32> to vector<8x640xbf16>
    %c0_27 = arith.constant 0 : index
    %c0_28 = arith.constant 0 : index
    %78 = vector.load %arg15[%c0_27, %c0_28] : memref<640x640xbf16, #tpu.memory_space<vmem>>, vector<640x640xbf16>
    %cst_29 = arith.constant dense<0.000000e+00> : vector<8x640xf32>
    %79 = tpu.matmul %77, %78, %cst_29 {dimension_numbers = #tpu.dot_dimension_numbers<[1], [0], [0], [1], [0, 0, 1, 1], [], []>} : vector<8x640xbf16>, vector<640x640xbf16>, vector<8x640xf32> -> vector<8x640xf32>
    %c0_30 = arith.constant 0 : index
    %c0_31 = arith.constant 0 : index
    %80 = vector.load %arg6[%c0_30, %c0_31] : memref<1x640xf32, #tpu.memory_space<vmem>>, vector<1x640xf32>
    %81 = vector.broadcast %80 : vector<1x640xf32> to vector<8x640xf32>
    %82 = arith.addf %79, %81 : vector<8x640xf32>
    %c0_32 = arith.constant 0 : index
    %c0_33 = arith.constant 0 : index
    %83 = vector.load %arg16[%c0_32, %c0_33] : memref<1280x640xbf16, #tpu.memory_space<vmem>>, vector<1280x640xbf16>
    %cst_34 = arith.constant dense<0.000000e+00> : vector<8x640xf32>
    %84 = tpu.matmul %67, %83, %cst_34 {dimension_numbers = #tpu.dot_dimension_numbers<[1], [0], [0], [1], [0, 0, 1, 1], [], []>} : vector<8x1280xbf16>, vector<1280x640xbf16>, vector<8x640xf32> -> vector<8x640xf32>
    %85 = arith.addf %84, %82 : vector<8x640xf32>
    %86 = arith.subf %19, %18 : vector<8x640xf32>
    %87 = arith.subf %85, %86 : vector<8x640xf32>
    %88 = arith.mulf %87, %87 : vector<8x640xf32>
    %89 = vector.shape_cast %88 : vector<8x640xf32> to vector<1x8x640xf32>
    %cst_35 = arith.constant dense<0.000000e+00> : vector<1xf32>
    %90 = vector.multi_reduction <add>, %89, %cst_35 [1, 2] : vector<1x8x640xf32> to vector<1xf32>
    %91 = vector.shape_cast %90 : vector<1xf32> to vector<1x1x1xf32>
    %92 = vector.extract %91[0, 0, 0] : f32 from vector<1x1x1xf32>
    %93 = vector.broadcast %92 : f32 to vector<1x1xf32>
    %cst_36 = arith.constant 5.120000e+03 : f32
    %94 = vector.broadcast %cst_36 : f32 to vector<1x1xf32>
    %95 = arith.divf %93, %94 : vector<1x1xf32>
    %cst_37 = arith.constant 1.000000e+01 : f32
    %96 = vector.broadcast %cst_37 : f32 to vector<1x1xf32>
    %97 = arith.mulf %96, %95 : vector<1x1xf32>
    %cst_38 = arith.constant 1.000000e+00 : f32
    %98 = vector.broadcast %cst_38 : f32 to vector<1x1xf32>
    %99 = arith.mulf %98, %59 : vector<1x1xf32>
    %100 = arith.addf %97, %99 : vector<1x1xf32>
    %cst_39 = arith.constant dense<0.000000e+00> : vector<8xf32>
    %101 = vector.multi_reduction <add>, %47, %cst_39 [0] : vector<8x8xf32> to vector<8xf32>
    %102 = vector.shape_cast %101 : vector<8xf32> to vector<1x8xf32>
    %cst_40 = arith.constant 8.000000e+00 : f32
    %103 = vector.broadcast %cst_40 : f32 to vector<1x8xf32>
    %104 = arith.divf %102, %103 : vector<1x8xf32>
    %cst_41 = arith.constant 1.000000e-10 : f32
    %105 = vector.broadcast %cst_41 : f32 to vector<1x8xf32>
    %106 = arith.addf %104, %105 : vector<1x8xf32>
    %107 = math.log %106 : vector<1x8xf32>
    %108 = arith.mulf %104, %107 : vector<1x8xf32>
    %cst_42 = arith.constant dense<0.000000e+00> : vector<1xf32>
    %109 = vector.multi_reduction <add>, %108, %cst_42 [1] : vector<1x8xf32> to vector<1xf32>
    %110 = vector.shape_cast %109 : vector<1xf32> to vector<1x1xf32>
    %cst_43 = arith.constant 0.000000e+00 : f32
    %111 = vector.broadcast %cst_43 : f32 to vector<1x1xf32>
    %112 = arith.subf %111, %110 : vector<1x1xf32>
    %113 = math.exp %112 : vector<1x1xf32>
    %114 = tpu.iota {dimensions = array<i32: 1>} : vector<1x128xi32>
    %c0_i32_44 = arith.constant 0 : i32
    %115 = vector.broadcast %c0_i32_44 : i32 to vector<1x128xi32>
    %116 = arith.cmpi eq, %114, %115 : vector<1x128xi32>
    %c1_i32_45 = arith.constant 1 : i32
    %117 = vector.broadcast %c1_i32_45 : i32 to vector<1x128xi32>
    %118 = arith.cmpi eq, %114, %117 : vector<1x128xi32>
    %cst_46 = arith.constant 0.000000e+00 : f32
    %119 = vector.shape_cast %113 : vector<1x1xf32> to vector<1x1xf32>
    %120 = vector.broadcast %119 : vector<1x1xf32> to vector<1x128xf32>
    %121 = vector.broadcast %cst_46 : f32 to vector<1x128xf32>
    %122 = arith.select %118, %120, %121 : vector<1x128xi1>, vector<1x128xf32>
    %123 = vector.shape_cast %100 : vector<1x1xf32> to vector<1x1xf32>
    %124 = vector.broadcast %123 : vector<1x1xf32> to vector<1x128xf32>
    %125 = arith.select %116, %124, %122 : vector<1x128xi1>, vector<1x128xf32>
    %c0_47 = arith.constant 0 : index
    %c0_48 = arith.constant 0 : index
    %126 = vector.load %arg10[%c0_47, %c0_48] : memref<1x128xf32, #tpu.memory_space<vmem>>, vector<1x128xf32>
    tpu.vector_store %arg10[%c0_47, %c0_48], %125 {strides = array<i32>} : memref<1x128xf32, #tpu.memory_space<vmem>>, vector<1x128xf32>,
    %cst_49 = arith.constant dense<0xFF800000> : vector<8xf32>
    %127 = vector.multi_reduction <maximumf>, %85, %cst_49 [1] : vector<8x640xf32> to vector<8xf32>
    %128 = vector.shape_cast %127 : vector<8xf32> to vector<8x1xf32>
    %129 = vector.broadcast %128 : vector<8x1xf32> to vector<8x640xf32>
    %130 = arith.subf %85, %129 : vector<8x640xf32>
    %131 = math.exp %130 : vector<8x640xf32>
    %cst_50 = arith.constant dense<0.000000e+00> : vector<8xf32>
    %132 = vector.multi_reduction <add>, %131, %cst_50 [1] : vector<8x640xf32> to vector<8xf32>
    %133 = vector.shape_cast %132 : vector<8xf32> to vector<8x1xf32>
    %134 = vector.broadcast %133 : vector<8x1xf32> to vector<8x640xf32>
    %135 = arith.divf %131, %134 : vector<8x640xf32>
    %c0_51 = arith.constant 0 : index
    %c0_52 = arith.constant 0 : index
    %136 = vector.load %arg11[%c0_51, %c0_52] : memref<8x640xf32, #tpu.memory_space<vmem>>, vector<8x640xf32>
    tpu.vector_store %arg11[%c0_51, %c0_52], %135 {strides = array<i32>} : memref<8x640xf32, #tpu.memory_space<vmem>>, vector<8x640xf32>,
    %c0_53 = arith.constant 0 : index
    %c0_54 = arith.constant 0 : index
    %137 = vector.load %arg12[%c0_53, %c0_54] : memref<8x640xf32, #tpu.memory_space<vmem>>, vector<8x640xf32>
    tpu.vector_store %arg12[%c0_53, %c0_54], %86 {strides = array<i32>} : memref<8x640xf32, #tpu.memory_space<vmem>>, vector<8x640xf32>,
    %c0_55 = arith.constant 0 : index
    %c0_56 = arith.constant 0 : index
    %138 = vector.load %arg13[%c0_55, %c0_56] : memref<8x640xf32, #tpu.memory_space<vmem>>, vector<8x640xf32>
    tpu.vector_store %arg13[%c0_55, %c0_56], %19 {strides = array<i32>} : memref<8x640xf32, #tpu.memory_space<vmem>>, vector<8x640xf32>,
    return
  }
  func.func @transform_0(%arg0: i32) -> (i32, i32) {
    %c0_i32 = arith.constant 0 : i32
    %c0_i32_0 = arith.constant 0 : i32
    %c0_i32_1 = arith.constant 0 : i32
    return %c0_i32, %c0_i32_0 : i32, i32
  }
  func.func @transform_1(%arg0: i32) -> (i32, i32) {
    %c0_i32 = arith.constant 0 : i32
    %c0_i32_0 = arith.constant 0 : i32
    %c0_i32_1 = arith.constant 0 : i32
    return %c0_i32, %c0_i32_0 : i32, i32
  }
  func.func @transform_2(%arg0: i32) -> (i32, i32) {
    %c0_i32 = arith.constant 0 : i32
    %c0_i32_0 = arith.constant 0 : i32
    %c0_i32_1 = arith.constant 0 : i32
    return %c0_i32, %c0_i32_0 : i32, i32
  }
  func.func @transform_3(%arg0: i32) -> (i32, i32) {
    %c0_i32 = arith.constant 0 : i32
    %c0_i32_0 = arith.constant 0 : i32
    %c0_i32_1 = arith.constant 0 : i32
    return %c0_i32, %c0_i32_0 : i32, i32
  }
  func.func @transform_4(%arg0: i32) -> (i32, i32) {
    %c0_i32 = arith.constant 0 : i32
    %c0_i32_0 = arith.constant 0 : i32
    %c0_i32_1 = arith.constant 0 : i32
    return %c0_i32, %c0_i32_0 : i32, i32
  }
  func.func @transform_5(%arg0: i32) -> (i32, i32) {
    %c0_i32 = arith.constant 0 : i32
    %c0_i32_0 = arith.constant 0 : i32
    %c0_i32_1 = arith.constant 0 : i32
    return %c0_i32, %c0_i32_0 : i32, i32
  }
  func.func @transform_9(%arg0: i32) -> (i32, i32) {
    %c0_i32 = arith.constant 0 : i32
    %c0_i32_0 = arith.constant 0 : i32
    %c0_i32_1 = arith.constant 0 : i32
    return %c0_i32, %c0_i32_0 : i32, i32
  }
  func.func @transform_10(%arg0: i32) -> (i32, i32) {
    %c0_i32 = arith.constant 0 : i32
    %c0_i32_0 = arith.constant 0 : i32
    %c0_i32_1 = arith.constant 0 : i32
    return %c0_i32, %c0_i32_0 : i32, i32
  }
  func.func @transform_11(%arg0: i32) -> (i32, i32) {
    %c0_i32 = arith.constant 0 : i32
    %c0_i32_0 = arith.constant 0 : i32
    %c0_i32_1 = arith.constant 0 : i32
    return %c0_i32, %c0_i32_0 : i32, i32
  }
  func.func @transform_12(%arg0: i32) -> (i32, i32) {
    %c0_i32 = arith.constant 0 : i32
    %c0_i32_0 = arith.constant 0 : i32
    %c0_i32_1 = arith.constant 0 : i32
    return %c0_i32, %c0_i32_0 : i32, i32
  }
}

</mosaic_0001>

<bundles_post_ra>
// kernel: task_model_forward.1
= control target key start
LH: loop header
LB: loop body
LE: loop exit
PB: predicated region body
PF: predicated region fallthrough
CT: control target
= control target key end

     0   :  { %18 = vsyncpa [#allocation7], 0  ;;  %s19145_s0 = inlined_call_operand.vmem [shape: bf16[80,1024], index: 0, kind: input, shape index: {}]   ;;  %s19146_s1 = inlined_call_operand.vmem [shape: bf16[1024,128], index: 1, kind: input, shape index: {}]   ;;  %s19147_s2 = inlined_call_operand.vmem [shape: f32[1,128], index: 2, kind: input, shape index: {}]   ;;  %s19148_s3 = inlined_call_operand.vmem [shape: f32[8,640], index: 3, kind: input, shape index: {}]   ;;  %s19149_s4 = inlined_call_operand.vmem [shape: f32[1,640], index: 4, kind: input, shape index: {}]   ;;  %s19150_s5 = inlined_call_operand.vmem [shape: f32[1,640], index: 5, kind: input, shape index: {}]   ;;  %s19151_s6 = inlined_call_operand.vmem [shape: bf16[1280,640], index: 6, kind: input, shape index: {}]   ;;  %s19152_s7 = inlined_call_operand.vmem [shape: bf16[640,640], index: 7, kind: input, shape index: {}]   ;;  %s19153_s8 = inlined_call_operand.vmem [shape: bf16[1280,640], index: 8, kind: input, shape index: {}]   ;;  %s19154_s9 = inlined_call_operand.vmem [shape: f32[1,128], index: 9, kind: output, shape index: {0}]   ;;  %s19155_s10 = inlined_call_operand.hbm [shape: f32[8,640], index: 10, kind: output, shape index: {1}]   ;;  %s19156_s11 = inlined_call_operand.hbm [shape: f32[8,640], index: 11, kind: output, shape index: {2}]   ;;  %s19157_s12 = inlined_call_operand.hbm [shape: f32[8,640], index: 12, kind: output, shape index: {3}]  }
   0x1   :  { %19 = vsyncpa [#allocation9], 0  ;;  %v66_v0 = vld [vmem:[%s19151_s6] sm:$0xff]  ;;  %v68_v1 = vld [vmem:[%s19151_s6 + $0x8] sm:$0xff] }
   0x2   :  { %67 = vst [vmem:[#allocation2] sm:$0xff] %v66_v0  ;;  %69 = vst [vmem:[#allocation2 + $0x8] sm:$0xff] %v68_v1  ;;  %v70_v2 = vld [vmem:[%s19151_s6 + $0x10] sm:$0xff]  ;;  %v72_v3 = vld [vmem:[%s19151_s6 + $0x18] sm:$0xff] }
   0x3   :  { %v74_v4 = vld [vmem:[%s19151_s6 + $0x20] sm:$0xff]  ;;  %71 = vst [vmem:[#allocation2 + $0x10] sm:$0xff] %v70_v2  ;;  %73 = vst [vmem:[#allocation2 + $0x18] sm:$0xff] %v72_v3  ;;  %v76_v5 = vld [vmem:[%s19151_s6 + $0x28] sm:$0xff] }
   0x4   :  { %75 = vst [vmem:[#allocation2 + $0x20] sm:$0xff] %v74_v4  ;;  %v78_v6 = vld [vmem:[%s19151_s6 + $0x30] sm:$0xff]  ;;  %v80_v7 = vld [vmem:[%s19151_s6 + $0x38] sm:$0xff]  ;;  %77 = vst [vmem:[#allocation2 + $0x28] sm:$0xff] %v76_v5 }
   0x5   :  { %79 = vst [vmem:[#allocation2 + $0x30] sm:$0xff] %v78_v6  ;;  %81 = vst [vmem:[#allocation2 + $0x38] sm:$0xff] %v80_v7  ;;  %v82_v8 = vld [vmem:[%s19151_s6 + $0x40] sm:$0xff]  ;;  %v84_v9 = vld [vmem:[%s19151_s6 + $0x48] sm:$0xff] }
   0x6   :  { %v86_v10 = vld [vmem:[%s19151_s6 + $0x50] sm:$0xff]  ;;  %83 = vst [vmem:[#allocation2 + $0x40] sm:$0xff] %v82_v8  ;;  %85 = vst [vmem:[#allocation2 + $0x48] sm:$0xff] %v84_v9  ;;  %v88_v11 = vld [vmem:[%s19151_s6 + $0x58] sm:$0xff] }
   0x7   :  { %87 = vst [vmem:[#allocation2 + $0x50] sm:$0xff] %v86_v10  ;;  %v90_v12 = vld [vmem:[%s19151_s6 + $0x60] sm:$0xff]  ;;  %v92_v13 = vld [vmem:[%s19151_s6 + $0x68] sm:$0xff]  ;;  %89 = vst [vmem:[#allocation2 + $0x58] sm:$0xff] %v88_v11 }
   0x8   :  { %91 = vst [vmem:[#allocation2 + $0x60] sm:$0xff] %v90_v12  ;;  %93 = vst [vmem:[#allocation2 + $0x68] sm:$0xff] %v92_v13  ;;  %v94_v14 = vld [vmem:[%s19151_s6 + $0x70] sm:$0xff]  ;;  %v96_v15 = vld [vmem:[%s19151_s6 + $0x78] sm:$0xff] }
   0x9   :  { %v98_v16 = vld [vmem:[%s19151_s6 + $0x80] sm:$0xff]  ;;  %95 = vst [vmem:[#allocation2 + $0x70] sm:$0xff] %v94_v14  ;;  %97 = vst [vmem:[#allocation2 + $0x78] sm:$0xff] %v96_v15  ;;  %v100_v17 = vld [vmem:[%s19151_s6 + $0x88] sm:$0xff] }
   0xa   :  { %99 = vst [vmem:[#allocation2 + $0x80] sm:$0xff] %v98_v16  ;;  %v102_v18 = vld [vmem:[%s19151_s6 + $0x90] sm:$0xff]  ;;  %v104_v19 = vld [vmem:[%s19151_s6 + $0x98] sm:$0xff]  ;;  %101 = vst [vmem:[#allocation2 + $0x88] sm:$0xff] %v100_v17 }
   0xb   :  { %103 = vst [vmem:[#allocation2 + $0x90] sm:$0xff] %v102_v18  ;;  %105 = vst [vmem:[#allocation2 + $0x98] sm:$0xff] %v104_v19  ;;  %v106_v20 = vld [vmem:[%s19151_s6 + $0xa0] sm:$0xff]  ;;  %v108_v21 = vld [vmem:[%s19151_s6 + $0xa8] sm:$0xff] }
   0xc   :  { %v110_v22 = vld [vmem:[%s19151_s6 + $0xb0] sm:$0xff]  ;;  %107 = vst [vmem:[#allocation2 + $0xa0] sm:$0xff] %v106_v20  ;;  %109 = vst [vmem:[#allocation2 + $0xa8] sm:$0xff] %v108_v21  ;;  %v112_v23 = vld [vmem:[%s19151_s6 + $0xb8] sm:$0xff] }
   0xd   :  { %111 = vst [vmem:[#allocation2 + $0xb0] sm:$0xff] %v110_v22  ;;  %v114_v24 = vld [vmem:[%s19151_s6 + $0xc0] sm:$0xff]  ;;  %v116_v25 = vld [vmem:[%s19151_s6 + $0xc8] sm:$0xff]  ;;  %113 = vst [vmem:[#allocation2 + $0xb8] sm:$0xff] %v112_v23 }
   0xe   :  { %115 = vst [vmem:[#allocation2 + $0xc0] sm:$0xff] %v114_v24  ;;  %117 = vst [vmem:[#allocation2 + $0xc8] sm:$0xff] %v116_v25  ;;  %v118_v26 = vld [vmem:[%s19151_s6 + $0xd0] sm:$0xff]  ;;  %v120_v27 = vld [vmem:[%s19151_s6 + $0xd8] sm:$0xff] }
   0xf   :  { %v122_v28 = vld [vmem:[%s19151_s6 + $0xe0] sm:$0xff]  ;;  %119 = vst [vmem:[#allocation2 + $0xd0] sm:$0xff] %v118_v26  ;;  %121 = vst [vmem:[#allocation2 + $0xd8] sm:$0xff] %v120_v27  ;;  %v124_v29 = vld [vmem:[%s19151_s6 + $0xe8] sm:$0xff] }
  0x10   :  { %123 = vst [vmem:[#allocation2 + $0xe0] sm:$0xff] %v122_v28  ;;  %v126_v30 = vld [vmem:[%s19151_s6 + $0xf0] sm:$0xff]  ;;  %v128_v31 = vld [vmem:[%s19151_s6 + $0xf8] sm:$0xff]  ;;  %125 = vst [vmem:[#allocation2 + $0xe8] sm:$0xff] %v124_v29 }
  0x11   :  { %127 = vst [vmem:[#allocation2 + $0xf0] sm:$0xff] %v126_v30  ;;  %129 = vst [vmem:[#allocation2 + $0xf8] sm:$0xff] %v128_v31  ;;  %v130_v32 = vld [vmem:[%s19151_s6 + $0x100] sm:$0xff]  ;;  %v132_v33 = vld [vmem:[%s19151_s6 + $0x108] sm:$0xff] }
  0x12   :  { %v134_v34 = vld [vmem:[%s19151_s6 + $0x110] sm:$0xff]  ;;  %131 = vst [vmem:[#allocation2 + $0x100] sm:$0xff] %v130_v32  ;;  %133 = vst [vmem:[#allocation2 + $0x108] sm:$0xff] %v132_v33  ;;  %v136_v35 = vld [vmem:[%s19151_s6 + $0x118] sm:$0xff] }
  0x13   :  { %135 = vst [vmem:[#allocation2 + $0x110] sm:$0xff] %v134_v34  ;;  %v138_v36 = vld [vmem:[%s19151_s6 + $0x120] sm:$0xff]  ;;  %v140_v37 = vld [vmem:[%s19151_s6 + $0x128] sm:$0xff]  ;;  %137 = vst [vmem:[#allocation2 + $0x118] sm:$0xff] %v136_v35 }
  0x14   :  { %139 = vst [vmem:[#allocation2 + $0x120] sm:$0xff] %v138_v36  ;;  %141 = vst [vmem:[#allocation2 + $0x128] sm:$0xff] %v140_v37  ;;  %v142_v38 = vld [vmem:[%s19151_s6 + $0x130] sm:$0xff]  ;;  %v144_v39 = vld [vmem:[%s19151_s6 + $0x138] sm:$0xff] }
  0x15   :  { %v146_v40 = vld [vmem:[%s19151_s6 + $0x140] sm:$0xff]  ;;  %143 = vst [vmem:[#allocation2 + $0x130] sm:$0xff] %v142_v38  ;;  %145 = vst [vmem:[#allocation2 + $0x138] sm:$0xff] %v144_v39  ;;  %v148_v41 = vld [vmem:[%s19151_s6 + $0x148] sm:$0xff] }
  0x16   :  { %147 = vst [vmem:[#allocation2 + $0x140] sm:$0xff] %v146_v40  ;;  %v150_v42 = vld [vmem:[%s19151_s6 + $0x150] sm:$0xff]  ;;  %v152_v43 = vld [vmem:[%s19151_s6 + $0x158] sm:$0xff]  ;;  %149 = vst [vmem:[#allocation2 + $0x148] sm:$0xff] %v148_v41 }
  0x17   :  { %151 = vst [vmem:[#allocation2 + $0x150] sm:$0xff] %v150_v42  ;;  %153 = vst [vmem:[#allocation2 + $0x158] sm:$0xff] %v152_v43  ;;  %v154_v44 = vld [vmem:[%s19151_s6 + $0x160] sm:$0xff]  ;;  %v156_v45 = vld [vmem:[%s19151_s6 + $0x168] sm:$0xff] }
  0x18   :  { %v158_v46 = vld [vmem:[%s19151_s6 + $0x170] sm:$0xff]  ;;  %155 = vst [vmem:[#allocation2 + $0x160] sm:$0xff] %v154_v44  ;;  %157 = vst [vmem:[#allocation2 + $0x168] sm:$0xff] %v156_v45  ;;  %v160_v47 = vld [vmem:[%s19151_s6 + $0x178] sm:$0xff] }
  0x19   :  { %159 = vst [vmem:[#allocation2 + $0x170] sm:$0xff] %v158_v46  ;;  %v162_v48 = vld [vmem:[%s19151_s6 + $0x180] sm:$0xff]  ;;  %v164_v49 = vld [vmem:[%s19151_s6 + $0x188] sm:$0xff]  ;;  %161 = vst [vmem:[#allocation2 + $0x178] sm:$0xff] %v160_v47 }
  0x1a   :  { %163 = vst [vmem:[#allocation2 + $0x180] sm:$0xff] %v162_v48  ;;  %165 = vst [vmem:[#allocation2 + $0x188] sm:$0xff] %v164_v49  ;;  %v166_v50 = vld [vmem:[%s19151_s6 + $0x190] sm:$0xff]  ;;  %v168_v51 = vld [vmem:[%s19151_s6 + $0x198] sm:$0xff] }
  0x1b   :  { %v170_v52 = vld [vmem:[%s19151_s6 + $0x1a0] sm:$0xff]  ;;  %167 = vst [vmem:[#allocation2 + $0x190] sm:$0xff] %v166_v50  ;;  %169 = vst [vmem:[#allocation2 + $0x198] sm:$0xff] %v168_v51  ;;  %v172_v53 = vld [vmem:[%s19151_s6 + $0x1a8] sm:$0xff] }
  0x1c   :  { %171 = vst [vmem:[#allocation2 + $0x1a0] sm:$0xff] %v170_v52  ;;  %v174_v54 = vld [vmem:[%s19151_s6 + $0x1b0] sm:$0xff]  ;;  %v176_v55 = vld [vmem:[%s19151_s6 + $0x1b8] sm:$0xff]  ;;  %173 = vst [vmem:[#allocation2 + $0x1a8] sm:$0xff] %v172_v53 }
  0x1d   :  { %175 = vst [vmem:[#allocation2 + $0x1b0] sm:$0xff] %v174_v54  ;;  %177 = vst [vmem:[#allocation2 + $0x1b8] sm:$0xff] %v176_v55  ;;  %v178_v56 = vld [vmem:[%s19151_s6 + $0x1c0] sm:$0xff]  ;;  %v180_v57 = vld [vmem:[%s19151_s6 + $0x1c8] sm:$0xff] }
  0x1e   :  { %v182_v58 = vld [vmem:[%s19151_s6 + $0x1d0] sm:$0xff]  ;;  %179 = vst [vmem:[#allocation2 + $0x1c0] sm:$0xff] %v178_v56  ;;  %181 = vst [vmem:[#allocation2 + $0x1c8] sm:$0xff] %v180_v57  ;;  %v184_v59 = vld [vmem:[%s19151_s6 + $0x1d8] sm:$0xff] }
  0x1f   :  { %183 = vst [vmem:[#allocation2 + $0x1d0] sm:$0xff] %v182_v58  ;;  %v186_v60 = vld [vmem:[%s19151_s6 + $0x1e0] sm:$0xff]  ;;  %v188_v61 = vld [vmem:[%s19151_s6 + $0x1e8] sm:$0xff]  ;;  %185 = vst [vmem:[#allocation2 + $0x1d8] sm:$0xff] %v184_v59 }
  0x20   :  { %187 = vst [vmem:[#allocation2 + $0x1e0] sm:$0xff] %v186_v60  ;;  %189 = vst [vmem:[#allocation2 + $0x1e8] sm:$0xff] %v188_v61  ;;  %v190_v62 = vld [vmem:[%s19151_s6 + $0x1f0] sm:$0xff]  ;;  %v192_v63 = vld [vmem:[%s19151_s6 + $0x1f8] sm:$0xff] }
  0x21   :  { %v194_v0 = vld [vmem:[%s19151_s6 + $0x200] sm:$0xff]  ;;  %191 = vst [vmem:[#allocation2 + $0x1f0] sm:$0xff] %v190_v62  ;;  %193 = vst [vmem:[#allocation2 + $0x1f8] sm:$0xff] %v192_v63  ;;  %v196_v1 = vld [vmem:[%s19151_s6 + $0x208] sm:$0xff] }
  0x22   :  { %195 = vst [vmem:[#allocation2 + $0x200] sm:$0xff] %v194_v0  ;;  %v198_v2 = vld [vmem:[%s19151_s6 + $0x210] sm:$0xff]  ;;  %v200_v3 = vld [vmem:[%s19151_s6 + $0x218] sm:$0xff]  ;;  %197 = vst [vmem:[#allocation2 + $0x208] sm:$0xff] %v196_v1 }
  0x23   :  { %199 = vst [vmem:[#allocation2 + $0x210] sm:$0xff] %v198_v2  ;;  %201 = vst [vmem:[#allocation2 + $0x218] sm:$0xff] %v200_v3  ;;  %v202_v4 = vld [vmem:[%s19151_s6 + $0x220] sm:$0xff]  ;;  %v204_v5 = vld [vmem:[%s19151_s6 + $0x228] sm:$0xff] }
  0x24   :  { %v206_v6 = vld [vmem:[%s19151_s6 + $0x230] sm:$0xff]  ;;  %203 = vst [vmem:[#allocation2 + $0x220] sm:$0xff] %v202_v4  ;;  %205 = vst [vmem:[#allocation2 + $0x228] sm:$0xff] %v204_v5  ;;  %v208_v7 = vld [vmem:[%s19151_s6 + $0x238] sm:$0xff] }
  0x25   :  { %207 = vst [vmem:[#allocation2 + $0x230] sm:$0xff] %v206_v6  ;;  %v210_v8 = vld [vmem:[%s19151_s6 + $0x240] sm:$0xff]  ;;  %v212_v9 = vld [vmem:[%s19151_s6 + $0x248] sm:$0xff]  ;;  %209 = vst [vmem:[#allocation2 + $0x238] sm:$0xff] %v208_v7 }
  0x26   :  { %211 = vst [vmem:[#allocation2 + $0x240] sm:$0xff] %v210_v8  ;;  %213 = vst [vmem:[#allocation2 + $0x248] sm:$0xff] %v212_v9  ;;  %v214_v10 = vld [vmem:[%s19151_s6 + $0x250] sm:$0xff]  ;;  %v216_v11 = vld [vmem:[%s19151_s6 + $0x258] sm:$0xff] }
  0x27   :  { %v218_v12 = vld [vmem:[%s19151_s6 + $0x260] sm:$0xff]  ;;  %215 = vst [vmem:[#allocation2 + $0x250] sm:$0xff] %v214_v10  ;;  %217 = vst [vmem:[#allocation2 + $0x258] sm:$0xff] %v216_v11  ;;  %v220_v13 = vld [vmem:[%s19151_s6 + $0x268] sm:$0xff] }
  0x28   :  { %219 = vst [vmem:[#allocation2 + $0x260] sm:$0xff] %v218_v12  ;;  %v222_v14 = vld [vmem:[%s19151_s6 + $0x270] sm:$0xff]  ;;  %v224_v15 = vld [vmem:[%s19151_s6 + $0x278] sm:$0xff]  ;;  %221 = vst [vmem:[#allocation2 + $0x268] sm:$0xff] %v220_v13 }
  0x29   :  { %223 = vst [vmem:[#allocation2 + $0x270] sm:$0xff] %v222_v14  ;;  %225 = vst [vmem:[#allocation2 + $0x278] sm:$0xff] %v224_v15  ;;  %v226_v16 = vld [vmem:[%s19151_s6 + $0x280] sm:$0xff]  ;;  %v228_v17 = vld [vmem:[%s19151_s6 + $0x288] sm:$0xff] }
  0x2a   :  { %v230_v18 = vld [vmem:[%s19151_s6 + $0x290] sm:$0xff]  ;;  %227 = vst [vmem:[#allocation2 + $0x280] sm:$0xff] %v226_v16  ;;  %229 = vst [vmem:[#allocation2 + $0x288] sm:$0xff] %v228_v17  ;;  %v232_v19 = vld [vmem:[%s19151_s6 + $0x298] sm:$0xff] }
  0x2b   :  { %231 = vst [vmem:[#allocation2 + $0x290] sm:$0xff] %v230_v18  ;;  %v234_v20 = vld [vmem:[%s19151_s6 + $0x2a0] sm:$0xff]  ;;  %v236_v21 = vld [vmem:[%s19151_s6 + $0x2a8] sm:$0xff]  ;;  %233 = vst [vmem:[#allocation2 + $0x298] sm:$0xff] %v232_v19 }
  0x2c   :  { %235 = vst [vmem:[#allocation2 + $0x2a0] sm:$0xff] %v234_v20  ;;  %237 = vst [vmem:[#allocation2 + $0x2a8] sm:$0xff] %v236_v21  ;;  %v238_v22 = vld [vmem:[%s19151_s6 + $0x2b0] sm:$0xff]  ;;  %v240_v23 = vld [vmem:[%s19151_s6 + $0x2b8] sm:$0xff] }
  0x2d   :  { %v242_v24 = vld [vmem:[%s19151_s6 + $0x2c0] sm:$0xff]  ;;  %239 = vst [vmem:[#allocation2 + $0x2b0] sm:$0xff] %v238_v22  ;;  %241 = vst [vmem:[#allocation2 + $0x2b8] sm:$0xff] %v240_v23  ;;  %v244_v25 = vld [vmem:[%s19151_s6 + $0x2c8] sm:$0xff] }
  0x2e   :  { %243 = vst [vmem:[#allocation2 + $0x2c0] sm:$0xff] %v242_v24  ;;  %v246_v26 = vld [vmem:[%s19151_s6 + $0x2d0] sm:$0xff]  ;;  %v248_v27 = vld [vmem:[%s19151_s6 + $0x2d8] sm:$0xff]  ;;  %245 = vst [vmem:[#allocation2 + $0x2c8] sm:$0xff] %v244_v25 }
  0x2f   :  { %247 = vst [vmem:[#allocation2 + $0x2d0] sm:$0xff] %v246_v26  ;;  %249 = vst [vmem:[#allocation2 + $0x2d8] sm:$0xff] %v248_v27  ;;  %v250_v28 = vld [vmem:[%s19151_s6 + $0x2e0] sm:$0xff]  ;;  %v252_v29 = vld [vmem:[%s19151_s6 + $0x2e8] sm:$0xff] }
  0x30   :  { %v254_v30 = vld [vmem:[%s19151_s6 + $0x2f0] sm:$0xff]  ;;  %251 = vst [vmem:[#allocation2 + $0x2e0] sm:$0xff] %v250_v28  ;;  %253 = vst [vmem:[#allocation2 + $0x2e8] sm:$0xff] %v252_v29  ;;  %v256_v31 = vld [vmem:[%s19151_s6 + $0x2f8] sm:$0xff] }
  0x31   :  { %255 = vst [vmem:[#allocation2 + $0x2f0] sm:$0xff] %v254_v30  ;;  %v258_v32 = vld [vmem:[%s19151_s6 + $0x300] sm:$0xff]  ;;  %v260_v33 = vld [vmem:[%s19151_s6 + $0x308] sm:$0xff]  ;;  %257 = vst [vmem:[#allocation2 + $0x2f8] sm:$0xff] %v256_v31 }
  0x32   :  { %259 = vst [vmem:[#allocation2 + $0x300] sm:$0xff] %v258_v32  ;;  %261 = vst [vmem:[#allocation2 + $0x308] sm:$0xff] %v260_v33  ;;  %v262_v34 = vld [vmem:[%s19151_s6 + $0x310] sm:$0xff]  ;;  %v264_v35 = vld [vmem:[%s19151_s6 + $0x318] sm:$0xff] }
  0x33   :  { %v266_v36 = vld [vmem:[%s19151_s6 + $0x320] sm:$0xff]  ;;  %263 = vst [vmem:[#allocation2 + $0x310] sm:$0xff] %v262_v34  ;;  %265 = vst [vmem:[#allocation2 + $0x318] sm:$0xff] %v264_v35  ;;  %v268_v37 = vld [vmem:[%s19151_s6 + $0x328] sm:$0xff] }
  0x34   :  { %267 = vst [vmem:[#allocation2 + $0x320] sm:$0xff] %v266_v36  ;;  %v270_v38 = vld [vmem:[%s19151_s6 + $0x330] sm:$0xff]  ;;  %v272_v39 = vld [vmem:[%s19151_s6 + $0x338] sm:$0xff]  ;;  %269 = vst [vmem:[#allocation2 + $0x328] sm:$0xff] %v268_v37 }
  0x35   :  { %271 = vst [vmem:[#allocation2 + $0x330] sm:$0xff] %v270_v38  ;;  %273 = vst [vmem:[#allocation2 + $0x338] sm:$0xff] %v272_v39  ;;  %v274_v40 = vld [vmem:[%s19151_s6 + $0x340] sm:$0xff]  ;;  %v276_v41 = vld [vmem:[%s19151_s6 + $0x348] sm:$0xff] }
  0x36   :  { %v278_v42 = vld [vmem:[%s19151_s6 + $0x350] sm:$0xff]  ;;  %275 = vst [vmem:[#allocation2 + $0x340] sm:$0xff] %v274_v40  ;;  %277 = vst [vmem:[#allocation2 + $0x348] sm:$0xff] %v276_v41  ;;  %v280_v43 = vld [vmem:[%s19151_s6 + $0x358] sm:$0xff] }
  0x37   :  { %279 = vst [vmem:[#allocation2 + $0x350] sm:$0xff] %v278_v42  ;;  %v282_v44 = vld [vmem:[%s19151_s6 + $0x360] sm:$0xff]  ;;  %v284_v45 = vld [vmem:[%s19151_s6 + $0x368] sm:$0xff]  ;;  %281 = vst [vmem:[#allocation2 + $0x358] sm:$0xff] %v280_v43 }
  0x38   :  { %283 = vst [vmem:[#allocation2 + $0x360] sm:$0xff] %v282_v44  ;;  %285 = vst [vmem:[#allocation2 + $0x368] sm:$0xff] %v284_v45  ;;  %v286_v46 = vld [vmem:[%s19151_s6 + $0x370] sm:$0xff]  ;;  %v288_v47 = vld [vmem:[%s19151_s6 + $0x378] sm:$0xff] }
  0x39   :  { %v290_v48 = vld [vmem:[%s19151_s6 + $0x380] sm:$0xff]  ;;  %287 = vst [vmem:[#allocation2 + $0x370] sm:$0xff] %v286_v46  ;;  %289 = vst [vmem:[#allocation2 + $0x378] sm:$0xff] %v288_v47  ;;  %v292_v49 = vld [vmem:[%s19151_s6 + $0x388] sm:$0xff] }
  0x3a   :  { %291 = vst [vmem:[#allocation2 + $0x380] sm:$0xff] %v290_v48  ;;  %v294_v50 = vld [vmem:[%s19151_s6 + $0x390] sm:$0xff]  ;;  %v296_v51 = vld [vmem:[%s19151_s6 + $0x398] sm:$0xff]  ;;  %293 = vst [vmem:[#allocation2 + $0x388] sm:$0xff] %v292_v49 }
  0x3b   :  { %295 = vst [vmem:[#allocation2 + $0x390] sm:$0xff] %v294_v50  ;;  %297 = vst [vmem:[#allocation2 + $0x398] sm:$0xff] %v296_v51  ;;  %v298_v52 = vld [vmem:[%s19151_s6 + $0x3a0] sm:$0xff]  ;;  %v300_v53 = vld [vmem:[%s19151_s6 + $0x3a8] sm:$0xff] }
  0x3c   :  { %v302_v54 = vld [vmem:[%s19151_s6 + $0x3b0] sm:$0xff]  ;;  %299 = vst [vmem:[#allocation2 + $0x3a0] sm:$0xff] %v298_v52  ;;  %301 = vst [vmem:[#allocation2 + $0x3a8] sm:$0xff] %v300_v53  ;;  %v304_v55 = vld [vmem:[%s19151_s6 + $0x3b8] sm:$0xff] }
  0x3d   :  { %303 = vst [vmem:[#allocation2 + $0x3b0] sm:$0xff] %v302_v54  ;;  %v306_v56 = vld [vmem:[%s19151_s6 + $0x3c0] sm:$0xff]  ;;  %v308_v57 = vld [vmem:[%s19151_s6 + $0x3c8] sm:$0xff]  ;;  %305 = vst [vmem:[#allocation2 + $0x3b8] sm:$0xff] %v304_v55 }
  0x3e   :  { %307 = vst [vmem:[#allocation2 + $0x3c0] sm:$0xff] %v306_v56  ;;  %309 = vst [vmem:[#allocation2 + $0x3c8] sm:$0xff] %v308_v57  ;;  %v310_v58 = vld [vmem:[%s19151_s6 + $0x3d0] sm:$0xff]  ;;  %v312_v59 = vld [vmem:[%s19151_s6 + $0x3d8] sm:$0xff] }
  0x3f   :  { %v314_v60 = vld [vmem:[%s19151_s6 + $0x3e0] sm:$0xff]  ;;  %311 = vst [vmem:[#allocation2 + $0x3d0] sm:$0xff] %v310_v58  ;;  %313 = vst [vmem:[#allocation2 + $0x3d8] sm:$0xff] %v312_v59  ;;  %v316_v61 = vld [vmem:[%s19151_s6 + $0x3e8] sm:$0xff] }
  0x40   :  { %315 = vst [vmem:[#allocation2 + $0x3e0] sm:$0xff] %v314_v60  ;;  %v318_v62 = vld [vmem:[%s19151_s6 + $0x3f0] sm:$0xff]  ;;  %v320_v63 = vld [vmem:[%s19151_s6 + $0x3f8] sm:$0xff]  ;;  %317 = vst [vmem:[#allocation2 + $0x3e8] sm:$0xff] %v316_v61 }
  0x41   :  { %319 = vst [vmem:[#allocation2 + $0x3f0] sm:$0xff] %v318_v62  ;;  %321 = vst [vmem:[#allocation2 + $0x3f8] sm:$0xff] %v320_v63  ;;  %v322_v0 = vld [vmem:[%s19151_s6 + $0x400] sm:$0xff]  ;;  %v324_v1 = vld [vmem:[%s19151_s6 + $0x408] sm:$0xff] }
  0x42   :  { %v326_v2 = vld [vmem:[%s19151_s6 + $0x410] sm:$0xff]  ;;  %323 = vst [vmem:[#allocation2 + $0x400] sm:$0xff] %v322_v0  ;;  %325 = vst [vmem:[#allocation2 + $0x408] sm:$0xff] %v324_v1  ;;  %v328_v3 = vld [vmem:[%s19151_s6 + $0x418] sm:$0xff] }
  0x43   :  { %327 = vst [vmem:[#allocation2 + $0x410] sm:$0xff] %v326_v2  ;;  %v330_v4 = vld [vmem:[%s19151_s6 + $0x420] sm:$0xff]  ;;  %v332_v5 = vld [vmem:[%s19151_s6 + $0x428] sm:$0xff]  ;;  %329 = vst [vmem:[#allocation2 + $0x418] sm:$0xff] %v328_v3 }
  0x44   :  { %331 = vst [vmem:[#allocation2 + $0x420] sm:$0xff] %v330_v4  ;;  %333 = vst [vmem:[#allocation2 + $0x428] sm:$0xff] %v332_v5  ;;  %v334_v6 = vld [vmem:[%s19151_s6 + $0x430] sm:$0xff]  ;;  %v336_v7 = vld [vmem:[%s19151_s6 + $0x438] sm:$0xff] }
  0x45   :  { %v338_v8 = vld [vmem:[%s19151_s6 + $0x440] sm:$0xff]  ;;  %335 = vst [vmem:[#allocation2 + $0x430] sm:$0xff] %v334_v6  ;;  %337 = vst [vmem:[#allocation2 + $0x438] sm:$0xff] %v336_v7  ;;  %v340_v9 = vld [vmem:[%s19151_s6 + $0x448] sm:$0xff] }
  0x46   :  { %339 = vst [vmem:[#allocation2 + $0x440] sm:$0xff] %v338_v8  ;;  %v342_v10 = vld [vmem:[%s19151_s6 + $0x450] sm:$0xff]  ;;  %v344_v11 = vld [vmem:[%s19151_s6 + $0x458] sm:$0xff]  ;;  %341 = vst [vmem:[#allocation2 + $0x448] sm:$0xff] %v340_v9 }
  0x47   :  { %343 = vst [vmem:[#allocation2 + $0x450] sm:$0xff] %v342_v10  ;;  %345 = vst [vmem:[#allocation2 + $0x458] sm:$0xff] %v344_v11  ;;  %v346_v12 = vld [vmem:[%s19151_s6 + $0x460] sm:$0xff]  ;;  %v348_v13 = vld [vmem:[%s19151_s6 + $0x468] sm:$0xff] }
  0x48   :  { %v350_v14 = vld [vmem:[%s19151_s6 + $0x470] sm:$0xff]  ;;  %347 = vst [vmem:[#allocation2 + $0x460] sm:$0xff] %v346_v12  ;;  %349 = vst [vmem:[#allocation2 + $0x468] sm:$0xff] %v348_v13  ;;  %v352_v15 = vld [vmem:[%s19151_s6 + $0x478] sm:$0xff] }
  0x49   :  { %351 = vst [vmem:[#allocation2 + $0x470] sm:$0xff] %v350_v14  ;;  %v354_v16 = vld [vmem:[%s19151_s6 + $0x480] sm:$0xff]  ;;  %v356_v17 = vld [vmem:[%s19151_s6 + $0x488] sm:$0xff]  ;;  %353 = vst [vmem:[#allocation2 + $0x478] sm:$0xff] %v352_v15 }
  0x4a   :  { %355 = vst [vmem:[#allocation2 + $0x480] sm:$0xff] %v354_v16  ;;  %357 = vst [vmem:[#allocation2 + $0x488] sm:$0xff] %v356_v17  ;;  %v358_v18 = vld [vmem:[%s19151_s6 + $0x490] sm:$0xff]  ;;  %v360_v19 = vld [vmem:[%s19151_s6 + $0x498] sm:$0xff] }
  0x4b   :  { %v362_v20 = vld [vmem:[%s19151_s6 + $0x4a0] sm:$0xff]  ;;  %359 = vst [vmem:[#allocation2 + $0x490] sm:$0xff] %v358_v18  ;;  %361 = vst [vmem:[#allocation2 + $0x498] sm:$0xff] %v360_v19  ;;  %v364_v21 = vld [vmem:[%s19151_s6 + $0x4a8] sm:$0xff] }
  0x4c   :  { %363 = vst [vmem:[#allocation2 + $0x4a0] sm:$0xff] %v362_v20  ;;  %v366_v22 = vld [vmem:[%s19151_s6 + $0x4b0] sm:$0xff]  ;;  %v368_v23 = vld [vmem:[%s19151_s6 + $0x4b8] sm:$0xff]  ;;  %365 = vst [vmem:[#allocation2 + $0x4a8] sm:$0xff] %v364_v21 }
  0x4d   :  { %367 = vst [vmem:[#allocation2 + $0x4b0] sm:$0xff] %v366_v22  ;;  %369 = vst [vmem:[#allocation2 + $0x4b8] sm:$0xff] %v368_v23  ;;  %v370_v24 = vld [vmem:[%s19151_s6 + $0x4c0] sm:$0xff]  ;;  %v372_v25 = vld [vmem:[%s19151_s6 + $0x4c8] sm:$0xff] }
  0x4e   :  { %v374_v26 = vld [vmem:[%s19151_s6 + $0x4d0] sm:$0xff]  ;;  %371 = vst [vmem:[#allocation2 + $0x4c0] sm:$0xff] %v370_v24  ;;  %373 = vst [vmem:[#allocation2 + $0x4c8] sm:$0xff] %v372_v25  ;;  %v376_v27 = vld [vmem:[%s19151_s6 + $0x4d8] sm:$0xff] }
  0x4f   :  { %375 = vst [vmem:[#allocation2 + $0x4d0] sm:$0xff] %v374_v26  ;;  %v378_v28 = vld [vmem:[%s19151_s6 + $0x4e0] sm:$0xff]  ;;  %v380_v29 = vld [vmem:[%s19151_s6 + $0x4e8] sm:$0xff]  ;;  %377 = vst [vmem:[#allocation2 + $0x4d8] sm:$0xff] %v376_v27 }
  0x50   :  { %379 = vst [vmem:[#allocation2 + $0x4e0] sm:$0xff] %v378_v28  ;;  %381 = vst [vmem:[#allocation2 + $0x4e8] sm:$0xff] %v380_v29  ;;  %v382_v30 = vld [vmem:[%s19151_s6 + $0x4f0] sm:$0xff]  ;;  %v384_v31 = vld [vmem:[%s19151_s6 + $0x4f8] sm:$0xff] }
  0x51   :  { %v386_v32 = vld [vmem:[%s19151_s6 + $0x500] sm:$0xff]  ;;  %383 = vst [vmem:[#allocation2 + $0x4f0] sm:$0xff] %v382_v30  ;;  %385 = vst [vmem:[#allocation2 + $0x4f8] sm:$0xff] %v384_v31  ;;  %v388_v33 = vld [vmem:[%s19151_s6 + $0x508] sm:$0xff] }
  0x52   :  { %387 = vst [vmem:[#allocation2 + $0x500] sm:$0xff] %v386_v32  ;;  %v390_v34 = vld [vmem:[%s19151_s6 + $0x510] sm:$0xff]  ;;  %v392_v35 = vld [vmem:[%s19151_s6 + $0x518] sm:$0xff]  ;;  %389 = vst [vmem:[#allocation2 + $0x508] sm:$0xff] %v388_v33 }
  0x53   :  { %391 = vst [vmem:[#allocation2 + $0x510] sm:$0xff] %v390_v34  ;;  %393 = vst [vmem:[#allocation2 + $0x518] sm:$0xff] %v392_v35  ;;  %v394_v36 = vld [vmem:[%s19151_s6 + $0x520] sm:$0xff]  ;;  %v396_v37 = vld [vmem:[%s19151_s6 + $0x528] sm:$0xff] }
  0x54   :  { %v398_v38 = vld [vmem:[%s19151_s6 + $0x530] sm:$0xff]  ;;  %395 = vst [vmem:[#allocation2 + $0x520] sm:$0xff] %v394_v36  ;;  %397 = vst [vmem:[#allocation2 + $0x528] sm:$0xff] %v396_v37  ;;  %v400_v39 = vld [vmem:[%s19151_s6 + $0x538] sm:$0xff] }
  0x55   :  { %399 = vst [vmem:[#allocation2 + $0x530] sm:$0xff] %v398_v38  ;;  %v402_v40 = vld [vmem:[%s19151_s6 + $0x540] sm:$0xff]  ;;  %v404_v41 = vld [vmem:[%s19151_s6 + $0x548] sm:$0xff]  ;;  %401 = vst [vmem:[#allocation2 + $0x538] sm:$0xff] %v400_v39 }
  0x56   :  { %403 = vst [vmem:[#allocation2 + $0x540] sm:$0xff] %v402_v40  ;;  %405 = vst [vmem:[#allocation2 + $0x548] sm:$0xff] %v404_v41  ;;  %v406_v42 = vld [vmem:[%s19151_s6 + $0x550] sm:$0xff]  ;;  %v408_v43 = vld [vmem:[%s19151_s6 + $0x558] sm:$0xff] }
  0x57   :  { %v410_v44 = vld [vmem:[%s19151_s6 + $0x560] sm:$0xff]  ;;  %407 = vst [vmem:[#allocation2 + $0x550] sm:$0xff] %v406_v42  ;;  %409 = vst [vmem:[#allocation2 + $0x558] sm:$0xff] %v408_v43  ;;  %v412_v45 = vld [vmem:[%s19151_s6 + $0x568] sm:$0xff] }
  0x58   :  { %411 = vst [vmem:[#allocation2 + $0x560] sm:$0xff] %v410_v44  ;;  %v414_v46 = vld [vmem:[%s19151_s6 + $0x570] sm:$0xff]  ;;  %v416_v47 = vld [vmem:[%s19151_s6 + $0x578] sm:$0xff]  ;;  %413 = vst [vmem:[#allocation2 + $0x568] sm:$0xff] %v412_v45 }
  0x59   :  { %415 = vst [vmem:[#allocation2 + $0x570] sm:$0xff] %v414_v46  ;;  %417 = vst [vmem:[#allocation2 + $0x578] sm:$0xff] %v416_v47  ;;  %v418_v48 = vld [vmem:[%s19151_s6 + $0x580] sm:$0xff]  ;;  %v420_v49 = vld [vmem:[%s19151_s6 + $0x588] sm:$0xff] }
  0x5a   :  { %v422_v50 = vld [vmem:[%s19151_s6 + $0x590] sm:$0xff]  ;;  %419 = vst [vmem:[#allocation2 + $0x580] sm:$0xff] %v418_v48  ;;  %421 = vst [vmem:[#allocation2 + $0x588] sm:$0xff] %v420_v49  ;;  %v424_v51 = vld [vmem:[%s19151_s6 + $0x598] sm:$0xff] }
  0x5b   :  { %423 = vst [vmem:[#allocation2 + $0x590] sm:$0xff] %v422_v50  ;;  %v426_v52 = vld [vmem:[%s19151_s6 + $0x5a0] sm:$0xff]  ;;  %v428_v53 = vld [vmem:[%s19151_s6 + $0x5a8] sm:$0xff]  ;;  %425 = vst [vmem:[#allocation2 + $0x598] sm:$0xff] %v424_v51 }
  0x5c   :  { %427 = vst [vmem:[#allocation2 + $0x5a0] sm:$0xff] %v426_v52  ;;  %429 = vst [vmem:[#allocation2 + $0x5a8] sm:$0xff] %v428_v53  ;;  %v430_v54 = vld [vmem:[%s19151_s6 + $0x5b0] sm:$0xff]  ;;  %v432_v55 = vld [vmem:[%s19151_s6 + $0x5b8] sm:$0xff] }
  0x5d   :  { %v434_v56 = vld [vmem:[%s19151_s6 + $0x5c0] sm:$0xff]  ;;  %431 = vst [vmem:[#allocation2 + $0x5b0] sm:$0xff] %v430_v54  ;;  %433 = vst [vmem:[#allocation2 + $0x5b8] sm:$0xff] %v432_v55  ;;  %v436_v57 = vld [vmem:[%s19151_s6 + $0x5c8] sm:$0xff] }
  0x5e   :  { %435 = vst [vmem:[#allocation2 + $0x5c0] sm:$0xff] %v434_v56  ;;  %v438_v58 = vld [vmem:[%s19151_s6 + $0x5d0] sm:$0xff]  ;;  %v440_v59 = vld [vmem:[%s19151_s6 + $0x5d8] sm:$0xff]  ;;  %437 = vst [vmem:[#allocation2 + $0x5c8] sm:$0xff] %v436_v57 }
  0x5f   :  { %439 = vst [vmem:[#allocation2 + $0x5d0] sm:$0xff] %v438_v58  ;;  %441 = vst [vmem:[#allocation2 + $0x5d8] sm:$0xff] %v440_v59  ;;  %v442_v60 = vld [vmem:[%s19151_s6 + $0x5e0] sm:$0xff]  ;;  %v444_v61 = vld [vmem:[%s19151_s6 + $0x5e8] sm:$0xff] }
  0x60   :  { %v446_v62 = vld [vmem:[%s19151_s6 + $0x5f0] sm:$0xff]  ;;  %443 = vst [vmem:[#allocation2 + $0x5e0] sm:$0xff] %v442_v60  ;;  %445 = vst [vmem:[#allocation2 + $0x5e8] sm:$0xff] %v444_v61  ;;  %v448_v63 = vld [vmem:[%s19151_s6 + $0x5f8] sm:$0xff] }
  0x61   :  { %447 = vst [vmem:[#allocation2 + $0x5f0] sm:$0xff] %v446_v62  ;;  %v450_v0 = vld [vmem:[%s19151_s6 + $0x600] sm:$0xff]  ;;  %v452_v1 = vld [vmem:[%s19151_s6 + $0x608] sm:$0xff]  ;;  %449 = vst [vmem:[#allocation2 + $0x5f8] sm:$0xff] %v448_v63 }
  0x62   :  { %451 = vst [vmem:[#allocation2 + $0x600] sm:$0xff] %v450_v0  ;;  %453 = vst [vmem:[#allocation2 + $0x608] sm:$0xff] %v452_v1  ;;  %v454_v2 = vld [vmem:[%s19151_s6 + $0x610] sm:$0xff]  ;;  %v456_v3 = vld [vmem:[%s19151_s6 + $0x618] sm:$0xff] }
  0x63   :  { %v458_v4 = vld [vmem:[%s19151_s6 + $0x620] sm:$0xff]  ;;  %455 = vst [vmem:[#allocation2 + $0x610] sm:$0xff] %v454_v2  ;;  %457 = vst [vmem:[#allocation2 + $0x618] sm:$0xff] %v456_v3  ;;  %v460_v5 = vld [vmem:[%s19151_s6 + $0x628] sm:$0xff] }
  0x64   :  { %459 = vst [vmem:[#allocation2 + $0x620] sm:$0xff] %v458_v4  ;;  %v462_v6 = vld [vmem:[%s19151_s6 + $0x630] sm:$0xff]  ;;  %v464_v7 = vld [vmem:[%s19151_s6 + $0x638] sm:$0xff]  ;;  %461 = vst [vmem:[#allocation2 + $0x628] sm:$0xff] %v460_v5 }
  0x65   :  { %463 = vst [vmem:[#allocation2 + $0x630] sm:$0xff] %v462_v6  ;;  %465 = vst [vmem:[#allocation2 + $0x638] sm:$0xff] %v464_v7  ;;  %v466_v8 = vld [vmem:[%s19151_s6 + $0x640] sm:$0xff]  ;;  %v468_v9 = vld [vmem:[%s19151_s6 + $0x648] sm:$0xff] }
  0x66   :  { %v470_v10 = vld [vmem:[%s19151_s6 + $0x650] sm:$0xff]  ;;  %467 = vst [vmem:[#allocation2 + $0x640] sm:$0xff] %v466_v8  ;;  %469 = vst [vmem:[#allocation2 + $0x648] sm:$0xff] %v468_v9  ;;  %v472_v11 = vld [vmem:[%s19151_s6 + $0x658] sm:$0xff] }
  0x67   :  { %471 = vst [vmem:[#allocation2 + $0x650] sm:$0xff] %v470_v10  ;;  %v474_v12 = vld [vmem:[%s19151_s6 + $0x660] sm:$0xff]  ;;  %v476_v13 = vld [vmem:[%s19151_s6 + $0x668] sm:$0xff]  ;;  %473 = vst [vmem:[#allocation2 + $0x658] sm:$0xff] %v472_v11 }
  0x68   :  { %475 = vst [vmem:[#allocation2 + $0x660] sm:$0xff] %v474_v12  ;;  %477 = vst [vmem:[#allocation2 + $0x668] sm:$0xff] %v476_v13  ;;  %v478_v14 = vld [vmem:[%s19151_s6 + $0x670] sm:$0xff]  ;;  %v480_v15 = vld [vmem:[%s19151_s6 + $0x678] sm:$0xff] }
  0x69   :  { %v482_v16 = vld [vmem:[%s19151_s6 + $0x680] sm:$0xff]  ;;  %479 = vst [vmem:[#allocation2 + $0x670] sm:$0xff] %v478_v14  ;;  %481 = vst [vmem:[#allocation2 + $0x678] sm:$0xff] %v480_v15  ;;  %v484_v17 = vld [vmem:[%s19151_s6 + $0x688] sm:$0xff] }
  0x6a   :  { %483 = vst [vmem:[#allocation2 + $0x680] sm:$0xff] %v482_v16  ;;  %v486_v18 = vld [vmem:[%s19151_s6 + $0x690] sm:$0xff]  ;;  %v488_v19 = vld [vmem:[%s19151_s6 + $0x698] sm:$0xff]  ;;  %485 = vst [vmem:[#allocation2 + $0x688] sm:$0xff] %v484_v17 }
  0x6b   :  { %487 = vst [vmem:[#allocation2 + $0x690] sm:$0xff] %v486_v18  ;;  %489 = vst [vmem:[#allocation2 + $0x698] sm:$0xff] %v488_v19  ;;  %v490_v20 = vld [vmem:[%s19151_s6 + $0x6a0] sm:$0xff]  ;;  %v492_v21 = vld [vmem:[%s19151_s6 + $0x6a8] sm:$0xff] }
  0x6c   :  { %v494_v22 = vld [vmem:[%s19151_s6 + $0x6b0] sm:$0xff]  ;;  %491 = vst [vmem:[#allocation2 + $0x6a0] sm:$0xff] %v490_v20  ;;  %493 = vst [vmem:[#allocation2 + $0x6a8] sm:$0xff] %v492_v21  ;;  %v496_v23 = vld [vmem:[%s19151_s6 + $0x6b8] sm:$0xff] }
  0x6d   :  { %495 = vst [vmem:[#allocation2 + $0x6b0] sm:$0xff] %v494_v22  ;;  %v498_v24 = vld [vmem:[%s19151_s6 + $0x6c0] sm:$0xff]  ;;  %v500_v25 = vld [vmem:[%s19151_s6 + $0x6c8] sm:$0xff]  ;;  %497 = vst [vmem:[#allocation2 + $0x6b8] sm:$0xff] %v496_v23 }
  0x6e   :  { %499 = vst [vmem:[#allocation2 + $0x6c0] sm:$0xff] %v498_v24  ;;  %501 = vst [vmem:[#allocation2 + $0x6c8] sm:$0xff] %v500_v25  ;;  %v502_v26 = vld [vmem:[%s19151_s6 + $0x6d0] sm:$0xff]  ;;  %v504_v27 = vld [vmem:[%s19151_s6 + $0x6d8] sm:$0xff] }
  0x6f   :  { %v506_v28 = vld [vmem:[%s19151_s6 + $0x6e0] sm:$0xff]  ;;  %503 = vst [vmem:[#allocation2 + $0x6d0] sm:$0xff] %v502_v26  ;;  %505 = vst [vmem:[#allocation2 + $0x6d8] sm:$0xff] %v504_v27  ;;  %v508_v29 = vld [vmem:[%s19151_s6 + $0x6e8] sm:$0xff] }
  0x70   :  { %507 = vst [vmem:[#allocation2 + $0x6e0] sm:$0xff] %v506_v28  ;;  %v510_v30 = vld [vmem:[%s19151_s6 + $0x6f0] sm:$0xff]  ;;  %v512_v31 = vld [vmem:[%s19151_s6 + $0x6f8] sm:$0xff]  ;;  %509 = vst [vmem:[#allocation2 + $0x6e8] sm:$0xff] %v508_v29 }
  0x71   :  { %511 = vst [vmem:[#allocation2 + $0x6f0] sm:$0xff] %v510_v30  ;;  %513 = vst [vmem:[#allocation2 + $0x6f8] sm:$0xff] %v512_v31  ;;  %v514_v32 = vld [vmem:[%s19151_s6 + $0x700] sm:$0xff]  ;;  %v516_v33 = vld [vmem:[%s19151_s6 + $0x708] sm:$0xff] }
  0x72   :  { %v518_v34 = vld [vmem:[%s19151_s6 + $0x710] sm:$0xff]  ;;  %515 = vst [vmem:[#allocation2 + $0x700] sm:$0xff] %v514_v32  ;;  %517 = vst [vmem:[#allocation2 + $0x708] sm:$0xff] %v516_v33  ;;  %v520_v35 = vld [vmem:[%s19151_s6 + $0x718] sm:$0xff] }
  0x73   :  { %519 = vst [vmem:[#allocation2 + $0x710] sm:$0xff] %v518_v34  ;;  %v522_v36 = vld [vmem:[%s19151_s6 + $0x720] sm:$0xff]  ;;  %v524_v37 = vld [vmem:[%s19151_s6 + $0x728] sm:$0xff]  ;;  %521 = vst [vmem:[#allocation2 + $0x718] sm:$0xff] %v520_v35 }
  0x74   :  { %523 = vst [vmem:[#allocation2 + $0x720] sm:$0xff] %v522_v36  ;;  %525 = vst [vmem:[#allocation2 + $0x728] sm:$0xff] %v524_v37  ;;  %v526_v38 = vld [vmem:[%s19151_s6 + $0x730] sm:$0xff]  ;;  %v528_v39 = vld [vmem:[%s19151_s6 + $0x738] sm:$0xff] }
  0x75   :  { %v530_v40 = vld [vmem:[%s19151_s6 + $0x740] sm:$0xff]  ;;  %527 = vst [vmem:[#allocation2 + $0x730] sm:$0xff] %v526_v38  ;;  %529 = vst [vmem:[#allocation2 + $0x738] sm:$0xff] %v528_v39  ;;  %v532_v41 = vld [vmem:[%s19151_s6 + $0x748] sm:$0xff] }
  0x76   :  { %531 = vst [vmem:[#allocation2 + $0x740] sm:$0xff] %v530_v40  ;;  %v534_v42 = vld [vmem:[%s19151_s6 + $0x750] sm:$0xff]  ;;  %v536_v43 = vld [vmem:[%s19151_s6 + $0x758] sm:$0xff]  ;;  %533 = vst [vmem:[#allocation2 + $0x748] sm:$0xff] %v532_v41 }
  0x77   :  { %535 = vst [vmem:[#allocation2 + $0x750] sm:$0xff] %v534_v42  ;;  %537 = vst [vmem:[#allocation2 + $0x758] sm:$0xff] %v536_v43  ;;  %v538_v44 = vld [vmem:[%s19151_s6 + $0x760] sm:$0xff]  ;;  %v540_v45 = vld [vmem:[%s19151_s6 + $0x768] sm:$0xff] }
  0x78   :  { %v542_v46 = vld [vmem:[%s19151_s6 + $0x770] sm:$0xff]  ;;  %539 = vst [vmem:[#allocation2 + $0x760] sm:$0xff] %v538_v44  ;;  %541 = vst [vmem:[#allocation2 + $0x768] sm:$0xff] %v540_v45  ;;  %v544_v47 = vld [vmem:[%s19151_s6 + $0x778] sm:$0xff] }
  0x79   :  { %543 = vst [vmem:[#allocation2 + $0x770] sm:$0xff] %v542_v46  ;;  %v546_v48 = vld [vmem:[%s19151_s6 + $0x780] sm:$0xff]  ;;  %v548_v49 = vld [vmem:[%s19151_s6 + $0x788] sm:$0xff]  ;;  %545 = vst [vmem:[#allocation2 + $0x778] sm:$0xff] %v544_v47 }
  0x7a   :  { %547 = vst [vmem:[#allocation2 + $0x780] sm:$0xff] %v546_v48  ;;  %549 = vst [vmem:[#allocation2 + $0x788] sm:$0xff] %v548_v49  ;;  %v550_v50 = vld [vmem:[%s19151_s6 + $0x790] sm:$0xff]  ;;  %v552_v51 = vld [vmem:[%s19151_s6 + $0x798] sm:$0xff] }
  0x7b   :  { %v554_v52 = vld [vmem:[%s19151_s6 + $0x7a0] sm:$0xff]  ;;  %551 = vst [vmem:[#allocation2 + $0x790] sm:$0xff] %v550_v50  ;;  %553 = vst [vmem:[#allocation2 + $0x798] sm:$0xff] %v552_v51  ;;  %v556_v53 = vld [vmem:[%s19151_s6 + $0x7a8] sm:$0xff] }
  0x7c   :  { %555 = vst [vmem:[#allocation2 + $0x7a0] sm:$0xff] %v554_v52  ;;  %v558_v54 = vld [vmem:[%s19151_s6 + $0x7b0] sm:$0xff]  ;;  %v560_v55 = vld [vmem:[%s19151_s6 + $0x7b8] sm:$0xff]  ;;  %557 = vst [vmem:[#allocation2 + $0x7a8] sm:$0xff] %v556_v53 }
  0x7d   :  { %559 = vst [vmem:[#allocation2 + $0x7b0] sm:$0xff] %v558_v54  ;;  %561 = vst [vmem:[#allocation2 + $0x7b8] sm:$0xff] %v560_v55  ;;  %v562_v56 = vld [vmem:[%s19151_s6 + $0x7c0] sm:$0xff]  ;;  %v564_v57 = vld [vmem:[%s19151_s6 + $0x7c8] sm:$0xff] }
  0x7e   :  { %v566_v58 = vld [vmem:[%s19151_s6 + $0x7d0] sm:$0xff]  ;;  %563 = vst [vmem:[#allocation2 + $0x7c0] sm:$0xff] %v562_v56  ;;  %565 = vst [vmem:[#allocation2 + $0x7c8] sm:$0xff] %v564_v57  ;;  %v568_v59 = vld [vmem:[%s19151_s6 + $0x7d8] sm:$0xff] }
  0x7f   :  { %567 = vst [vmem:[#allocation2 + $0x7d0] sm:$0xff] %v566_v58  ;;  %v570_v60 = vld [vmem:[%s19151_s6 + $0x7e0] sm:$0xff]  ;;  %v572_v61 = vld [vmem:[%s19151_s6 + $0x7e8] sm:$0xff]  ;;  %569 = vst [vmem:[#allocation2 + $0x7d8] sm:$0xff] %v568_v59 }
  0x80   :  { %571 = vst [vmem:[#allocation2 + $0x7e0] sm:$0xff] %v570_v60  ;;  %573 = vst [vmem:[#allocation2 + $0x7e8] sm:$0xff] %v572_v61  ;;  %v574_v62 = vld [vmem:[%s19151_s6 + $0x7f0] sm:$0xff]  ;;  %v576_v63 = vld [vmem:[%s19151_s6 + $0x7f8] sm:$0xff] }
  0x81   :  { %v578_v0 = vld [vmem:[%s19151_s6 + $0x800] sm:$0xff]  ;;  %575 = vst [vmem:[#allocation2 + $0x7f0] sm:$0xff] %v574_v62  ;;  %577 = vst [vmem:[#allocation2 + $0x7f8] sm:$0xff] %v576_v63  ;;  %v580_v1 = vld [vmem:[%s19151_s6 + $0x808] sm:$0xff] }
  0x82   :  { %579 = vst [vmem:[#allocation2 + $0x800] sm:$0xff] %v578_v0  ;;  %v582_v2 = vld [vmem:[%s19151_s6 + $0x810] sm:$0xff]  ;;  %v584_v3 = vld [vmem:[%s19151_s6 + $0x818] sm:$0xff]  ;;  %581 = vst [vmem:[#allocation2 + $0x808] sm:$0xff] %v580_v1 }
  0x83   :  { %583 = vst [vmem:[#allocation2 + $0x810] sm:$0xff] %v582_v2  ;;  %585 = vst [vmem:[#allocation2 + $0x818] sm:$0xff] %v584_v3  ;;  %v586_v4 = vld [vmem:[%s19151_s6 + $0x820] sm:$0xff]  ;;  %v588_v5 = vld [vmem:[%s19151_s6 + $0x828] sm:$0xff] }
  0x84   :  { %v590_v6 = vld [vmem:[%s19151_s6 + $0x830] sm:$0xff]  ;;  %587 = vst [vmem:[#allocation2 + $0x820] sm:$0xff] %v586_v4  ;;  %589 = vst [vmem:[#allocation2 + $0x828] sm:$0xff] %v588_v5  ;;  %v592_v7 = vld [vmem:[%s19151_s6 + $0x838] sm:$0xff] }
  0x85   :  { %591 = vst [vmem:[#allocation2 + $0x830] sm:$0xff] %v590_v6  ;;  %v594_v8 = vld [vmem:[%s19151_s6 + $0x840] sm:$0xff]  ;;  %v596_v9 = vld [vmem:[%s19151_s6 + $0x848] sm:$0xff]  ;;  %593 = vst [vmem:[#allocation2 + $0x838] sm:$0xff] %v592_v7 }
  0x86   :  { %595 = vst [vmem:[#allocation2 + $0x840] sm:$0xff] %v594_v8  ;;  %597 = vst [vmem:[#allocation2 + $0x848] sm:$0xff] %v596_v9  ;;  %v598_v10 = vld [vmem:[%s19151_s6 + $0x850] sm:$0xff]  ;;  %v600_v11 = vld [vmem:[%s19151_s6 + $0x858] sm:$0xff] }
  0x87   :  { %v602_v12 = vld [vmem:[%s19151_s6 + $0x860] sm:$0xff]  ;;  %599 = vst [vmem:[#allocation2 + $0x850] sm:$0xff] %v598_v10  ;;  %601 = vst [vmem:[#allocation2 + $0x858] sm:$0xff] %v600_v11  ;;  %v604_v13 = vld [vmem:[%s19151_s6 + $0x868] sm:$0xff] }
  0x88   :  { %603 = vst [vmem:[#allocation2 + $0x860] sm:$0xff] %v602_v12  ;;  %v606_v14 = vld [vmem:[%s19151_s6 + $0x870] sm:$0xff]  ;;  %v608_v15 = vld [vmem:[%s19151_s6 + $0x878] sm:$0xff]  ;;  %605 = vst [vmem:[#allocation2 + $0x868] sm:$0xff] %v604_v13 }
  0x89   :  { %607 = vst [vmem:[#allocation2 + $0x870] sm:$0xff] %v606_v14  ;;  %609 = vst [vmem:[#allocation2 + $0x878] sm:$0xff] %v608_v15  ;;  %v610_v16 = vld [vmem:[%s19151_s6 + $0x880] sm:$0xff]  ;;  %v612_v17 = vld [vmem:[%s19151_s6 + $0x888] sm:$0xff] }
  0x8a   :  { %v614_v18 = vld [vmem:[%s19151_s6 + $0x890] sm:$0xff]  ;;  %611 = vst [vmem:[#allocation2 + $0x880] sm:$0xff] %v610_v16  ;;  %613 = vst [vmem:[#allocation2 + $0x888] sm:$0xff] %v612_v17  ;;  %v616_v19 = vld [vmem:[%s19151_s6 + $0x898] sm:$0xff] }
  0x8b   :  { %615 = vst [vmem:[#allocation2 + $0x890] sm:$0xff] %v614_v18  ;;  %v618_v20 = vld [vmem:[%s19151_s6 + $0x8a0] sm:$0xff]  ;;  %v620_v21 = vld [vmem:[%s19151_s6 + $0x8a8] sm:$0xff]  ;;  %617 = vst [vmem:[#allocation2 + $0x898] sm:$0xff] %v616_v19 }
  0x8c   :  { %619 = vst [vmem:[#allocation2 + $0x8a0] sm:$0xff] %v618_v20  ;;  %621 = vst [vmem:[#allocation2 + $0x8a8] sm:$0xff] %v620_v21  ;;  %v622_v22 = vld [vmem:[%s19151_s6 + $0x8b0] sm:$0xff]  ;;  %v624_v23 = vld [vmem:[%s19151_s6 + $0x8b8] sm:$0xff] }
  0x8d   :  { %v626_v24 = vld [vmem:[%s19151_s6 + $0x8c0] sm:$0xff]  ;;  %623 = vst [vmem:[#allocation2 + $0x8b0] sm:$0xff] %v622_v22  ;;  %625 = vst [vmem:[#allocation2 + $0x8b8] sm:$0xff] %v624_v23  ;;  %v628_v25 = vld [vmem:[%s19151_s6 + $0x8c8] sm:$0xff] }
  0x8e   :  { %627 = vst [vmem:[#allocation2 + $0x8c0] sm:$0xff] %v626_v24  ;;  %v630_v26 = vld [vmem:[%s19151_s6 + $0x8d0] sm:$0xff]  ;;  %v632_v27 = vld [vmem:[%s19151_s6 + $0x8d8] sm:$0xff]  ;;  %629 = vst [vmem:[#allocation2 + $0x8c8] sm:$0xff] %v628_v25 }
  0x8f   :  { %631 = vst [vmem:[#allocation2 + $0x8d0] sm:$0xff] %v630_v26  ;;  %633 = vst [vmem:[#allocation2 + $0x8d8] sm:$0xff] %v632_v27  ;;  %v634_v28 = vld [vmem:[%s19151_s6 + $0x8e0] sm:$0xff]  ;;  %v636_v29 = vld [vmem:[%s19151_s6 + $0x8e8] sm:$0xff] }
  0x90   :  { %v638_v30 = vld [vmem:[%s19151_s6 + $0x8f0] sm:$0xff]  ;;  %635 = vst [vmem:[#allocation2 + $0x8e0] sm:$0xff] %v634_v28  ;;  %637 = vst [vmem:[#allocation2 + $0x8e8] sm:$0xff] %v636_v29  ;;  %v640_v31 = vld [vmem:[%s19151_s6 + $0x8f8] sm:$0xff] }
  0x91   :  { %639 = vst [vmem:[#allocation2 + $0x8f0] sm:$0xff] %v638_v30  ;;  %v642_v32 = vld [vmem:[%s19151_s6 + $0x900] sm:$0xff]  ;;  %v644_v33 = vld [vmem:[%s19151_s6 + $0x908] sm:$0xff]  ;;  %641 = vst [vmem:[#allocation2 + $0x8f8] sm:$0xff] %v640_v31 }
  0x92   :  { %643 = vst [vmem:[#allocation2 + $0x900] sm:$0xff] %v642_v32  ;;  %645 = vst [vmem:[#allocation2 + $0x908] sm:$0xff] %v644_v33  ;;  %v646_v34 = vld [vmem:[%s19151_s6 + $0x910] sm:$0xff]  ;;  %v648_v35 = vld [vmem:[%s19151_s6 + $0x918] sm:$0xff] }
  0x93   :  { %v650_v36 = vld [vmem:[%s19151_s6 + $0x920] sm:$0xff]  ;;  %647 = vst [vmem:[#allocation2 + $0x910] sm:$0xff] %v646_v34  ;;  %649 = vst [vmem:[#allocation2 + $0x918] sm:$0xff] %v648_v35  ;;  %v652_v37 = vld [vmem:[%s19151_s6 + $0x928] sm:$0xff] }
  0x94   :  { %651 = vst [vmem:[#allocation2 + $0x920] sm:$0xff] %v650_v36  ;;  %v654_v38 = vld [vmem:[%s19151_s6 + $0x930] sm:$0xff]  ;;  %v656_v39 = vld [vmem:[%s19151_s6 + $0x938] sm:$0xff]  ;;  %653 = vst [vmem:[#allocation2 + $0x928] sm:$0xff] %v652_v37 }
  0x95   :  { %655 = vst [vmem:[#allocation2 + $0x930] sm:$0xff] %v654_v38  ;;  %657 = vst [vmem:[#allocation2 + $0x938] sm:$0xff] %v656_v39  ;;  %v658_v40 = vld [vmem:[%s19151_s6 + $0x940] sm:$0xff]  ;;  %v660_v41 = vld [vmem:[%s19151_s6 + $0x948] sm:$0xff] }
  0x96   :  { %v662_v42 = vld [vmem:[%s19151_s6 + $0x950] sm:$0xff]  ;;  %659 = vst [vmem:[#allocation2 + $0x940] sm:$0xff] %v658_v40  ;;  %661 = vst [vmem:[#allocation2 + $0x948] sm:$0xff] %v660_v41  ;;  %v664_v43 = vld [vmem:[%s19151_s6 + $0x958] sm:$0xff] }
  0x97   :  { %663 = vst [vmem:[#allocation2 + $0x950] sm:$0xff] %v662_v42  ;;  %v666_v44 = vld [vmem:[%s19151_s6 + $0x960] sm:$0xff]  ;;  %v668_v45 = vld [vmem:[%s19151_s6 + $0x968] sm:$0xff]  ;;  %665 = vst [vmem:[#allocation2 + $0x958] sm:$0xff] %v664_v43 }
  0x98   :  { %667 = vst [vmem:[#allocation2 + $0x960] sm:$0xff] %v666_v44  ;;  %669 = vst [vmem:[#allocation2 + $0x968] sm:$0xff] %v668_v45  ;;  %v670_v46 = vld [vmem:[%s19151_s6 + $0x970] sm:$0xff]  ;;  %v672_v47 = vld [vmem:[%s19151_s6 + $0x978] sm:$0xff] }
  0x99   :  { %v674_v48 = vld [vmem:[%s19151_s6 + $0x980] sm:$0xff]  ;;  %671 = vst [vmem:[#allocation2 + $0x970] sm:$0xff] %v670_v46  ;;  %673 = vst [vmem:[#allocation2 + $0x978] sm:$0xff] %v672_v47  ;;  %v676_v49 = vld [vmem:[%s19151_s6 + $0x988] sm:$0xff] }
  0x9a   :  { %675 = vst [vmem:[#allocation2 + $0x980] sm:$0xff] %v674_v48  ;;  %v678_v50 = vld [vmem:[%s19151_s6 + $0x990] sm:$0xff]  ;;  %v680_v51 = vld [vmem:[%s19151_s6 + $0x998] sm:$0xff]  ;;  %677 = vst [vmem:[#allocation2 + $0x988] sm:$0xff] %v676_v49 }
  0x9b   :  { %679 = vst [vmem:[#allocation2 + $0x990] sm:$0xff] %v678_v50  ;;  %681 = vst [vmem:[#allocation2 + $0x998] sm:$0xff] %v680_v51  ;;  %v682_v52 = vld [vmem:[%s19151_s6 + $0x9a0] sm:$0xff]  ;;  %v684_v53 = vld [vmem:[%s19151_s6 + $0x9a8] sm:$0xff] }
  0x9c   :  { %v686_v54 = vld [vmem:[%s19151_s6 + $0x9b0] sm:$0xff]  ;;  %683 = vst [vmem:[#allocation2 + $0x9a0] sm:$0xff] %v682_v52  ;;  %685 = vst [vmem:[#allocation2 + $0x9a8] sm:$0xff] %v684_v53  ;;  %v688_v55 = vld [vmem:[%s19151_s6 + $0x9b8] sm:$0xff] }
  0x9d   :  { %687 = vst [vmem:[#allocation2 + $0x9b0] sm:$0xff] %v686_v54  ;;  %v690_v56 = vld [vmem:[%s19151_s6 + $0x9c0] sm:$0xff]  ;;  %v692_v57 = vld [vmem:[%s19151_s6 + $0x9c8] sm:$0xff]  ;;  %689 = vst [vmem:[#allocation2 + $0x9b8] sm:$0xff] %v688_v55 }
  0x9e   :  { %691 = vst [vmem:[#allocation2 + $0x9c0] sm:$0xff] %v690_v56  ;;  %693 = vst [vmem:[#allocation2 + $0x9c8] sm:$0xff] %v692_v57  ;;  %v694_v58 = vld [vmem:[%s19151_s6 + $0x9d0] sm:$0xff]  ;;  %v696_v59 = vld [vmem:[%s19151_s6 + $0x9d8] sm:$0xff] }
  0x9f   :  { %v698_v60 = vld [vmem:[%s19151_s6 + $0x9e0] sm:$0xff]  ;;  %695 = vst [vmem:[#allocation2 + $0x9d0] sm:$0xff] %v694_v58  ;;  %697 = vst [vmem:[#allocation2 + $0x9d8] sm:$0xff] %v696_v59  ;;  %v700_v61 = vld [vmem:[%s19151_s6 + $0x9e8] sm:$0xff] }
  0xa0   :  { %699 = vst [vmem:[#allocation2 + $0x9e0] sm:$0xff] %v698_v60  ;;  %v702_v62 = vld [vmem:[%s19151_s6 + $0x9f0] sm:$0xff]  ;;  %v704_v63 = vld [vmem:[%s19151_s6 + $0x9f8] sm:$0xff]  ;;  %701 = vst [vmem:[#allocation2 + $0x9e8] sm:$0xff] %v700_v61 }
  0xa1   :  { %703 = vst [vmem:[#allocation2 + $0x9f0] sm:$0xff] %v702_v62  ;;  %705 = vst [vmem:[#allocation2 + $0x9f8] sm:$0xff] %v704_v63  ;;  %v706_v0 = vld [vmem:[%s19151_s6 + $0xa00] sm:$0xff]  ;;  %v708_v1 = vld [vmem:[%s19151_s6 + $0xa08] sm:$0xff] }
  0xa2   :  { %v710_v2 = vld [vmem:[%s19151_s6 + $0xa10] sm:$0xff]  ;;  %707 = vst [vmem:[#allocation2 + $0xa00] sm:$0xff] %v706_v0  ;;  %709 = vst [vmem:[#allocation2 + $0xa08] sm:$0xff] %v708_v1  ;;  %v712_v3 = vld [vmem:[%s19151_s6 + $0xa18] sm:$0xff] }
  0xa3   :  { %711 = vst [vmem:[#allocation2 + $0xa10] sm:$0xff] %v710_v2  ;;  %v714_v4 = vld [vmem:[%s19151_s6 + $0xa20] sm:$0xff]  ;;  %v716_v5 = vld [vmem:[%s19151_s6 + $0xa28] sm:$0xff]  ;;  %713 = vst [vmem:[#allocation2 + $0xa18] sm:$0xff] %v712_v3 }
  0xa4   :  { %715 = vst [vmem:[#allocation2 + $0xa20] sm:$0xff] %v714_v4  ;;  %717 = vst [vmem:[#allocation2 + $0xa28] sm:$0xff] %v716_v5  ;;  %v718_v6 = vld [vmem:[%s19151_s6 + $0xa30] sm:$0xff]  ;;  %v720_v7 = vld [vmem:[%s19151_s6 + $0xa38] sm:$0xff] }
  0xa5   :  { %v722_v8 = vld [vmem:[%s19151_s6 + $0xa40] sm:$0xff]  ;;  %719 = vst [vmem:[#allocation2 + $0xa30] sm:$0xff] %v718_v6  ;;  %721 = vst [vmem:[#allocation2 + $0xa38] sm:$0xff] %v720_v7  ;;  %v724_v9 = vld [vmem:[%s19151_s6 + $0xa48] sm:$0xff] }
  0xa6   :  { %723 = vst [vmem:[#allocation2 + $0xa40] sm:$0xff] %v722_v8  ;;  %v726_v10 = vld [vmem:[%s19151_s6 + $0xa50] sm:$0xff]  ;;  %v728_v11 = vld [vmem:[%s19151_s6 + $0xa58] sm:$0xff]  ;;  %725 = vst [vmem:[#allocation2 + $0xa48] sm:$0xff] %v724_v9 }
  0xa7   :  { %727 = vst [vmem:[#allocation2 + $0xa50] sm:$0xff] %v726_v10  ;;  %729 = vst [vmem:[#allocation2 + $0xa58] sm:$0xff] %v728_v11  ;;  %v730_v12 = vld [vmem:[%s19151_s6 + $0xa60] sm:$0xff]  ;;  %v732_v13 = vld [vmem:[%s19151_s6 + $0xa68] sm:$0xff] }
  0xa8   :  { %v734_v14 = vld [vmem:[%s19151_s6 + $0xa70] sm:$0xff]  ;;  %731 = vst [vmem:[#allocation2 + $0xa60] sm:$0xff] %v730_v12  ;;  %733 = vst [vmem:[#allocation2 + $0xa68] sm:$0xff] %v732_v13  ;;  %v736_v15 = vld [vmem:[%s19151_s6 + $0xa78] sm:$0xff] }
  0xa9   :  { %735 = vst [vmem:[#allocation2 + $0xa70] sm:$0xff] %v734_v14  ;;  %v738_v16 = vld [vmem:[%s19151_s6 + $0xa80] sm:$0xff]  ;;  %v740_v17 = vld [vmem:[%s19151_s6 + $0xa88] sm:$0xff]  ;;  %737 = vst [vmem:[#allocation2 + $0xa78] sm:$0xff] %v736_v15 }
  0xaa   :  { %739 = vst [vmem:[#allocation2 + $0xa80] sm:$0xff] %v738_v16  ;;  %741 = vst [vmem:[#allocation2 + $0xa88] sm:$0xff] %v740_v17  ;;  %v742_v18 = vld [vmem:[%s19151_s6 + $0xa90] sm:$0xff]  ;;  %v744_v19 = vld [vmem:[%s19151_s6 + $0xa98] sm:$0xff] }
  0xab   :  { %v746_v20 = vld [vmem:[%s19151_s6 + $0xaa0] sm:$0xff]  ;;  %743 = vst [vmem:[#allocation2 + $0xa90] sm:$0xff] %v742_v18  ;;  %745 = vst [vmem:[#allocation2 + $0xa98] sm:$0xff] %v744_v19  ;;  %v748_v21 = vld [vmem:[%s19151_s6 + $0xaa8] sm:$0xff] }
  0xac   :  { %747 = vst [vmem:[#allocation2 + $0xaa0] sm:$0xff] %v746_v20  ;;  %v750_v22 = vld [vmem:[%s19151_s6 + $0xab0] sm:$0xff]  ;;  %v752_v23 = vld [vmem:[%s19151_s6 + $0xab8] sm:$0xff]  ;;  %749 = vst [vmem:[#allocation2 + $0xaa8] sm:$0xff] %v748_v21 }
  0xad   :  { %751 = vst [vmem:[#allocation2 + $0xab0] sm:$0xff] %v750_v22  ;;  %753 = vst [vmem:[#allocation2 + $0xab8] sm:$0xff] %v752_v23  ;;  %v754_v24 = vld [vmem:[%s19151_s6 + $0xac0] sm:$0xff]  ;;  %v756_v25 = vld [vmem:[%s19151_s6 + $0xac8] sm:$0xff] }
  0xae   :  { %v758_v26 = vld [vmem:[%s19151_s6 + $0xad0] sm:$0xff]  ;;  %755 = vst [vmem:[#allocation2 + $0xac0] sm:$0xff] %v754_v24  ;;  %757 = vst [vmem:[#allocation2 + $0xac8] sm:$0xff] %v756_v25  ;;  %v760_v27 = vld [vmem:[%s19151_s6 + $0xad8] sm:$0xff] }
  0xaf   :  { %759 = vst [vmem:[#allocation2 + $0xad0] sm:$0xff] %v758_v26  ;;  %v762_v28 = vld [vmem:[%s19151_s6 + $0xae0] sm:$0xff]  ;;  %v764_v29 = vld [vmem:[%s19151_s6 + $0xae8] sm:$0xff]  ;;  %761 = vst [vmem:[#allocation2 + $0xad8] sm:$0xff] %v760_v27 }
  0xb0   :  { %763 = vst [vmem:[#allocation2 + $0xae0] sm:$0xff] %v762_v28  ;;  %765 = vst [vmem:[#allocation2 + $0xae8] sm:$0xff] %v764_v29  ;;  %v766_v30 = vld [vmem:[%s19151_s6 + $0xaf0] sm:$0xff]  ;;  %v768_v31 = vld [vmem:[%s19151_s6 + $0xaf8] sm:$0xff] }
  0xb1   :  { %v770_v32 = vld [vmem:[%s19151_s6 + $0xb00] sm:$0xff]  ;;  %767 = vst [vmem:[#allocation2 + $0xaf0] sm:$0xff] %v766_v30  ;;  %769 = vst [vmem:[#allocation2 + $0xaf8] sm:$0xff] %v768_v31  ;;  %v772_v33 = vld [vmem:[%s19151_s6 + $0xb08] sm:$0xff] }
  0xb2   :  { %771 = vst [vmem:[#allocation2 + $0xb00] sm:$0xff] %v770_v32  ;;  %v774_v34 = vld [vmem:[%s19151_s6 + $0xb10] sm:$0xff]  ;;  %v776_v35 = vld [vmem:[%s19151_s6 + $0xb18] sm:$0xff]  ;;  %773 = vst [vmem:[#allocation2 + $0xb08] sm:$0xff] %v772_v33 }
  0xb3   :  { %775 = vst [vmem:[#allocation2 + $0xb10] sm:$0xff] %v774_v34  ;;  %777 = vst [vmem:[#allocation2 + $0xb18] sm:$0xff] %v776_v35  ;;  %v778_v36 = vld [vmem:[%s19151_s6 + $0xb20] sm:$0xff]  ;;  %v780_v37 = vld [vmem:[%s19151_s6 + $0xb28] sm:$0xff] }
  0xb4   :  { %v782_v38 = vld [vmem:[%s19151_s6 + $0xb30] sm:$0xff]  ;;  %779 = vst [vmem:[#allocation2 + $0xb20] sm:$0xff] %v778_v36  ;;  %781 = vst [vmem:[#allocation2 + $0xb28] sm:$0xff] %v780_v37  ;;  %v784_v39 = vld [vmem:[%s19151_s6 + $0xb38] sm:$0xff] }
  0xb5   :  { %783 = vst [vmem:[#allocation2 + $0xb30] sm:$0xff] %v782_v38  ;;  %v786_v40 = vld [vmem:[%s19151_s6 + $0xb40] sm:$0xff]  ;;  %v788_v41 = vld [vmem:[%s19151_s6 + $0xb48] sm:$0xff]  ;;  %785 = vst [vmem:[#allocation2 + $0xb38] sm:$0xff] %v784_v39 }
  0xb6   :  { %787 = vst [vmem:[#allocation2 + $0xb40] sm:$0xff] %v786_v40  ;;  %789 = vst [vmem:[#allocation2 + $0xb48] sm:$0xff] %v788_v41  ;;  %v790_v42 = vld [vmem:[%s19151_s6 + $0xb50] sm:$0xff]  ;;  %v792_v43 = vld [vmem:[%s19151_s6 + $0xb58] sm:$0xff] }
  0xb7   :  { %v794_v44 = vld [vmem:[%s19151_s6 + $0xb60] sm:$0xff]  ;;  %791 = vst [vmem:[#allocation2 + $0xb50] sm:$0xff] %v790_v42  ;;  %793 = vst [vmem:[#allocation2 + $0xb58] sm:$0xff] %v792_v43  ;;  %v796_v45 = vld [vmem:[%s19151_s6 + $0xb68] sm:$0xff] }
  0xb8   :  { %795 = vst [vmem:[#allocation2 + $0xb60] sm:$0xff] %v794_v44  ;;  %v798_v46 = vld [vmem:[%s19151_s6 + $0xb70] sm:$0xff]  ;;  %v800_v47 = vld [vmem:[%s19151_s6 + $0xb78] sm:$0xff]  ;;  %797 = vst [vmem:[#allocation2 + $0xb68] sm:$0xff] %v796_v45 }
  0xb9   :  { %799 = vst [vmem:[#allocation2 + $0xb70] sm:$0xff] %v798_v46  ;;  %801 = vst [vmem:[#allocation2 + $0xb78] sm:$0xff] %v800_v47  ;;  %v802_v48 = vld [vmem:[%s19151_s6 + $0xb80] sm:$0xff]  ;;  %v804_v49 = vld [vmem:[%s19151_s6 + $0xb88] sm:$0xff] }
  0xba   :  { %v806_v50 = vld [vmem:[%s19151_s6 + $0xb90] sm:$0xff]  ;;  %803 = vst [vmem:[#allocation2 + $0xb80] sm:$0xff] %v802_v48  ;;  %805 = vst [vmem:[#allocation2 + $0xb88] sm:$0xff] %v804_v49  ;;  %v808_v51 = vld [vmem:[%s19151_s6 + $0xb98] sm:$0xff] }
  0xbb   :  { %807 = vst [vmem:[#allocation2 + $0xb90] sm:$0xff] %v806_v50  ;;  %v810_v52 = vld [vmem:[%s19151_s6 + $0xba0] sm:$0xff]  ;;  %v812_v53 = vld [vmem:[%s19151_s6 + $0xba8] sm:$0xff]  ;;  %809 = vst [vmem:[#allocation2 + $0xb98] sm:$0xff] %v808_v51 }
  0xbc   :  { %811 = vst [vmem:[#allocation2 + $0xba0] sm:$0xff] %v810_v52  ;;  %813 = vst [vmem:[#allocation2 + $0xba8] sm:$0xff] %v812_v53  ;;  %v814_v54 = vld [vmem:[%s19151_s6 + $0xbb0] sm:$0xff]  ;;  %v816_v55 = vld [vmem:[%s19151_s6 + $0xbb8] sm:$0xff] }
  0xbd   :  { %v818_v56 = vld [vmem:[%s19151_s6 + $0xbc0] sm:$0xff]  ;;  %815 = vst [vmem:[#allocation2 + $0xbb0] sm:$0xff] %v814_v54  ;;  %817 = vst [vmem:[#allocation2 + $0xbb8] sm:$0xff] %v816_v55  ;;  %v820_v57 = vld [vmem:[%s19151_s6 + $0xbc8] sm:$0xff] }
  0xbe   :  { %819 = vst [vmem:[#allocation2 + $0xbc0] sm:$0xff] %v818_v56  ;;  %v822_v58 = vld [vmem:[%s19151_s6 + $0xbd0] sm:$0xff]  ;;  %v824_v59 = vld [vmem:[%s19151_s6 + $0xbd8] sm:$0xff]  ;;  %821 = vst [vmem:[#allocation2 + $0xbc8] sm:$0xff] %v820_v57 }
  0xbf   :  { %823 = vst [vmem:[#allocation2 + $0xbd0] sm:$0xff] %v822_v58  ;;  %825 = vst [vmem:[#allocation2 + $0xbd8] sm:$0xff] %v824_v59  ;;  %v826_v60 = vld [vmem:[%s19151_s6 + $0xbe0] sm:$0xff]  ;;  %v828_v61 = vld [vmem:[%s19151_s6 + $0xbe8] sm:$0xff] }
  0xc0   :  { %v830_v62 = vld [vmem:[%s19151_s6 + $0xbf0] sm:$0xff]  ;;  %827 = vst [vmem:[#allocation2 + $0xbe0] sm:$0xff] %v826_v60  ;;  %829 = vst [vmem:[#allocation2 + $0xbe8] sm:$0xff] %v828_v61  ;;  %v832_v63 = vld [vmem:[%s19151_s6 + $0xbf8] sm:$0xff] }
  0xc1   :  { %831 = vst [vmem:[#allocation2 + $0xbf0] sm:$0xff] %v830_v62  ;;  %v834_v0 = vld [vmem:[%s19151_s6 + $0xc00] sm:$0xff]  ;;  %v836_v1 = vld [vmem:[%s19151_s6 + $0xc08] sm:$0xff]  ;;  %833 = vst [vmem:[#allocation2 + $0xbf8] sm:$0xff] %v832_v63 }
  0xc2   :  { %835 = vst [vmem:[#allocation2 + $0xc00] sm:$0xff] %v834_v0  ;;  %837 = vst [vmem:[#allocation2 + $0xc08] sm:$0xff] %v836_v1  ;;  %v838_v2 = vld [vmem:[%s19151_s6 + $0xc10] sm:$0xff]  ;;  %v840_v3 = vld [vmem:[%s19151_s6 + $0xc18] sm:$0xff] }
  0xc3   :  { %v842_v4 = vld [vmem:[%s19151_s6 + $0xc20] sm:$0xff]  ;;  %839 = vst [vmem:[#allocation2 + $0xc10] sm:$0xff] %v838_v2  ;;  %841 = vst [vmem:[#allocation2 + $0xc18] sm:$0xff] %v840_v3  ;;  %v844_v5 = vld [vmem:[%s19151_s6 + $0xc28] sm:$0xff] }
  0xc4   :  { %843 = vst [vmem:[#allocation2 + $0xc20] sm:$0xff] %v842_v4  ;;  %v846_v6 = vld [vmem:[%s19151_s6 + $0xc30] sm:$0xff]  ;;  %v848_v7 = vld [vmem:[%s19151_s6 + $0xc38] sm:$0xff]  ;;  %845 = vst [vmem:[#allocation2 + $0xc28] sm:$0xff] %v844_v5 }
  0xc5   :  { %847 = vst [vmem:[#allocation2 + $0xc30] sm:$0xff] %v846_v6  ;;  %849 = vst [vmem:[#allocation2 + $0xc38] sm:$0xff] %v848_v7  ;;  %v850_v8 = vld [vmem:[%s19151_s6 + $0xc40] sm:$0xff]  ;;  %v852_v9 = vld [vmem:[%s19151_s6 + $0xc48] sm:$0xff] }
  0xc6   :  { %v854_v10 = vld [vmem:[%s19151_s6 + $0xc50] sm:$0xff]  ;;  %851 = vst [vmem:[#allocation2 + $0xc40] sm:$0xff] %v850_v8  ;;  %853 = vst [vmem:[#allocation2 + $0xc48] sm:$0xff] %v852_v9  ;;  %v856_v11 = vld [vmem:[%s19151_s6 + $0xc58] sm:$0xff] }
  0xc7   :  { %855 = vst [vmem:[#allocation2 + $0xc50] sm:$0xff] %v854_v10  ;;  %v858_v12 = vld [vmem:[%s19151_s6 + $0xc60] sm:$0xff]  ;;  %v860_v13 = vld [vmem:[%s19151_s6 + $0xc68] sm:$0xff]  ;;  %857 = vst [vmem:[#allocation2 + $0xc58] sm:$0xff] %v856_v11 }
  0xc8   :  { %859 = vst [vmem:[#allocation2 + $0xc60] sm:$0xff] %v858_v12  ;;  %861 = vst [vmem:[#allocation2 + $0xc68] sm:$0xff] %v860_v13  ;;  %v862_v14 = vld [vmem:[%s19151_s6 + $0xc70] sm:$0xff]  ;;  %v864_v15 = vld [vmem:[%s19151_s6 + $0xc78] sm:$0xff] }
  0xc9   :  { %863 = vst [vmem:[#allocation2 + $0xc70] sm:$0xff] %v862_v14  ;;  %865 = vst [vmem:[#allocation2 + $0xc78] sm:$0xff] %v864_v15 }
  0xca   :  { %873 = vsyncadd [#allocation5], 51200  ;;  %v908_v16 = vld [vmem:[%s19152_s7] sm:$0xff]  ;;  %v910_v17 = vld [vmem:[%s19152_s7 + $0x8] sm:$0xff] }
  0xcb   :  { %909 = vst [vmem:[#allocation3] sm:$0xff] %v908_v16  ;;  %911 = vst [vmem:[#allocation3 + $0x8] sm:$0xff] %v910_v17  ;;  %v912_v18 = vld [vmem:[%s19152_s7 + $0x10] sm:$0xff]  ;;  %v914_v19 = vld [vmem:[%s19152_s7 + $0x18] sm:$0xff] }
  0xcc   :  { %v916_v20 = vld [vmem:[%s19152_s7 + $0x20] sm:$0xff]  ;;  %913 = vst [vmem:[#allocation3 + $0x10] sm:$0xff] %v912_v18  ;;  %915 = vst [vmem:[#allocation3 + $0x18] sm:$0xff] %v914_v19  ;;  %v918_v21 = vld [vmem:[%s19152_s7 + $0x28] sm:$0xff] }
  0xcd   :  { %917 = vst [vmem:[#allocation3 + $0x20] sm:$0xff] %v916_v20  ;;  %v920_v22 = vld [vmem:[%s19152_s7 + $0x30] sm:$0xff]  ;;  %v922_v23 = vld [vmem:[%s19152_s7 + $0x38] sm:$0xff]  ;;  %919 = vst [vmem:[#allocation3 + $0x28] sm:$0xff] %v918_v21 }
  0xce   :  { %921 = vst [vmem:[#allocation3 + $0x30] sm:$0xff] %v920_v22  ;;  %923 = vst [vmem:[#allocation3 + $0x38] sm:$0xff] %v922_v23  ;;  %v924_v24 = vld [vmem:[%s19152_s7 + $0x40] sm:$0xff]  ;;  %v926_v25 = vld [vmem:[%s19152_s7 + $0x48] sm:$0xff] }
  0xcf   :  { %v928_v26 = vld [vmem:[%s19152_s7 + $0x50] sm:$0xff]  ;;  %925 = vst [vmem:[#allocation3 + $0x40] sm:$0xff] %v924_v24  ;;  %927 = vst [vmem:[#allocation3 + $0x48] sm:$0xff] %v926_v25  ;;  %v930_v27 = vld [vmem:[%s19152_s7 + $0x58] sm:$0xff] }
  0xd0   :  { %929 = vst [vmem:[#allocation3 + $0x50] sm:$0xff] %v928_v26  ;;  %v932_v28 = vld [vmem:[%s19152_s7 + $0x60] sm:$0xff]  ;;  %v934_v29 = vld [vmem:[%s19152_s7 + $0x68] sm:$0xff]  ;;  %931 = vst [vmem:[#allocation3 + $0x58] sm:$0xff] %v930_v27 }
  0xd1   :  { %933 = vst [vmem:[#allocation3 + $0x60] sm:$0xff] %v932_v28  ;;  %935 = vst [vmem:[#allocation3 + $0x68] sm:$0xff] %v934_v29  ;;  %v936_v30 = vld [vmem:[%s19152_s7 + $0x70] sm:$0xff]  ;;  %v938_v31 = vld [vmem:[%s19152_s7 + $0x78] sm:$0xff] }
  0xd2   :  { %v940_v32 = vld [vmem:[%s19152_s7 + $0x80] sm:$0xff]  ;;  %937 = vst [vmem:[#allocation3 + $0x70] sm:$0xff] %v936_v30  ;;  %939 = vst [vmem:[#allocation3 + $0x78] sm:$0xff] %v938_v31  ;;  %v942_v33 = vld [vmem:[%s19152_s7 + $0x88] sm:$0xff] }
  0xd3   :  { %941 = vst [vmem:[#allocation3 + $0x80] sm:$0xff] %v940_v32  ;;  %v944_v34 = vld [vmem:[%s19152_s7 + $0x90] sm:$0xff]  ;;  %v946_v35 = vld [vmem:[%s19152_s7 + $0x98] sm:$0xff]  ;;  %943 = vst [vmem:[#allocation3 + $0x88] sm:$0xff] %v942_v33 }
  0xd4   :  { %945 = vst [vmem:[#allocation3 + $0x90] sm:$0xff] %v944_v34  ;;  %947 = vst [vmem:[#allocation3 + $0x98] sm:$0xff] %v946_v35  ;;  %v948_v36 = vld [vmem:[%s19152_s7 + $0xa0] sm:$0xff]  ;;  %v950_v37 = vld [vmem:[%s19152_s7 + $0xa8] sm:$0xff] }
  0xd5   :  { %v952_v38 = vld [vmem:[%s19152_s7 + $0xb0] sm:$0xff]  ;;  %949 = vst [vmem:[#allocation3 + $0xa0] sm:$0xff] %v948_v36  ;;  %951 = vst [vmem:[#allocation3 + $0xa8] sm:$0xff] %v950_v37  ;;  %v954_v39 = vld [vmem:[%s19152_s7 + $0xb8] sm:$0xff] }
  0xd6   :  { %953 = vst [vmem:[#allocation3 + $0xb0] sm:$0xff] %v952_v38  ;;  %v956_v40 = vld [vmem:[%s19152_s7 + $0xc0] sm:$0xff]  ;;  %v958_v41 = vld [vmem:[%s19152_s7 + $0xc8] sm:$0xff]  ;;  %955 = vst [vmem:[#allocation3 + $0xb8] sm:$0xff] %v954_v39 }
  0xd7   :  { %957 = vst [vmem:[#allocation3 + $0xc0] sm:$0xff] %v956_v40  ;;  %959 = vst [vmem:[#allocation3 + $0xc8] sm:$0xff] %v958_v41  ;;  %v960_v42 = vld [vmem:[%s19152_s7 + $0xd0] sm:$0xff]  ;;  %v962_v43 = vld [vmem:[%s19152_s7 + $0xd8] sm:$0xff] }
  0xd8   :  { %v964_v44 = vld [vmem:[%s19152_s7 + $0xe0] sm:$0xff]  ;;  %961 = vst [vmem:[#allocation3 + $0xd0] sm:$0xff] %v960_v42  ;;  %963 = vst [vmem:[#allocation3 + $0xd8] sm:$0xff] %v962_v43  ;;  %v966_v45 = vld [vmem:[%s19152_s7 + $0xe8] sm:$0xff] }
  0xd9   :  { %965 = vst [vmem:[#allocation3 + $0xe0] sm:$0xff] %v964_v44  ;;  %v968_v46 = vld [vmem:[%s19152_s7 + $0xf0] sm:$0xff]  ;;  %v970_v47 = vld [vmem:[%s19152_s7 + $0xf8] sm:$0xff]  ;;  %967 = vst [vmem:[#allocation3 + $0xe8] sm:$0xff] %v966_v45 }
  0xda   :  { %969 = vst [vmem:[#allocation3 + $0xf0] sm:$0xff] %v968_v46  ;;  %971 = vst [vmem:[#allocation3 + $0xf8] sm:$0xff] %v970_v47  ;;  %v972_v48 = vld [vmem:[%s19152_s7 + $0x100] sm:$0xff]  ;;  %v974_v49 = vld [vmem:[%s19152_s7 + $0x108] sm:$0xff] }
  0xdb   :  { %v976_v50 = vld [vmem:[%s19152_s7 + $0x110] sm:$0xff]  ;;  %973 = vst [vmem:[#allocation3 + $0x100] sm:$0xff] %v972_v48  ;;  %975 = vst [vmem:[#allocation3 + $0x108] sm:$0xff] %v974_v49  ;;  %v978_v51 = vld [vmem:[%s19152_s7 + $0x118] sm:$0xff] }
  0xdc   :  { %977 = vst [vmem:[#allocation3 + $0x110] sm:$0xff] %v976_v50  ;;  %v980_v52 = vld [vmem:[%s19152_s7 + $0x120] sm:$0xff]  ;;  %v982_v53 = vld [vmem:[%s19152_s7 + $0x128] sm:$0xff]  ;;  %979 = vst [vmem:[#allocation3 + $0x118] sm:$0xff] %v978_v51 }
  0xdd   :  { %981 = vst [vmem:[#allocation3 + $0x120] sm:$0xff] %v980_v52  ;;  %983 = vst [vmem:[#allocation3 + $0x128] sm:$0xff] %v982_v53  ;;  %v984_v54 = vld [vmem:[%s19152_s7 + $0x130] sm:$0xff]  ;;  %v986_v55 = vld [vmem:[%s19152_s7 + $0x138] sm:$0xff] }
  0xde   :  { %v988_v56 = vld [vmem:[%s19152_s7 + $0x140] sm:$0xff]  ;;  %985 = vst [vmem:[#allocation3 + $0x130] sm:$0xff] %v984_v54  ;;  %987 = vst [vmem:[#allocation3 + $0x138] sm:$0xff] %v986_v55  ;;  %v990_v57 = vld [vmem:[%s19152_s7 + $0x148] sm:$0xff] }
  0xdf   :  { %989 = vst [vmem:[#allocation3 + $0x140] sm:$0xff] %v988_v56  ;;  %v992_v58 = vld [vmem:[%s19152_s7 + $0x150] sm:$0xff]  ;;  %v994_v59 = vld [vmem:[%s19152_s7 + $0x158] sm:$0xff]  ;;  %991 = vst [vmem:[#allocation3 + $0x148] sm:$0xff] %v990_v57 }
  0xe0   :  { %993 = vst [vmem:[#allocation3 + $0x150] sm:$0xff] %v992_v58  ;;  %995 = vst [vmem:[#allocation3 + $0x158] sm:$0xff] %v994_v59  ;;  %v996_v60 = vld [vmem:[%s19152_s7 + $0x160] sm:$0xff]  ;;  %v998_v61 = vld [vmem:[%s19152_s7 + $0x168] sm:$0xff] }
  0xe1   :  { %v1000_v62 = vld [vmem:[%s19152_s7 + $0x170] sm:$0xff]  ;;  %997 = vst [vmem:[#allocation3 + $0x160] sm:$0xff] %v996_v60  ;;  %999 = vst [vmem:[#allocation3 + $0x168] sm:$0xff] %v998_v61  ;;  %v1002_v63 = vld [vmem:[%s19152_s7 + $0x178] sm:$0xff] }
  0xe2   :  { %1001 = vst [vmem:[#allocation3 + $0x170] sm:$0xff] %v1000_v62  ;;  %v1004_v0 = vld [vmem:[%s19152_s7 + $0x180] sm:$0xff]  ;;  %v1006_v1 = vld [vmem:[%s19152_s7 + $0x188] sm:$0xff]  ;;  %1003 = vst [vmem:[#allocation3 + $0x178] sm:$0xff] %v1002_v63 }
  0xe3   :  { %1005 = vst [vmem:[#allocation3 + $0x180] sm:$0xff] %v1004_v0  ;;  %1007 = vst [vmem:[#allocation3 + $0x188] sm:$0xff] %v1006_v1  ;;  %v1008_v2 = vld [vmem:[%s19152_s7 + $0x190] sm:$0xff]  ;;  %v1010_v3 = vld [vmem:[%s19152_s7 + $0x198] sm:$0xff] }
  0xe4   :  { %v1012_v4 = vld [vmem:[%s19152_s7 + $0x1a0] sm:$0xff]  ;;  %1009 = vst [vmem:[#allocation3 + $0x190] sm:$0xff] %v1008_v2  ;;  %1011 = vst [vmem:[#allocation3 + $0x198] sm:$0xff] %v1010_v3  ;;  %v1014_v5 = vld [vmem:[%s19152_s7 + $0x1a8] sm:$0xff] }
  0xe5   :  { %1013 = vst [vmem:[#allocation3 + $0x1a0] sm:$0xff] %v1012_v4  ;;  %v1016_v6 = vld [vmem:[%s19152_s7 + $0x1b0] sm:$0xff]  ;;  %v1018_v7 = vld [vmem:[%s19152_s7 + $0x1b8] sm:$0xff]  ;;  %1015 = vst [vmem:[#allocation3 + $0x1a8] sm:$0xff] %v1014_v5 }
  0xe6   :  { %1017 = vst [vmem:[#allocation3 + $0x1b0] sm:$0xff] %v1016_v6  ;;  %1019 = vst [vmem:[#allocation3 + $0x1b8] sm:$0xff] %v1018_v7  ;;  %v1020_v8 = vld [vmem:[%s19152_s7 + $0x1c0] sm:$0xff]  ;;  %v1022_v9 = vld [vmem:[%s19152_s7 + $0x1c8] sm:$0xff] }
  0xe7   :  { %v1024_v10 = vld [vmem:[%s19152_s7 + $0x1d0] sm:$0xff]  ;;  %1021 = vst [vmem:[#allocation3 + $0x1c0] sm:$0xff] %v1020_v8  ;;  %1023 = vst [vmem:[#allocation3 + $0x1c8] sm:$0xff] %v1022_v9  ;;  %v1026_v11 = vld [vmem:[%s19152_s7 + $0x1d8] sm:$0xff] }
  0xe8   :  { %1025 = vst [vmem:[#allocation3 + $0x1d0] sm:$0xff] %v1024_v10  ;;  %v1028_v12 = vld [vmem:[%s19152_s7 + $0x1e0] sm:$0xff]  ;;  %v1030_v13 = vld [vmem:[%s19152_s7 + $0x1e8] sm:$0xff]  ;;  %1027 = vst [vmem:[#allocation3 + $0x1d8] sm:$0xff] %v1026_v11 }
  0xe9   :  { %1029 = vst [vmem:[#allocation3 + $0x1e0] sm:$0xff] %v1028_v12  ;;  %1031 = vst [vmem:[#allocation3 + $0x1e8] sm:$0xff] %v1030_v13  ;;  %v1032_v14 = vld [vmem:[%s19152_s7 + $0x1f0] sm:$0xff]  ;;  %v1034_v15 = vld [vmem:[%s19152_s7 + $0x1f8] sm:$0xff] }
  0xea   :  { %v1036_v16 = vld [vmem:[%s19152_s7 + $0x200] sm:$0xff]  ;;  %1033 = vst [vmem:[#allocation3 + $0x1f0] sm:$0xff] %v1032_v14  ;;  %1035 = vst [vmem:[#allocation3 + $0x1f8] sm:$0xff] %v1034_v15  ;;  %v1038_v17 = vld [vmem:[%s19152_s7 + $0x208] sm:$0xff] }
  0xeb   :  { %1037 = vst [vmem:[#allocation3 + $0x200] sm:$0xff] %v1036_v16  ;;  %v1040_v18 = vld [vmem:[%s19152_s7 + $0x210] sm:$0xff]  ;;  %v1042_v19 = vld [vmem:[%s19152_s7 + $0x218] sm:$0xff]  ;;  %1039 = vst [vmem:[#allocation3 + $0x208] sm:$0xff] %v1038_v17 }
  0xec   :  { %1041 = vst [vmem:[#allocation3 + $0x210] sm:$0xff] %v1040_v18  ;;  %1043 = vst [vmem:[#allocation3 + $0x218] sm:$0xff] %v1042_v19  ;;  %v1044_v20 = vld [vmem:[%s19152_s7 + $0x220] sm:$0xff]  ;;  %v1046_v21 = vld [vmem:[%s19152_s7 + $0x228] sm:$0xff] }
  0xed   :  { %v1048_v22 = vld [vmem:[%s19152_s7 + $0x230] sm:$0xff]  ;;  %1045 = vst [vmem:[#allocation3 + $0x220] sm:$0xff] %v1044_v20  ;;  %1047 = vst [vmem:[#allocation3 + $0x228] sm:$0xff] %v1046_v21  ;;  %v1050_v23 = vld [vmem:[%s19152_s7 + $0x238] sm:$0xff] }
  0xee   :  { %1049 = vst [vmem:[#allocation3 + $0x230] sm:$0xff] %v1048_v22  ;;  %v1052_v24 = vld [vmem:[%s19152_s7 + $0x240] sm:$0xff]  ;;  %v1054_v25 = vld [vmem:[%s19152_s7 + $0x248] sm:$0xff]  ;;  %1051 = vst [vmem:[#allocation3 + $0x238] sm:$0xff] %v1050_v23 }
  0xef   :  { %1053 = vst [vmem:[#allocation3 + $0x240] sm:$0xff] %v1052_v24  ;;  %1055 = vst [vmem:[#allocation3 + $0x248] sm:$0xff] %v1054_v25  ;;  %v1056_v26 = vld [vmem:[%s19152_s7 + $0x250] sm:$0xff]  ;;  %v1058_v27 = vld [vmem:[%s19152_s7 + $0x258] sm:$0xff] }
  0xf0   :  { %v1060_v28 = vld [vmem:[%s19152_s7 + $0x260] sm:$0xff]  ;;  %1057 = vst [vmem:[#allocation3 + $0x250] sm:$0xff] %v1056_v26  ;;  %1059 = vst [vmem:[#allocation3 + $0x258] sm:$0xff] %v1058_v27  ;;  %v1062_v29 = vld [vmem:[%s19152_s7 + $0x268] sm:$0xff] }
  0xf1   :  { %1061 = vst [vmem:[#allocation3 + $0x260] sm:$0xff] %v1060_v28  ;;  %v1064_v30 = vld [vmem:[%s19152_s7 + $0x270] sm:$0xff]  ;;  %v1066_v31 = vld [vmem:[%s19152_s7 + $0x278] sm:$0xff]  ;;  %1063 = vst [vmem:[#allocation3 + $0x268] sm:$0xff] %v1062_v29 }
  0xf2   :  { %1065 = vst [vmem:[#allocation3 + $0x270] sm:$0xff] %v1064_v30  ;;  %1067 = vst [vmem:[#allocation3 + $0x278] sm:$0xff] %v1066_v31  ;;  %v1068_v32 = vld [vmem:[%s19152_s7 + $0x280] sm:$0xff]  ;;  %v1070_v33 = vld [vmem:[%s19152_s7 + $0x288] sm:$0xff] }
  0xf3   :  { %v1072_v34 = vld [vmem:[%s19152_s7 + $0x290] sm:$0xff]  ;;  %1069 = vst [vmem:[#allocation3 + $0x280] sm:$0xff] %v1068_v32  ;;  %1071 = vst [vmem:[#allocation3 + $0x288] sm:$0xff] %v1070_v33  ;;  %v1074_v35 = vld [vmem:[%s19152_s7 + $0x298] sm:$0xff] }
  0xf4   :  { %1073 = vst [vmem:[#allocation3 + $0x290] sm:$0xff] %v1072_v34  ;;  %v1076_v36 = vld [vmem:[%s19152_s7 + $0x2a0] sm:$0xff]  ;;  %v1078_v37 = vld [vmem:[%s19152_s7 + $0x2a8] sm:$0xff]  ;;  %1075 = vst [vmem:[#allocation3 + $0x298] sm:$0xff] %v1074_v35 }
  0xf5   :  { %1077 = vst [vmem:[#allocation3 + $0x2a0] sm:$0xff] %v1076_v36  ;;  %1079 = vst [vmem:[#allocation3 + $0x2a8] sm:$0xff] %v1078_v37  ;;  %v1080_v38 = vld [vmem:[%s19152_s7 + $0x2b0] sm:$0xff]  ;;  %v1082_v39 = vld [vmem:[%s19152_s7 + $0x2b8] sm:$0xff] }
  0xf6   :  { %v1084_v40 = vld [vmem:[%s19152_s7 + $0x2c0] sm:$0xff]  ;;  %1081 = vst [vmem:[#allocation3 + $0x2b0] sm:$0xff] %v1080_v38  ;;  %1083 = vst [vmem:[#allocation3 + $0x2b8] sm:$0xff] %v1082_v39  ;;  %v1086_v41 = vld [vmem:[%s19152_s7 + $0x2c8] sm:$0xff] }
  0xf7   :  { %1085 = vst [vmem:[#allocation3 + $0x2c0] sm:$0xff] %v1084_v40  ;;  %v1088_v42 = vld [vmem:[%s19152_s7 + $0x2d0] sm:$0xff]  ;;  %v1090_v43 = vld [vmem:[%s19152_s7 + $0x2d8] sm:$0xff]  ;;  %1087 = vst [vmem:[#allocation3 + $0x2c8] sm:$0xff] %v1086_v41 }
  0xf8   :  { %1089 = vst [vmem:[#allocation3 + $0x2d0] sm:$0xff] %v1088_v42  ;;  %1091 = vst [vmem:[#allocation3 + $0x2d8] sm:$0xff] %v1090_v43  ;;  %v1092_v44 = vld [vmem:[%s19152_s7 + $0x2e0] sm:$0xff]  ;;  %v1094_v45 = vld [vmem:[%s19152_s7 + $0x2e8] sm:$0xff] }
  0xf9   :  { %v1096_v46 = vld [vmem:[%s19152_s7 + $0x2f0] sm:$0xff]  ;;  %1093 = vst [vmem:[#allocation3 + $0x2e0] sm:$0xff] %v1092_v44  ;;  %1095 = vst [vmem:[#allocation3 + $0x2e8] sm:$0xff] %v1094_v45  ;;  %v1098_v47 = vld [vmem:[%s19152_s7 + $0x2f8] sm:$0xff] }
  0xfa   :  { %1097 = vst [vmem:[#allocation3 + $0x2f0] sm:$0xff] %v1096_v46  ;;  %v1100_v48 = vld [vmem:[%s19152_s7 + $0x300] sm:$0xff]  ;;  %v1102_v49 = vld [vmem:[%s19152_s7 + $0x308] sm:$0xff]  ;;  %1099 = vst [vmem:[#allocation3 + $0x2f8] sm:$0xff] %v1098_v47 }
  0xfb   :  { %1101 = vst [vmem:[#allocation3 + $0x300] sm:$0xff] %v1100_v48  ;;  %1103 = vst [vmem:[#allocation3 + $0x308] sm:$0xff] %v1102_v49  ;;  %v1104_v50 = vld [vmem:[%s19152_s7 + $0x310] sm:$0xff]  ;;  %v1106_v51 = vld [vmem:[%s19152_s7 + $0x318] sm:$0xff] }
  0xfc   :  { %v1108_v52 = vld [vmem:[%s19152_s7 + $0x320] sm:$0xff]  ;;  %1105 = vst [vmem:[#allocation3 + $0x310] sm:$0xff] %v1104_v50  ;;  %1107 = vst [vmem:[#allocation3 + $0x318] sm:$0xff] %v1106_v51  ;;  %v1110_v53 = vld [vmem:[%s19152_s7 + $0x328] sm:$0xff] }
  0xfd   :  { %1109 = vst [vmem:[#allocation3 + $0x320] sm:$0xff] %v1108_v52  ;;  %v1112_v54 = vld [vmem:[%s19152_s7 + $0x330] sm:$0xff]  ;;  %v1114_v55 = vld [vmem:[%s19152_s7 + $0x338] sm:$0xff]  ;;  %1111 = vst [vmem:[#allocation3 + $0x328] sm:$0xff] %v1110_v53 }
  0xfe   :  { %1113 = vst [vmem:[#allocation3 + $0x330] sm:$0xff] %v1112_v54  ;;  %1115 = vst [vmem:[#allocation3 + $0x338] sm:$0xff] %v1114_v55  ;;  %v1116_v56 = vld [vmem:[%s19152_s7 + $0x340] sm:$0xff]  ;;  %v1118_v57 = vld [vmem:[%s19152_s7 + $0x348] sm:$0xff] }
  0xff   :  { %v1120_v58 = vld [vmem:[%s19152_s7 + $0x350] sm:$0xff]  ;;  %1117 = vst [vmem:[#allocation3 + $0x340] sm:$0xff] %v1116_v56  ;;  %1119 = vst [vmem:[#allocation3 + $0x348] sm:$0xff] %v1118_v57  ;;  %v1122_v59 = vld [vmem:[%s19152_s7 + $0x358] sm:$0xff] }
 0x100   :  { %1121 = vst [vmem:[#allocation3 + $0x350] sm:$0xff] %v1120_v58  ;;  %v1124_v60 = vld [vmem:[%s19152_s7 + $0x360] sm:$0xff]  ;;  %v1126_v61 = vld [vmem:[%s19152_s7 + $0x368] sm:$0xff]  ;;  %1123 = vst [vmem:[#allocation3 + $0x358] sm:$0xff] %v1122_v59 }
 0x101   :  { %1125 = vst [vmem:[#allocation3 + $0x360] sm:$0xff] %v1124_v60  ;;  %1127 = vst [vmem:[#allocation3 + $0x368] sm:$0xff] %v1126_v61  ;;  %v1128_v62 = vld [vmem:[%s19152_s7 + $0x370] sm:$0xff]  ;;  %v1130_v63 = vld [vmem:[%s19152_s7 + $0x378] sm:$0xff] }
 0x102   :  { %v1132_v0 = vld [vmem:[%s19152_s7 + $0x380] sm:$0xff]  ;;  %1129 = vst [vmem:[#allocation3 + $0x370] sm:$0xff] %v1128_v62  ;;  %1131 = vst [vmem:[#allocation3 + $0x378] sm:$0xff] %v1130_v63  ;;  %v1134_v1 = vld [vmem:[%s19152_s7 + $0x388] sm:$0xff] }
 0x103   :  { %1133 = vst [vmem:[#allocation3 + $0x380] sm:$0xff] %v1132_v0  ;;  %v1136_v2 = vld [vmem:[%s19152_s7 + $0x390] sm:$0xff]  ;;  %v1138_v3 = vld [vmem:[%s19152_s7 + $0x398] sm:$0xff]  ;;  %1135 = vst [vmem:[#allocation3 + $0x388] sm:$0xff] %v1134_v1 }
 0x104   :  { %1137 = vst [vmem:[#allocation3 + $0x390] sm:$0xff] %v1136_v2  ;;  %1139 = vst [vmem:[#allocation3 + $0x398] sm:$0xff] %v1138_v3  ;;  %v1140_v4 = vld [vmem:[%s19152_s7 + $0x3a0] sm:$0xff]  ;;  %v1142_v5 = vld [vmem:[%s19152_s7 + $0x3a8] sm:$0xff] }
 0x105   :  { %v1144_v6 = vld [vmem:[%s19152_s7 + $0x3b0] sm:$0xff]  ;;  %1141 = vst [vmem:[#allocation3 + $0x3a0] sm:$0xff] %v1140_v4  ;;  %1143 = vst [vmem:[#allocation3 + $0x3a8] sm:$0xff] %v1142_v5  ;;  %v1146_v7 = vld [vmem:[%s19152_s7 + $0x3b8] sm:$0xff] }
 0x106   :  { %1145 = vst [vmem:[#allocation3 + $0x3b0] sm:$0xff] %v1144_v6  ;;  %v1148_v8 = vld [vmem:[%s19152_s7 + $0x3c0] sm:$0xff]  ;;  %v1150_v9 = vld [vmem:[%s19152_s7 + $0x3c8] sm:$0xff]  ;;  %1147 = vst [vmem:[#allocation3 + $0x3b8] sm:$0xff] %v1146_v7 }
 0x107   :  { %1149 = vst [vmem:[#allocation3 + $0x3c0] sm:$0xff] %v1148_v8  ;;  %1151 = vst [vmem:[#allocation3 + $0x3c8] sm:$0xff] %v1150_v9  ;;  %v1152_v10 = vld [vmem:[%s19152_s7 + $0x3d0] sm:$0xff]  ;;  %v1154_v11 = vld [vmem:[%s19152_s7 + $0x3d8] sm:$0xff] }
 0x108   :  { %v1156_v12 = vld [vmem:[%s19152_s7 + $0x3e0] sm:$0xff]  ;;  %1153 = vst [vmem:[#allocation3 + $0x3d0] sm:$0xff] %v1152_v10  ;;  %1155 = vst [vmem:[#allocation3 + $0x3d8] sm:$0xff] %v1154_v11  ;;  %v1158_v13 = vld [vmem:[%s19152_s7 + $0x3e8] sm:$0xff] }
 0x109   :  { %1157 = vst [vmem:[#allocation3 + $0x3e0] sm:$0xff] %v1156_v12  ;;  %v1160_v14 = vld [vmem:[%s19152_s7 + $0x3f0] sm:$0xff]  ;;  %v1162_v15 = vld [vmem:[%s19152_s7 + $0x3f8] sm:$0xff]  ;;  %1159 = vst [vmem:[#allocation3 + $0x3e8] sm:$0xff] %v1158_v13 }
 0x10a   :  { %1161 = vst [vmem:[#allocation3 + $0x3f0] sm:$0xff] %v1160_v14  ;;  %1163 = vst [vmem:[#allocation3 + $0x3f8] sm:$0xff] %v1162_v15  ;;  %v1164_v16 = vld [vmem:[%s19152_s7 + $0x400] sm:$0xff]  ;;  %v1166_v17 = vld [vmem:[%s19152_s7 + $0x408] sm:$0xff] }
 0x10b   :  { %v1168_v18 = vld [vmem:[%s19152_s7 + $0x410] sm:$0xff]  ;;  %1165 = vst [vmem:[#allocation3 + $0x400] sm:$0xff] %v1164_v16  ;;  %1167 = vst [vmem:[#allocation3 + $0x408] sm:$0xff] %v1166_v17  ;;  %v1170_v19 = vld [vmem:[%s19152_s7 + $0x418] sm:$0xff] }
 0x10c   :  { %1169 = vst [vmem:[#allocation3 + $0x410] sm:$0xff] %v1168_v18  ;;  %v1172_v20 = vld [vmem:[%s19152_s7 + $0x420] sm:$0xff]  ;;  %v1174_v21 = vld [vmem:[%s19152_s7 + $0x428] sm:$0xff]  ;;  %1171 = vst [vmem:[#allocation3 + $0x418] sm:$0xff] %v1170_v19 }
 0x10d   :  { %1173 = vst [vmem:[#allocation3 + $0x420] sm:$0xff] %v1172_v20  ;;  %1175 = vst [vmem:[#allocation3 + $0x428] sm:$0xff] %v1174_v21  ;;  %v1176_v22 = vld [vmem:[%s19152_s7 + $0x430] sm:$0xff]  ;;  %v1178_v23 = vld [vmem:[%s19152_s7 + $0x438] sm:$0xff] }
 0x10e   :  { %v1180_v24 = vld [vmem:[%s19152_s7 + $0x440] sm:$0xff]  ;;  %1177 = vst [vmem:[#allocation3 + $0x430] sm:$0xff] %v1176_v22  ;;  %1179 = vst [vmem:[#allocation3 + $0x438] sm:$0xff] %v1178_v23  ;;  %v1182_v25 = vld [vmem:[%s19152_s7 + $0x448] sm:$0xff] }
 0x10f   :  { %1181 = vst [vmem:[#allocation3 + $0x440] sm:$0xff] %v1180_v24  ;;  %v1184_v26 = vld [vmem:[%s19152_s7 + $0x450] sm:$0xff]  ;;  %v1186_v27 = vld [vmem:[%s19152_s7 + $0x458] sm:$0xff]  ;;  %1183 = vst [vmem:[#allocation3 + $0x448] sm:$0xff] %v1182_v25 }
 0x110   :  { %1185 = vst [vmem:[#allocation3 + $0x450] sm:$0xff] %v1184_v26  ;;  %1187 = vst [vmem:[#allocation3 + $0x458] sm:$0xff] %v1186_v27  ;;  %v1188_v28 = vld [vmem:[%s19152_s7 + $0x460] sm:$0xff]  ;;  %v1190_v29 = vld [vmem:[%s19152_s7 + $0x468] sm:$0xff] }
 0x111   :  { %v1192_v30 = vld [vmem:[%s19152_s7 + $0x470] sm:$0xff]  ;;  %1189 = vst [vmem:[#allocation3 + $0x460] sm:$0xff] %v1188_v28  ;;  %1191 = vst [vmem:[#allocation3 + $0x468] sm:$0xff] %v1190_v29  ;;  %v1194_v31 = vld [vmem:[%s19152_s7 + $0x478] sm:$0xff] }
 0x112   :  { %1193 = vst [vmem:[#allocation3 + $0x470] sm:$0xff] %v1192_v30  ;;  %v1196_v32 = vld [vmem:[%s19152_s7 + $0x480] sm:$0xff]  ;;  %v1198_v33 = vld [vmem:[%s19152_s7 + $0x488] sm:$0xff]  ;;  %1195 = vst [vmem:[#allocation3 + $0x478] sm:$0xff] %v1194_v31 }
 0x113   :  { %1197 = vst [vmem:[#allocation3 + $0x480] sm:$0xff] %v1196_v32  ;;  %1199 = vst [vmem:[#allocation3 + $0x488] sm:$0xff] %v1198_v33  ;;  %v1200_v34 = vld [vmem:[%s19152_s7 + $0x490] sm:$0xff]  ;;  %v1202_v35 = vld [vmem:[%s19152_s7 + $0x498] sm:$0xff] }
 0x114   :  { %v1204_v36 = vld [vmem:[%s19152_s7 + $0x4a0] sm:$0xff]  ;;  %1201 = vst [vmem:[#allocation3 + $0x490] sm:$0xff] %v1200_v34  ;;  %1203 = vst [vmem:[#allocation3 + $0x498] sm:$0xff] %v1202_v35  ;;  %v1206_v37 = vld [vmem:[%s19152_s7 + $0x4a8] sm:$0xff] }
 0x115   :  { %1205 = vst [vmem:[#allocation3 + $0x4a0] sm:$0xff] %v1204_v36  ;;  %v1208_v38 = vld [vmem:[%s19152_s7 + $0x4b0] sm:$0xff]  ;;  %v1210_v39 = vld [vmem:[%s19152_s7 + $0x4b8] sm:$0xff]  ;;  %1207 = vst [vmem:[#allocation3 + $0x4a8] sm:$0xff] %v1206_v37 }
 0x116   :  { %1209 = vst [vmem:[#allocation3 + $0x4b0] sm:$0xff] %v1208_v38  ;;  %1211 = vst [vmem:[#allocation3 + $0x4b8] sm:$0xff] %v1210_v39  ;;  %v1212_v40 = vld [vmem:[%s19152_s7 + $0x4c0] sm:$0xff]  ;;  %v1214_v41 = vld [vmem:[%s19152_s7 + $0x4c8] sm:$0xff] }
 0x117   :  { %v1216_v42 = vld [vmem:[%s19152_s7 + $0x4d0] sm:$0xff]  ;;  %1213 = vst [vmem:[#allocation3 + $0x4c0] sm:$0xff] %v1212_v40  ;;  %1215 = vst [vmem:[#allocation3 + $0x4c8] sm:$0xff] %v1214_v41  ;;  %v1218_v43 = vld [vmem:[%s19152_s7 + $0x4d8] sm:$0xff] }
 0x118   :  { %1217 = vst [vmem:[#allocation3 + $0x4d0] sm:$0xff] %v1216_v42  ;;  %v1220_v44 = vld [vmem:[%s19152_s7 + $0x4e0] sm:$0xff]  ;;  %v1222_v45 = vld [vmem:[%s19152_s7 + $0x4e8] sm:$0xff]  ;;  %1219 = vst [vmem:[#allocation3 + $0x4d8] sm:$0xff] %v1218_v43 }
 0x119   :  { %1221 = vst [vmem:[#allocation3 + $0x4e0] sm:$0xff] %v1220_v44  ;;  %1223 = vst [vmem:[#allocation3 + $0x4e8] sm:$0xff] %v1222_v45  ;;  %v1224_v46 = vld [vmem:[%s19152_s7 + $0x4f0] sm:$0xff]  ;;  %v1226_v47 = vld [vmem:[%s19152_s7 + $0x4f8] sm:$0xff] }
 0x11a   :  { %v1228_v48 = vld [vmem:[%s19152_s7 + $0x500] sm:$0xff]  ;;  %1225 = vst [vmem:[#allocation3 + $0x4f0] sm:$0xff] %v1224_v46  ;;  %1227 = vst [vmem:[#allocation3 + $0x4f8] sm:$0xff] %v1226_v47  ;;  %v1230_v49 = vld [vmem:[%s19152_s7 + $0x508] sm:$0xff] }
 0x11b   :  { %1229 = vst [vmem:[#allocation3 + $0x500] sm:$0xff] %v1228_v48  ;;  %v1232_v50 = vld [vmem:[%s19152_s7 + $0x510] sm:$0xff]  ;;  %v1234_v51 = vld [vmem:[%s19152_s7 + $0x518] sm:$0xff]  ;;  %1231 = vst [vmem:[#allocation3 + $0x508] sm:$0xff] %v1230_v49 }
 0x11c   :  { %1233 = vst [vmem:[#allocation3 + $0x510] sm:$0xff] %v1232_v50  ;;  %1235 = vst [vmem:[#allocation3 + $0x518] sm:$0xff] %v1234_v51  ;;  %v1236_v52 = vld [vmem:[%s19152_s7 + $0x520] sm:$0xff]  ;;  %v1238_v53 = vld [vmem:[%s19152_s7 + $0x528] sm:$0xff] }
 0x11d   :  { %v1240_v54 = vld [vmem:[%s19152_s7 + $0x530] sm:$0xff]  ;;  %1237 = vst [vmem:[#allocation3 + $0x520] sm:$0xff] %v1236_v52  ;;  %1239 = vst [vmem:[#allocation3 + $0x528] sm:$0xff] %v1238_v53  ;;  %v1242_v55 = vld [vmem:[%s19152_s7 + $0x538] sm:$0xff] }
 0x11e   :  { %1241 = vst [vmem:[#allocation3 + $0x530] sm:$0xff] %v1240_v54  ;;  %v1244_v56 = vld [vmem:[%s19152_s7 + $0x540] sm:$0xff]  ;;  %v1246_v57 = vld [vmem:[%s19152_s7 + $0x548] sm:$0xff]  ;;  %1243 = vst [vmem:[#allocation3 + $0x538] sm:$0xff] %v1242_v55 }
 0x11f   :  { %1245 = vst [vmem:[#allocation3 + $0x540] sm:$0xff] %v1244_v56  ;;  %1247 = vst [vmem:[#allocation3 + $0x548] sm:$0xff] %v1246_v57  ;;  %v1248_v58 = vld [vmem:[%s19152_s7 + $0x550] sm:$0xff]  ;;  %v1250_v59 = vld [vmem:[%s19152_s7 + $0x558] sm:$0xff] }
 0x120   :  { %v1252_v60 = vld [vmem:[%s19152_s7 + $0x560] sm:$0xff]  ;;  %1249 = vst [vmem:[#allocation3 + $0x550] sm:$0xff] %v1248_v58  ;;  %1251 = vst [vmem:[#allocation3 + $0x558] sm:$0xff] %v1250_v59  ;;  %v1254_v61 = vld [vmem:[%s19152_s7 + $0x568] sm:$0xff] }
 0x121   :  { %1253 = vst [vmem:[#allocation3 + $0x560] sm:$0xff] %v1252_v60  ;;  %v1256_v62 = vld [vmem:[%s19152_s7 + $0x570] sm:$0xff]  ;;  %v1258_v63 = vld [vmem:[%s19152_s7 + $0x578] sm:$0xff]  ;;  %1255 = vst [vmem:[#allocation3 + $0x568] sm:$0xff] %v1254_v61 }
 0x122   :  { %1257 = vst [vmem:[#allocation3 + $0x570] sm:$0xff] %v1256_v62  ;;  %1259 = vst [vmem:[#allocation3 + $0x578] sm:$0xff] %v1258_v63  ;;  %v1260_v0 = vld [vmem:[%s19152_s7 + $0x580] sm:$0xff]  ;;  %v1262_v1 = vld [vmem:[%s19152_s7 + $0x588] sm:$0xff] }
 0x123   :  { %v1264_v2 = vld [vmem:[%s19152_s7 + $0x590] sm:$0xff]  ;;  %1261 = vst [vmem:[#allocation3 + $0x580] sm:$0xff] %v1260_v0  ;;  %1263 = vst [vmem:[#allocation3 + $0x588] sm:$0xff] %v1262_v1  ;;  %v1266_v3 = vld [vmem:[%s19152_s7 + $0x598] sm:$0xff] }
 0x124   :  { %1265 = vst [vmem:[#allocation3 + $0x590] sm:$0xff] %v1264_v2  ;;  %v1268_v4 = vld [vmem:[%s19152_s7 + $0x5a0] sm:$0xff]  ;;  %v1270_v5 = vld [vmem:[%s19152_s7 + $0x5a8] sm:$0xff]  ;;  %1267 = vst [vmem:[#allocation3 + $0x598] sm:$0xff] %v1266_v3 }
 0x125   :  { %1269 = vst [vmem:[#allocation3 + $0x5a0] sm:$0xff] %v1268_v4  ;;  %1271 = vst [vmem:[#allocation3 + $0x5a8] sm:$0xff] %v1270_v5  ;;  %v1272_v6 = vld [vmem:[%s19152_s7 + $0x5b0] sm:$0xff]  ;;  %v1274_v7 = vld [vmem:[%s19152_s7 + $0x5b8] sm:$0xff] }
 0x126   :  { %v1276_v8 = vld [vmem:[%s19152_s7 + $0x5c0] sm:$0xff]  ;;  %1273 = vst [vmem:[#allocation3 + $0x5b0] sm:$0xff] %v1272_v6  ;;  %1275 = vst [vmem:[#allocation3 + $0x5b8] sm:$0xff] %v1274_v7  ;;  %v1278_v9 = vld [vmem:[%s19152_s7 + $0x5c8] sm:$0xff] }
 0x127   :  { %1277 = vst [vmem:[#allocation3 + $0x5c0] sm:$0xff] %v1276_v8  ;;  %v1280_v10 = vld [vmem:[%s19152_s7 + $0x5d0] sm:$0xff]  ;;  %v1282_v11 = vld [vmem:[%s19152_s7 + $0x5d8] sm:$0xff]  ;;  %1279 = vst [vmem:[#allocation3 + $0x5c8] sm:$0xff] %v1278_v9 }
 0x128   :  { %1281 = vst [vmem:[#allocation3 + $0x5d0] sm:$0xff] %v1280_v10  ;;  %1283 = vst [vmem:[#allocation3 + $0x5d8] sm:$0xff] %v1282_v11  ;;  %v1284_v12 = vld [vmem:[%s19152_s7 + $0x5e0] sm:$0xff]  ;;  %v1286_v13 = vld [vmem:[%s19152_s7 + $0x5e8] sm:$0xff] }
 0x129   :  { %v1288_v14 = vld [vmem:[%s19152_s7 + $0x5f0] sm:$0xff]  ;;  %1285 = vst [vmem:[#allocation3 + $0x5e0] sm:$0xff] %v1284_v12  ;;  %1287 = vst [vmem:[#allocation3 + $0x5e8] sm:$0xff] %v1286_v13  ;;  %v1290_v15 = vld [vmem:[%s19152_s7 + $0x5f8] sm:$0xff] }
 0x12a   :  { %1289 = vst [vmem:[#allocation3 + $0x5f0] sm:$0xff] %v1288_v14  ;;  %v1292_v16 = vld [vmem:[%s19152_s7 + $0x600] sm:$0xff]  ;;  %v1294_v17 = vld [vmem:[%s19152_s7 + $0x608] sm:$0xff]  ;;  %1291 = vst [vmem:[#allocation3 + $0x5f8] sm:$0xff] %v1290_v15 }
 0x12b   :  { %1293 = vst [vmem:[#allocation3 + $0x600] sm:$0xff] %v1292_v16  ;;  %1295 = vst [vmem:[#allocation3 + $0x608] sm:$0xff] %v1294_v17  ;;  %v1296_v18 = vld [vmem:[%s19152_s7 + $0x610] sm:$0xff]  ;;  %v1298_v19 = vld [vmem:[%s19152_s7 + $0x618] sm:$0xff] }
 0x12c   :  { %v1300_v20 = vld [vmem:[%s19152_s7 + $0x620] sm:$0xff]  ;;  %1297 = vst [vmem:[#allocation3 + $0x610] sm:$0xff] %v1296_v18  ;;  %1299 = vst [vmem:[#allocation3 + $0x618] sm:$0xff] %v1298_v19  ;;  %v1302_v21 = vld [vmem:[%s19152_s7 + $0x628] sm:$0xff] }
 0x12d   :  { %1301 = vst [vmem:[#allocation3 + $0x620] sm:$0xff] %v1300_v20  ;;  %v1304_v22 = vld [vmem:[%s19152_s7 + $0x630] sm:$0xff]  ;;  %v1306_v23 = vld [vmem:[%s19152_s7 + $0x638] sm:$0xff]  ;;  %1303 = vst [vmem:[#allocation3 + $0x628] sm:$0xff] %v1302_v21 }
 0x12e   :  { %1305 = vst [vmem:[#allocation3 + $0x630] sm:$0xff] %v1304_v22  ;;  %1307 = vst [vmem:[#allocation3 + $0x638] sm:$0xff] %v1306_v23 }
 0x12f   :  { %1315 = vsyncadd [#allocation5 + $0x1], 25600  ;;  %v1350_v24 = vld [vmem:[%s19153_s8] sm:$0xff]  ;;  %v1352_v25 = vld [vmem:[%s19153_s8 + $0x8] sm:$0xff] }
 0x130   :  { %1351 = vst [vmem:[#allocation4] sm:$0xff] %v1350_v24  ;;  %1353 = vst [vmem:[#allocation4 + $0x8] sm:$0xff] %v1352_v25  ;;  %v1354_v26 = vld [vmem:[%s19153_s8 + $0x10] sm:$0xff]  ;;  %v1356_v27 = vld [vmem:[%s19153_s8 + $0x18] sm:$0xff] }
 0x131   :  { %v1358_v28 = vld [vmem:[%s19153_s8 + $0x20] sm:$0xff]  ;;  %1355 = vst [vmem:[#allocation4 + $0x10] sm:$0xff] %v1354_v26  ;;  %1357 = vst [vmem:[#allocation4 + $0x18] sm:$0xff] %v1356_v27  ;;  %v1360_v29 = vld [vmem:[%s19153_s8 + $0x28] sm:$0xff] }
 0x132   :  { %1359 = vst [vmem:[#allocation4 + $0x20] sm:$0xff] %v1358_v28  ;;  %v1362_v30 = vld [vmem:[%s19153_s8 + $0x30] sm:$0xff]  ;;  %v1364_v31 = vld [vmem:[%s19153_s8 + $0x38] sm:$0xff]  ;;  %1361 = vst [vmem:[#allocation4 + $0x28] sm:$0xff] %v1360_v29 }
 0x133   :  { %1363 = vst [vmem:[#allocation4 + $0x30] sm:$0xff] %v1362_v30  ;;  %1365 = vst [vmem:[#allocation4 + $0x38] sm:$0xff] %v1364_v31  ;;  %v1366_v32 = vld [vmem:[%s19153_s8 + $0x40] sm:$0xff]  ;;  %v1368_v33 = vld [vmem:[%s19153_s8 + $0x48] sm:$0xff] }
 0x134   :  { %v1370_v34 = vld [vmem:[%s19153_s8 + $0x50] sm:$0xff]  ;;  %1367 = vst [vmem:[#allocation4 + $0x40] sm:$0xff] %v1366_v32  ;;  %1369 = vst [vmem:[#allocation4 + $0x48] sm:$0xff] %v1368_v33  ;;  %v1372_v35 = vld [vmem:[%s19153_s8 + $0x58] sm:$0xff] }
 0x135   :  { %1371 = vst [vmem:[#allocation4 + $0x50] sm:$0xff] %v1370_v34  ;;  %v1374_v36 = vld [vmem:[%s19153_s8 + $0x60] sm:$0xff]  ;;  %v1376_v37 = vld [vmem:[%s19153_s8 + $0x68] sm:$0xff]  ;;  %1373 = vst [vmem:[#allocation4 + $0x58] sm:$0xff] %v1372_v35 }
 0x136   :  { %1375 = vst [vmem:[#allocation4 + $0x60] sm:$0xff] %v1374_v36  ;;  %1377 = vst [vmem:[#allocation4 + $0x68] sm:$0xff] %v1376_v37  ;;  %v1378_v38 = vld [vmem:[%s19153_s8 + $0x70] sm:$0xff]  ;;  %v1380_v39 = vld [vmem:[%s19153_s8 + $0x78] sm:$0xff] }
 0x137   :  { %v1382_v40 = vld [vmem:[%s19153_s8 + $0x80] sm:$0xff]  ;;  %1379 = vst [vmem:[#allocation4 + $0x70] sm:$0xff] %v1378_v38  ;;  %1381 = vst [vmem:[#allocation4 + $0x78] sm:$0xff] %v1380_v39  ;;  %v1384_v41 = vld [vmem:[%s19153_s8 + $0x88] sm:$0xff] }
 0x138   :  { %1383 = vst [vmem:[#allocation4 + $0x80] sm:$0xff] %v1382_v40  ;;  %v1386_v42 = vld [vmem:[%s19153_s8 + $0x90] sm:$0xff]  ;;  %v1388_v43 = vld [vmem:[%s19153_s8 + $0x98] sm:$0xff]  ;;  %1385 = vst [vmem:[#allocation4 + $0x88] sm:$0xff] %v1384_v41 }
 0x139   :  { %1387 = vst [vmem:[#allocation4 + $0x90] sm:$0xff] %v1386_v42  ;;  %1389 = vst [vmem:[#allocation4 + $0x98] sm:$0xff] %v1388_v43  ;;  %v1390_v44 = vld [vmem:[%s19153_s8 + $0xa0] sm:$0xff]  ;;  %v1392_v45 = vld [vmem:[%s19153_s8 + $0xa8] sm:$0xff] }
 0x13a   :  { %v1394_v46 = vld [vmem:[%s19153_s8 + $0xb0] sm:$0xff]  ;;  %1391 = vst [vmem:[#allocation4 + $0xa0] sm:$0xff] %v1390_v44  ;;  %1393 = vst [vmem:[#allocation4 + $0xa8] sm:$0xff] %v1392_v45  ;;  %v1396_v47 = vld [vmem:[%s19153_s8 + $0xb8] sm:$0xff] }
 0x13b   :  { %1395 = vst [vmem:[#allocation4 + $0xb0] sm:$0xff] %v1394_v46  ;;  %v1398_v48 = vld [vmem:[%s19153_s8 + $0xc0] sm:$0xff]  ;;  %v1400_v49 = vld [vmem:[%s19153_s8 + $0xc8] sm:$0xff]  ;;  %1397 = vst [vmem:[#allocation4 + $0xb8] sm:$0xff] %v1396_v47 }
 0x13c   :  { %1399 = vst [vmem:[#allocation4 + $0xc0] sm:$0xff] %v1398_v48  ;;  %1401 = vst [vmem:[#allocation4 + $0xc8] sm:$0xff] %v1400_v49  ;;  %v1402_v50 = vld [vmem:[%s19153_s8 + $0xd0] sm:$0xff]  ;;  %v1404_v51 = vld [vmem:[%s19153_s8 + $0xd8] sm:$0xff] }
 0x13d   :  { %v1406_v52 = vld [vmem:[%s19153_s8 + $0xe0] sm:$0xff]  ;;  %1403 = vst [vmem:[#allocation4 + $0xd0] sm:$0xff] %v1402_v50  ;;  %1405 = vst [vmem:[#allocation4 + $0xd8] sm:$0xff] %v1404_v51  ;;  %v1408_v53 = vld [vmem:[%s19153_s8 + $0xe8] sm:$0xff] }
 0x13e   :  { %1407 = vst [vmem:[#allocation4 + $0xe0] sm:$0xff] %v1406_v52  ;;  %v1410_v54 = vld [vmem:[%s19153_s8 + $0xf0] sm:$0xff]  ;;  %v1412_v55 = vld [vmem:[%s19153_s8 + $0xf8] sm:$0xff]  ;;  %1409 = vst [vmem:[#allocation4 + $0xe8] sm:$0xff] %v1408_v53 }
 0x13f   :  { %1411 = vst [vmem:[#allocation4 + $0xf0] sm:$0xff] %v1410_v54  ;;  %1413 = vst [vmem:[#allocation4 + $0xf8] sm:$0xff] %v1412_v55  ;;  %v1414_v56 = vld [vmem:[%s19153_s8 + $0x100] sm:$0xff]  ;;  %v1416_v57 = vld [vmem:[%s19153_s8 + $0x108] sm:$0xff] }
 0x140   :  { %v1418_v58 = vld [vmem:[%s19153_s8 + $0x110] sm:$0xff]  ;;  %1415 = vst [vmem:[#allocation4 + $0x100] sm:$0xff] %v1414_v56  ;;  %1417 = vst [vmem:[#allocation4 + $0x108] sm:$0xff] %v1416_v57  ;;  %v1420_v59 = vld [vmem:[%s19153_s8 + $0x118] sm:$0xff] }
 0x141   :  { %1419 = vst [vmem:[#allocation4 + $0x110] sm:$0xff] %v1418_v58  ;;  %v1422_v60 = vld [vmem:[%s19153_s8 + $0x120] sm:$0xff]  ;;  %v1424_v61 = vld [vmem:[%s19153_s8 + $0x128] sm:$0xff]  ;;  %1421 = vst [vmem:[#allocation4 + $0x118] sm:$0xff] %v1420_v59 }
 0x142   :  { %1423 = vst [vmem:[#allocation4 + $0x120] sm:$0xff] %v1422_v60  ;;  %1425 = vst [vmem:[#allocation4 + $0x128] sm:$0xff] %v1424_v61  ;;  %v1426_v62 = vld [vmem:[%s19153_s8 + $0x130] sm:$0xff]  ;;  %v1428_v63 = vld [vmem:[%s19153_s8 + $0x138] sm:$0xff] }
 0x143   :  { %v1430_v0 = vld [vmem:[%s19153_s8 + $0x140] sm:$0xff]  ;;  %1427 = vst [vmem:[#allocation4 + $0x130] sm:$0xff] %v1426_v62  ;;  %1429 = vst [vmem:[#allocation4 + $0x138] sm:$0xff] %v1428_v63  ;;  %v1432_v1 = vld [vmem:[%s19153_s8 + $0x148] sm:$0xff] }
 0x144   :  { %1431 = vst [vmem:[#allocation4 + $0x140] sm:$0xff] %v1430_v0  ;;  %v1434_v2 = vld [vmem:[%s19153_s8 + $0x150] sm:$0xff]  ;;  %v1436_v3 = vld [vmem:[%s19153_s8 + $0x158] sm:$0xff]  ;;  %1433 = vst [vmem:[#allocation4 + $0x148] sm:$0xff] %v1432_v1 }
 0x145   :  { %1435 = vst [vmem:[#allocation4 + $0x150] sm:$0xff] %v1434_v2  ;;  %1437 = vst [vmem:[#allocation4 + $0x158] sm:$0xff] %v1436_v3  ;;  %v1438_v4 = vld [vmem:[%s19153_s8 + $0x160] sm:$0xff]  ;;  %v1440_v5 = vld [vmem:[%s19153_s8 + $0x168] sm:$0xff] }
 0x146   :  { %v1442_v6 = vld [vmem:[%s19153_s8 + $0x170] sm:$0xff]  ;;  %1439 = vst [vmem:[#allocation4 + $0x160] sm:$0xff] %v1438_v4  ;;  %1441 = vst [vmem:[#allocation4 + $0x168] sm:$0xff] %v1440_v5  ;;  %v1444_v7 = vld [vmem:[%s19153_s8 + $0x178] sm:$0xff] }
 0x147   :  { %1443 = vst [vmem:[#allocation4 + $0x170] sm:$0xff] %v1442_v6  ;;  %v1446_v8 = vld [vmem:[%s19153_s8 + $0x180] sm:$0xff]  ;;  %v1448_v9 = vld [vmem:[%s19153_s8 + $0x188] sm:$0xff]  ;;  %1445 = vst [vmem:[#allocation4 + $0x178] sm:$0xff] %v1444_v7 }
 0x148   :  { %1447 = vst [vmem:[#allocation4 + $0x180] sm:$0xff] %v1446_v8  ;;  %1449 = vst [vmem:[#allocation4 + $0x188] sm:$0xff] %v1448_v9  ;;  %v1450_v10 = vld [vmem:[%s19153_s8 + $0x190] sm:$0xff]  ;;  %v1452_v11 = vld [vmem:[%s19153_s8 + $0x198] sm:$0xff] }
 0x149   :  { %v1454_v12 = vld [vmem:[%s19153_s8 + $0x1a0] sm:$0xff]  ;;  %1451 = vst [vmem:[#allocation4 + $0x190] sm:$0xff] %v1450_v10  ;;  %1453 = vst [vmem:[#allocation4 + $0x198] sm:$0xff] %v1452_v11  ;;  %v1456_v13 = vld [vmem:[%s19153_s8 + $0x1a8] sm:$0xff] }
 0x14a   :  { %1455 = vst [vmem:[#allocation4 + $0x1a0] sm:$0xff] %v1454_v12  ;;  %v1458_v14 = vld [vmem:[%s19153_s8 + $0x1b0] sm:$0xff]  ;;  %v1460_v15 = vld [vmem:[%s19153_s8 + $0x1b8] sm:$0xff]  ;;  %1457 = vst [vmem:[#allocation4 + $0x1a8] sm:$0xff] %v1456_v13 }
 0x14b   :  { %1459 = vst [vmem:[#allocation4 + $0x1b0] sm:$0xff] %v1458_v14  ;;  %1461 = vst [vmem:[#allocation4 + $0x1b8] sm:$0xff] %v1460_v15  ;;  %v1462_v16 = vld [vmem:[%s19153_s8 + $0x1c0] sm:$0xff]  ;;  %v1464_v17 = vld [vmem:[%s19153_s8 + $0x1c8] sm:$0xff] }
 0x14c   :  { %v1466_v18 = vld [vmem:[%s19153_s8 + $0x1d0] sm:$0xff]  ;;  %1463 = vst [vmem:[#allocation4 + $0x1c0] sm:$0xff] %v1462_v16  ;;  %1465 = vst [vmem:[#allocation4 + $0x1c8] sm:$0xff] %v1464_v17  ;;  %v1468_v19 = vld [vmem:[%s19153_s8 + $0x1d8] sm:$0xff] }
 0x14d   :  { %1467 = vst [vmem:[#allocation4 + $0x1d0] sm:$0xff] %v1466_v18  ;;  %v1470_v20 = vld [vmem:[%s19153_s8 + $0x1e0] sm:$0xff]  ;;  %v1472_v21 = vld [vmem:[%s19153_s8 + $0x1e8] sm:$0xff]  ;;  %1469 = vst [vmem:[#allocation4 + $0x1d8] sm:$0xff] %v1468_v19 }
 0x14e   :  { %1471 = vst [vmem:[#allocation4 + $0x1e0] sm:$0xff] %v1470_v20  ;;  %1473 = vst [vmem:[#allocation4 + $0x1e8] sm:$0xff] %v1472_v21  ;;  %v1474_v22 = vld [vmem:[%s19153_s8 + $0x1f0] sm:$0xff]  ;;  %v1476_v23 = vld [vmem:[%s19153_s8 + $0x1f8] sm:$0xff] }
 0x14f   :  { %v1478_v24 = vld [vmem:[%s19153_s8 + $0x200] sm:$0xff]  ;;  %1475 = vst [vmem:[#allocation4 + $0x1f0] sm:$0xff] %v1474_v22  ;;  %1477 = vst [vmem:[#allocation4 + $0x1f8] sm:$0xff] %v1476_v23  ;;  %v1480_v25 = vld [vmem:[%s19153_s8 + $0x208] sm:$0xff] }
 0x150   :  { %1479 = vst [vmem:[#allocation4 + $0x200] sm:$0xff] %v1478_v24  ;;  %v1482_v26 = vld [vmem:[%s19153_s8 + $0x210] sm:$0xff]  ;;  %v1484_v27 = vld [vmem:[%s19153_s8 + $0x218] sm:$0xff]  ;;  %1481 = vst [vmem:[#allocation4 + $0x208] sm:$0xff] %v1480_v25 }
 0x151   :  { %1483 = vst [vmem:[#allocation4 + $0x210] sm:$0xff] %v1482_v26  ;;  %1485 = vst [vmem:[#allocation4 + $0x218] sm:$0xff] %v1484_v27  ;;  %v1486_v28 = vld [vmem:[%s19153_s8 + $0x220] sm:$0xff]  ;;  %v1488_v29 = vld [vmem:[%s19153_s8 + $0x228] sm:$0xff] }
 0x152   :  { %v1490_v30 = vld [vmem:[%s19153_s8 + $0x230] sm:$0xff]  ;;  %1487 = vst [vmem:[#allocation4 + $0x220] sm:$0xff] %v1486_v28  ;;  %1489 = vst [vmem:[#allocation4 + $0x228] sm:$0xff] %v1488_v29  ;;  %v1492_v31 = vld [vmem:[%s19153_s8 + $0x238] sm:$0xff] }
 0x153   :  { %1491 = vst [vmem:[#allocation4 + $0x230] sm:$0xff] %v1490_v30  ;;  %v1494_v32 = vld [vmem:[%s19153_s8 + $0x240] sm:$0xff]  ;;  %v1496_v33 = vld [vmem:[%s19153_s8 + $0x248] sm:$0xff]  ;;  %1493 = vst [vmem:[#allocation4 + $0x238] sm:$0xff] %v1492_v31 }
 0x154   :  { %1495 = vst [vmem:[#allocation4 + $0x240] sm:$0xff] %v1494_v32  ;;  %1497 = vst [vmem:[#allocation4 + $0x248] sm:$0xff] %v1496_v33  ;;  %v1498_v34 = vld [vmem:[%s19153_s8 + $0x250] sm:$0xff]  ;;  %v1500_v35 = vld [vmem:[%s19153_s8 + $0x258] sm:$0xff] }
 0x155   :  { %v1502_v36 = vld [vmem:[%s19153_s8 + $0x260] sm:$0xff]  ;;  %1499 = vst [vmem:[#allocation4 + $0x250] sm:$0xff] %v1498_v34  ;;  %1501 = vst [vmem:[#allocation4 + $0x258] sm:$0xff] %v1500_v35  ;;  %v1504_v37 = vld [vmem:[%s19153_s8 + $0x268] sm:$0xff] }
 0x156   :  { %1503 = vst [vmem:[#allocation4 + $0x260] sm:$0xff] %v1502_v36  ;;  %v1506_v38 = vld [vmem:[%s19153_s8 + $0x270] sm:$0xff]  ;;  %v1508_v39 = vld [vmem:[%s19153_s8 + $0x278] sm:$0xff]  ;;  %1505 = vst [vmem:[#allocation4 + $0x268] sm:$0xff] %v1504_v37 }
 0x157   :  { %1507 = vst [vmem:[#allocation4 + $0x270] sm:$0xff] %v1506_v38  ;;  %1509 = vst [vmem:[#allocation4 + $0x278] sm:$0xff] %v1508_v39  ;;  %v1510_v40 = vld [vmem:[%s19153_s8 + $0x280] sm:$0xff]  ;;  %v1512_v41 = vld [vmem:[%s19153_s8 + $0x288] sm:$0xff] }
 0x158   :  { %v1514_v42 = vld [vmem:[%s19153_s8 + $0x290] sm:$0xff]  ;;  %1511 = vst [vmem:[#allocation4 + $0x280] sm:$0xff] %v1510_v40  ;;  %1513 = vst [vmem:[#allocation4 + $0x288] sm:$0xff] %v1512_v41  ;;  %v1516_v43 = vld [vmem:[%s19153_s8 + $0x298] sm:$0xff] }
 0x159   :  { %1515 = vst [vmem:[#allocation4 + $0x290] sm:$0xff] %v1514_v42  ;;  %v1518_v44 = vld [vmem:[%s19153_s8 + $0x2a0] sm:$0xff]  ;;  %v1520_v45 = vld [vmem:[%s19153_s8 + $0x2a8] sm:$0xff]  ;;  %1517 = vst [vmem:[#allocation4 + $0x298] sm:$0xff] %v1516_v43 }
 0x15a   :  { %1519 = vst [vmem:[#allocation4 + $0x2a0] sm:$0xff] %v1518_v44  ;;  %1521 = vst [vmem:[#allocation4 + $0x2a8] sm:$0xff] %v1520_v45  ;;  %v1522_v46 = vld [vmem:[%s19153_s8 + $0x2b0] sm:$0xff]  ;;  %v1524_v47 = vld [vmem:[%s19153_s8 + $0x2b8] sm:$0xff] }
 0x15b   :  { %v1526_v48 = vld [vmem:[%s19153_s8 + $0x2c0] sm:$0xff]  ;;  %1523 = vst [vmem:[#allocation4 + $0x2b0] sm:$0xff] %v1522_v46  ;;  %1525 = vst [vmem:[#allocation4 + $0x2b8] sm:$0xff] %v1524_v47  ;;  %v1528_v49 = vld [vmem:[%s19153_s8 + $0x2c8] sm:$0xff] }
 0x15c   :  { %1527 = vst [vmem:[#allocation4 + $0x2c0] sm:$0xff] %v1526_v48  ;;  %v1530_v50 = vld [vmem:[%s19153_s8 + $0x2d0] sm:$0xff]  ;;  %v1532_v51 = vld [vmem:[%s19153_s8 + $0x2d8] sm:$0xff]  ;;  %1529 = vst [vmem:[#allocation4 + $0x2c8] sm:$0xff] %v1528_v49 }
 0x15d   :  { %1531 = vst [vmem:[#allocation4 + $0x2d0] sm:$0xff] %v1530_v50  ;;  %1533 = vst [vmem:[#allocation4 + $0x2d8] sm:$0xff] %v1532_v51  ;;  %v1534_v52 = vld [vmem:[%s19153_s8 + $0x2e0] sm:$0xff]  ;;  %v1536_v53 = vld [vmem:[%s19153_s8 + $0x2e8] sm:$0xff] }
 0x15e   :  { %v1538_v54 = vld [vmem:[%s19153_s8 + $0x2f0] sm:$0xff]  ;;  %1535 = vst [vmem:[#allocation4 + $0x2e0] sm:$0xff] %v1534_v52  ;;  %1537 = vst [vmem:[#allocation4 + $0x2e8] sm:$0xff] %v1536_v53  ;;  %v1540_v55 = vld [vmem:[%s19153_s8 + $0x2f8] sm:$0xff] }
 0x15f   :  { %1539 = vst [vmem:[#allocation4 + $0x2f0] sm:$0xff] %v1538_v54  ;;  %v1542_v56 = vld [vmem:[%s19153_s8 + $0x300] sm:$0xff]  ;;  %v1544_v57 = vld [vmem:[%s19153_s8 + $0x308] sm:$0xff]  ;;  %1541 = vst [vmem:[#allocation4 + $0x2f8] sm:$0xff] %v1540_v55 }
 0x160   :  { %1543 = vst [vmem:[#allocation4 + $0x300] sm:$0xff] %v1542_v56  ;;  %1545 = vst [vmem:[#allocation4 + $0x308] sm:$0xff] %v1544_v57  ;;  %v1546_v58 = vld [vmem:[%s19153_s8 + $0x310] sm:$0xff]  ;;  %v1548_v59 = vld [vmem:[%s19153_s8 + $0x318] sm:$0xff] }
 0x161   :  { %v1550_v60 = vld [vmem:[%s19153_s8 + $0x320] sm:$0xff]  ;;  %1547 = vst [vmem:[#allocation4 + $0x310] sm:$0xff] %v1546_v58  ;;  %1549 = vst [vmem:[#allocation4 + $0x318] sm:$0xff] %v1548_v59  ;;  %v1552_v61 = vld [vmem:[%s19153_s8 + $0x328] sm:$0xff] }
 0x162   :  { %1551 = vst [vmem:[#allocation4 + $0x320] sm:$0xff] %v1550_v60  ;;  %v1554_v62 = vld [vmem:[%s19153_s8 + $0x330] sm:$0xff]  ;;  %v1556_v63 = vld [vmem:[%s19153_s8 + $0x338] sm:$0xff]  ;;  %1553 = vst [vmem:[#allocation4 + $0x328] sm:$0xff] %v1552_v61 }
 0x163   :  { %1555 = vst [vmem:[#allocation4 + $0x330] sm:$0xff] %v1554_v62  ;;  %1557 = vst [vmem:[#allocation4 + $0x338] sm:$0xff] %v1556_v63  ;;  %v1558_v0 = vld [vmem:[%s19153_s8 + $0x340] sm:$0xff]  ;;  %v1560_v1 = vld [vmem:[%s19153_s8 + $0x348] sm:$0xff] }
 0x164   :  { %v1562_v2 = vld [vmem:[%s19153_s8 + $0x350] sm:$0xff]  ;;  %1559 = vst [vmem:[#allocation4 + $0x340] sm:$0xff] %v1558_v0  ;;  %1561 = vst [vmem:[#allocation4 + $0x348] sm:$0xff] %v1560_v1  ;;  %v1564_v3 = vld [vmem:[%s19153_s8 + $0x358] sm:$0xff] }
 0x165   :  { %1563 = vst [vmem:[#allocation4 + $0x350] sm:$0xff] %v1562_v2  ;;  %v1566_v4 = vld [vmem:[%s19153_s8 + $0x360] sm:$0xff]  ;;  %v1568_v5 = vld [vmem:[%s19153_s8 + $0x368] sm:$0xff]  ;;  %1565 = vst [vmem:[#allocation4 + $0x358] sm:$0xff] %v1564_v3 }
 0x166   :  { %1567 = vst [vmem:[#allocation4 + $0x360] sm:$0xff] %v1566_v4  ;;  %1569 = vst [vmem:[#allocation4 + $0x368] sm:$0xff] %v1568_v5  ;;  %v1570_v6 = vld [vmem:[%s19153_s8 + $0x370] sm:$0xff]  ;;  %v1572_v7 = vld [vmem:[%s19153_s8 + $0x378] sm:$0xff] }
 0x167   :  { %v1574_v8 = vld [vmem:[%s19153_s8 + $0x380] sm:$0xff]  ;;  %1571 = vst [vmem:[#allocation4 + $0x370] sm:$0xff] %v1570_v6  ;;  %1573 = vst [vmem:[#allocation4 + $0x378] sm:$0xff] %v1572_v7  ;;  %v1576_v9 = vld [vmem:[%s19153_s8 + $0x388] sm:$0xff] }
 0x168   :  { %1575 = vst [vmem:[#allocation4 + $0x380] sm:$0xff] %v1574_v8  ;;  %v1578_v10 = vld [vmem:[%s19153_s8 + $0x390] sm:$0xff]  ;;  %v1580_v11 = vld [vmem:[%s19153_s8 + $0x398] sm:$0xff]  ;;  %1577 = vst [vmem:[#allocation4 + $0x388] sm:$0xff] %v1576_v9 }
 0x169   :  { %1579 = vst [vmem:[#allocation4 + $0x390] sm:$0xff] %v1578_v10  ;;  %1581 = vst [vmem:[#allocation4 + $0x398] sm:$0xff] %v1580_v11  ;;  %v1582_v12 = vld [vmem:[%s19153_s8 + $0x3a0] sm:$0xff]  ;;  %v1584_v13 = vld [vmem:[%s19153_s8 + $0x3a8] sm:$0xff] }
 0x16a   :  { %v1586_v14 = vld [vmem:[%s19153_s8 + $0x3b0] sm:$0xff]  ;;  %1583 = vst [vmem:[#allocation4 + $0x3a0] sm:$0xff] %v1582_v12  ;;  %1585 = vst [vmem:[#allocation4 + $0x3a8] sm:$0xff] %v1584_v13  ;;  %v1588_v15 = vld [vmem:[%s19153_s8 + $0x3b8] sm:$0xff] }
 0x16b   :  { %1587 = vst [vmem:[#allocation4 + $0x3b0] sm:$0xff] %v1586_v14  ;;  %v1590_v16 = vld [vmem:[%s19153_s8 + $0x3c0] sm:$0xff]  ;;  %v1592_v17 = vld [vmem:[%s19153_s8 + $0x3c8] sm:$0xff]  ;;  %1589 = vst [vmem:[#allocation4 + $0x3b8] sm:$0xff] %v1588_v15 }
 0x16c   :  { %1591 = vst [vmem:[#allocation4 + $0x3c0] sm:$0xff] %v1590_v16  ;;  %1593 = vst [vmem:[#allocation4 + $0x3c8] sm:$0xff] %v1592_v17  ;;  %v1594_v18 = vld [vmem:[%s19153_s8 + $0x3d0] sm:$0xff]  ;;  %v1596_v19 = vld [vmem:[%s19153_s8 + $0x3d8] sm:$0xff] }
 0x16d   :  { %v1598_v20 = vld [vmem:[%s19153_s8 + $0x3e0] sm:$0xff]  ;;  %1595 = vst [vmem:[#allocation4 + $0x3d0] sm:$0xff] %v1594_v18  ;;  %1597 = vst [vmem:[#allocation4 + $0x3d8] sm:$0xff] %v1596_v19  ;;  %v1600_v21 = vld [vmem:[%s19153_s8 + $0x3e8] sm:$0xff] }
 0x16e   :  { %1599 = vst [vmem:[#allocation4 + $0x3e0] sm:$0xff] %v1598_v20  ;;  %v1602_v22 = vld [vmem:[%s19153_s8 + $0x3f0] sm:$0xff]  ;;  %v1604_v23 = vld [vmem:[%s19153_s8 + $0x3f8] sm:$0xff]  ;;  %1601 = vst [vmem:[#allocation4 + $0x3e8] sm:$0xff] %v1600_v21 }
 0x16f   :  { %1603 = vst [vmem:[#allocation4 + $0x3f0] sm:$0xff] %v1602_v22  ;;  %1605 = vst [vmem:[#allocation4 + $0x3f8] sm:$0xff] %v1604_v23  ;;  %v1606_v24 = vld [vmem:[%s19153_s8 + $0x400] sm:$0xff]  ;;  %v1608_v25 = vld [vmem:[%s19153_s8 + $0x408] sm:$0xff] }
 0x170   :  { %v1610_v26 = vld [vmem:[%s19153_s8 + $0x410] sm:$0xff]  ;;  %1607 = vst [vmem:[#allocation4 + $0x400] sm:$0xff] %v1606_v24  ;;  %1609 = vst [vmem:[#allocation4 + $0x408] sm:$0xff] %v1608_v25  ;;  %v1612_v27 = vld [vmem:[%s19153_s8 + $0x418] sm:$0xff] }
 0x171   :  { %1611 = vst [vmem:[#allocation4 + $0x410] sm:$0xff] %v1610_v26  ;;  %v1614_v28 = vld [vmem:[%s19153_s8 + $0x420] sm:$0xff]  ;;  %v1616_v29 = vld [vmem:[%s19153_s8 + $0x428] sm:$0xff]  ;;  %1613 = vst [vmem:[#allocation4 + $0x418] sm:$0xff] %v1612_v27 }
 0x172   :  { %1615 = vst [vmem:[#allocation4 + $0x420] sm:$0xff] %v1614_v28  ;;  %1617 = vst [vmem:[#allocation4 + $0x428] sm:$0xff] %v1616_v29  ;;  %v1618_v30 = vld [vmem:[%s19153_s8 + $0x430] sm:$0xff]  ;;  %v1620_v31 = vld [vmem:[%s19153_s8 + $0x438] sm:$0xff] }
 0x173   :  { %v1622_v32 = vld [vmem:[%s19153_s8 + $0x440] sm:$0xff]  ;;  %1619 = vst [vmem:[#allocation4 + $0x430] sm:$0xff] %v1618_v30  ;;  %1621 = vst [vmem:[#allocation4 + $0x438] sm:$0xff] %v1620_v31  ;;  %v1624_v33 = vld [vmem:[%s19153_s8 + $0x448] sm:$0xff] }
 0x174   :  { %1623 = vst [vmem:[#allocation4 + $0x440] sm:$0xff] %v1622_v32  ;;  %v1626_v34 = vld [vmem:[%s19153_s8 + $0x450] sm:$0xff]  ;;  %v1628_v35 = vld [vmem:[%s19153_s8 + $0x458] sm:$0xff]  ;;  %1625 = vst [vmem:[#allocation4 + $0x448] sm:$0xff] %v1624_v33 }
 0x175   :  { %1627 = vst [vmem:[#allocation4 + $0x450] sm:$0xff] %v1626_v34  ;;  %1629 = vst [vmem:[#allocation4 + $0x458] sm:$0xff] %v1628_v35  ;;  %v1630_v36 = vld [vmem:[%s19153_s8 + $0x460] sm:$0xff]  ;;  %v1632_v37 = vld [vmem:[%s19153_s8 + $0x468] sm:$0xff] }
 0x176   :  { %v1634_v38 = vld [vmem:[%s19153_s8 + $0x470] sm:$0xff]  ;;  %1631 = vst [vmem:[#allocation4 + $0x460] sm:$0xff] %v1630_v36  ;;  %1633 = vst [vmem:[#allocation4 + $0x468] sm:$0xff] %v1632_v37  ;;  %v1636_v39 = vld [vmem:[%s19153_s8 + $0x478] sm:$0xff] }
 0x177   :  { %1635 = vst [vmem:[#allocation4 + $0x470] sm:$0xff] %v1634_v38  ;;  %v1638_v40 = vld [vmem:[%s19153_s8 + $0x480] sm:$0xff]  ;;  %v1640_v41 = vld [vmem:[%s19153_s8 + $0x488] sm:$0xff]  ;;  %1637 = vst [vmem:[#allocation4 + $0x478] sm:$0xff] %v1636_v39 }
 0x178   :  { %1639 = vst [vmem:[#allocation4 + $0x480] sm:$0xff] %v1638_v40  ;;  %1641 = vst [vmem:[#allocation4 + $0x488] sm:$0xff] %v1640_v41  ;;  %v1642_v42 = vld [vmem:[%s19153_s8 + $0x490] sm:$0xff]  ;;  %v1644_v43 = vld [vmem:[%s19153_s8 + $0x498] sm:$0xff] }
 0x179   :  { %v1646_v44 = vld [vmem:[%s19153_s8 + $0x4a0] sm:$0xff]  ;;  %1643 = vst [vmem:[#allocation4 + $0x490] sm:$0xff] %v1642_v42  ;;  %1645 = vst [vmem:[#allocation4 + $0x498] sm:$0xff] %v1644_v43  ;;  %v1648_v45 = vld [vmem:[%s19153_s8 + $0x4a8] sm:$0xff] }
 0x17a   :  { %1647 = vst [vmem:[#allocation4 + $0x4a0] sm:$0xff] %v1646_v44  ;;  %v1650_v46 = vld [vmem:[%s19153_s8 + $0x4b0] sm:$0xff]  ;;  %v1652_v47 = vld [vmem:[%s19153_s8 + $0x4b8] sm:$0xff]  ;;  %1649 = vst [vmem:[#allocation4 + $0x4a8] sm:$0xff] %v1648_v45 }
 0x17b   :  { %1651 = vst [vmem:[#allocation4 + $0x4b0] sm:$0xff] %v1650_v46  ;;  %1653 = vst [vmem:[#allocation4 + $0x4b8] sm:$0xff] %v1652_v47  ;;  %v1654_v48 = vld [vmem:[%s19153_s8 + $0x4c0] sm:$0xff]  ;;  %v1656_v49 = vld [vmem:[%s19153_s8 + $0x4c8] sm:$0xff] }
 0x17c   :  { %v1658_v50 = vld [vmem:[%s19153_s8 + $0x4d0] sm:$0xff]  ;;  %1655 = vst [vmem:[#allocation4 + $0x4c0] sm:$0xff] %v1654_v48  ;;  %1657 = vst [vmem:[#allocation4 + $0x4c8] sm:$0xff] %v1656_v49  ;;  %v1660_v51 = vld [vmem:[%s19153_s8 + $0x4d8] sm:$0xff] }
 0x17d   :  { %1659 = vst [vmem:[#allocation4 + $0x4d0] sm:$0xff] %v1658_v50  ;;  %v1662_v52 = vld [vmem:[%s19153_s8 + $0x4e0] sm:$0xff]  ;;  %v1664_v53 = vld [vmem:[%s19153_s8 + $0x4e8] sm:$0xff]  ;;  %1661 = vst [vmem:[#allocation4 + $0x4d8] sm:$0xff] %v1660_v51 }
 0x17e   :  { %1663 = vst [vmem:[#allocation4 + $0x4e0] sm:$0xff] %v1662_v52  ;;  %1665 = vst [vmem:[#allocation4 + $0x4e8] sm:$0xff] %v1664_v53  ;;  %v1666_v54 = vld [vmem:[%s19153_s8 + $0x4f0] sm:$0xff]  ;;  %v1668_v55 = vld [vmem:[%s19153_s8 + $0x4f8] sm:$0xff] }
 0x17f   :  { %v1670_v56 = vld [vmem:[%s19153_s8 + $0x500] sm:$0xff]  ;;  %1667 = vst [vmem:[#allocation4 + $0x4f0] sm:$0xff] %v1666_v54  ;;  %1669 = vst [vmem:[#allocation4 + $0x4f8] sm:$0xff] %v1668_v55  ;;  %v1672_v57 = vld [vmem:[%s19153_s8 + $0x508] sm:$0xff] }
 0x180   :  { %1671 = vst [vmem:[#allocation4 + $0x500] sm:$0xff] %v1670_v56  ;;  %v1674_v58 = vld [vmem:[%s19153_s8 + $0x510] sm:$0xff]  ;;  %v1676_v59 = vld [vmem:[%s19153_s8 + $0x518] sm:$0xff]  ;;  %1673 = vst [vmem:[#allocation4 + $0x508] sm:$0xff] %v1672_v57 }
 0x181   :  { %1675 = vst [vmem:[#allocation4 + $0x510] sm:$0xff] %v1674_v58  ;;  %1677 = vst [vmem:[#allocation4 + $0x518] sm:$0xff] %v1676_v59  ;;  %v1678_v60 = vld [vmem:[%s19153_s8 + $0x520] sm:$0xff]  ;;  %v1680_v61 = vld [vmem:[%s19153_s8 + $0x528] sm:$0xff] }
 0x182   :  { %v1682_v62 = vld [vmem:[%s19153_s8 + $0x530] sm:$0xff]  ;;  %1679 = vst [vmem:[#allocation4 + $0x520] sm:$0xff] %v1678_v60  ;;  %1681 = vst [vmem:[#allocation4 + $0x528] sm:$0xff] %v1680_v61  ;;  %v1684_v63 = vld [vmem:[%s19153_s8 + $0x538] sm:$0xff] }
 0x183   :  { %1683 = vst [vmem:[#allocation4 + $0x530] sm:$0xff] %v1682_v62  ;;  %v1686_v0 = vld [vmem:[%s19153_s8 + $0x540] sm:$0xff]  ;;  %v1688_v1 = vld [vmem:[%s19153_s8 + $0x548] sm:$0xff]  ;;  %1685 = vst [vmem:[#allocation4 + $0x538] sm:$0xff] %v1684_v63 }
 0x184   :  { %1687 = vst [vmem:[#allocation4 + $0x540] sm:$0xff] %v1686_v0  ;;  %1689 = vst [vmem:[#allocation4 + $0x548] sm:$0xff] %v1688_v1  ;;  %v1690_v2 = vld [vmem:[%s19153_s8 + $0x550] sm:$0xff]  ;;  %v1692_v3 = vld [vmem:[%s19153_s8 + $0x558] sm:$0xff] }
 0x185   :  { %v1694_v4 = vld [vmem:[%s19153_s8 + $0x560] sm:$0xff]  ;;  %1691 = vst [vmem:[#allocation4 + $0x550] sm:$0xff] %v1690_v2  ;;  %1693 = vst [vmem:[#allocation4 + $0x558] sm:$0xff] %v1692_v3  ;;  %v1696_v5 = vld [vmem:[%s19153_s8 + $0x568] sm:$0xff] }
 0x186   :  { %1695 = vst [vmem:[#allocation4 + $0x560] sm:$0xff] %v1694_v4  ;;  %v1698_v6 = vld [vmem:[%s19153_s8 + $0x570] sm:$0xff]  ;;  %v1700_v7 = vld [vmem:[%s19153_s8 + $0x578] sm:$0xff]  ;;  %1697 = vst [vmem:[#allocation4 + $0x568] sm:$0xff] %v1696_v5 }
 0x187   :  { %1699 = vst [vmem:[#allocation4 + $0x570] sm:$0xff] %v1698_v6  ;;  %1701 = vst [vmem:[#allocation4 + $0x578] sm:$0xff] %v1700_v7  ;;  %v1702_v8 = vld [vmem:[%s19153_s8 + $0x580] sm:$0xff]  ;;  %v1704_v9 = vld [vmem:[%s19153_s8 + $0x588] sm:$0xff] }
 0x188   :  { %v1706_v10 = vld [vmem:[%s19153_s8 + $0x590] sm:$0xff]  ;;  %1703 = vst [vmem:[#allocation4 + $0x580] sm:$0xff] %v1702_v8  ;;  %1705 = vst [vmem:[#allocation4 + $0x588] sm:$0xff] %v1704_v9  ;;  %v1708_v11 = vld [vmem:[%s19153_s8 + $0x598] sm:$0xff] }
 0x189   :  { %1707 = vst [vmem:[#allocation4 + $0x590] sm:$0xff] %v1706_v10  ;;  %v1710_v12 = vld [vmem:[%s19153_s8 + $0x5a0] sm:$0xff]  ;;  %v1712_v13 = vld [vmem:[%s19153_s8 + $0x5a8] sm:$0xff]  ;;  %1709 = vst [vmem:[#allocation4 + $0x598] sm:$0xff] %v1708_v11 }
 0x18a   :  { %1711 = vst [vmem:[#allocation4 + $0x5a0] sm:$0xff] %v1710_v12  ;;  %1713 = vst [vmem:[#allocation4 + $0x5a8] sm:$0xff] %v1712_v13  ;;  %v1714_v14 = vld [vmem:[%s19153_s8 + $0x5b0] sm:$0xff]  ;;  %v1716_v15 = vld [vmem:[%s19153_s8 + $0x5b8] sm:$0xff] }
 0x18b   :  { %v1718_v16 = vld [vmem:[%s19153_s8 + $0x5c0] sm:$0xff]  ;;  %1715 = vst [vmem:[#allocation4 + $0x5b0] sm:$0xff] %v1714_v14  ;;  %1717 = vst [vmem:[#allocation4 + $0x5b8] sm:$0xff] %v1716_v15  ;;  %v1720_v17 = vld [vmem:[%s19153_s8 + $0x5c8] sm:$0xff] }
 0x18c   :  { %1719 = vst [vmem:[#allocation4 + $0x5c0] sm:$0xff] %v1718_v16  ;;  %v1722_v18 = vld [vmem:[%s19153_s8 + $0x5d0] sm:$0xff]  ;;  %v1724_v19 = vld [vmem:[%s19153_s8 + $0x5d8] sm:$0xff]  ;;  %1721 = vst [vmem:[#allocation4 + $0x5c8] sm:$0xff] %v1720_v17 }
 0x18d   :  { %1723 = vst [vmem:[#allocation4 + $0x5d0] sm:$0xff] %v1722_v18  ;;  %1725 = vst [vmem:[#allocation4 + $0x5d8] sm:$0xff] %v1724_v19  ;;  %v1726_v20 = vld [vmem:[%s19153_s8 + $0x5e0] sm:$0xff]  ;;  %v1728_v21 = vld [vmem:[%s19153_s8 + $0x5e8] sm:$0xff] }
 0x18e   :  { %v1730_v22 = vld [vmem:[%s19153_s8 + $0x5f0] sm:$0xff]  ;;  %1727 = vst [vmem:[#allocation4 + $0x5e0] sm:$0xff] %v1726_v20  ;;  %1729 = vst [vmem:[#allocation4 + $0x5e8] sm:$0xff] %v1728_v21  ;;  %v1732_v23 = vld [vmem:[%s19153_s8 + $0x5f8] sm:$0xff] }
 0x18f   :  { %1731 = vst [vmem:[#allocation4 + $0x5f0] sm:$0xff] %v1730_v22  ;;  %v1734_v24 = vld [vmem:[%s19153_s8 + $0x600] sm:$0xff]  ;;  %v1736_v25 = vld [vmem:[%s19153_s8 + $0x608] sm:$0xff]  ;;  %1733 = vst [vmem:[#allocation4 + $0x5f8] sm:$0xff] %v1732_v23 }
 0x190   :  { %1735 = vst [vmem:[#allocation4 + $0x600] sm:$0xff] %v1734_v24  ;;  %1737 = vst [vmem:[#allocation4 + $0x608] sm:$0xff] %v1736_v25  ;;  %v1738_v26 = vld [vmem:[%s19153_s8 + $0x610] sm:$0xff]  ;;  %v1740_v27 = vld [vmem:[%s19153_s8 + $0x618] sm:$0xff] }
 0x191   :  { %v1742_v28 = vld [vmem:[%s19153_s8 + $0x620] sm:$0xff]  ;;  %1739 = vst [vmem:[#allocation4 + $0x610] sm:$0xff] %v1738_v26  ;;  %1741 = vst [vmem:[#allocation4 + $0x618] sm:$0xff] %v1740_v27  ;;  %v1744_v29 = vld [vmem:[%s19153_s8 + $0x628] sm:$0xff] }
 0x192   :  { %1743 = vst [vmem:[#allocation4 + $0x620] sm:$0xff] %v1742_v28  ;;  %v1746_v30 = vld [vmem:[%s19153_s8 + $0x630] sm:$0xff]  ;;  %v1748_v31 = vld [vmem:[%s19153_s8 + $0x638] sm:$0xff]  ;;  %1745 = vst [vmem:[#allocation4 + $0x628] sm:$0xff] %v1744_v29 }
 0x193   :  { %1747 = vst [vmem:[#allocation4 + $0x630] sm:$0xff] %v1746_v30  ;;  %1749 = vst [vmem:[#allocation4 + $0x638] sm:$0xff] %v1748_v31  ;;  %v1750_v32 = vld [vmem:[%s19153_s8 + $0x640] sm:$0xff]  ;;  %v1752_v33 = vld [vmem:[%s19153_s8 + $0x648] sm:$0xff] }
 0x194   :  { %v1754_v34 = vld [vmem:[%s19153_s8 + $0x650] sm:$0xff]  ;;  %1751 = vst [vmem:[#allocation4 + $0x640] sm:$0xff] %v1750_v32  ;;  %1753 = vst [vmem:[#allocation4 + $0x648] sm:$0xff] %v1752_v33  ;;  %v1756_v35 = vld [vmem:[%s19153_s8 + $0x658] sm:$0xff] }
 0x195   :  { %1755 = vst [vmem:[#allocation4 + $0x650] sm:$0xff] %v1754_v34  ;;  %v1758_v36 = vld [vmem:[%s19153_s8 + $0x660] sm:$0xff]  ;;  %v1760_v37 = vld [vmem:[%s19153_s8 + $0x668] sm:$0xff]  ;;  %1757 = vst [vmem:[#allocation4 + $0x658] sm:$0xff] %v1756_v35 }
 0x196   :  { %1759 = vst [vmem:[#allocation4 + $0x660] sm:$0xff] %v1758_v36  ;;  %1761 = vst [vmem:[#allocation4 + $0x668] sm:$0xff] %v1760_v37  ;;  %v1762_v38 = vld [vmem:[%s19153_s8 + $0x670] sm:$0xff]  ;;  %v1764_v39 = vld [vmem:[%s19153_s8 + $0x678] sm:$0xff] }
 0x197   :  { %v1766_v40 = vld [vmem:[%s19153_s8 + $0x680] sm:$0xff]  ;;  %1763 = vst [vmem:[#allocation4 + $0x670] sm:$0xff] %v1762_v38  ;;  %1765 = vst [vmem:[#allocation4 + $0x678] sm:$0xff] %v1764_v39  ;;  %v1768_v41 = vld [vmem:[%s19153_s8 + $0x688] sm:$0xff] }
 0x198   :  { %1767 = vst [vmem:[#allocation4 + $0x680] sm:$0xff] %v1766_v40  ;;  %v1770_v42 = vld [vmem:[%s19153_s8 + $0x690] sm:$0xff]  ;;  %v1772_v43 = vld [vmem:[%s19153_s8 + $0x698] sm:$0xff]  ;;  %1769 = vst [vmem:[#allocation4 + $0x688] sm:$0xff] %v1768_v41 }
 0x199   :  { %1771 = vst [vmem:[#allocation4 + $0x690] sm:$0xff] %v1770_v42  ;;  %1773 = vst [vmem:[#allocation4 + $0x698] sm:$0xff] %v1772_v43  ;;  %v1774_v44 = vld [vmem:[%s19153_s8 + $0x6a0] sm:$0xff]  ;;  %v1776_v45 = vld [vmem:[%s19153_s8 + $0x6a8] sm:$0xff] }
 0x19a   :  { %v1778_v46 = vld [vmem:[%s19153_s8 + $0x6b0] sm:$0xff]  ;;  %1775 = vst [vmem:[#allocation4 + $0x6a0] sm:$0xff] %v1774_v44  ;;  %1777 = vst [vmem:[#allocation4 + $0x6a8] sm:$0xff] %v1776_v45  ;;  %v1780_v47 = vld [vmem:[%s19153_s8 + $0x6b8] sm:$0xff] }
 0x19b   :  { %1779 = vst [vmem:[#allocation4 + $0x6b0] sm:$0xff] %v1778_v46  ;;  %v1782_v48 = vld [vmem:[%s19153_s8 + $0x6c0] sm:$0xff]  ;;  %v1784_v49 = vld [vmem:[%s19153_s8 + $0x6c8] sm:$0xff]  ;;  %1781 = vst [vmem:[#allocation4 + $0x6b8] sm:$0xff] %v1780_v47 }
 0x19c   :  { %1783 = vst [vmem:[#allocation4 + $0x6c0] sm:$0xff] %v1782_v48  ;;  %1785 = vst [vmem:[#allocation4 + $0x6c8] sm:$0xff] %v1784_v49  ;;  %v1786_v50 = vld [vmem:[%s19153_s8 + $0x6d0] sm:$0xff]  ;;  %v1788_v51 = vld [vmem:[%s19153_s8 + $0x6d8] sm:$0xff] }
 0x19d   :  { %v1790_v52 = vld [vmem:[%s19153_s8 + $0x6e0] sm:$0xff]  ;;  %1787 = vst [vmem:[#allocation4 + $0x6d0] sm:$0xff] %v1786_v50  ;;  %1789 = vst [vmem:[#allocation4 + $0x6d8] sm:$0xff] %v1788_v51  ;;  %v1792_v53 = vld [vmem:[%s19153_s8 + $0x6e8] sm:$0xff] }
 0x19e   :  { %1791 = vst [vmem:[#allocation4 + $0x6e0] sm:$0xff] %v1790_v52  ;;  %v1794_v54 = vld [vmem:[%s19153_s8 + $0x6f0] sm:$0xff]  ;;  %v1796_v55 = vld [vmem:[%s19153_s8 + $0x6f8] sm:$0xff]  ;;  %1793 = vst [vmem:[#allocation4 + $0x6e8] sm:$0xff] %v1792_v53 }
 0x19f   :  { %1795 = vst [vmem:[#allocation4 + $0x6f0] sm:$0xff] %v1794_v54  ;;  %1797 = vst [vmem:[#allocation4 + $0x6f8] sm:$0xff] %v1796_v55  ;;  %v1798_v56 = vld [vmem:[%s19153_s8 + $0x700] sm:$0xff]  ;;  %v1800_v57 = vld [vmem:[%s19153_s8 + $0x708] sm:$0xff] }
 0x1a0   :  { %v1802_v58 = vld [vmem:[%s19153_s8 + $0x710] sm:$0xff]  ;;  %1799 = vst [vmem:[#allocation4 + $0x700] sm:$0xff] %v1798_v56  ;;  %1801 = vst [vmem:[#allocation4 + $0x708] sm:$0xff] %v1800_v57  ;;  %v1804_v59 = vld [vmem:[%s19153_s8 + $0x718] sm:$0xff] }
 0x1a1   :  { %1803 = vst [vmem:[#allocation4 + $0x710] sm:$0xff] %v1802_v58  ;;  %v1806_v60 = vld [vmem:[%s19153_s8 + $0x720] sm:$0xff]  ;;  %v1808_v61 = vld [vmem:[%s19153_s8 + $0x728] sm:$0xff]  ;;  %1805 = vst [vmem:[#allocation4 + $0x718] sm:$0xff] %v1804_v59 }
 0x1a2   :  { %1807 = vst [vmem:[#allocation4 + $0x720] sm:$0xff] %v1806_v60  ;;  %1809 = vst [vmem:[#allocation4 + $0x728] sm:$0xff] %v1808_v61  ;;  %v1810_v62 = vld [vmem:[%s19153_s8 + $0x730] sm:$0xff]  ;;  %v1812_v63 = vld [vmem:[%s19153_s8 + $0x738] sm:$0xff] }
 0x1a3   :  { %v1814_v0 = vld [vmem:[%s19153_s8 + $0x740] sm:$0xff]  ;;  %1811 = vst [vmem:[#allocation4 + $0x730] sm:$0xff] %v1810_v62  ;;  %1813 = vst [vmem:[#allocation4 + $0x738] sm:$0xff] %v1812_v63  ;;  %v1816_v1 = vld [vmem:[%s19153_s8 + $0x748] sm:$0xff] }
 0x1a4   :  { %1815 = vst [vmem:[#allocation4 + $0x740] sm:$0xff] %v1814_v0  ;;  %v1818_v2 = vld [vmem:[%s19153_s8 + $0x750] sm:$0xff]  ;;  %v1820_v3 = vld [vmem:[%s19153_s8 + $0x758] sm:$0xff]  ;;  %1817 = vst [vmem:[#allocation4 + $0x748] sm:$0xff] %v1816_v1 }
 0x1a5   :  { %1819 = vst [vmem:[#allocation4 + $0x750] sm:$0xff] %v1818_v2  ;;  %1821 = vst [vmem:[#allocation4 + $0x758] sm:$0xff] %v1820_v3  ;;  %v1822_v4 = vld [vmem:[%s19153_s8 + $0x760] sm:$0xff]  ;;  %v1824_v5 = vld [vmem:[%s19153_s8 + $0x768] sm:$0xff] }
 0x1a6   :  { %v1826_v6 = vld [vmem:[%s19153_s8 + $0x770] sm:$0xff]  ;;  %1823 = vst [vmem:[#allocation4 + $0x760] sm:$0xff] %v1822_v4  ;;  %1825 = vst [vmem:[#allocation4 + $0x768] sm:$0xff] %v1824_v5  ;;  %v1828_v7 = vld [vmem:[%s19153_s8 + $0x778] sm:$0xff] }
 0x1a7   :  { %1827 = vst [vmem:[#allocation4 + $0x770] sm:$0xff] %v1826_v6  ;;  %v1830_v8 = vld [vmem:[%s19153_s8 + $0x780] sm:$0xff]  ;;  %v1832_v9 = vld [vmem:[%s19153_s8 + $0x788] sm:$0xff]  ;;  %1829 = vst [vmem:[#allocation4 + $0x778] sm:$0xff] %v1828_v7 }
 0x1a8   :  { %1831 = vst [vmem:[#allocation4 + $0x780] sm:$0xff] %v1830_v8  ;;  %1833 = vst [vmem:[#allocation4 + $0x788] sm:$0xff] %v1832_v9  ;;  %v1834_v10 = vld [vmem:[%s19153_s8 + $0x790] sm:$0xff]  ;;  %v1836_v11 = vld [vmem:[%s19153_s8 + $0x798] sm:$0xff] }
 0x1a9   :  { %v1838_v12 = vld [vmem:[%s19153_s8 + $0x7a0] sm:$0xff]  ;;  %1835 = vst [vmem:[#allocation4 + $0x790] sm:$0xff] %v1834_v10  ;;  %1837 = vst [vmem:[#allocation4 + $0x798] sm:$0xff] %v1836_v11  ;;  %v1840_v13 = vld [vmem:[%s19153_s8 + $0x7a8] sm:$0xff] }
 0x1aa   :  { %1839 = vst [vmem:[#allocation4 + $0x7a0] sm:$0xff] %v1838_v12  ;;  %v1842_v14 = vld [vmem:[%s19153_s8 + $0x7b0] sm:$0xff]  ;;  %v1844_v15 = vld [vmem:[%s19153_s8 + $0x7b8] sm:$0xff]  ;;  %1841 = vst [vmem:[#allocation4 + $0x7a8] sm:$0xff] %v1840_v13 }
 0x1ab   :  { %1843 = vst [vmem:[#allocation4 + $0x7b0] sm:$0xff] %v1842_v14  ;;  %1845 = vst [vmem:[#allocation4 + $0x7b8] sm:$0xff] %v1844_v15  ;;  %v1846_v16 = vld [vmem:[%s19153_s8 + $0x7c0] sm:$0xff]  ;;  %v1848_v17 = vld [vmem:[%s19153_s8 + $0x7c8] sm:$0xff] }
 0x1ac   :  { %v1850_v18 = vld [vmem:[%s19153_s8 + $0x7d0] sm:$0xff]  ;;  %1847 = vst [vmem:[#allocation4 + $0x7c0] sm:$0xff] %v1846_v16  ;;  %1849 = vst [vmem:[#allocation4 + $0x7c8] sm:$0xff] %v1848_v17  ;;  %v1852_v19 = vld [vmem:[%s19153_s8 + $0x7d8] sm:$0xff] }
 0x1ad   :  { %1851 = vst [vmem:[#allocation4 + $0x7d0] sm:$0xff] %v1850_v18  ;;  %v1854_v20 = vld [vmem:[%s19153_s8 + $0x7e0] sm:$0xff]  ;;  %v1856_v21 = vld [vmem:[%s19153_s8 + $0x7e8] sm:$0xff]  ;;  %1853 = vst [vmem:[#allocation4 + $0x7d8] sm:$0xff] %v1852_v19 }
 0x1ae   :  { %1855 = vst [vmem:[#allocation4 + $0x7e0] sm:$0xff] %v1854_v20  ;;  %1857 = vst [vmem:[#allocation4 + $0x7e8] sm:$0xff] %v1856_v21  ;;  %v1858_v22 = vld [vmem:[%s19153_s8 + $0x7f0] sm:$0xff]  ;;  %v1860_v23 = vld [vmem:[%s19153_s8 + $0x7f8] sm:$0xff] }
 0x1af   :  { %v1862_v24 = vld [vmem:[%s19153_s8 + $0x800] sm:$0xff]  ;;  %1859 = vst [vmem:[#allocation4 + $0x7f0] sm:$0xff] %v1858_v22  ;;  %1861 = vst [vmem:[#allocation4 + $0x7f8] sm:$0xff] %v1860_v23  ;;  %v1864_v25 = vld [vmem:[%s19153_s8 + $0x808] sm:$0xff] }
 0x1b0   :  { %1863 = vst [vmem:[#allocation4 + $0x800] sm:$0xff] %v1862_v24  ;;  %v1866_v26 = vld [vmem:[%s19153_s8 + $0x810] sm:$0xff]  ;;  %v1868_v27 = vld [vmem:[%s19153_s8 + $0x818] sm:$0xff]  ;;  %1865 = vst [vmem:[#allocation4 + $0x808] sm:$0xff] %v1864_v25 }
 0x1b1   :  { %1867 = vst [vmem:[#allocation4 + $0x810] sm:$0xff] %v1866_v26  ;;  %1869 = vst [vmem:[#allocation4 + $0x818] sm:$0xff] %v1868_v27  ;;  %v1870_v28 = vld [vmem:[%s19153_s8 + $0x820] sm:$0xff]  ;;  %v1872_v29 = vld [vmem:[%s19153_s8 + $0x828] sm:$0xff] }
 0x1b2   :  { %v1874_v30 = vld [vmem:[%s19153_s8 + $0x830] sm:$0xff]  ;;  %1871 = vst [vmem:[#allocation4 + $0x820] sm:$0xff] %v1870_v28  ;;  %1873 = vst [vmem:[#allocation4 + $0x828] sm:$0xff] %v1872_v29  ;;  %v1876_v31 = vld [vmem:[%s19153_s8 + $0x838] sm:$0xff] }
 0x1b3   :  { %1875 = vst [vmem:[#allocation4 + $0x830] sm:$0xff] %v1874_v30  ;;  %v1878_v32 = vld [vmem:[%s19153_s8 + $0x840] sm:$0xff]  ;;  %v1880_v33 = vld [vmem:[%s19153_s8 + $0x848] sm:$0xff]  ;;  %1877 = vst [vmem:[#allocation4 + $0x838] sm:$0xff] %v1876_v31 }
 0x1b4   :  { %1879 = vst [vmem:[#allocation4 + $0x840] sm:$0xff] %v1878_v32  ;;  %1881 = vst [vmem:[#allocation4 + $0x848] sm:$0xff] %v1880_v33  ;;  %v1882_v34 = vld [vmem:[%s19153_s8 + $0x850] sm:$0xff]  ;;  %v1884_v35 = vld [vmem:[%s19153_s8 + $0x858] sm:$0xff] }
 0x1b5   :  { %v1886_v36 = vld [vmem:[%s19153_s8 + $0x860] sm:$0xff]  ;;  %1883 = vst [vmem:[#allocation4 + $0x850] sm:$0xff] %v1882_v34  ;;  %1885 = vst [vmem:[#allocation4 + $0x858] sm:$0xff] %v1884_v35  ;;  %v1888_v37 = vld [vmem:[%s19153_s8 + $0x868] sm:$0xff] }
 0x1b6   :  { %1887 = vst [vmem:[#allocation4 + $0x860] sm:$0xff] %v1886_v36  ;;  %v1890_v38 = vld [vmem:[%s19153_s8 + $0x870] sm:$0xff]  ;;  %v1892_v39 = vld [vmem:[%s19153_s8 + $0x878] sm:$0xff]  ;;  %1889 = vst [vmem:[#allocation4 + $0x868] sm:$0xff] %v1888_v37 }
 0x1b7   :  { %1891 = vst [vmem:[#allocation4 + $0x870] sm:$0xff] %v1890_v38  ;;  %1893 = vst [vmem:[#allocation4 + $0x878] sm:$0xff] %v1892_v39  ;;  %v1894_v40 = vld [vmem:[%s19153_s8 + $0x880] sm:$0xff]  ;;  %v1896_v41 = vld [vmem:[%s19153_s8 + $0x888] sm:$0xff] }
 0x1b8   :  { %v1898_v42 = vld [vmem:[%s19153_s8 + $0x890] sm:$0xff]  ;;  %1895 = vst [vmem:[#allocation4 + $0x880] sm:$0xff] %v1894_v40  ;;  %1897 = vst [vmem:[#allocation4 + $0x888] sm:$0xff] %v1896_v41  ;;  %v1900_v43 = vld [vmem:[%s19153_s8 + $0x898] sm:$0xff] }
 0x1b9   :  { %1899 = vst [vmem:[#allocation4 + $0x890] sm:$0xff] %v1898_v42  ;;  %v1902_v44 = vld [vmem:[%s19153_s8 + $0x8a0] sm:$0xff]  ;;  %v1904_v45 = vld [vmem:[%s19153_s8 + $0x8a8] sm:$0xff]  ;;  %1901 = vst [vmem:[#allocation4 + $0x898] sm:$0xff] %v1900_v43 }
 0x1ba   :  { %1903 = vst [vmem:[#allocation4 + $0x8a0] sm:$0xff] %v1902_v44  ;;  %1905 = vst [vmem:[#allocation4 + $0x8a8] sm:$0xff] %v1904_v45  ;;  %v1906_v46 = vld [vmem:[%s19153_s8 + $0x8b0] sm:$0xff]  ;;  %v1908_v47 = vld [vmem:[%s19153_s8 + $0x8b8] sm:$0xff] }
 0x1bb   :  { %v1910_v48 = vld [vmem:[%s19153_s8 + $0x8c0] sm:$0xff]  ;;  %1907 = vst [vmem:[#allocation4 + $0x8b0] sm:$0xff] %v1906_v46  ;;  %1909 = vst [vmem:[#allocation4 + $0x8b8] sm:$0xff] %v1908_v47  ;;  %v1912_v49 = vld [vmem:[%s19153_s8 + $0x8c8] sm:$0xff] }
 0x1bc   :  { %1911 = vst [vmem:[#allocation4 + $0x8c0] sm:$0xff] %v1910_v48  ;;  %v1914_v50 = vld [vmem:[%s19153_s8 + $0x8d0] sm:$0xff]  ;;  %v1916_v51 = vld [vmem:[%s19153_s8 + $0x8d8] sm:$0xff]  ;;  %1913 = vst [vmem:[#allocation4 + $0x8c8] sm:$0xff] %v1912_v49 }
 0x1bd   :  { %1915 = vst [vmem:[#allocation4 + $0x8d0] sm:$0xff] %v1914_v50  ;;  %1917 = vst [vmem:[#allocation4 + $0x8d8] sm:$0xff] %v1916_v51  ;;  %v1918_v52 = vld [vmem:[%s19153_s8 + $0x8e0] sm:$0xff]  ;;  %v1920_v53 = vld [vmem:[%s19153_s8 + $0x8e8] sm:$0xff] }
 0x1be   :  { %v1922_v54 = vld [vmem:[%s19153_s8 + $0x8f0] sm:$0xff]  ;;  %1919 = vst [vmem:[#allocation4 + $0x8e0] sm:$0xff] %v1918_v52  ;;  %1921 = vst [vmem:[#allocation4 + $0x8e8] sm:$0xff] %v1920_v53  ;;  %v1924_v55 = vld [vmem:[%s19153_s8 + $0x8f8] sm:$0xff] }
 0x1bf   :  { %1923 = vst [vmem:[#allocation4 + $0x8f0] sm:$0xff] %v1922_v54  ;;  %v1926_v56 = vld [vmem:[%s19153_s8 + $0x900] sm:$0xff]  ;;  %v1928_v57 = vld [vmem:[%s19153_s8 + $0x908] sm:$0xff]  ;;  %1925 = vst [vmem:[#allocation4 + $0x8f8] sm:$0xff] %v1924_v55 }
 0x1c0   :  { %1927 = vst [vmem:[#allocation4 + $0x900] sm:$0xff] %v1926_v56  ;;  %1929 = vst [vmem:[#allocation4 + $0x908] sm:$0xff] %v1928_v57  ;;  %v1930_v58 = vld [vmem:[%s19153_s8 + $0x910] sm:$0xff]  ;;  %v1932_v59 = vld [vmem:[%s19153_s8 + $0x918] sm:$0xff] }
 0x1c1   :  { %v1934_v60 = vld [vmem:[%s19153_s8 + $0x920] sm:$0xff]  ;;  %1931 = vst [vmem:[#allocation4 + $0x910] sm:$0xff] %v1930_v58  ;;  %1933 = vst [vmem:[#allocation4 + $0x918] sm:$0xff] %v1932_v59  ;;  %v1936_v61 = vld [vmem:[%s19153_s8 + $0x928] sm:$0xff] }
 0x1c2   :  { %1935 = vst [vmem:[#allocation4 + $0x920] sm:$0xff] %v1934_v60  ;;  %v1938_v62 = vld [vmem:[%s19153_s8 + $0x930] sm:$0xff]  ;;  %v1940_v63 = vld [vmem:[%s19153_s8 + $0x938] sm:$0xff]  ;;  %1937 = vst [vmem:[#allocation4 + $0x928] sm:$0xff] %v1936_v61 }
 0x1c3   :  { %1939 = vst [vmem:[#allocation4 + $0x930] sm:$0xff] %v1938_v62  ;;  %1941 = vst [vmem:[#allocation4 + $0x938] sm:$0xff] %v1940_v63  ;;  %v1942_v0 = vld [vmem:[%s19153_s8 + $0x940] sm:$0xff]  ;;  %v1944_v1 = vld [vmem:[%s19153_s8 + $0x948] sm:$0xff] }
 0x1c4   :  { %v1946_v2 = vld [vmem:[%s19153_s8 + $0x950] sm:$0xff]  ;;  %1943 = vst [vmem:[#allocation4 + $0x940] sm:$0xff] %v1942_v0  ;;  %1945 = vst [vmem:[#allocation4 + $0x948] sm:$0xff] %v1944_v1  ;;  %v1948_v3 = vld [vmem:[%s19153_s8 + $0x958] sm:$0xff] }
 0x1c5   :  { %1947 = vst [vmem:[#allocation4 + $0x950] sm:$0xff] %v1946_v2  ;;  %v1950_v4 = vld [vmem:[%s19153_s8 + $0x960] sm:$0xff]  ;;  %v1952_v5 = vld [vmem:[%s19153_s8 + $0x968] sm:$0xff]  ;;  %1949 = vst [vmem:[#allocation4 + $0x958] sm:$0xff] %v1948_v3 }
 0x1c6   :  { %1951 = vst [vmem:[#allocation4 + $0x960] sm:$0xff] %v1950_v4  ;;  %1953 = vst [vmem:[#allocation4 + $0x968] sm:$0xff] %v1952_v5  ;;  %v1954_v6 = vld [vmem:[%s19153_s8 + $0x970] sm:$0xff]  ;;  %v1956_v7 = vld [vmem:[%s19153_s8 + $0x978] sm:$0xff] }
 0x1c7   :  { %v1958_v8 = vld [vmem:[%s19153_s8 + $0x980] sm:$0xff]  ;;  %1955 = vst [vmem:[#allocation4 + $0x970] sm:$0xff] %v1954_v6  ;;  %1957 = vst [vmem:[#allocation4 + $0x978] sm:$0xff] %v1956_v7  ;;  %v1960_v9 = vld [vmem:[%s19153_s8 + $0x988] sm:$0xff] }
 0x1c8   :  { %1959 = vst [vmem:[#allocation4 + $0x980] sm:$0xff] %v1958_v8  ;;  %v1962_v10 = vld [vmem:[%s19153_s8 + $0x990] sm:$0xff]  ;;  %v1964_v11 = vld [vmem:[%s19153_s8 + $0x998] sm:$0xff]  ;;  %1961 = vst [vmem:[#allocation4 + $0x988] sm:$0xff] %v1960_v9 }
 0x1c9   :  { %1963 = vst [vmem:[#allocation4 + $0x990] sm:$0xff] %v1962_v10  ;;  %1965 = vst [vmem:[#allocation4 + $0x998] sm:$0xff] %v1964_v11  ;;  %v1966_v12 = vld [vmem:[%s19153_s8 + $0x9a0] sm:$0xff]  ;;  %v1968_v13 = vld [vmem:[%s19153_s8 + $0x9a8] sm:$0xff] }
 0x1ca   :  { %v1970_v14 = vld [vmem:[%s19153_s8 + $0x9b0] sm:$0xff]  ;;  %1967 = vst [vmem:[#allocation4 + $0x9a0] sm:$0xff] %v1966_v12  ;;  %1969 = vst [vmem:[#allocation4 + $0x9a8] sm:$0xff] %v1968_v13  ;;  %v1972_v15 = vld [vmem:[%s19153_s8 + $0x9b8] sm:$0xff] }
 0x1cb   :  { %1971 = vst [vmem:[#allocation4 + $0x9b0] sm:$0xff] %v1970_v14  ;;  %v1974_v16 = vld [vmem:[%s19153_s8 + $0x9c0] sm:$0xff]  ;;  %v1976_v17 = vld [vmem:[%s19153_s8 + $0x9c8] sm:$0xff]  ;;  %1973 = vst [vmem:[#allocation4 + $0x9b8] sm:$0xff] %v1972_v15 }
 0x1cc   :  { %1975 = vst [vmem:[#allocation4 + $0x9c0] sm:$0xff] %v1974_v16  ;;  %1977 = vst [vmem:[#allocation4 + $0x9c8] sm:$0xff] %v1976_v17  ;;  %v1978_v18 = vld [vmem:[%s19153_s8 + $0x9d0] sm:$0xff]  ;;  %v1980_v19 = vld [vmem:[%s19153_s8 + $0x9d8] sm:$0xff] }
 0x1cd   :  { %v1982_v20 = vld [vmem:[%s19153_s8 + $0x9e0] sm:$0xff]  ;;  %1979 = vst [vmem:[#allocation4 + $0x9d0] sm:$0xff] %v1978_v18  ;;  %1981 = vst [vmem:[#allocation4 + $0x9d8] sm:$0xff] %v1980_v19  ;;  %v1984_v21 = vld [vmem:[%s19153_s8 + $0x9e8] sm:$0xff] }
 0x1ce   :  { %1983 = vst [vmem:[#allocation4 + $0x9e0] sm:$0xff] %v1982_v20  ;;  %v1986_v22 = vld [vmem:[%s19153_s8 + $0x9f0] sm:$0xff]  ;;  %v1988_v23 = vld [vmem:[%s19153_s8 + $0x9f8] sm:$0xff]  ;;  %1985 = vst [vmem:[#allocation4 + $0x9e8] sm:$0xff] %v1984_v21 }
 0x1cf   :  { %1987 = vst [vmem:[#allocation4 + $0x9f0] sm:$0xff] %v1986_v22  ;;  %1989 = vst [vmem:[#allocation4 + $0x9f8] sm:$0xff] %v1988_v23  ;;  %v1990_v24 = vld [vmem:[%s19153_s8 + $0xa00] sm:$0xff]  ;;  %v1992_v25 = vld [vmem:[%s19153_s8 + $0xa08] sm:$0xff] }
 0x1d0   :  { %v1994_v26 = vld [vmem:[%s19153_s8 + $0xa10] sm:$0xff]  ;;  %1991 = vst [vmem:[#allocation4 + $0xa00] sm:$0xff] %v1990_v24  ;;  %1993 = vst [vmem:[#allocation4 + $0xa08] sm:$0xff] %v1992_v25  ;;  %v1996_v27 = vld [vmem:[%s19153_s8 + $0xa18] sm:$0xff] }
 0x1d1   :  { %1995 = vst [vmem:[#allocation4 + $0xa10] sm:$0xff] %v1994_v26  ;;  %v1998_v28 = vld [vmem:[%s19153_s8 + $0xa20] sm:$0xff]  ;;  %v2000_v29 = vld [vmem:[%s19153_s8 + $0xa28] sm:$0xff]  ;;  %1997 = vst [vmem:[#allocation4 + $0xa18] sm:$0xff] %v1996_v27 }
 0x1d2   :  { %1999 = vst [vmem:[#allocation4 + $0xa20] sm:$0xff] %v1998_v28  ;;  %2001 = vst [vmem:[#allocation4 + $0xa28] sm:$0xff] %v2000_v29  ;;  %v2002_v30 = vld [vmem:[%s19153_s8 + $0xa30] sm:$0xff]  ;;  %v2004_v31 = vld [vmem:[%s19153_s8 + $0xa38] sm:$0xff] }
 0x1d3   :  { %v2006_v32 = vld [vmem:[%s19153_s8 + $0xa40] sm:$0xff]  ;;  %2003 = vst [vmem:[#allocation4 + $0xa30] sm:$0xff] %v2002_v30  ;;  %2005 = vst [vmem:[#allocation4 + $0xa38] sm:$0xff] %v2004_v31  ;;  %v2008_v33 = vld [vmem:[%s19153_s8 + $0xa48] sm:$0xff] }
 0x1d4   :  { %2007 = vst [vmem:[#allocation4 + $0xa40] sm:$0xff] %v2006_v32  ;;  %v2010_v34 = vld [vmem:[%s19153_s8 + $0xa50] sm:$0xff]  ;;  %v2012_v35 = vld [vmem:[%s19153_s8 + $0xa58] sm:$0xff]  ;;  %2009 = vst [vmem:[#allocation4 + $0xa48] sm:$0xff] %v2008_v33 }
 0x1d5   :  { %2011 = vst [vmem:[#allocation4 + $0xa50] sm:$0xff] %v2010_v34  ;;  %2013 = vst [vmem:[#allocation4 + $0xa58] sm:$0xff] %v2012_v35  ;;  %v2014_v36 = vld [vmem:[%s19153_s8 + $0xa60] sm:$0xff]  ;;  %v2016_v37 = vld [vmem:[%s19153_s8 + $0xa68] sm:$0xff] }
 0x1d6   :  { %v2018_v38 = vld [vmem:[%s19153_s8 + $0xa70] sm:$0xff]  ;;  %2015 = vst [vmem:[#allocation4 + $0xa60] sm:$0xff] %v2014_v36  ;;  %2017 = vst [vmem:[#allocation4 + $0xa68] sm:$0xff] %v2016_v37  ;;  %v2020_v39 = vld [vmem:[%s19153_s8 + $0xa78] sm:$0xff] }
 0x1d7   :  { %2019 = vst [vmem:[#allocation4 + $0xa70] sm:$0xff] %v2018_v38  ;;  %v2022_v40 = vld [vmem:[%s19153_s8 + $0xa80] sm:$0xff]  ;;  %v2024_v41 = vld [vmem:[%s19153_s8 + $0xa88] sm:$0xff]  ;;  %2021 = vst [vmem:[#allocation4 + $0xa78] sm:$0xff] %v2020_v39 }
 0x1d8   :  { %2023 = vst [vmem:[#allocation4 + $0xa80] sm:$0xff] %v2022_v40  ;;  %2025 = vst [vmem:[#allocation4 + $0xa88] sm:$0xff] %v2024_v41  ;;  %v2026_v42 = vld [vmem:[%s19153_s8 + $0xa90] sm:$0xff]  ;;  %v2028_v43 = vld [vmem:[%s19153_s8 + $0xa98] sm:$0xff] }
 0x1d9   :  { %v2030_v44 = vld [vmem:[%s19153_s8 + $0xaa0] sm:$0xff]  ;;  %2027 = vst [vmem:[#allocation4 + $0xa90] sm:$0xff] %v2026_v42  ;;  %2029 = vst [vmem:[#allocation4 + $0xa98] sm:$0xff] %v2028_v43  ;;  %v2032_v45 = vld [vmem:[%s19153_s8 + $0xaa8] sm:$0xff] }
 0x1da   :  { %2031 = vst [vmem:[#allocation4 + $0xaa0] sm:$0xff] %v2030_v44  ;;  %v2034_v46 = vld [vmem:[%s19153_s8 + $0xab0] sm:$0xff]  ;;  %v2036_v47 = vld [vmem:[%s19153_s8 + $0xab8] sm:$0xff]  ;;  %2033 = vst [vmem:[#allocation4 + $0xaa8] sm:$0xff] %v2032_v45 }
 0x1db   :  { %2035 = vst [vmem:[#allocation4 + $0xab0] sm:$0xff] %v2034_v46  ;;  %2037 = vst [vmem:[#allocation4 + $0xab8] sm:$0xff] %v2036_v47  ;;  %v2038_v48 = vld [vmem:[%s19153_s8 + $0xac0] sm:$0xff]  ;;  %v2040_v49 = vld [vmem:[%s19153_s8 + $0xac8] sm:$0xff] }
 0x1dc   :  { %v2042_v50 = vld [vmem:[%s19153_s8 + $0xad0] sm:$0xff]  ;;  %2039 = vst [vmem:[#allocation4 + $0xac0] sm:$0xff] %v2038_v48  ;;  %2041 = vst [vmem:[#allocation4 + $0xac8] sm:$0xff] %v2040_v49  ;;  %v2044_v51 = vld [vmem:[%s19153_s8 + $0xad8] sm:$0xff] }
 0x1dd   :  { %2043 = vst [vmem:[#allocation4 + $0xad0] sm:$0xff] %v2042_v50  ;;  %v2046_v52 = vld [vmem:[%s19153_s8 + $0xae0] sm:$0xff]  ;;  %v2048_v53 = vld [vmem:[%s19153_s8 + $0xae8] sm:$0xff]  ;;  %2045 = vst [vmem:[#allocation4 + $0xad8] sm:$0xff] %v2044_v51 }
 0x1de   :  { %2047 = vst [vmem:[#allocation4 + $0xae0] sm:$0xff] %v2046_v52  ;;  %2049 = vst [vmem:[#allocation4 + $0xae8] sm:$0xff] %v2048_v53  ;;  %v2050_v54 = vld [vmem:[%s19153_s8 + $0xaf0] sm:$0xff]  ;;  %v2052_v55 = vld [vmem:[%s19153_s8 + $0xaf8] sm:$0xff] }
 0x1df   :  { %v2054_v56 = vld [vmem:[%s19153_s8 + $0xb00] sm:$0xff]  ;;  %2051 = vst [vmem:[#allocation4 + $0xaf0] sm:$0xff] %v2050_v54  ;;  %2053 = vst [vmem:[#allocation4 + $0xaf8] sm:$0xff] %v2052_v55  ;;  %v2056_v57 = vld [vmem:[%s19153_s8 + $0xb08] sm:$0xff] }
 0x1e0   :  { %2055 = vst [vmem:[#allocation4 + $0xb00] sm:$0xff] %v2054_v56  ;;  %v2058_v58 = vld [vmem:[%s19153_s8 + $0xb10] sm:$0xff]  ;;  %v2060_v59 = vld [vmem:[%s19153_s8 + $0xb18] sm:$0xff]  ;;  %2057 = vst [vmem:[#allocation4 + $0xb08] sm:$0xff] %v2056_v57 }
 0x1e1   :  { %2059 = vst [vmem:[#allocation4 + $0xb10] sm:$0xff] %v2058_v58  ;;  %2061 = vst [vmem:[#allocation4 + $0xb18] sm:$0xff] %v2060_v59  ;;  %v2062_v60 = vld [vmem:[%s19153_s8 + $0xb20] sm:$0xff]  ;;  %v2064_v61 = vld [vmem:[%s19153_s8 + $0xb28] sm:$0xff] }
 0x1e2   :  { %v2066_v62 = vld [vmem:[%s19153_s8 + $0xb30] sm:$0xff]  ;;  %2063 = vst [vmem:[#allocation4 + $0xb20] sm:$0xff] %v2062_v60  ;;  %2065 = vst [vmem:[#allocation4 + $0xb28] sm:$0xff] %v2064_v61  ;;  %v2068_v63 = vld [vmem:[%s19153_s8 + $0xb38] sm:$0xff] }
 0x1e3   :  { %2067 = vst [vmem:[#allocation4 + $0xb30] sm:$0xff] %v2066_v62  ;;  %v2070_v0 = vld [vmem:[%s19153_s8 + $0xb40] sm:$0xff]  ;;  %v2072_v1 = vld [vmem:[%s19153_s8 + $0xb48] sm:$0xff]  ;;  %2069 = vst [vmem:[#allocation4 + $0xb38] sm:$0xff] %v2068_v63 }
 0x1e4   :  { %2071 = vst [vmem:[#allocation4 + $0xb40] sm:$0xff] %v2070_v0  ;;  %2073 = vst [vmem:[#allocation4 + $0xb48] sm:$0xff] %v2072_v1  ;;  %v2074_v2 = vld [vmem:[%s19153_s8 + $0xb50] sm:$0xff]  ;;  %v2076_v3 = vld [vmem:[%s19153_s8 + $0xb58] sm:$0xff] }
 0x1e5   :  { %v2078_v4 = vld [vmem:[%s19153_s8 + $0xb60] sm:$0xff]  ;;  %2075 = vst [vmem:[#allocation4 + $0xb50] sm:$0xff] %v2074_v2  ;;  %2077 = vst [vmem:[#allocation4 + $0xb58] sm:$0xff] %v2076_v3  ;;  %v2080_v5 = vld [vmem:[%s19153_s8 + $0xb68] sm:$0xff] }
 0x1e6   :  { %2079 = vst [vmem:[#allocation4 + $0xb60] sm:$0xff] %v2078_v4  ;;  %v2082_v6 = vld [vmem:[%s19153_s8 + $0xb70] sm:$0xff]  ;;  %v2084_v7 = vld [vmem:[%s19153_s8 + $0xb78] sm:$0xff]  ;;  %2081 = vst [vmem:[#allocation4 + $0xb68] sm:$0xff] %v2080_v5 }
 0x1e7   :  { %2083 = vst [vmem:[#allocation4 + $0xb70] sm:$0xff] %v2082_v6  ;;  %2085 = vst [vmem:[#allocation4 + $0xb78] sm:$0xff] %v2084_v7  ;;  %v2086_v8 = vld [vmem:[%s19153_s8 + $0xb80] sm:$0xff]  ;;  %v2088_v9 = vld [vmem:[%s19153_s8 + $0xb88] sm:$0xff] }
 0x1e8   :  { %v2090_v10 = vld [vmem:[%s19153_s8 + $0xb90] sm:$0xff]  ;;  %2087 = vst [vmem:[#allocation4 + $0xb80] sm:$0xff] %v2086_v8  ;;  %2089 = vst [vmem:[#allocation4 + $0xb88] sm:$0xff] %v2088_v9  ;;  %v2092_v11 = vld [vmem:[%s19153_s8 + $0xb98] sm:$0xff] }
 0x1e9   :  { %2091 = vst [vmem:[#allocation4 + $0xb90] sm:$0xff] %v2090_v10  ;;  %v2094_v12 = vld [vmem:[%s19153_s8 + $0xba0] sm:$0xff]  ;;  %v2096_v13 = vld [vmem:[%s19153_s8 + $0xba8] sm:$0xff]  ;;  %2093 = vst [vmem:[#allocation4 + $0xb98] sm:$0xff] %v2092_v11 }
 0x1ea   :  { %2095 = vst [vmem:[#allocation4 + $0xba0] sm:$0xff] %v2094_v12  ;;  %2097 = vst [vmem:[#allocation4 + $0xba8] sm:$0xff] %v2096_v13  ;;  %v2098_v14 = vld [vmem:[%s19153_s8 + $0xbb0] sm:$0xff]  ;;  %v2100_v15 = vld [vmem:[%s19153_s8 + $0xbb8] sm:$0xff] }
 0x1eb   :  { %v2102_v16 = vld [vmem:[%s19153_s8 + $0xbc0] sm:$0xff]  ;;  %2099 = vst [vmem:[#allocation4 + $0xbb0] sm:$0xff] %v2098_v14  ;;  %2101 = vst [vmem:[#allocation4 + $0xbb8] sm:$0xff] %v2100_v15  ;;  %v2104_v17 = vld [vmem:[%s19153_s8 + $0xbc8] sm:$0xff] }
 0x1ec   :  { %2103 = vst [vmem:[#allocation4 + $0xbc0] sm:$0xff] %v2102_v16  ;;  %v2106_v18 = vld [vmem:[%s19153_s8 + $0xbd0] sm:$0xff]  ;;  %v2108_v19 = vld [vmem:[%s19153_s8 + $0xbd8] sm:$0xff]  ;;  %2105 = vst [vmem:[#allocation4 + $0xbc8] sm:$0xff] %v2104_v17 }
 0x1ed   :  { %2107 = vst [vmem:[#allocation4 + $0xbd0] sm:$0xff] %v2106_v18  ;;  %2109 = vst [vmem:[#allocation4 + $0xbd8] sm:$0xff] %v2108_v19  ;;  %v2110_v20 = vld [vmem:[%s19153_s8 + $0xbe0] sm:$0xff]  ;;  %v2112_v21 = vld [vmem:[%s19153_s8 + $0xbe8] sm:$0xff] }
 0x1ee   :  { %v2114_v22 = vld [vmem:[%s19153_s8 + $0xbf0] sm:$0xff]  ;;  %2111 = vst [vmem:[#allocation4 + $0xbe0] sm:$0xff] %v2110_v20  ;;  %2113 = vst [vmem:[#allocation4 + $0xbe8] sm:$0xff] %v2112_v21  ;;  %v2116_v23 = vld [vmem:[%s19153_s8 + $0xbf8] sm:$0xff] }
 0x1ef   :  { %2115 = vst [vmem:[#allocation4 + $0xbf0] sm:$0xff] %v2114_v22  ;;  %v2118_v24 = vld [vmem:[%s19153_s8 + $0xc00] sm:$0xff]  ;;  %v2120_v25 = vld [vmem:[%s19153_s8 + $0xc08] sm:$0xff]  ;;  %2117 = vst [vmem:[#allocation4 + $0xbf8] sm:$0xff] %v2116_v23 }
 0x1f0   :  { %2119 = vst [vmem:[#allocation4 + $0xc00] sm:$0xff] %v2118_v24  ;;  %2121 = vst [vmem:[#allocation4 + $0xc08] sm:$0xff] %v2120_v25  ;;  %v2122_v26 = vld [vmem:[%s19153_s8 + $0xc10] sm:$0xff]  ;;  %v2124_v27 = vld [vmem:[%s19153_s8 + $0xc18] sm:$0xff] }
 0x1f1   :  { %v2126_v28 = vld [vmem:[%s19153_s8 + $0xc20] sm:$0xff]  ;;  %2123 = vst [vmem:[#allocation4 + $0xc10] sm:$0xff] %v2122_v26  ;;  %2125 = vst [vmem:[#allocation4 + $0xc18] sm:$0xff] %v2124_v27  ;;  %v2128_v29 = vld [vmem:[%s19153_s8 + $0xc28] sm:$0xff] }
 0x1f2   :  { %2127 = vst [vmem:[#allocation4 + $0xc20] sm:$0xff] %v2126_v28  ;;  %v2130_v30 = vld [vmem:[%s19153_s8 + $0xc30] sm:$0xff]  ;;  %v2132_v31 = vld [vmem:[%s19153_s8 + $0xc38] sm:$0xff]  ;;  %2129 = vst [vmem:[#allocation4 + $0xc28] sm:$0xff] %v2128_v29 }
 0x1f3   :  { %2131 = vst [vmem:[#allocation4 + $0xc30] sm:$0xff] %v2130_v30  ;;  %2133 = vst [vmem:[#allocation4 + $0xc38] sm:$0xff] %v2132_v31  ;;  %v2134_v32 = vld [vmem:[%s19153_s8 + $0xc40] sm:$0xff]  ;;  %v2136_v33 = vld [vmem:[%s19153_s8 + $0xc48] sm:$0xff] }
 0x1f4   :  { %v2138_v34 = vld [vmem:[%s19153_s8 + $0xc50] sm:$0xff]  ;;  %2135 = vst [vmem:[#allocation4 + $0xc40] sm:$0xff] %v2134_v32  ;;  %2137 = vst [vmem:[#allocation4 + $0xc48] sm:$0xff] %v2136_v33  ;;  %v2140_v35 = vld [vmem:[%s19153_s8 + $0xc58] sm:$0xff] }
 0x1f5   :  { %2139 = vst [vmem:[#allocation4 + $0xc50] sm:$0xff] %v2138_v34  ;;  %v2142_v36 = vld [vmem:[%s19153_s8 + $0xc60] sm:$0xff]  ;;  %v2144_v37 = vld [vmem:[%s19153_s8 + $0xc68] sm:$0xff]  ;;  %2141 = vst [vmem:[#allocation4 + $0xc58] sm:$0xff] %v2140_v35 }
 0x1f6   :  { %2143 = vst [vmem:[#allocation4 + $0xc60] sm:$0xff] %v2142_v36  ;;  %2145 = vst [vmem:[#allocation4 + $0xc68] sm:$0xff] %v2144_v37  ;;  %v2146_v38 = vld [vmem:[%s19153_s8 + $0xc70] sm:$0xff]  ;;  %v2148_v39 = vld [vmem:[%s19153_s8 + $0xc78] sm:$0xff] }
 0x1f7   :  { %2147 = vst [vmem:[#allocation4 + $0xc70] sm:$0xff] %v2146_v38  ;;  %2149 = vst [vmem:[#allocation4 + $0xc78] sm:$0xff] %v2148_v39 }
 0x1f8   :  { %2157 = vsyncadd [#allocation5 + $0x2], 51200  ;;  %v13621_v40 = vld [vmem:[%s19146_s1 + $0x78] sm:$0xff]   ;;  %v13625_v44 = vld [vmem:[%s19146_s1 + $0x70] sm:$0xff]   ;;  %vm15179_vm0 = vmmov 0   ;;  %vm3469_vm1 = vcmask 64512  }
 0x1f9   :  { %v13622_v41 = vld [vmem:[%s19146_s1 + $0xf8] sm:$0xff]   ;;  %13120 = vmatprep.subr.bf16.mxu0 %v13621_v40  ;;  %v13626_v45 = vld [vmem:[%s19146_s1 + $0xf0] sm:$0xff]   ;;  %v13629_v48 = vld [vmem:[%s19146_s1 + $0x68] sm:$0xff]  }
 0x1fa   :  { %v13623_v42 = vld [vmem:[%s19146_s1 + $0x38] sm:$0xff]   ;;  %13166 = vmatprep.subr.bf16.mxu1 %v13622_v41  ;;  %v13627_v46 = vld [vmem:[%s19146_s1 + $0x30] sm:$0xff]   ;;  %v13630_v49 = vld [vmem:[%s19146_s1 + $0xe8] sm:$0xff]  }
 0x1fb   :  { %v13624_v43 = vld [vmem:[%s19146_s1 + $0xb8] sm:$0xff]   ;;  %13121 = vmatpush3.bf16.msra.mxu0 %v13623_v42  ;;  %v13628_v47 = vld [vmem:[%s19146_s1 + $0xb0] sm:$0xff]   ;;  %v13631_v50 = vld [vmem:[%s19146_s1 + $0x28] sm:$0xff]  }
 0x1fc   :  { %13167 = vmatpush3.bf16.msra.mxu1 %v13624_v43  ;;  %13122 = vmatprep.subr.bf16.mxu0 %v13625_v44  ;;  %v13632_v51 = vld [vmem:[%s19146_s1 + $0xa8] sm:$0xff]   ;;  %v13633_v52 = vld [vmem:[%s19146_s1 + $0x60] sm:$0xff]   ;;  %v13637_v56 = vld [vmem:[%s19146_s1 + $0x58] sm:$0xff]  }
 0x1fd   :  { %13168 = vmatprep.subr.bf16.mxu1 %v13626_v45  ;;  %v13634_v53 = vld [vmem:[%s19146_s1 + $0xe0] sm:$0xff]   ;;  %v13638_v57 = vld [vmem:[%s19146_s1 + $0xd8] sm:$0xff]   ;;  %v13641_v60 = vld [vmem:[%s19146_s1 + $0x50] sm:$0xff]  }
 0x1fe   :  { %v13635_v54 = vld [vmem:[%s19146_s1 + $0x20] sm:$0xff]   ;;  %v13639_v58 = vld [vmem:[%s19146_s1 + $0x18] sm:$0xff]   ;;  %v13642_v61 = vld [vmem:[%s19146_s1 + $0xd0] sm:$0xff]  }
 0x1ff   :  { %13123 = vmatpush3.bf16.msra.mxu0 %v13627_v46  ;;  %v13636_v55 = vld [vmem:[%s19146_s1 + $0xa0] sm:$0xff]   ;;  %v13640_v59 = vld [vmem:[%s19146_s1 + $0x98] sm:$0xff]   ;;  %v13643_v62 = vld [vmem:[%s19146_s1 + $0x10] sm:$0xff]  }
 0x200   :  { %13169 = vmatpush3.bf16.msra.mxu1 %v13628_v47  ;;  %13124 = vmatprep.subr.bf16.mxu0 %v13629_v48  ;;  %v13644_v63 = vld [vmem:[%s19146_s1 + $0x90] sm:$0xff]   ;;  %v13645_v0 = vld [vmem:[%s19146_s1 + $0x48] sm:$0xff]   ;;  %v13649_v4 = vld [vmem:[%s19146_s1 + $0x40] sm:$0xff]  }
 0x201   :  { %13170 = vmatprep.subr.bf16.mxu1 %v13630_v49  ;;  %v13646_v1 = vld [vmem:[%s19146_s1 + $0xc8] sm:$0xff]   ;;  %v13650_v5 = vld [vmem:[%s19146_s1 + $0xc0] sm:$0xff]   ;;  %v13653_v16 = vld [vmem:[%s19146_s1 + $0x178] sm:$0xff]  }
 0x202   :  { %v13647_v2 = vld [vmem:[%s19146_s1 + $0x8] sm:$0xff]   ;;  %v13651_v6 = vld [vmem:[%s19146_s1] sm:$0xff]   ;;  %v13654_v17 = vld [vmem:[%s19146_s1 + $0x138] sm:$0xff]  }
 0x203   :  { %13125 = vmatpush3.bf16.msra.mxu0 %v13631_v50  ;;  %v13648_v3 = vld [vmem:[%s19146_s1 + $0x88] sm:$0xff]   ;;  %v13652_v7 = vld [vmem:[%s19146_s1 + $0x80] sm:$0xff]   ;;  %v13655_v18 = vld [vmem:[%s19146_s1 + $0x1f8] sm:$0xff]  }
 0x204   :  { %13171 = vmatpush3.bf16.msra.mxu1 %v13632_v51  ;;  %13126 = vmatprep.subr.bf16.mxu0 %v13633_v52  ;;  %v2158_v8 = vld [vmem:[%s19145_s0] sm:$0xff]  ;;  %v2159_v12 = vld [vmem:[%s19145_s0 + $0x8] sm:$0xff]  ;;  %v13656_v19 = vld [vmem:[%s19146_s1 + $0x1b8] sm:$0xff]  }
 0x205   :  { %13172 = vmatprep.subr.bf16.mxu1 %v13634_v53  ;;  %v2162_v9 = vld [vmem:[%s19145_s0 + $0x20] sm:$0xff]  ;;  %v2163_v13 = vld [vmem:[%s19145_s0 + $0x28] sm:$0xff]  ;;  %v13657_v20 = vld [vmem:[%s19146_s1 + $0x170] sm:$0xff]  }
 0x206   :  { %v12009_v10 = vcombine.low %v2158_v8, %v2162_v9  ;;  %v12010_v11 = vcombine.high %v2158_v8, %v2162_v9  ;;  %v12011_v14 = vcombine.low %v2159_v12, %v2163_v13  ;;  %v12012_v15 = vcombine.high %v2159_v12, %v2163_v13  ;;  %v13658_v21 = vld [vmem:[%s19146_s1 + $0x130] sm:$0xff]   ;;  %v2166_v22 = vld [vmem:[%s19145_s0 + $0x40] sm:$0xff]  ;;  %v2167_v24 = vld [vmem:[%s19145_s0 + $0x48] sm:$0xff] }
 0x207   :  { %13127 = vmatpush3.bf16.msra.mxu0 %v13635_v54  ;;  %v2170_v23 = vld [vmem:[%s19145_s0 + $0x60] sm:$0xff]  ;;  %v2171_v25 = vld [vmem:[%s19145_s0 + $0x68] sm:$0xff]  ;;  %v13659_v28 = vld [vmem:[%s19146_s1 + $0x1f0] sm:$0xff]  }
 0x208   :  { %13173 = vmatpush3.bf16.msra.mxu1 %v13636_v55  ;;  %13128 = vmatprep.subr.bf16.mxu0 %v13637_v56  ;;  %v12018_v26 = vcombine.high %v2166_v22, %v2170_v23  ;;  %v12020_v27 = vcombine.high %v2167_v24, %v2171_v25  ;;  %v12017_v29 = vcombine.low %v2166_v22, %v2170_v23  ;;  %v13660_v31 = vld [vmem:[%s19146_s1 + $0x1b0] sm:$0xff]   ;;  %v13661_v32 = vld [vmem:[%s19146_s1 + $0x168] sm:$0xff]   ;;  %v2174_v36 = vld [vmem:[%s19145_s0 + $0x80] sm:$0xff] }
 0x209   :  { %13174 = vmatprep.subr.bf16.mxu1 %v13638_v57  ;;  %2949 = vmatprep.mubr.bf16.mxu0 %v12010_v11  ;;  %v12019_v30 = vcombine.low %v2167_v24, %v2171_v25  ;;  %v13662_v33 = vld [vmem:[%s19146_s1 + $0x128] sm:$0xff]   ;;  %v2178_v37 = vld [vmem:[%s19145_s0 + $0xa0] sm:$0xff]  ;;  %v13669_v48 = vld [vmem:[%s19146_s1 + $0x158] sm:$0xff]  }
 0x20a   :  { %3022 = vmatprep.mubr.bf16.mxu1 %v12012_v15  ;;  %v13663_v34 = vld [vmem:[%s19146_s1 + $0x1e8] sm:$0xff]   ;;  %v12026_v39 = vcombine.high %v2174_v36, %v2178_v37  ;;  %v12025_v41 = vcombine.low %v2174_v36, %v2178_v37  ;;  %v13665_v43 = vld [vmem:[%s19146_s1 + $0x160] sm:$0xff]   ;;  %v13670_v49 = vld [vmem:[%s19146_s1 + $0x118] sm:$0xff]  }
 0x20b   :  { %13129 = vmatpush3.bf16.msra.mxu0 %v13639_v58  ;;  %v13664_v35 = vld [vmem:[%s19146_s1 + $0x1a8] sm:$0xff]   ;;  %v13666_v45 = vld [vmem:[%s19146_s1 + $0x120] sm:$0xff]   ;;  %v13671_v50 = vld [vmem:[%s19146_s1 + $0x1d8] sm:$0xff]  }
 0x20c   :  { %13175 = vmatpush3.bf16.msra.mxu1 %v13640_v59  ;;  %13130 = vmatprep.subr.bf16.mxu0 %v13641_v60  ;;  %v2175_v38 = vld [vmem:[%s19145_s0 + $0x88] sm:$0xff]  ;;  %v13667_v46 = vld [vmem:[%s19146_s1 + $0x1e0] sm:$0xff]   ;;  %v13672_v58 = vld [vmem:[%s19146_s1 + $0x198] sm:$0xff]  }
 0x20d   :  { %13176 = vmatprep.subr.bf16.mxu1 %v13642_v61  ;;  %v2179_v40 = vld [vmem:[%s19145_s0 + $0xa8] sm:$0xff]  ;;  %v13668_v47 = vld [vmem:[%s19146_s1 + $0x1a0] sm:$0xff]   ;;  %v13673_v60 = vld [vmem:[%s19146_s1 + $0x150] sm:$0xff]  }
 0x20e   :  { %v12028_v42 = vcombine.high %v2175_v38, %v2179_v40  ;;  %v12027_v44 = vcombine.low %v2175_v38, %v2179_v40  ;;  %v2182_v51 = vld [vmem:[%s19145_s0 + $0xc0] sm:$0xff]  ;;  %v2183_v54 = vld [vmem:[%s19145_s0 + $0xc8] sm:$0xff]  ;;  %v13674_v61 = vld [vmem:[%s19146_s1 + $0x110] sm:$0xff]  }
 0x20f   :  { %13131 = vmatpush3.bf16.msra.mxu0 %v13643_v62  ;;  %v2186_v52 = vld [vmem:[%s19145_s0 + $0xe0] sm:$0xff]  ;;  %v2187_v55 = vld [vmem:[%s19145_s0 + $0xe8] sm:$0xff]  ;;  %v13675_v62 = vld [vmem:[%s19146_s1 + $0x1d0] sm:$0xff]  }
 0x210   :  { %13177 = vmatpush3.bf16.msra.mxu1 %v13644_v63  ;;  %13132 = vmatprep.subr.bf16.mxu0 %v13645_v0  ;;  %v12034_v53 = vcombine.high %v2182_v51, %v2186_v52  ;;  %v12033_v56 = vcombine.low %v2182_v51, %v2186_v52  ;;  %v12036_v57 = vcombine.high %v2183_v54, %v2187_v55  ;;  %v13676_v63 = vld [vmem:[%s19146_s1 + $0x190] sm:$0xff]   ;;  %v13677_v0 = vld [vmem:[%s19146_s1 + $0x148] sm:$0xff]   ;;  %v13681_v12 = vld [vmem:[%s19146_s1 + $0x140] sm:$0xff]  }
 0x211   :  { %13178 = vmatprep.subr.bf16.mxu1 %v13646_v1  ;;  %v12035_v59 = vcombine.low %v2183_v54, %v2187_v55  ;;  %v2190_v1 = vld [vmem:[%s19145_s0 + $0x100] sm:$0xff]  ;;  %v13680_v11 = vld [vmem:[%s19146_s1 + $0x188] sm:$0xff]   ;;  %v2168_v22 = vld [vmem:[%s19145_s0 + $0x50] sm:$0xff] }
 0x212   :  { %v13682_v13 = vld [vmem:[%s19146_s1 + $0x100] sm:$0xff]   ;;  %v2172_v23 = vld [vmem:[%s19145_s0 + $0x70] sm:$0xff]  ;;  %v2185_v40 = vld [vmem:[%s19145_s0 + $0xd8] sm:$0xff] }
 0x213   :  { %13133 = vmatpush3.bf16.msra.mxu0 %v13647_v2  ;;  %v2194_v2 = vld [vmem:[%s19145_s0 + $0x120] sm:$0xff]  ;;  %v2184_v38 = vld [vmem:[%s19145_s0 + $0xd0] sm:$0xff] }
 0x214   :  { %13179 = vmatpush3.bf16.msra.mxu1 %v13648_v3  ;;  %13134 = vmatprep.subr.bf16.mxu0 %v13649_v4  ;;  %v2191_v3 = vld [vmem:[%s19145_s0 + $0x108] sm:$0xff]  ;;  %v12041_v8 = vcombine.low %v2190_v1, %v2194_v2  ;;  %v13684_v15 = vld [vmem:[%s19146_s1 + $0x180] sm:$0xff]  }
 0x215   :  { %13180 = vmatprep.subr.bf16.mxu1 %v13650_v5  ;;  %v2195_v4 = vld [vmem:[%s19145_s0 + $0x128] sm:$0xff]  ;;  %v12042_v5 = vcombine.high %v2190_v1, %v2194_v2  ;;  %v18595_v2 = vld [vmem:[%s19148_s3 + $0x20] sm:$0xff] }
 0x216   :  { %v12043_v9 = vcombine.low %v2191_v3, %v2195_v4 }
 0x217   :  { %13135 = vmatpush3.bf16.msra.mxu0 %v13651_v6  ;;  %v12044_v6 = vcombine.high %v2191_v3, %v2195_v4  ;;  %v3229_v3 = vmul.f32 %v18595_v2, %v18595_v2 }
 0x218   :  { %13181 = vmatpush3.bf16.msra.mxu1 %v13652_v7  ;;  %13212 = vmatprep.subr.bf16.mxu0 %v13653_v16  ;;  %v13678_v7 = vld [vmem:[%s19146_s1 + $0x108] sm:$0xff]   ;;  %v2160_v16 = vld [vmem:[%s19145_s0 + $0x10] sm:$0xff] }
 0x219   :  { %13258 = vmatprep.subr.bf16.mxu1 %v13655_v18  ;;  %v2161_v18 = vld [vmem:[%s19145_s0 + $0x18] sm:$0xff] }
 0x21a   :  { %2950 = vmatmul.mubr.bf16.vlgmr.msra.gmra.mxu0 %v12009_v10  ;;  %v13679_v10 = vld [vmem:[%s19146_s1 + $0x1c8] sm:$0xff]  }
 0x21b   :  { %3023 = vmatmul.mubr.bf16.vlgmr.msra.gmra.mxu1 %v12011_v14  ;;  %13213 = vmatpush3.bf16.msra.mxu0 %v13654_v17  ;;  %v13683_v14 = vld [vmem:[%s19146_s1 + $0x1c0] sm:$0xff]   ;;  %v2164_v17 = vld [vmem:[%s19145_s0 + $0x30] sm:$0xff] }
 0x21c   :  { %13259 = vmatpush3.bf16.msra.mxu1 %v13656_v19  ;;  %13214 = vmatprep.subr.bf16.mxu0 %v13657_v20  ;;  %v12013_v19 = vcombine.low %v2160_v16, %v2164_v17  ;;  %v12014_v20 = vcombine.high %v2160_v16, %v2164_v17 }
 0x21d   :  { %2957 = vmatprep.mubr.bf16.mxu0 %v12018_v26  ;;  %3030 = vmatprep.mubr.bf16.mxu1 %v12020_v27  ;;  %v12022_v26 = vcombine.high %v2168_v22, %v2172_v23  ;;  %v2169_v27 = vld [vmem:[%s19145_s0 + $0x58] sm:$0xff] }
 0x21e   :  { %13260 = vmatprep.subr.bf16.mxu1 %v13659_v28  ;;  %v2173_v28 = vld [vmem:[%s19145_s0 + $0x78] sm:$0xff] }
 0x21f   :  { %13215 = vmatpush3.bf16.msra.mxu0 %v13658_v21  ;;  %v2165_v21 = vld [vmem:[%s19145_s0 + $0x38] sm:$0xff] }
 0x220   :  { %13216 = vmatprep.subr.bf16.mxu0 %v13661_v32  ;;  %13261 = vmatpush3.bf16.msra.mxu1 %v13660_v31  ;;  %v12015_v24 = vcombine.low %v2161_v18, %v2165_v21  ;;  %v12016_v25 = vcombine.high %v2161_v18, %v2165_v21  ;;  %v2180_v31 = vld [vmem:[%s19145_s0 + $0xb0] sm:$0xff]  ;;  %v2177_v32 = vld [vmem:[%s19145_s0 + $0x98] sm:$0xff] }
 0x221   :  { %13262 = vmatprep.subr.bf16.mxu1 %v13663_v34  ;;  %v12021_v34 = vcombine.low %v2168_v22, %v2172_v23 }
 0x222   :  { %2958 = vmatmul.mubr.bf16.gmra.mxu0 %v12017_v29  ;;  %v12024_v29 = vcombine.high %v2169_v27, %v2173_v28 }
 0x223   :  { %3031 = vmatmul.mubr.bf16.gmra.mxu1 %v12019_v30  ;;  %13217 = vmatpush3.bf16.msra.mxu0 %v13662_v33  ;;  %v2176_v30 = vld [vmem:[%s19145_s0 + $0x90] sm:$0xff]  ;;  %v2181_v33 = vld [vmem:[%s19145_s0 + $0xb8] sm:$0xff] }
 0x224   :  { %13263 = vmatpush3.bf16.msra.mxu1 %v13664_v35  ;;  %2965 = vmatprep.mubr.bf16.mxu0 %v12026_v39  ;;  %v12023_v35 = vcombine.low %v2169_v27, %v2173_v28  ;;  %v12030_v36 = vcombine.high %v2176_v30, %v2180_v31  ;;  %v12032_v37 = vcombine.high %v2177_v32, %v2181_v33  ;;  %v2188_v39 = vld [vmem:[%s19145_s0 + $0xf0] sm:$0xff] }
 0x225   :  { %3038 = vmatprep.mubr.bf16.mxu1 %v12028_v42  ;;  %13218 = vmatprep.subr.bf16.mxu0 %v13665_v43  ;;  %v12029_v42 = vcombine.low %v2176_v30, %v2180_v31  ;;  %v12031_v43 = vcombine.low %v2177_v32, %v2181_v33 }
 0x226   :  { %13264 = vmatprep.subr.bf16.mxu1 %v13667_v46  ;;  %v2192_v46 = vld [vmem:[%s19145_s0 + $0x110] sm:$0xff] }
 0x227   :  { %13219 = vmatpush3.bf16.msra.mxu0 %v13666_v45 }
 0x228   :  { %13265 = vmatpush3.bf16.msra.mxu1 %v13668_v47  ;;  %13220 = vmatprep.subr.bf16.mxu0 %v13669_v48  ;;  %v2196_v47 = vld [vmem:[%s19145_s0 + $0x130] sm:$0xff]  ;;  %v2193_v48 = vld [vmem:[%s19145_s0 + $0x118] sm:$0xff] }
 0x229   :  { %13266 = vmatprep.subr.bf16.mxu1 %v13671_v50  ;;  %v12037_v50 = vcombine.low %v2184_v38, %v2188_v39  ;;  %v12046_v52 = vcombine.high %v2192_v46, %v2196_v47  ;;  %v12045_v54 = vcombine.low %v2192_v46, %v2196_v47 }
 0x22a   :  { %2966 = vmatmul.mubr.bf16.gmra.mxu0 %v12025_v41  ;;  %v2189_v41 = vld [vmem:[%s19145_s0 + $0xf8] sm:$0xff] }
 0x22b   :  { %3039 = vmatmul.mubr.bf16.gmra.mxu1 %v12027_v44  ;;  %13221 = vmatpush3.bf16.msra.mxu0 %v13670_v49  ;;  %v12038_v44 = vcombine.high %v2184_v38, %v2188_v39  ;;  %v12040_v45 = vcombine.high %v2185_v40, %v2189_v41  ;;  %v2197_v49 = vld [vmem:[%s19145_s0 + $0x138] sm:$0xff]  ;;  %v12039_v51 = vcombine.low %v2185_v40, %v2189_v41 }
 0x22c   :  { %2973 = vmatprep.mubr.bf16.mxu0 %v12034_v53  ;;  %3046 = vmatprep.mubr.bf16.mxu1 %v12036_v57  ;;  %v12048_v53 = vcombine.high %v2193_v48, %v2197_v49  ;;  %v12047_v55 = vcombine.low %v2193_v48, %v2197_v49  ;;  %v18570_v57 = vld [vmem:[%s19148_s3] sm:$0xff] }
 0x22d   :  { %13267 = vmatpush3.bf16.msra.mxu1 %v13672_v58  ;;  %13222 = vmatprep.subr.bf16.mxu0 %v13673_v60  ;;  %v18580_v60 = vld [vmem:[%s19148_s3 + $0x18] sm:$0xff] }
 0x22e   :  { %13268 = vmatprep.subr.bf16.mxu1 %v13675_v62 }
 0x22f   :  { %13223 = vmatpush3.bf16.msra.mxu0 %v13674_v61  ;;  %v18586_v61 = vld [vmem:[%s19148_s3 + $0x10] sm:$0xff] }
 0x230   :  { %13224 = vmatprep.subr.bf16.mxu0 %v13677_v0  ;;  %v3227_v62 = vmul.f32 %v18586_v61, %v18586_v61  ;;  %v3228_v0 = vmul.f32 %v18580_v60, %v18580_v60 }
 0x231   :  { %13269 = vmatpush3.bf16.msra.mxu1 %v13676_v63 }
 0x232   :  { %2974 = vmatmul.mubr.bf16.gmra.mxu0 %v12033_v56  ;;  %13270 = vmatprep.subr.bf16.mxu1 %v13679_v10  ;;  %v18564_v56 = vld [vmem:[%s19148_s3 + $0x8] sm:$0xff] }
 0x233   :  { %3047 = vmatmul.mubr.bf16.gmra.mxu1 %v12035_v59  ;;  %2981 = vmatprep.mubr.bf16.mxu0 %v12042_v5  ;;  %v3226_v58 = vmul.f32 %v18564_v56, %v18564_v56  ;;  %v3225_v59 = vmul.f32 %v18570_v57, %v18570_v57 }
 0x234   :  { %3054 = vmatprep.mubr.bf16.mxu1 %v12044_v6  ;;  %13225 = vmatpush3.bf16.msra.mxu0 %v13678_v7 }
 0x235   :  { %13271 = vmatpush3.bf16.msra.mxu1 %v13680_v11  ;;  %13226 = vmatprep.subr.bf16.mxu0 %v13681_v12  ;;  %v3230_v63 = vadd.f32 %v3226_v58, %v3225_v59 }
 0x236   :  { %13272 = vmatprep.subr.bf16.mxu1 %v13683_v14 }
 0x237   :  { %v3231_v1 = vadd.f32 %v3230_v63, %v3227_v62 }
 0x238   :  { %13227 = vmatpush3.bf16.msra.mxu0 %v13682_v13 }
 0x239   :  { %13273 = vmatpush3.bf16.msra.mxu1 %v13684_v15  ;;  %v3232_v4 = vadd.f32 %v3231_v1, %v3228_v0 }
 0x23a   :  { %2982 = vmatmul.mubr.bf16.gmra.mxu0 %v12041_v8  ;;  %3266 = vmatprep.subr.mxu1 %v18564_v56  ;;  %v18602_v8 = vld [vmem:[%s19147_s2] ss:$0 sm:$0xff] }
 0x23b   :  { %3055 = vmatmul.mubr.bf16.gmra.mxu1 %v12043_v9  ;;  %3095 = vmatprep.mubr.bf16.mxu0 %v12014_v20  ;;  %v3233_v5 = vadd.f32 %v3232_v4, %v3229_v3 }
 0x23c   :  { %3168 = vmatprep.mubr.bf16.mxu1 %v12016_v25 }
 0x23d   :  { %3234 = vadd.xlane.f32.xlu0 %v3233_v5 }
 0x242   :  { %3096 = vmatmul.mubr.bf16.vlgmr.msra.gmra.mxu0 %v12013_v19 }
 0x243   :  { %3169 = vmatmul.mubr.bf16.vlgmr.msra.gmra.mxu1 %v12015_v24  ;;  %3103 = vmatprep.mubr.bf16.mxu0 %v12022_v26 }
 0x244   :  { %3176 = vmatprep.mubr.bf16.mxu1 %v12024_v29  ;;  %3267 = vmatpush1.xpose.msra.mxu1 %v18570_v57 }
 0x245   :  { %3336 = vmatprep.subr.mxu1 %v18580_v60 }
 0x24a   :  { %3104 = vmatmul.mubr.bf16.gmra.mxu0 %v12021_v34 }
 0x24b   :  { %3177 = vmatmul.mubr.bf16.gmra.mxu1 %v12023_v35  ;;  %3111 = vmatprep.mubr.bf16.mxu0 %v12030_v36 }
 0x24c   :  { %3184 = vmatprep.mubr.bf16.mxu1 %v12032_v37 }
 0x252   :  { %3112 = vmatmul.mubr.bf16.gmra.mxu0 %v12029_v42 }
 0x253   :  { %3185 = vmatmul.mubr.bf16.gmra.mxu1 %v12031_v43  ;;  %3119 = vmatprep.mubr.bf16.mxu0 %v12038_v44 }
 0x254   :  { %3192 = vmatprep.mubr.bf16.mxu1 %v12040_v45 }
 0x25a   :  { %3120 = vmatmul.mubr.bf16.gmra.mxu0 %v12037_v50 }
 0x25b   :  { %3193 = vmatmul.mubr.bf16.gmra.mxu1 %v12039_v51  ;;  %3127 = vmatprep.mubr.bf16.mxu0 %v12046_v52 }
 0x25c   :  { %3200 = vmatprep.mubr.bf16.mxu1 %v12048_v53 }
 0x262   :  { %3128 = vmatmul.mubr.bf16.gmra.mxu0 %v12045_v54 }
 0x263   :  { %3201 = vmatmul.mubr.bf16.gmra.mxu1 %v12047_v55 }
 0x2da   :  { %v13136_v6 = vpop.f32.mrf.mxu0 }
 0x2db   :  { %v13182_v7 = vpop.f32.mrf.mxu1 }
 0x2dc   :  { %v13137_v9 = vpop.f32.mrf.mxu0 }
 0x2dd   :  { %v13138_v10 = vadd.f32 %v13137_v9, %v13136_v6  ;;  %v13183_v11 = vpop.f32.mrf.mxu1 }
 0x2de   :  { %v13184_v12 = vadd.f32 %v13183_v11, %v13182_v7  ;;  %v18604_v13 = vpop.f32.mrf.mxu0 }
 0x2df   :  { %v2952_v14 = vadd.f32 %v13138_v10, %v18602_v8  ;;  %v18607_v15 = vpop.f32.mrf.mxu1 }
 0x2e0   :  { %v13140_v16 = vpop.f32.mrf.mxu0 }
 0x2e1   :  { %v3025_v17 = vadd.f32 %v13184_v12, %v2952_v14  ;;  %v18609_v18 = vpop.f32.mrf.mxu1 }
 0x2e2   :  { %v13142_v19 = vpop.f32.mrf.mxu0 }
 0x2e3   :  { %v13188_v20 = vpop.f32.mrf.mxu1 }
 0x2e4   :  { %v13143_v21 = vpop.f32.mrf.mxu0 }
 0x2e5   :  { %v13144_v22 = vadd.f32 %v13143_v21, %v13142_v19  ;;  %v13189_v23 = vpop.f32.mrf.mxu1 }
 0x2e6   :  { %v13190_v24 = vadd.f32 %v13189_v23, %v13188_v20  ;;  %v13145_v25 = vpop.f32.mrf.mxu0  ;;  %v13141_v23 = vadd.f32 %v13140_v16, %v18604_v13 }
 0x2e7   :  { %v2960_v26 = vadd.f32 %v13144_v22, %v18602_v8  ;;  %v18612_v27 = vpop.f32.mrf.mxu1 }
 0x2e8   :  { %v13146_v28 = vpop.f32.mrf.mxu0 }
 0x2e9   :  { %v18614_v29 = vadd.f32 %v13190_v24, %v2960_v26  ;;  %v13192_v30 = vpop.f32.mrf.mxu1  ;;  %v13147_v26 = vadd.f32 %v13146_v28, %v13145_v25 }
 0x2ea   :  { %v13148_v31 = vpop.f32.mrf.mxu0  ;;  %v13193_v16 = vadd.f32 %v13192_v30, %v18612_v27 }
 0x2eb   :  { %v13194_v32 = vpop.f32.mrf.mxu1 }
 0x2ec   :  { %v13149_v33 = vpop.f32.mrf.mxu0 }
 0x2ed   :  { %v13150_v34 = vadd.f32 %v13149_v33, %v13148_v31  ;;  %v13195_v35 = vpop.f32.mrf.mxu1 }
 0x2ee   :  { %v13196_v36 = vadd.f32 %v13195_v35, %v13194_v32  ;;  %v18616_v37 = vpop.f32.mrf.mxu0  ;;  %v2955_v35 = vadd.f32 %v13141_v23, %v18602_v8 }
 0x2ef   :  { %v2968_v38 = vadd.f32 %v13150_v34, %v18602_v8  ;;  %v18619_v39 = vpop.f32.mrf.mxu1 }
 0x2f0   :  { %v18621_v40 = vpop.f32.mrf.mxu0 }
 0x2f1   :  { %v18623_v41 = vadd.f32 %v13196_v36, %v2968_v38  ;;  %v18625_v42 = vpop.f32.mrf.mxu1  ;;  %v2963_v38 = vadd.f32 %v13147_v26, %v18602_v8 }
 0x2f2   :  { %v13154_v43 = vpop.f32.mrf.mxu0 }
 0x2f3   :  { %v13200_v44 = vpop.f32.mrf.mxu1 }
 0x2f4   :  { %v13155_v45 = vpop.f32.mrf.mxu0 }
 0x2f5   :  { %v13156_v46 = vadd.f32 %v13155_v45, %v13154_v43  ;;  %v13201_v47 = vpop.f32.mrf.mxu1 }
 0x2f6   :  { %v13202_v48 = vadd.f32 %v13201_v47, %v13200_v44  ;;  %v18627_v49 = vpop.f32.mrf.mxu0 }
 0x2f7   :  { %v2976_v50 = vadd.f32 %v13156_v46, %v18602_v8  ;;  %v18630_v51 = vpop.f32.mrf.mxu1 }
 0x2f8   :  { %v18632_v52 = vpop.f32.mrf.mxu0 }
 0x2f9   :  { %v18634_v53 = vadd.f32 %v13202_v48, %v2976_v50  ;;  %v18636_v54 = vpop.f32.mrf.mxu1  ;;  %v3036_v50 = vadd.f32 %v13193_v16, %v2963_v38 }
 0x2fa   :  { %v13160_v55 = vpop.f32.mrf.mxu0 }
 0x2fb   :  { %v13206_v58 = vpop.f32.mrf.mxu1 }
 0x2fc   :  { %v13161_v59 = vpop.f32.mrf.mxu0 }
 0x2fd   :  { %v13162_v62 = vadd.f32 %v13161_v59, %v13160_v55  ;;  %v13207_v63 = vpop.f32.mrf.mxu1 }
 0x2fe   :  { %v13208_v0 = vadd.f32 %v13207_v63, %v13206_v58  ;;  %v18638_v1 = vpop.f32.mrf.mxu0 }
 0x2ff   :  { %v2984_v3 = vadd.f32 %v13162_v62, %v18602_v8  ;;  %v18641_v4 = vpop.f32.mrf.mxu1 }
 0x300   :  { %v18643_v5 = vpop.f32.mrf.mxu0 }
 0x301   :  { %v18645_v6 = vadd.f32 %v13208_v0, %v2984_v3  ;;  %v18647_v7 = vpop.f32.mrf.mxu1 }
 0x302   :  { %v13228_v9 = vpop.f32.mrf.mxu0 }
 0x303   :  { %v13274_v10 = vpop.f32.mrf.mxu1 }
 0x304   :  { %v13229_v11 = vpop.f32.mrf.mxu0 }
 0x305   :  { %v13230_v12 = vadd.f32 %v13229_v11, %v13228_v9  ;;  %v13275_v14 = vpop.f32.mrf.mxu1 }
 0x306   :  { %v13276_v19 = vadd.f32 %v13275_v14, %v13274_v10  ;;  %v13231_v20 = vpop.f32.mrf.mxu0  ;;  %v13153_v14 = vadd.f32 %v18621_v40, %v18616_v37 }
 0x307   :  { %v3098_v21 = vadd.f32 %v13230_v12, %v3025_v17  ;;  %v13277_v22 = vpop.f32.mrf.mxu1  ;;  %v13187_v17 = vadd.f32 %v18609_v18, %v18607_v15 }
 0x308   :  { %v13232_v24 = vpop.f32.mrf.mxu0  ;;  %v2971_v37 = vadd.f32 %v13153_v14, %v18602_v8 }
 0x309   :  { %v18650_v31 = vadd.f32 %v13276_v19, %v3098_v21  ;;  %v13278_v32 = vpop.f32.mrf.mxu1  ;;  %v13233_v45 = vadd.f32 %v13232_v24, %v13231_v20  ;;  %v3028_v47 = vadd.f32 %v13187_v17, %v2955_v35 }
 0x30a   :  { %v13234_v33 = vpop.f32.mrf.mxu0  ;;  %v13279_v18 = vadd.f32 %v13278_v32, %v13277_v22  ;;  %v13159_v22 = vadd.f32 %v18632_v52, %v18627_v49  ;;  %v15178_v32 = vmov 0.0  }
 0x30b   :  { %v13280_v34 = vpop.f32.mrf.mxu1  ;;  %v3101_v62 = vadd.f32 %v13233_v45, %v3028_v47 }
 0x30c   :  { %v13235_v36 = vpop.f32.mrf.mxu0 }
 0x30d   :  { %v13236_v43 = vadd.f32 %v13235_v36, %v13234_v33  ;;  %v13281_v44 = vpop.f32.mrf.mxu1  ;;  %v13199_v33 = vadd.f32 %v18625_v42, %v18619_v39 }
 0x30e   :  { %v13282_v46 = vadd.f32 %v13281_v44, %v13280_v34  ;;  %v13237_v13 = vpop.f32.mrf.mxu0  ;;  %v2979_v34 = vadd.f32 %v13159_v22, %v18602_v8  ;;  %v13205_v44 = vadd.f32 %v18636_v54, %v18630_v51 }
 0x30f   :  { %v3106_v25 = vadd.f32 %v13236_v43, %v18614_v29  ;;  %v13283_v28 = vpop.f32.mrf.mxu1  ;;  %v18662_v29 = vadd.f32 %v13279_v18, %v3101_v62  ;;  %v3044_v43 = vadd.f32 %v13199_v33, %v2971_v37 }
 0x310   :  { %v13238_v48 = vpop.f32.mrf.mxu0  ;;  %v3052_v16 = vadd.f32 %v13205_v44, %v2979_v34 }
 0x311   :  { %v18658_v55 = vadd.f32 %v13282_v46, %v3106_v25  ;;  %v13239_v58 = vadd.f32 %v13238_v48, %v13237_v13  ;;  %v13284_v59 = vpop.f32.mrf.mxu1  ;;  %v13165_v46 = vadd.f32 %v18643_v5, %v18638_v1 }
 0x312   :  { %v13240_v63 = vpop.f32.mrf.mxu0  ;;  %v13285_v3 = vadd.f32 %v13284_v59, %v13283_v28 }
 0x313   :  { %v3109_v0 = vadd.f32 %v13239_v58, %v3036_v50  ;;  %v13286_v15 = vpop.f32.mrf.mxu1  ;;  %v2987_v51 = vadd.f32 %v13165_v46, %v18602_v8 }
 0x314   :  { %v13241_v9 = vpop.f32.mrf.mxu0 }
 0x315   :  { %v18660_v10 = vadd.f32 %v13285_v3, %v3109_v0  ;;  %v13242_v27 = vadd.f32 %v13241_v9, %v13240_v63  ;;  %v13287_v30 = vpop.f32.mrf.mxu1  ;;  %v13211_v63 = vadd.f32 %v18647_v7, %v18641_v4 }
 0x316   :  { %v13288_v11 = vadd.f32 %v13287_v30, %v13286_v15  ;;  %v13243_v12 = vpop.f32.mrf.mxu0 }
 0x317   :  { %v3114_v19 = vadd.f32 %v13242_v27, %v18623_v41  ;;  %v13289_v20 = vpop.f32.mrf.mxu1  ;;  %3300 = vmatprep.mubr.f32.mxu1 %v18660_v10  ;;  %v3215_v15 = vmul.f32 %v18660_v10, %v18660_v10  ;;  %v3060_v8 = vadd.f32 %v13211_v63, %v2987_v51  ;;  %v3214_v27 = vmul.f32 %v18662_v29, %v18662_v29 }
 0x318   :  { %v13244_v21 = vpop.f32.mrf.mxu0  ;;  %3301 = vmatmul.mubr.f32.vlgmr.msra.gmra.mxu1 %v18662_v29 }
 0x319   :  { %v18671_v23 = vadd.f32 %v13288_v11, %v3114_v19  ;;  %v13290_v24 = vpop.f32.mrf.mxu1  ;;  %3337 = vmatpush1.xpose.msra.mxu1 %v18586_v61  ;;  %v13245_v35 = vadd.f32 %v13244_v21, %v13243_v12 }
 0x31a   :  { %v13246_v26 = vpop.f32.mrf.mxu0  ;;  %13581 = vmatprep.subr.mxu1 %v15178_v32  ;;  %v13291_v48 = vadd.f32 %v13290_v24, %v13289_v20  ;;  %v3219_v20 = vadd.f32 %v3215_v15, %v3214_v27 }
 0x31b   :  { %v13292_v40 = vpop.f32.mrf.mxu1  ;;  %v3117_v39 = vadd.f32 %v13245_v35, %v3044_v43 }
 0x31c   :  { %v13247_v41 = vpop.f32.mrf.mxu0 }
 0x31d   :  { %v13248_v49 = vadd.f32 %v13247_v41, %v13246_v26  ;;  %v13293_v52 = vpop.f32.mrf.mxu1  ;;  %v3447_v41 = vlaneseq }
 0x31e   :  { %v13294_v36 = vadd.f32 %v13293_v52, %v13292_v40  ;;  %v13249_v38 = vpop.f32.mrf.mxu0 }
 0x31f   :  { %v3122_v17 = vadd.f32 %v13248_v49, %v18634_v53  ;;  %v13295_v45 = vpop.f32.mrf.mxu1  ;;  %v18687_v53 = vadd.f32 %v13291_v48, %v3117_v39  ;;  %v18718_v33 = vand.u32 127, %v3447_v41  ;;  %v18720_v34 = vshrl.u32 %v3447_v41, 7  ;;  %v3235_v49 = vpop.xlane.xlu0 %3234 }
 0x320   :  { %v13250_v13 = vpop.f32.mrf.mxu0 }
 0x321   :  { %v18684_v42 = vadd.f32 %v13294_v36, %v3122_v17  ;;  %v13251_v25 = vadd.f32 %v13250_v13, %v13249_v38  ;;  %v13296_v28 = vpop.f32.mrf.mxu1  ;;  %v3216_v4 = vmul.f32 %v18687_v53, %v18687_v53  ;;  %v3451_v52 = vsub.s32 %v18718_v33, %v18720_v34 }
 0x322   :  { %v13252_v47 = vpop.f32.mrf.mxu0  ;;  %v13297_v58 = vadd.f32 %v13296_v28, %v13295_v45 }
 0x323   :  { %v3125_v50 = vadd.f32 %v13251_v25, %v3052_v16  ;;  %v13298_v59 = vpop.f32.mrf.mxu1  ;;  %v3220_v22 = vadd.f32 %v3219_v20, %v3216_v4 }
 0x324   :  { %v13253_v54 = vpop.f32.mrf.mxu0 }
 0x325   :  { %v18689_v62 = vadd.f32 %v13297_v58, %v3125_v50  ;;  %v13254_v1 = vadd.f32 %v13253_v54, %v13252_v47  ;;  %v13299_v5 = vpop.f32.mrf.mxu1 }
 0x326   :  { %v13300_v0 = vadd.f32 %v13299_v5, %v13298_v59  ;;  %v13255_v3 = vpop.f32.mrf.mxu0 }
 0x327   :  { %v3130_v18 = vadd.f32 %v13254_v1, %v18645_v6  ;;  %v13301_v9 = vpop.f32.mrf.mxu1  ;;  %3370 = vmatprep.mubr.f32.mxu1 %v18689_v62  ;;  %v3217_v19 = vmul.f32 %v18689_v62, %v18689_v62 }
 0x328   :  { %v13256_v30 = vpop.f32.mrf.mxu0  ;;  %3371 = vmatmul.mubr.f32.vlgmr.msra.gmra.mxu1 %v18687_v53 }
 0x329   :  { %v18702_v7 = vadd.f32 %v13300_v0, %v3130_v18  ;;  %v13257_v11 = vadd.f32 %v13256_v30, %v13255_v3  ;;  %v13302_v12 = vpop.f32.mrf.mxu1  ;;  %13582 = vmatpush3.xpose.msra.mxu1 %v18595_v2  ;;  %13583 = vmatprep.mubr.msk.f32.mxu1 %vm15179_vm0, %v15178_v32  ;;  %v3221_v26 = vadd.f32 %v3220_v22, %v3217_v19 }
 0x32a   :  { %3526 = vmatprep.subr.mxu1 %v18564_v56  ;;  %v13303_v14 = vadd.f32 %v13302_v12, %v13301_v9 }
 0x32b   :  { %v3133_v6 = vadd.f32 %v13257_v11, %v3060_v8 }
 0x32d   :  { %v18710_v21 = vadd.f32 %v13303_v14, %v3133_v6 }
 0x32f   :  { %13584 = vmatmul.mubr.f32.vlgmr.msra.gmra.mxu1 %v18710_v21  ;;  %v3218_v24 = vmul.f32 %v18710_v21, %v18710_v21 }
 0x330   :  { %3527 = vmatpush1.msra.mxu1 %v18570_v57  ;;  %3560 = vmatprep.mubr.f32.mxu1 %v15178_v32  ;;  %v3452_v57 = vrot.slane %v3235_v49, %v3451_v52 }
 0x331   :  { %v3222_v56 = vadd.f32 %v3221_v26, %v3218_v24  ;;  %3597 = vmatprep.subr.mxu1 %v18580_v60 }
 0x333   :  { %3223 = vadd.xlane.f32.xlu0 %v3222_v56 }
 0x3bc   :  { %v3224_v43 = vpop.xlane.xlu0 %3223 }
 0x3bd   :  { %v3466_v45 = vadd.f32 %v3452_v57, %v3224_v43 }
 0x3d8   :  { %v3302_v37 = vpop.f32.mrf.mxu1 }
 0x3da   :  { %v3304_v40 = vpop.f32.mrf.mxu1 }
 0x3e8   :  { %v3372_v35 = vpop.f32.mrf.mxu1 }
 0x3e9   :  { %v3373_v38 = vadd.f32 %v3372_v35, %v3302_v37 }
 0x3ea   :  { %v3374_v36 = vpop.f32.mrf.mxu1 }
 0x3ef   :  { %v3442_v44 = vpop.f32.mrf.mxu1 }
 0x3f0   :  { %v3443_v17 = vadd.f32 %v3442_v44, %v3373_v38 }
 0x3f1   :  { %v13585_v60 = vpop.f32.mrf.mxu1 }
 0x3f2   :  { %v3467_v46 = vmul.f32 2.0, %v3443_v17 }
 0x3f4   :  { %v3468_v13 = vsub.f32 %v3466_v45, %v3467_v46 }
 0x3f6   :  { %v3470_v16 = vsel %vm3469_vm1, %v3468_v13, inf }
 0x3f7   :  { %3471 = vmin.xlane.f32.xlu1 %v3470_v16 }
 0x480   :  { %v3472_v39 = vpop.xlane.xlu1 %3471 }
 0x481   :  { %vm3473_vm2 = vcmp.le.f32.partialorder %v3468_v13, %v3472_v39 }
 0x482   :  { %v3474_v25 = vsel %vm3473_vm2, %v18718_v33, 8 }
 0x483   :  { %v3475_v28 = vsel %vm3469_vm1, %v3474_v25, 2147483647 }
 0x484   :  { %v3477_v47 = vshra.s32 %v3475_v28, 16  ;;  %v3476_v50 = vand.u32 65535, %v3475_v28 }
 0x486   :  { %v3479_v48 = vcvt.s32.f32 %v3477_v47  ;;  %v3478_v59 = vcvt.s32.f32 %v3476_v50 }
 0x488   :  { %3480 = vmin.xlane.f32.xlu1 %v3479_v48 }
 0x511   :  { %v3481_v58 = vpop.xlane.xlu1 %3480 }
 0x512   :  { %vm3482_vm3 = vcmp.eq.f32.partialorder %v3479_v48, %v3481_v58  ;;  %v3487_v54 = vcvt.f32.s32 %v3481_v58 }
 0x513   :  { %v3483_v51 = vsel %vm3482_vm3, %v3478_v59, inf }
 0x514   :  { %3484 = vmin.xlane.f32.xlu0 %v3483_v51  ;;  %v3488_v5 = vshll.u32 %v3487_v54, 16 }
 0x59d   :  { %v3485_v1 = vpop.xlane.xlu0 %3484 }
 0x59e   :  { %v3486_v63 = vcvt.f32.s32 %v3485_v1 }
 0x5a0   :  { %v3489_v0 = vadd.s32 %v3488_v5, %v3486_v63 }
 0x5a2   :  { %vm3490_vm4 = vcmp.eq.s32.totalorder %v18718_v33, %v3489_v0 }
 0x5a3   :  { %v18729_v3 = vsel %vm3490_vm4, 1.0, %v15178_v32 }
 0x5a4   :  { %12114 = vmatmul.mubr.msk.f32.vlgmr.msra.gmra.mxu1 %vm3469_vm1, %v18729_v3 }
 0x5a5   :  { %3598 = vmatpush1.msra.mxu1 %v18586_v61  ;;  %3631 = vmatprep.mubr.f32.mxu1 %v15178_v32 }
 0x5a6   :  { %13586 = vmatprep.subr.mxu1 %v15178_v32 }
 0x5a8   :  { %12115 = vmatmul.mubr.msk.f32.vlgmr.msra.gmra.mxu1 %vm3469_vm1, %v18729_v3 }
 0x5a9   :  { %13587 = vmatpush3.msra.mxu1 %v18595_v2  ;;  %13588 = vmatprep.mubr.msk.f32.mxu1 %vm15179_vm0, %v15178_v32 }
 0x5ac   :  { %13589 = vmatmul.mubr.msk.f32.vlgmr.msra.gmra.mxu1 %vm3469_vm1, %v18729_v3 }
 0x664   :  { %v18743_v15 = vpop.f32.mrf.mxu1 }
 0x665   :  { %v3708_v61 = vsub.f32 %v18743_v15, %v18662_v29 }
 0x666   :  { %v3564_v18 = vpop.f32.mrf.mxu1 }
 0x667   :  { %v3709_v9 = vsub.f32 %v3564_v18, %v18660_v10  ;;  %v3713_v27 = vmul.f32 %v3708_v61, %v3708_v61 }
 0x668   :  { %v18748_v8 = vpop.f32.mrf.mxu1 }
 0x669   :  { %v3714_v30 = vmul.f32 %v3709_v9, %v3709_v9  ;;  %v3710_v2 = vsub.f32 %v18748_v8, %v18687_v53 }
 0x66a   :  { %v3635_v4 = vpop.f32.mrf.mxu1 }
 0x66b   :  { %v3718_v11 = vadd.f32 %v3714_v30, %v3713_v27  ;;  %v3715_v12 = vmul.f32 %v3710_v2, %v3710_v2  ;;  %v3711_v6 = vsub.f32 %v3635_v4, %v18689_v62 }
 0x66c   :  { %v18753_v14 = vpop.f32.mrf.mxu1 }
 0x66d   :  { %v3719_v19 = vadd.f32 %v3718_v11, %v3715_v12  ;;  %v3716_v20 = vmul.f32 %v3711_v6, %v3711_v6  ;;  %v3712_v22 = vsub.f32 %v18753_v14, %v18710_v21 }
 0x66e   :  { %v13590_v24 = vpop.f32.mrf.mxu1 }
 0x66f   :  { %v3720_v26 = vadd.f32 %v3719_v19, %v3716_v20  ;;  %v3717_v56 = vmul.f32 %v3712_v22, %v3712_v22 }
 0x671   :  { %v3721_v37 = vadd.f32 %v3720_v26, %v3717_v56 }
 0x673   :  { %3722 = vadd.xlane.f32.xlu1 %v3721_v37 }
 0x6fc   :  { %v3723_v40 = vpop.xlane.xlu1 %3722 }
 0x6fd   :  { %v3724_v41 = vrot.slane %v3723_v40, 4 }
 0x6ff   :  { %v3725_v35 = vadd.f32 %v3724_v41, %v3723_v40 }
 0x701   :  { %v3726_v49 = vrot.slane %v3725_v35, 2 }
 0x703   :  { %v3727_v52 = vadd.f32 %v3726_v49, %v3725_v35 }
 0x705   :  { %v3728_v36 = vrot.slane %v3727_v52, 1 }
 0x707   :  { %v3729_v57 = vadd.f32 %v3728_v36, %v3727_v52 }
 0x709   :  { %13611 = vpush %v3729_v57 }
 0x73a   :  { %s13612_s2 = spop %13611 }
 0x73b   :  { %v3731_v38 = vstv %s13612_s2 }
 0x73c   :  { %v3733_v43 = vmul.f32 0.0001953125, %v3731_v38 }
 0x73e   :  { %v18757_v44 = vmul.f32 1.25, %v3733_v43 }
 0x73f   :  { %15168 = dma.done.wait [#allocation5], 51200 }
 0x740   :  { %15169 = vsyncadd [#allocation5], 4294916096 }
 0x741   :  { %15170 = dma.done.wait [#allocation5 + $0x1], 25600 }
 0x742   :  { %15171 = vsyncadd [#allocation5 + $0x1], 4294941696 }
 0x743   :  { %15172 = dma.done.wait [#allocation5 + $0x2], 51200 }
 0x744   :  { %15173 = vsyncadd [#allocation5 + $0x2], 4294916096  ;;  %v18759_v17 = vpack.c.bf16 %v3564_v18, %v3564_v18  ;;  %v18761_v60 = vpack.c.bf16 %v3635_v4, %v3635_v4  ;;  %11914 = vst [vmem:[#allocation10] sm:$0xff] %v18662_v29  ;;  %v15180_v45 = vmov 0   ;;  %v13687_v29 = vld [vmem:[#allocation2 + $0x39c] ss:$20 sps:$4 sm:$0xff]  }
 0x745   :  { %11915 = vst [vmem:[#allocation10 + $0x8] sm:$0xff] %v18660_v10  ;;  %11916 = vst [vmem:[#allocation10 + $0x10] sm:$0xff] %v18687_v53  ;;  %v13685_v10 = vld [vmem:[#allocation2 + $0x11c] ss:$20 sps:$4 sm:$0xff]   ;;  %v13689_v53 = vld [vmem:[#allocation2 + $0x118] ss:$20 sps:$4 sm:$0xff]   ;;  %6393 = vmatprep.subr.bf16.mxu1 %v13687_v29 }
 0x746   :  { %11917 = vst [vmem:[#allocation10 + $0x18] sm:$0xff] %v18689_v62  ;;  %11918 = vst [vmem:[#allocation10 + $0x20] sm:$0xff] %v18710_v21  ;;  %v18770_v46 = vmax.bf16 %v15180_v45, %v18759_v17  ;;  %v18774_v13 = vmax.bf16 %v15180_v45, %v18761_v60  ;;  %6352 = vmatprep.subr.bf16.mxu0 %v13685_v10  ;;  %v13690_v62 = vld [vmem:[#allocation2 + $0x398] ss:$20 sps:$4 sm:$0xff]   ;;  %v13691_v21 = vld [vmem:[#allocation2 + $0xf4] ss:$20 sps:$4 sm:$0xff]  }
 0x747   :  { %6353 = vmatpush1.bf16.msra.mxu0 %v13689_v53  ;;  %6394 = vmatpush1.bf16.msra.mxu1 %v13690_v62  ;;  %v13693_v16 = vld [vmem:[#allocation2 + $0x374] ss:$20 sps:$4 sm:$0xff]   ;;  %v13695_v39 = vld [vmem:[#allocation2 + $0xf0] ss:$20 sps:$4 sm:$0xff]   ;;  %v13697_v28 = vld [vmem:[#allocation2 + $0xcc] ss:$20 sps:$4 sm:$0xff]  }
 0x748   :  { %6384 = vmatprep.mubr.bf16.mxu0 %v18770_v46  ;;  %6425 = vmatprep.mubr.bf16.mxu1 %v18774_v13  ;;  %v13696_v25 = vld [vmem:[#allocation2 + $0x370] ss:$20 sps:$4 sm:$0xff]   ;;  %v13699_v47 = vld [vmem:[#allocation2 + $0x34c] ss:$20 sps:$4 sm:$0xff]   ;;  %v13701_v48 = vld [vmem:[#allocation2 + $0xc8] ss:$20 sps:$4 sm:$0xff]  }
 0x749   :  { %6354 = vmatprep.subr.bf16.mxu0 %v13691_v21  ;;  %6395 = vmatprep.subr.bf16.mxu1 %v13693_v16  ;;  %v13702_v50 = vld [vmem:[#allocation2 + $0x348] ss:$20 sps:$4 sm:$0xff]   ;;  %v13703_v58 = vld [vmem:[#allocation2 + $0xa4] ss:$20 sps:$4 sm:$0xff]   ;;  %v13707_v51 = vld [vmem:[#allocation2 + $0xa0] ss:$20 sps:$4 sm:$0xff]  }
 0x74a   :  { %v13705_v59 = vld [vmem:[#allocation2 + $0x324] ss:$20 sps:$4 sm:$0xff]   ;;  %v13708_v54 = vld [vmem:[#allocation2 + $0x320] ss:$20 sps:$4 sm:$0xff]   ;;  %v13709_v1 = vld [vmem:[#allocation2 + $0x7c] ss:$20 sps:$4 sm:$0xff]  }
 0x74b   :  { %6355 = vmatpush1.bf16.msra.mxu0 %v13695_v39  ;;  %6396 = vmatpush1.bf16.msra.mxu1 %v13696_v25  ;;  %v13711_v5 = vld [vmem:[#allocation2 + $0x2fc] ss:$20 sps:$4 sm:$0xff]   ;;  %v13713_v63 = vld [vmem:[#allocation2 + $0x78] ss:$20 sps:$4 sm:$0xff]   ;;  %v13715_v61 = vld [vmem:[#allocation2 + $0x54] ss:$20 sps:$4 sm:$0xff]  }
 0x74c   :  { %6356 = vmatprep.subr.bf16.mxu0 %v13697_v28  ;;  %6397 = vmatprep.subr.bf16.mxu1 %v13699_v47  ;;  %v13714_v0 = vld [vmem:[#allocation2 + $0x2f8] ss:$20 sps:$4 sm:$0xff]   ;;  %v13717_v18 = vld [vmem:[#allocation2 + $0x2d4] ss:$20 sps:$4 sm:$0xff]   ;;  %v13719_v9 = vld [vmem:[#allocation2 + $0x50] ss:$20 sps:$4 sm:$0xff]  }
 0x74d   :  { %v13720_v27 = vld [vmem:[#allocation2 + $0x2d0] ss:$20 sps:$4 sm:$0xff]   ;;  %v13721_v30 = vld [vmem:[#allocation2 + $0x2c] ss:$20 sps:$4 sm:$0xff]   ;;  %v13725_v4 = vld [vmem:[#allocation2 + $0x28] ss:$20 sps:$4 sm:$0xff]  }
 0x74e   :  { %v13723_v2 = vld [vmem:[#allocation2 + $0x2ac] ss:$20 sps:$4 sm:$0xff]   ;;  %v13726_v11 = vld [vmem:[#allocation2 + $0x2a8] ss:$20 sps:$4 sm:$0xff]   ;;  %v13727_v12 = vld [vmem:[#allocation2 + $0x4] ss:$20 sps:$4 sm:$0xff]  }
 0x74f   :  { %6357 = vmatpush1.bf16.msra.mxu0 %v13701_v48  ;;  %6398 = vmatpush1.bf16.msra.mxu1 %v13702_v50  ;;  %v13729_v6 = vld [vmem:[#allocation2 + $0x284] ss:$20 sps:$4 sm:$0xff]   ;;  %v13731_v19 = vld [vmem:[#allocation2] ss:$20 sps:$4 sm:$0xff]   ;;  %v13733_v22 = vld [vmem:[#allocation2 + $0x25c] ss:$20 sps:$4 sm:$0xff]  }
 0x750   :  { %6358 = vmatprep.subr.bf16.mxu0 %v13703_v58  ;;  %6399 = vmatprep.subr.bf16.mxu1 %v13705_v59  ;;  %v13732_v20 = vld [vmem:[#allocation2 + $0x280] ss:$20 sps:$4 sm:$0xff]   ;;  %v13735_v24 = vld [vmem:[#allocation2 + $0x4dc] ss:$20 sps:$4 sm:$0xff]   ;;  %v13737_v26 = vld [vmem:[#allocation2 + $0x258] ss:$20 sps:$4 sm:$0xff]  }
 0x751   :  { %v13738_v56 = vld [vmem:[#allocation2 + $0x4d8] ss:$20 sps:$4 sm:$0xff]   ;;  %v13739_v37 = vld [vmem:[#allocation2 + $0x234] ss:$20 sps:$4 sm:$0xff]   ;;  %v13743_v41 = vld [vmem:[#allocation2 + $0x230] ss:$20 sps:$4 sm:$0xff]  }
 0x752   :  { %v13741_v40 = vld [vmem:[#allocation2 + $0x4b4] ss:$20 sps:$4 sm:$0xff]   ;;  %v13744_v35 = vld [vmem:[#allocation2 + $0x4b0] ss:$20 sps:$4 sm:$0xff]   ;;  %v13745_v49 = vld [vmem:[#allocation2 + $0x20c] ss:$20 sps:$4 sm:$0xff]  }
 0x753   :  { %6359 = vmatpush1.bf16.msra.mxu0 %v13707_v51  ;;  %6400 = vmatpush1.bf16.msra.mxu1 %v13708_v54  ;;  %v13747_v52 = vld [vmem:[#allocation2 + $0x48c] ss:$20 sps:$4 sm:$0xff]   ;;  %v13749_v36 = vld [vmem:[#allocation2 + $0x208] ss:$20 sps:$4 sm:$0xff]   ;;  %v13751_v38 = vld [vmem:[#allocation2 + $0x1e4] ss:$20 sps:$4 sm:$0xff]  }
 0x754   :  { %6360 = vmatprep.subr.bf16.mxu0 %v13709_v1  ;;  %6401 = vmatprep.subr.bf16.mxu1 %v13711_v5  ;;  %v13750_v57 = vld [vmem:[#allocation2 + $0x488] ss:$20 sps:$4 sm:$0xff]   ;;  %v13753_v43 = vld [vmem:[#allocation2 + $0x464] ss:$20 sps:$4 sm:$0xff]   ;;  %v13755_v10 = vld [vmem:[#allocation2 + $0x1e0] ss:$20 sps:$4 sm:$0xff]  }
 0x755   :  { %v13756_v29 = vld [vmem:[#allocation2 + $0x460] ss:$20 sps:$4 sm:$0xff]   ;;  %v13757_v53 = vld [vmem:[#allocation2 + $0x1bc] ss:$20 sps:$4 sm:$0xff]   ;;  %v13761_v21 = vld [vmem:[#allocation2 + $0x1b8] ss:$20 sps:$4 sm:$0xff]  }
 0x756   :  { %v13759_v62 = vld [vmem:[#allocation2 + $0x43c] ss:$20 sps:$4 sm:$0xff]   ;;  %v13762_v16 = vld [vmem:[#allocation2 + $0x438] ss:$20 sps:$4 sm:$0xff]   ;;  %v13763_v39 = vld [vmem:[#allocation2 + $0x194] ss:$20 sps:$4 sm:$0xff]  }
 0x757   :  { %6361 = vmatpush1.bf16.msra.mxu0 %v13713_v63  ;;  %6402 = vmatpush1.bf16.msra.mxu1 %v13714_v0  ;;  %v13765_v25 = vld [vmem:[#allocation2 + $0x414] ss:$20 sps:$4 sm:$0xff]   ;;  %v13767_v28 = vld [vmem:[#allocation2 + $0x190] ss:$20 sps:$4 sm:$0xff]   ;;  %v13769_v48 = vld [vmem:[#allocation2 + $0x16c] ss:$20 sps:$4 sm:$0xff]   ;;  %v18780_v63 = vpack.c.bf16 %v18743_v15, %v18743_v15  ;;  %v18784_v0 = vpack.c.bf16 %v18748_v8, %v18748_v8 }
 0x758   :  { %6362 = vmatprep.subr.bf16.mxu0 %v13715_v61  ;;  %6403 = vmatprep.subr.bf16.mxu1 %v13717_v18  ;;  %v13768_v47 = vld [vmem:[#allocation2 + $0x410] ss:$20 sps:$4 sm:$0xff]   ;;  %v13771_v50 = vld [vmem:[#allocation2 + $0x3ec] ss:$20 sps:$4 sm:$0xff]   ;;  %v13773_v58 = vld [vmem:[#allocation2 + $0x168] ss:$20 sps:$4 sm:$0xff]  }
 0x759   :  { %v13774_v59 = vld [vmem:[#allocation2 + $0x3e8] ss:$20 sps:$4 sm:$0xff]   ;;  %v13775_v51 = vld [vmem:[#allocation2 + $0x144] ss:$20 sps:$4 sm:$0xff]   ;;  %v13779_v1 = vld [vmem:[#allocation2 + $0x140] ss:$20 sps:$4 sm:$0xff]   ;;  %v18796_v15 = vmax.bf16 %v15180_v45, %v18780_v63 }
 0x75a   :  { %v13777_v54 = vld [vmem:[#allocation2 + $0x3c4] ss:$20 sps:$4 sm:$0xff]   ;;  %v13780_v5 = vld [vmem:[#allocation2 + $0x3c0] ss:$20 sps:$4 sm:$0xff]   ;;  %v13783_v61 = vld [vmem:[#allocation2 + $0x61c] ss:$20 sps:$4 sm:$0xff]  }
 0x75b   :  { %6363 = vmatpush1.bf16.msra.mxu0 %v13719_v9  ;;  %6404 = vmatpush1.bf16.msra.mxu1 %v13720_v27  ;;  %v13786_v18 = vld [vmem:[#allocation2 + $0x89c] ss:$20 sps:$4 sm:$0xff]   ;;  %v18788_v9 = vpack.c.bf16 %v18650_v31, %v18650_v31  ;;  %v18792_v27 = vpack.c.bf16 %v18671_v23, %v18671_v23  ;;  %v13781_v8 = vld [vmem:[#allocation2 + $0x618] ss:$20 sps:$4 sm:$0xff]  }
 0x75c   :  { %6364 = vmatprep.subr.bf16.mxu0 %v13721_v30  ;;  %6405 = vmatprep.subr.bf16.mxu1 %v13723_v2  ;;  %v13784_v30 = vld [vmem:[#allocation2 + $0x898] ss:$20 sps:$4 sm:$0xff]   ;;  %v18800_v2 = vmax.bf16 %v15180_v45, %v18784_v0 }
 0x75f   :  { %6365 = vmatpush1.bf16.msra.mxu0 %v13725_v4  ;;  %6406 = vmatpush1.bf16.msra.mxu1 %v13726_v11  ;;  %v13789_v4 = vld [vmem:[#allocation2 + $0x5f4] ss:$20 sps:$4 sm:$0xff]  }
 0x760   :  { %6366 = vmatprep.subr.bf16.mxu0 %v13727_v12  ;;  %6407 = vmatprep.subr.bf16.mxu1 %v13729_v6  ;;  %v13792_v11 = vld [vmem:[#allocation2 + $0x874] ss:$20 sps:$4 sm:$0xff]   ;;  %v18804_v12 = vmax.bf16 %v15180_v45, %v18788_v9  ;;  %v18808_v6 = vmax.bf16 %v15180_v45, %v18792_v27 }
 0x763   :  { %6367 = vmatpush1.bf16.msra.mxu0 %v13731_v19  ;;  %6408 = vmatpush1.bf16.msra.mxu1 %v13732_v20  ;;  %v13787_v19 = vld [vmem:[#allocation2 + $0x5f0] ss:$20 sps:$4 sm:$0xff]  }
 0x764   :  { %6368 = vmatprep.subr.bf16.mxu0 %v13733_v22  ;;  %6409 = vmatprep.subr.bf16.mxu1 %v13735_v24  ;;  %v13790_v20 = vld [vmem:[#allocation2 + $0x870] ss:$20 sps:$4 sm:$0xff]   ;;  %v13795_v22 = vld [vmem:[#allocation2 + $0x5cc] ss:$20 sps:$4 sm:$0xff]  }
 0x765   :  { %v13798_v24 = vld [vmem:[#allocation2 + $0x84c] ss:$20 sps:$4 sm:$0xff]  }
 0x767   :  { %6369 = vmatpush2.bf16.msra.mxu0 %v13737_v26  ;;  %6410 = vmatpush2.bf16.msra.mxu1 %v13738_v56  ;;  %v13793_v26 = vld [vmem:[#allocation2 + $0x5c8] ss:$20 sps:$4 sm:$0xff]  }
 0x768   :  { %6370 = vmatprep.subr.bf16.mxu0 %v13739_v37  ;;  %6411 = vmatprep.subr.bf16.mxu1 %v13741_v40  ;;  %v13796_v56 = vld [vmem:[#allocation2 + $0x848] ss:$20 sps:$4 sm:$0xff]   ;;  %v13801_v37 = vld [vmem:[#allocation2 + $0x5a4] ss:$20 sps:$4 sm:$0xff]  }
 0x769   :  { %v13804_v40 = vld [vmem:[#allocation2 + $0x824] ss:$20 sps:$4 sm:$0xff]  }
 0x76b   :  { %6371 = vmatpush2.bf16.msra.mxu0 %v13743_v41  ;;  %6412 = vmatpush2.bf16.msra.mxu1 %v13744_v35  ;;  %v13799_v41 = vld [vmem:[#allocation2 + $0x5a0] ss:$20 sps:$4 sm:$0xff]  }
 0x76c   :  { %6372 = vmatprep.subr.bf16.mxu0 %v13745_v49  ;;  %6413 = vmatprep.subr.bf16.mxu1 %v13747_v52  ;;  %v13802_v35 = vld [vmem:[#allocation2 + $0x820] ss:$20 sps:$4 sm:$0xff]   ;;  %v13807_v49 = vld [vmem:[#allocation2 + $0x57c] ss:$20 sps:$4 sm:$0xff]  }
 0x76d   :  { %v13810_v52 = vld [vmem:[#allocation2 + $0x7fc] ss:$20 sps:$4 sm:$0xff]  }
 0x76f   :  { %6373 = vmatpush2.bf16.msra.mxu0 %v13749_v36  ;;  %6414 = vmatpush2.bf16.msra.mxu1 %v13750_v57  ;;  %v13805_v36 = vld [vmem:[#allocation2 + $0x578] ss:$20 sps:$4 sm:$0xff]  }
 0x770   :  { %6374 = vmatprep.subr.bf16.mxu0 %v13751_v38  ;;  %6415 = vmatprep.subr.bf16.mxu1 %v13753_v43  ;;  %v13808_v57 = vld [vmem:[#allocation2 + $0x7f8] ss:$20 sps:$4 sm:$0xff]   ;;  %v13813_v38 = vld [vmem:[#allocation2 + $0x554] ss:$20 sps:$4 sm:$0xff]  }
 0x771   :  { %v13816_v43 = vld [vmem:[#allocation2 + $0x7d4] ss:$20 sps:$4 sm:$0xff]  }
 0x773   :  { %6375 = vmatpush2.bf16.msra.mxu0 %v13755_v10  ;;  %6416 = vmatpush2.bf16.msra.mxu1 %v13756_v29  ;;  %v13811_v10 = vld [vmem:[#allocation2 + $0x550] ss:$20 sps:$4 sm:$0xff]  }
 0x774   :  { %6376 = vmatprep.subr.bf16.mxu0 %v13757_v53  ;;  %6417 = vmatprep.subr.bf16.mxu1 %v13759_v62  ;;  %v13814_v29 = vld [vmem:[#allocation2 + $0x7d0] ss:$20 sps:$4 sm:$0xff]   ;;  %v13819_v53 = vld [vmem:[#allocation2 + $0x52c] ss:$20 sps:$4 sm:$0xff]  }
 0x775   :  { %v13822_v62 = vld [vmem:[#allocation2 + $0x7ac] ss:$20 sps:$4 sm:$0xff]  }
 0x777   :  { %6377 = vmatpush2.bf16.msra.mxu0 %v13761_v21  ;;  %6418 = vmatpush2.bf16.msra.mxu1 %v13762_v16  ;;  %v13817_v21 = vld [vmem:[#allocation2 + $0x528] ss:$20 sps:$4 sm:$0xff]  }
 0x778   :  { %6378 = vmatprep.subr.bf16.mxu0 %v13763_v39  ;;  %6419 = vmatprep.subr.bf16.mxu1 %v13765_v25  ;;  %v13820_v16 = vld [vmem:[#allocation2 + $0x7a8] ss:$20 sps:$4 sm:$0xff]   ;;  %v13825_v39 = vld [vmem:[#allocation2 + $0x504] ss:$20 sps:$4 sm:$0xff]  }
 0x779   :  { %v13828_v25 = vld [vmem:[#allocation2 + $0x784] ss:$20 sps:$4 sm:$0xff]  }
 0x77b   :  { %6379 = vmatpush2.bf16.msra.mxu0 %v13767_v28  ;;  %6420 = vmatpush2.bf16.msra.mxu1 %v13768_v47  ;;  %v13823_v28 = vld [vmem:[#allocation2 + $0x500] ss:$20 sps:$4 sm:$0xff]  }
 0x77c   :  { %6380 = vmatprep.subr.bf16.mxu0 %v13769_v48  ;;  %6421 = vmatprep.subr.bf16.mxu1 %v13771_v50  ;;  %v13826_v47 = vld [vmem:[#allocation2 + $0x780] ss:$20 sps:$4 sm:$0xff]   ;;  %v13831_v48 = vld [vmem:[#allocation2 + $0x75c] ss:$20 sps:$4 sm:$0xff]  }
 0x77d   :  { %v13834_v50 = vld [vmem:[#allocation2 + $0x9dc] ss:$20 sps:$4 sm:$0xff]  }
 0x77f   :  { %6381 = vmatpush2.bf16.msra.mxu0 %v13773_v58  ;;  %6422 = vmatpush2.bf16.msra.mxu1 %v13774_v59  ;;  %v13829_v58 = vld [vmem:[#allocation2 + $0x758] ss:$20 sps:$4 sm:$0xff]  }
 0x780   :  { %6382 = vmatprep.subr.bf16.mxu0 %v13775_v51  ;;  %6423 = vmatprep.subr.bf16.mxu1 %v13777_v54  ;;  %v13832_v59 = vld [vmem:[#allocation2 + $0x9d8] ss:$20 sps:$4 sm:$0xff]   ;;  %v13837_v51 = vld [vmem:[#allocation2 + $0x734] ss:$20 sps:$4 sm:$0xff]  }
 0x781   :  { %v13840_v54 = vld [vmem:[#allocation2 + $0x9b4] ss:$20 sps:$4 sm:$0xff]  }
 0x783   :  { %6383 = vmatpush2.bf16.msra.mxu0 %v13779_v1  ;;  %6424 = vmatpush2.bf16.msra.mxu1 %v13780_v5  ;;  %v13835_v1 = vld [vmem:[#allocation2 + $0x730] ss:$20 sps:$4 sm:$0xff]  }
 0x784   :  { %6434 = vmatprep.subr.bf16.mxu0 %v13783_v61  ;;  %6475 = vmatprep.subr.bf16.mxu1 %v13786_v18  ;;  %v13838_v5 = vld [vmem:[#allocation2 + $0x9b0] ss:$20 sps:$4 sm:$0xff]   ;;  %v13843_v61 = vld [vmem:[#allocation2 + $0x70c] ss:$20 sps:$4 sm:$0xff]  }
 0x785   :  { %v13846_v18 = vld [vmem:[#allocation2 + $0x98c] ss:$20 sps:$4 sm:$0xff]  }
 0x786   :  { %6385 = vmatmul.mubr.bf16.vlgmr.msra.gmra.mxu0 %v18796_v15  ;;  %6426 = vmatmul.mubr.bf16.vlgmr.msra.gmra.mxu1 %v18800_v2 }
 0x787   :  { %6435 = vmatpush1.bf16.msra.mxu0 %v13781_v8  ;;  %6476 = vmatpush1.bf16.msra.mxu1 %v13784_v30  ;;  %v13841_v8 = vld [vmem:[#allocation2 + $0x708] ss:$20 sps:$4 sm:$0xff]  }
 0x788   :  { %6436 = vmatprep.subr.bf16.mxu0 %v13789_v4  ;;  %6477 = vmatprep.subr.bf16.mxu1 %v13792_v11  ;;  %v13844_v30 = vld [vmem:[#allocation2 + $0x988] ss:$20 sps:$4 sm:$0xff]   ;;  %v13849_v4 = vld [vmem:[#allocation2 + $0x6e4] ss:$20 sps:$4 sm:$0xff]  }
 0x789   :  { %6466 = vmatprep.mubr.bf16.mxu0 %v18804_v12  ;;  %6507 = vmatprep.mubr.bf16.mxu1 %v18808_v6  ;;  %v13852_v11 = vld [vmem:[#allocation2 + $0x964] ss:$20 sps:$4 sm:$0xff]  }
 0x78b   :  { %6437 = vmatpush1.bf16.msra.mxu0 %v13787_v19  ;;  %6478 = vmatpush1.bf16.msra.mxu1 %v13790_v20  ;;  %v13847_v19 = vld [vmem:[#allocation2 + $0x6e0] ss:$20 sps:$4 sm:$0xff]  }
 0x78c   :  { %6438 = vmatprep.subr.bf16.mxu0 %v13795_v22  ;;  %6479 = vmatprep.subr.bf16.mxu1 %v13798_v24  ;;  %v13850_v20 = vld [vmem:[#allocation2 + $0x960] ss:$20 sps:$4 sm:$0xff]   ;;  %v13855_v22 = vld [vmem:[#allocation2 + $0x6bc] ss:$20 sps:$4 sm:$0xff]  }
 0x78d   :  { %v13858_v24 = vld [vmem:[#allocation2 + $0x93c] ss:$20 sps:$4 sm:$0xff]  }
 0x78f   :  { %6439 = vmatpush1.bf16.msra.mxu0 %v13793_v26  ;;  %6480 = vmatpush1.bf16.msra.mxu1 %v13796_v56  ;;  %v13853_v26 = vld [vmem:[#allocation2 + $0x6b8] ss:$20 sps:$4 sm:$0xff]  }
 0x790   :  { %6440 = vmatprep.subr.bf16.mxu0 %v13801_v37  ;;  %6481 = vmatprep.subr.bf16.mxu1 %v13804_v40  ;;  %v13856_v56 = vld [vmem:[#allocation2 + $0x938] ss:$20 sps:$4 sm:$0xff]   ;;  %v13861_v37 = vld [vmem:[#allocation2 + $0x694] ss:$20 sps:$4 sm:$0xff]  }
 0x791   :  { %v13864_v40 = vld [vmem:[#allocation2 + $0x914] ss:$20 sps:$4 sm:$0xff]  }
 0x793   :  { %6441 = vmatpush1.bf16.msra.mxu0 %v13799_v41  ;;  %6482 = vmatpush1.bf16.msra.mxu1 %v13802_v35  ;;  %v13859_v41 = vld [vmem:[#allocation2 + $0x690] ss:$20 sps:$4 sm:$0xff]  }
 0x794   :  { %6442 = vmatprep.subr.bf16.mxu0 %v13807_v49  ;;  %6483 = vmatprep.subr.bf16.mxu1 %v13810_v52  ;;  %v13862_v35 = vld [vmem:[#allocation2 + $0x910] ss:$20 sps:$4 sm:$0xff]   ;;  %v13867_v49 = vld [vmem:[#allocation2 + $0x66c] ss:$20 sps:$4 sm:$0xff]  }
 0x795   :  { %v13870_v52 = vld [vmem:[#allocation2 + $0x8ec] ss:$20 sps:$4 sm:$0xff]  }
 0x797   :  { %6443 = vmatpush1.bf16.msra.mxu0 %v13805_v36  ;;  %6484 = vmatpush1.bf16.msra.mxu1 %v13808_v57  ;;  %v13865_v36 = vld [vmem:[#allocation2 + $0x668] ss:$20 sps:$4 sm:$0xff]  }
 0x798   :  { %6444 = vmatprep.subr.bf16.mxu0 %v13813_v38  ;;  %6485 = vmatprep.subr.bf16.mxu1 %v13816_v43  ;;  %v13868_v57 = vld [vmem:[#allocation2 + $0x8e8] ss:$20 sps:$4 sm:$0xff]   ;;  %v13873_v38 = vld [vmem:[#allocation2 + $0x644] ss:$20 sps:$4 sm:$0xff]  }
 0x799   :  { %v13876_v43 = vld [vmem:[#allocation2 + $0x8c4] ss:$20 sps:$4 sm:$0xff]  }
 0x79b   :  { %6445 = vmatpush1.bf16.msra.mxu0 %v13811_v10  ;;  %6486 = vmatpush1.bf16.msra.mxu1 %v13814_v29  ;;  %v13871_v10 = vld [vmem:[#allocation2 + $0x640] ss:$20 sps:$4 sm:$0xff]  }
 0x79c   :  { %6446 = vmatprep.subr.bf16.mxu0 %v13819_v53  ;;  %6487 = vmatprep.subr.bf16.mxu1 %v13822_v62  ;;  %v13874_v29 = vld [vmem:[#allocation2 + $0x8c0] ss:$20 sps:$4 sm:$0xff]   ;;  %v18816_v53 = vpack.c.bf16 %v18753_v14, %v18753_v14  ;;  %v18820_v62 = vpack.c.bf16 %v18658_v55, %v18658_v55  ;;  %v13877_v14 = vld [vmem:[#allocation2 + $0xb18] ss:$20 sps:$4 sm:$0xff]  }
 0x79f   :  { %6447 = vmatpush1.bf16.msra.mxu0 %v13817_v21  ;;  %6488 = vmatpush1.bf16.msra.mxu1 %v13820_v16  ;;  %v13879_v21 = vld [vmem:[#allocation2 + $0xb1c] ss:$20 sps:$4 sm:$0xff]   ;;  %v13882_v16 = vld [vmem:[#allocation2 + $0x124] ss:$20 sps:$4 sm:$0xff]  }
 0x7a0   :  { %6448 = vmatprep.subr.bf16.mxu0 %v13825_v39  ;;  %6489 = vmatprep.subr.bf16.mxu1 %v13828_v25  ;;  %v18824_v39 = vpack.c.bf16 %v18702_v7, %v18702_v7  ;;  %v18828_v25 = vmax.bf16 %v15180_v45, %v18816_v53 }
 0x7a3   :  { %6449 = vmatpush1.bf16.msra.mxu0 %v13823_v28  ;;  %6490 = vmatpush1.bf16.msra.mxu1 %v13826_v47  ;;  %v13880_v28 = vld [vmem:[#allocation2 + $0x120] ss:$20 sps:$4 sm:$0xff]   ;;  %v18832_v47 = vmax.bf16 %v15180_v45, %v18820_v62 }
 0x7a4   :  { %6450 = vmatprep.subr.bf16.mxu0 %v13831_v48  ;;  %6491 = vmatprep.subr.bf16.mxu1 %v13834_v50  ;;  %v13885_v48 = vld [vmem:[#allocation2 + $0xaf4] ss:$20 sps:$4 sm:$0xff]   ;;  %v13888_v50 = vld [vmem:[#allocation2 + $0xfc] ss:$20 sps:$4 sm:$0xff]  }
 0x7a7   :  { %6451 = vmatpush2.bf16.msra.mxu0 %v13829_v58  ;;  %6492 = vmatpush2.bf16.msra.mxu1 %v13832_v59  ;;  %v18836_v58 = vmax.bf16 %v15180_v45, %v18824_v39  ;;  %v13883_v59 = vld [vmem:[#allocation2 + $0xaf0] ss:$20 sps:$4 sm:$0xff]  }
 0x7a8   :  { %6452 = vmatprep.subr.bf16.mxu0 %v13837_v51  ;;  %6493 = vmatprep.subr.bf16.mxu1 %v13840_v54  ;;  %v13886_v51 = vld [vmem:[#allocation2 + $0xf8] ss:$20 sps:$4 sm:$0xff]  }
 0x7a9   :  { %v13891_v54 = vld [vmem:[#allocation2 + $0xacc] ss:$20 sps:$4 sm:$0xff]  }
 0x7ab   :  { %6453 = vmatpush2.bf16.msra.mxu0 %v13835_v1  ;;  %6494 = vmatpush2.bf16.msra.mxu1 %v13838_v5  ;;  %v13894_v1 = vld [vmem:[#allocation2 + $0xd4] ss:$20 sps:$4 sm:$0xff]  }
 0x7ac   :  { %6454 = vmatprep.subr.bf16.mxu0 %v13843_v61  ;;  %6495 = vmatprep.subr.bf16.mxu1 %v13846_v18  ;;  %v13889_v5 = vld [vmem:[#allocation2 + $0xac8] ss:$20 sps:$4 sm:$0xff]   ;;  %v13892_v61 = vld [vmem:[#allocation2 + $0xd0] ss:$20 sps:$4 sm:$0xff]  }
 0x7ad   :  { %v13897_v18 = vld [vmem:[#allocation2 + $0xaa4] ss:$20 sps:$4 sm:$0xff]  }
 0x7af   :  { %6455 = vmatpush2.bf16.msra.mxu0 %v13841_v8  ;;  %6496 = vmatpush2.bf16.msra.mxu1 %v13844_v30  ;;  %v13900_v8 = vld [vmem:[#allocation2 + $0xac] ss:$20 sps:$4 sm:$0xff]  }
 0x7b0   :  { %6456 = vmatprep.subr.bf16.mxu0 %v13849_v4  ;;  %6497 = vmatprep.subr.bf16.mxu1 %v13852_v11  ;;  %v13895_v30 = vld [vmem:[#allocation2 + $0xaa0] ss:$20 sps:$4 sm:$0xff]   ;;  %v13898_v4 = vld [vmem:[#allocation2 + $0xa8] ss:$20 sps:$4 sm:$0xff]  }
 0x7b1   :  { %v13903_v11 = vld [vmem:[#allocation2 + $0xa7c] ss:$20 sps:$4 sm:$0xff]  }
 0x7b3   :  { %6457 = vmatpush2.bf16.msra.mxu0 %v13847_v19  ;;  %6498 = vmatpush2.bf16.msra.mxu1 %v13850_v20  ;;  %v13906_v19 = vld [vmem:[#allocation2 + $0x84] ss:$20 sps:$4 sm:$0xff]  }
 0x7b4   :  { %6458 = vmatprep.subr.bf16.mxu0 %v13855_v22  ;;  %6499 = vmatprep.subr.bf16.mxu1 %v13858_v24  ;;  %v13901_v20 = vld [vmem:[#allocation2 + $0xa78] ss:$20 sps:$4 sm:$0xff]   ;;  %v13904_v22 = vld [vmem:[#allocation2 + $0x80] ss:$20 sps:$4 sm:$0xff]  }
 0x7b5   :  { %v13909_v24 = vld [vmem:[#allocation2 + $0xa54] ss:$20 sps:$4 sm:$0xff]  }
 0x7b7   :  { %6459 = vmatpush2.bf16.msra.mxu0 %v13853_v26  ;;  %6500 = vmatpush2.bf16.msra.mxu1 %v13856_v56  ;;  %v13912_v26 = vld [vmem:[#allocation2 + $0x5c] ss:$20 sps:$4 sm:$0xff]  }
 0x7b8   :  { %6460 = vmatprep.subr.bf16.mxu0 %v13861_v37  ;;  %6501 = vmatprep.subr.bf16.mxu1 %v13864_v40  ;;  %v13907_v56 = vld [vmem:[#allocation2 + $0xa50] ss:$20 sps:$4 sm:$0xff]   ;;  %v13910_v37 = vld [vmem:[#allocation2 + $0x58] ss:$20 sps:$4 sm:$0xff]  }
 0x7b9   :  { %v13915_v40 = vld [vmem:[#allocation2 + $0xa2c] ss:$20 sps:$4 sm:$0xff]  }
 0x7bb   :  { %6461 = vmatpush2.bf16.msra.mxu0 %v13859_v41  ;;  %6502 = vmatpush2.bf16.msra.mxu1 %v13862_v35  ;;  %v13918_v41 = vld [vmem:[#allocation2 + $0x34] ss:$20 sps:$4 sm:$0xff]  }
 0x7bc   :  { %6462 = vmatprep.subr.bf16.mxu0 %v13867_v49  ;;  %6503 = vmatprep.subr.bf16.mxu1 %v13870_v52  ;;  %v13913_v35 = vld [vmem:[#allocation2 + $0xa28] ss:$20 sps:$4 sm:$0xff]   ;;  %v13916_v49 = vld [vmem:[#allocation2 + $0x30] ss:$20 sps:$4 sm:$0xff]  }
 0x7bd   :  { %v13921_v52 = vld [vmem:[#allocation2 + $0xa04] ss:$20 sps:$4 sm:$0xff]  }
 0x7bf   :  { %6463 = vmatpush2.bf16.msra.mxu0 %v13865_v36  ;;  %6504 = vmatpush2.bf16.msra.mxu1 %v13868_v57  ;;  %v13924_v36 = vld [vmem:[#allocation2 + $0xc] ss:$20 sps:$4 sm:$0xff]  }
 0x7c0   :  { %6464 = vmatprep.subr.bf16.mxu0 %v13873_v38  ;;  %6505 = vmatprep.subr.bf16.mxu1 %v13876_v43  ;;  %v13919_v57 = vld [vmem:[#allocation2 + $0xa00] ss:$20 sps:$4 sm:$0xff]   ;;  %v13922_v38 = vld [vmem:[#allocation2 + $0x8] ss:$20 sps:$4 sm:$0xff]  }
 0x7c1   :  { %v13927_v43 = vld [vmem:[#allocation2 + $0xc5c] ss:$20 sps:$4 sm:$0xff]  }
 0x7c3   :  { %6465 = vmatpush2.bf16.msra.mxu0 %v13871_v10  ;;  %6506 = vmatpush2.bf16.msra.mxu1 %v13874_v29  ;;  %v13930_v10 = vld [vmem:[#allocation2 + $0x264] ss:$20 sps:$4 sm:$0xff]  }
 0x7c4   :  { %6516 = vmatprep.subr.bf16.mxu0 %v13879_v21  ;;  %6557 = vmatprep.subr.bf16.mxu1 %v13882_v16  ;;  %v13925_v29 = vld [vmem:[#allocation2 + $0xc58] ss:$20 sps:$4 sm:$0xff]   ;;  %v13928_v21 = vld [vmem:[#allocation2 + $0x260] ss:$20 sps:$4 sm:$0xff]  }
 0x7c5   :  { %v13933_v16 = vld [vmem:[#allocation2 + $0xc34] ss:$20 sps:$4 sm:$0xff]  }
 0x7c6   :  { %6467 = vmatmul.mubr.bf16.vlgmr.msra.gmra.mxu0 %v18828_v25  ;;  %6508 = vmatmul.mubr.bf16.vlgmr.msra.gmra.mxu1 %v18832_v47 }
 0x7c7   :  { %6517 = vmatpush1.bf16.msra.mxu0 %v13877_v14  ;;  %6558 = vmatpush1.bf16.msra.mxu1 %v13880_v28  ;;  %v13936_v14 = vld [vmem:[#allocation2 + $0x23c] ss:$20 sps:$4 sm:$0xff]  }
 0x7c8   :  { %6518 = vmatprep.subr.bf16.mxu0 %v13885_v48  ;;  %6559 = vmatprep.subr.bf16.mxu1 %v13888_v50  ;;  %v13931_v28 = vld [vmem:[#allocation2 + $0xc30] ss:$20 sps:$4 sm:$0xff]   ;;  %v13934_v48 = vld [vmem:[#allocation2 + $0x238] ss:$20 sps:$4 sm:$0xff]  }
 0x7c9   :  { %6548 = vmatprep.mubr.bf16.mxu0 %v18836_v58  ;;  %6589 = vmatprep.mubr.bf16.mxu1 %v18770_v46  ;;  %v13939_v50 = vld [vmem:[#allocation2 + $0xc0c] ss:$20 sps:$4 sm:$0xff]  }
 0x7cb   :  { %6519 = vmatpush1.bf16.msra.mxu0 %v13883_v59  ;;  %6560 = vmatpush1.bf16.msra.mxu1 %v13886_v51  ;;  %v13942_v59 = vld [vmem:[#allocation2 + $0x214] ss:$20 sps:$4 sm:$0xff]  }
 0x7cc   :  { %6520 = vmatprep.subr.bf16.mxu0 %v13891_v54  ;;  %6561 = vmatprep.subr.bf16.mxu1 %v13894_v1  ;;  %v13937_v51 = vld [vmem:[#allocation2 + $0xc08] ss:$20 sps:$4 sm:$0xff]   ;;  %v13940_v54 = vld [vmem:[#allocation2 + $0x210] ss:$20 sps:$4 sm:$0xff]  }
 0x7cd   :  { %v13945_v1 = vld [vmem:[#allocation2 + $0xbe4] ss:$20 sps:$4 sm:$0xff]  }
 0x7cf   :  { %6521 = vmatpush1.bf16.msra.mxu0 %v13889_v5  ;;  %6562 = vmatpush1.bf16.msra.mxu1 %v13892_v61  ;;  %v13948_v5 = vld [vmem:[#allocation2 + $0x1ec] ss:$20 sps:$4 sm:$0xff]  }
 0x7d0   :  { %6522 = vmatprep.subr.bf16.mxu0 %v13897_v18  ;;  %6563 = vmatprep.subr.bf16.mxu1 %v13900_v8  ;;  %v13943_v61 = vld [vmem:[#allocation2 + $0xbe0] ss:$20 sps:$4 sm:$0xff]   ;;  %v13946_v18 = vld [vmem:[#allocation2 + $0x1e8] ss:$20 sps:$4 sm:$0xff]  }
 0x7d1   :  { %v13951_v8 = vld [vmem:[#allocation2 + $0xbbc] ss:$20 sps:$4 sm:$0xff]  }
 0x7d3   :  { %6523 = vmatpush1.bf16.msra.mxu0 %v13895_v30  ;;  %6564 = vmatpush1.bf16.msra.mxu1 %v13898_v4  ;;  %v13954_v30 = vld [vmem:[#allocation2 + $0x1c4] ss:$20 sps:$4 sm:$0xff]  }
 0x7d4   :  { %6524 = vmatprep.subr.bf16.mxu0 %v13903_v11  ;;  %6565 = vmatprep.subr.bf16.mxu1 %v13906_v19  ;;  %v13949_v4 = vld [vmem:[#allocation2 + $0xbb8] ss:$20 sps:$4 sm:$0xff]   ;;  %v13952_v11 = vld [vmem:[#allocation2 + $0x1c0] ss:$20 sps:$4 sm:$0xff]  }
 0x7d5   :  { %v13957_v19 = vld [vmem:[#allocation2 + $0xb94] ss:$20 sps:$4 sm:$0xff]  }
 0x7d7   :  { %6525 = vmatpush1.bf16.msra.mxu0 %v13901_v20  ;;  %6566 = vmatpush1.bf16.msra.mxu1 %v13904_v22  ;;  %v13960_v20 = vld [vmem:[#allocation2 + $0x19c] ss:$20 sps:$4 sm:$0xff]  }
 0x7d8   :  { %6526 = vmatprep.subr.bf16.mxu0 %v13909_v24  ;;  %6567 = vmatprep.subr.bf16.mxu1 %v13912_v26  ;;  %v13955_v22 = vld [vmem:[#allocation2 + $0xb90] ss:$20 sps:$4 sm:$0xff]   ;;  %v13958_v24 = vld [vmem:[#allocation2 + $0x198] ss:$20 sps:$4 sm:$0xff]  }
 0x7d9   :  { %v13963_v26 = vld [vmem:[#allocation2 + $0xb6c] ss:$20 sps:$4 sm:$0xff]  }
 0x7db   :  { %6527 = vmatpush1.bf16.msra.mxu0 %v13907_v56  ;;  %6568 = vmatpush1.bf16.msra.mxu1 %v13910_v37  ;;  %v13966_v56 = vld [vmem:[#allocation2 + $0x174] ss:$20 sps:$4 sm:$0xff]  }
 0x7dc   :  { %6528 = vmatprep.subr.bf16.mxu0 %v13915_v40  ;;  %6569 = vmatprep.subr.bf16.mxu1 %v13918_v41  ;;  %v13961_v37 = vld [vmem:[#allocation2 + $0xb68] ss:$20 sps:$4 sm:$0xff]   ;;  %v13964_v40 = vld [vmem:[#allocation2 + $0x170] ss:$20 sps:$4 sm:$0xff]  }
 0x7dd   :  { %v13969_v41 = vld [vmem:[#allocation2 + $0xb44] ss:$20 sps:$4 sm:$0xff]  }
 0x7df   :  { %6529 = vmatpush1.bf16.msra.mxu0 %v13913_v35  ;;  %6570 = vmatpush1.bf16.msra.mxu1 %v13916_v49  ;;  %v13972_v35 = vld [vmem:[#allocation2 + $0x14c] ss:$20 sps:$4 sm:$0xff]  }
 0x7e0   :  { %6530 = vmatprep.subr.bf16.mxu0 %v13921_v52  ;;  %6571 = vmatprep.subr.bf16.mxu1 %v13924_v36  ;;  %v13967_v49 = vld [vmem:[#allocation2 + $0xb40] ss:$20 sps:$4 sm:$0xff]   ;;  %v18844_v52 = vpack.c.bf16 %v18684_v42, %v18684_v42  ;;  %v13970_v36 = vld [vmem:[#allocation2 + $0x148] ss:$20 sps:$4 sm:$0xff]  }
 0x7e3   :  { %6531 = vmatpush1.bf16.msra.mxu0 %v13919_v57  ;;  %6572 = vmatpush1.bf16.msra.mxu1 %v13922_v38  ;;  %v13975_v57 = vld [vmem:[#allocation2 + $0x3a4] ss:$20 sps:$4 sm:$0xff]  }
 0x7e4   :  { %6532 = vmatprep.subr.bf16.mxu0 %v13927_v43  ;;  %6573 = vmatprep.subr.bf16.mxu1 %v13930_v10  ;;  %v13978_v38 = vld [vmem:[#allocation2 + $0x624] ss:$20 sps:$4 sm:$0xff]   ;;  %v18848_v43 = vmax.bf16 %v15180_v45, %v18844_v52  ;;  %v13973_v10 = vld [vmem:[#allocation2 + $0x3a0] ss:$20 sps:$4 sm:$0xff]  }
 0x7e7   :  { %6533 = vmatpush2.bf16.msra.mxu0 %v13925_v29  ;;  %6574 = vmatpush2.bf16.msra.mxu1 %v13928_v21  ;;  %v13976_v29 = vld [vmem:[#allocation2 + $0x620] ss:$20 sps:$4 sm:$0xff]   ;;  %v13981_v21 = vld [vmem:[#allocation2 + $0x37c] ss:$20 sps:$4 sm:$0xff]  }
 0x7e8   :  { %6534 = vmatprep.subr.bf16.mxu0 %v13933_v16  ;;  %6575 = vmatprep.subr.bf16.mxu1 %v13936_v14  ;;  %v13984_v16 = vld [vmem:[#allocation2 + $0x5fc] ss:$20 sps:$4 sm:$0xff]   ;;  %v13979_v14 = vld [vmem:[#allocation2 + $0x378] ss:$20 sps:$4 sm:$0xff]  }
 0x7eb   :  { %6535 = vmatpush2.bf16.msra.mxu0 %v13931_v28  ;;  %6576 = vmatpush2.bf16.msra.mxu1 %v13934_v48  ;;  %v13982_v28 = vld [vmem:[#allocation2 + $0x5f8] ss:$20 sps:$4 sm:$0xff]   ;;  %v13987_v48 = vld [vmem:[#allocation2 + $0x354] ss:$20 sps:$4 sm:$0xff]  }
 0x7ec   :  { %6536 = vmatprep.subr.bf16.mxu0 %v13939_v50  ;;  %6577 = vmatprep.subr.bf16.mxu1 %v13942_v59  ;;  %v13990_v50 = vld [vmem:[#allocation2 + $0x5d4] ss:$20 sps:$4 sm:$0xff]   ;;  %v13985_v59 = vld [vmem:[#allocation2 + $0x350] ss:$20 sps:$4 sm:$0xff]  }
 0x7ef   :  { %6537 = vmatpush2.bf16.msra.mxu0 %v13937_v51  ;;  %6578 = vmatpush2.bf16.msra.mxu1 %v13940_v54  ;;  %v13988_v51 = vld [vmem:[#allocation2 + $0x5d0] ss:$20 sps:$4 sm:$0xff]   ;;  %v13993_v54 = vld [vmem:[#allocation2 + $0x32c] ss:$20 sps:$4 sm:$0xff]  }
 0x7f0   :  { %6538 = vmatprep.subr.bf16.mxu0 %v13945_v1  ;;  %6579 = vmatprep.subr.bf16.mxu1 %v13948_v5  ;;  %v13996_v1 = vld [vmem:[#allocation2 + $0x5ac] ss:$20 sps:$4 sm:$0xff]   ;;  %v13991_v5 = vld [vmem:[#allocation2 + $0x328] ss:$20 sps:$4 sm:$0xff]  }
 0x7f3   :  { %6539 = vmatpush2.bf16.msra.mxu0 %v13943_v61  ;;  %6580 = vmatpush2.bf16.msra.mxu1 %v13946_v18  ;;  %v13994_v61 = vld [vmem:[#allocation2 + $0x5a8] ss:$20 sps:$4 sm:$0xff]   ;;  %v13999_v18 = vld [vmem:[#allocation2 + $0x304] ss:$20 sps:$4 sm:$0xff]  }
 0x7f4   :  { %6540 = vmatprep.subr.bf16.mxu0 %v13951_v8  ;;  %6581 = vmatprep.subr.bf16.mxu1 %v13954_v30  ;;  %v14002_v8 = vld [vmem:[#allocation2 + $0x584] ss:$20 sps:$4 sm:$0xff]   ;;  %v13997_v30 = vld [vmem:[#allocation2 + $0x300] ss:$20 sps:$4 sm:$0xff]  }
 0x7f7   :  { %6541 = vmatpush2.bf16.msra.mxu0 %v13949_v4  ;;  %6582 = vmatpush2.bf16.msra.mxu1 %v13952_v11  ;;  %v14000_v4 = vld [vmem:[#allocation2 + $0x580] ss:$20 sps:$4 sm:$0xff]   ;;  %v14005_v11 = vld [vmem:[#allocation2 + $0x2dc] ss:$20 sps:$4 sm:$0xff]  }
 0x7f8   :  { %6542 = vmatprep.subr.bf16.mxu0 %v13957_v19  ;;  %6583 = vmatprep.subr.bf16.mxu1 %v13960_v20  ;;  %v14008_v19 = vld [vmem:[#allocation2 + $0x55c] ss:$20 sps:$4 sm:$0xff]   ;;  %v14003_v20 = vld [vmem:[#allocation2 + $0x2d8] ss:$20 sps:$4 sm:$0xff]  }
 0x7fb   :  { %6543 = vmatpush2.bf16.msra.mxu0 %v13955_v22  ;;  %6584 = vmatpush2.bf16.msra.mxu1 %v13958_v24  ;;  %v14006_v22 = vld [vmem:[#allocation2 + $0x558] ss:$20 sps:$4 sm:$0xff]   ;;  %v4249_v24 = vsub.s32 0, %v18720_v34 }
 0x7fc   :  { %6544 = vmatprep.subr.bf16.mxu0 %v13963_v26  ;;  %6585 = vmatprep.subr.bf16.mxu1 %v13966_v56  ;;  %v4253_v26 = vsub.s32 1, %v18720_v34  ;;  %v14011_v56 = vld [vmem:[#allocation2 + $0x2b4] ss:$20 sps:$4 sm:$0xff]  }
 0x7ff   :  { %6545 = vmatpush2.bf16.msra.mxu0 %v13961_v37  ;;  %6586 = vmatpush2.bf16.msra.mxu1 %v13964_v40  ;;  %v14014_v37 = vld [vmem:[#allocation2 + $0x534] ss:$20 sps:$4 sm:$0xff]   ;;  %v14009_v40 = vld [vmem:[#allocation2 + $0x2b0] ss:$20 sps:$4 sm:$0xff]  }
 0x800   :  { %6546 = vmatprep.subr.bf16.mxu0 %v13969_v41  ;;  %6587 = vmatprep.subr.bf16.mxu1 %v13972_v35  ;;  %v14012_v41 = vld [vmem:[#allocation2 + $0x530] ss:$20 sps:$4 sm:$0xff]   ;;  %v14017_v35 = vld [vmem:[#allocation2 + $0x28c] ss:$20 sps:$4 sm:$0xff]  }
 0x803   :  { %6547 = vmatpush2.bf16.msra.mxu0 %v13967_v49  ;;  %6588 = vmatpush2.bf16.msra.mxu1 %v13970_v36  ;;  %v14020_v49 = vld [vmem:[#allocation2 + $0x50c] ss:$20 sps:$4 sm:$0xff]   ;;  %v14015_v36 = vld [vmem:[#allocation2 + $0x288] ss:$20 sps:$4 sm:$0xff]  }
 0x804   :  { %6598 = vmatprep.subr.bf16.mxu0 %v13975_v57  ;;  %6639 = vmatprep.subr.bf16.mxu1 %v13978_v38  ;;  %v14018_v57 = vld [vmem:[#allocation2 + $0x508] ss:$20 sps:$4 sm:$0xff]   ;;  %v14023_v38 = vld [vmem:[#allocation2 + $0x4e4] ss:$20 sps:$4 sm:$0xff]  }
 0x806   :  { %6549 = vmatmul.mubr.bf16.vlgmr.msra.gmra.mxu0 %v18848_v43  ;;  %6590 = vmatmul.mubr.bf16.vlgmr.msra.gmra.mxu1 %v18796_v15 }
 0x807   :  { %6599 = vmatpush1.bf16.msra.mxu0 %v13973_v10  ;;  %6640 = vmatpush1.bf16.msra.mxu1 %v13976_v29  ;;  %v14026_v10 = vld [vmem:[#allocation2 + $0x764] ss:$20 sps:$4 sm:$0xff]   ;;  %v14021_v29 = vld [vmem:[#allocation2 + $0x4e0] ss:$20 sps:$4 sm:$0xff]  }
 0x808   :  { %6600 = vmatprep.subr.bf16.mxu0 %v13981_v21  ;;  %6641 = vmatprep.subr.bf16.mxu1 %v13984_v16  ;;  %v14024_v21 = vld [vmem:[#allocation2 + $0x760] ss:$20 sps:$4 sm:$0xff]   ;;  %v14029_v16 = vld [vmem:[#allocation2 + $0x4bc] ss:$20 sps:$4 sm:$0xff]  }
 0x809   :  { %6630 = vmatprep.mubr.bf16.mxu0 %v18774_v13  ;;  %6671 = vmatprep.mubr.bf16.mxu1 %v18804_v12 }
 0x80b   :  { %6601 = vmatpush1.bf16.msra.mxu0 %v13979_v14  ;;  %6642 = vmatpush1.bf16.msra.mxu1 %v13982_v28  ;;  %v14032_v14 = vld [vmem:[#allocation2 + $0x73c] ss:$20 sps:$4 sm:$0xff]   ;;  %v14027_v28 = vld [vmem:[#allocation2 + $0x4b8] ss:$20 sps:$4 sm:$0xff]  }
 0x80c   :  { %6602 = vmatprep.subr.bf16.mxu0 %v13987_v48  ;;  %6643 = vmatprep.subr.bf16.mxu1 %v13990_v50  ;;  %v14030_v48 = vld [vmem:[#allocation2 + $0x738] ss:$20 sps:$4 sm:$0xff]   ;;  %v14035_v50 = vld [vmem:[#allocation2 + $0x494] ss:$20 sps:$4 sm:$0xff]  }
 0x80f   :  { %6603 = vmatpush1.bf16.msra.mxu0 %v13985_v59  ;;  %6644 = vmatpush1.bf16.msra.mxu1 %v13988_v51  ;;  %v14038_v59 = vld [vmem:[#allocation2 + $0x714] ss:$20 sps:$4 sm:$0xff]   ;;  %v14033_v51 = vld [vmem:[#allocation2 + $0x490] ss:$20 sps:$4 sm:$0xff]  }
 0x810   :  { %6604 = vmatprep.subr.bf16.mxu0 %v13993_v54  ;;  %6645 = vmatprep.subr.bf16.mxu1 %v13996_v1  ;;  %v14036_v54 = vld [vmem:[#allocation2 + $0x710] ss:$20 sps:$4 sm:$0xff]   ;;  %v14041_v1 = vld [vmem:[#allocation2 + $0x46c] ss:$20 sps:$4 sm:$0xff]  }
 0x813   :  { %6605 = vmatpush1.bf16.msra.mxu0 %v13991_v5  ;;  %6646 = vmatpush1.bf16.msra.mxu1 %v13994_v61  ;;  %v14044_v5 = vld [vmem:[#allocation2 + $0x6ec] ss:$20 sps:$4 sm:$0xff]   ;;  %v14039_v61 = vld [vmem:[#allocation2 + $0x468] ss:$20 sps:$4 sm:$0xff]  }
 0x814   :  { %6606 = vmatprep.subr.bf16.mxu0 %v13999_v18  ;;  %6647 = vmatprep.subr.bf16.mxu1 %v14002_v8  ;;  %v14042_v18 = vld [vmem:[#allocation2 + $0x6e8] ss:$20 sps:$4 sm:$0xff]   ;;  %v14047_v8 = vld [vmem:[#allocation2 + $0x444] ss:$20 sps:$4 sm:$0xff]  }
 0x817   :  { %6607 = vmatpush1.bf16.msra.mxu0 %v13997_v30  ;;  %6648 = vmatpush1.bf16.msra.mxu1 %v14000_v4  ;;  %v14050_v30 = vld [vmem:[#allocation2 + $0x6c4] ss:$20 sps:$4 sm:$0xff]   ;;  %v14045_v4 = vld [vmem:[#allocation2 + $0x440] ss:$20 sps:$4 sm:$0xff]  }
 0x818   :  { %6608 = vmatprep.subr.bf16.mxu0 %v14005_v11  ;;  %6649 = vmatprep.subr.bf16.mxu1 %v14008_v19  ;;  %v14048_v11 = vld [vmem:[#allocation2 + $0x6c0] ss:$20 sps:$4 sm:$0xff]   ;;  %v14053_v19 = vld [vmem:[#allocation2 + $0x41c] ss:$20 sps:$4 sm:$0xff]  }
 0x81b   :  { %6609 = vmatpush1.bf16.msra.mxu0 %v14003_v20  ;;  %6650 = vmatpush1.bf16.msra.mxu1 %v14006_v22  ;;  %v14056_v20 = vld [vmem:[#allocation2 + $0x69c] ss:$20 sps:$4 sm:$0xff]   ;;  %v14051_v22 = vld [vmem:[#allocation2 + $0x418] ss:$20 sps:$4 sm:$0xff]  }
 0x81c   :  { %6610 = vmatprep.subr.bf16.mxu0 %v14011_v56  ;;  %6651 = vmatprep.subr.bf16.mxu1 %v14014_v37  ;;  %v14054_v56 = vld [vmem:[#allocation2 + $0x698] ss:$20 sps:$4 sm:$0xff]   ;;  %v14059_v37 = vld [vmem:[#allocation2 + $0x3f4] ss:$20 sps:$4 sm:$0xff]  }
 0x81f   :  { %6611 = vmatpush1.bf16.msra.mxu0 %v14009_v40  ;;  %6652 = vmatpush1.bf16.msra.mxu1 %v14012_v41  ;;  %v14062_v40 = vld [vmem:[#allocation2 + $0x674] ss:$20 sps:$4 sm:$0xff]   ;;  %v14057_v41 = vld [vmem:[#allocation2 + $0x3f0] ss:$20 sps:$4 sm:$0xff]  }
 0x820   :  { %6612 = vmatprep.subr.bf16.mxu0 %v14017_v35  ;;  %6653 = vmatprep.subr.bf16.mxu1 %v14020_v49  ;;  %v14060_v35 = vld [vmem:[#allocation2 + $0x670] ss:$20 sps:$4 sm:$0xff]   ;;  %v14065_v49 = vld [vmem:[#allocation2 + $0x3cc] ss:$20 sps:$4 sm:$0xff]  }
 0x823   :  { %6613 = vmatpush1.bf16.msra.mxu0 %v14015_v36  ;;  %6654 = vmatpush1.bf16.msra.mxu1 %v14018_v57  ;;  %v14068_v36 = vld [vmem:[#allocation2 + $0x64c] ss:$20 sps:$4 sm:$0xff]   ;;  %v14063_v57 = vld [vmem:[#allocation2 + $0x3c8] ss:$20 sps:$4 sm:$0xff]  }
 0x824   :  { %6614 = vmatprep.subr.bf16.mxu0 %v14023_v38  ;;  %6655 = vmatprep.subr.bf16.mxu1 %v14026_v10  ;;  %v14066_v38 = vld [vmem:[#allocation2 + $0x648] ss:$20 sps:$4 sm:$0xff]   ;;  %v4245_v10 = vld [vmem:[%s19149_s4] sm:$0x1f] }
 0x827   :  { %6615 = vmatpush2.bf16.msra.mxu0 %v14021_v29  ;;  %6656 = vmatpush2.bf16.msra.mxu1 %v14024_v21  ;;  %v14071_v29 = vld [vmem:[#allocation2 + $0x8a4] ss:$20 sps:$4 sm:$0xff]  }
 0x828   :  { %6616 = vmatprep.subr.bf16.mxu0 %v14029_v16  ;;  %6657 = vmatprep.subr.bf16.mxu1 %v14032_v14  ;;  %v14074_v21 = vld [vmem:[#allocation2 + $0xb24] ss:$20 sps:$4 sm:$0xff]   ;;  %v14069_v16 = vld [vmem:[#allocation2 + $0x8a0] ss:$20 sps:$4 sm:$0xff]  }
 0x829   :  { %v14072_v14 = vld [vmem:[#allocation2 + $0xb20] ss:$20 sps:$4 sm:$0xff]  }
 0x82b   :  { %6617 = vmatpush2.bf16.msra.mxu0 %v14027_v28  ;;  %6658 = vmatpush2.bf16.msra.mxu1 %v14030_v48  ;;  %v4250_v28 = vrot.slane %v4245_v10, %v4249_v24  ;;  %v14077_v48 = vld [vmem:[#allocation2 + $0x87c] ss:$20 sps:$4 sm:$0xff]  }
 0x82c   :  { %6618 = vmatprep.subr.bf16.mxu0 %v14035_v50  ;;  %6659 = vmatprep.subr.bf16.mxu1 %v14038_v59  ;;  %v14080_v50 = vld [vmem:[#allocation2 + $0xafc] ss:$20 sps:$4 sm:$0xff]   ;;  %v4254_v59 = vrot.slane %v4245_v10, %v4253_v26  ;;  %v14095_v10 = vld [vmem:[#allocation2 + $0x804] ss:$20 sps:$4 sm:$0xff]  }
 0x82f   :  { %6619 = vmatpush2.bf16.msra.mxu0 %v14033_v51  ;;  %6660 = vmatpush2.bf16.msra.mxu1 %v14036_v54  ;;  %v14075_v51 = vld [vmem:[#allocation2 + $0x878] ss:$20 sps:$4 sm:$0xff]  }
 0x830   :  { %6620 = vmatprep.subr.bf16.mxu0 %v14041_v1  ;;  %6661 = vmatprep.subr.bf16.mxu1 %v14044_v5  ;;  %v14078_v5 = vld [vmem:[#allocation2 + $0xaf8] ss:$20 sps:$4 sm:$0xff]  }
 0x833   :  { %6621 = vmatpush2.bf16.msra.mxu0 %v14039_v61  ;;  %6662 = vmatpush2.bf16.msra.mxu1 %v14042_v18  ;;  %v14083_v18 = vld [vmem:[#allocation2 + $0x854] ss:$20 sps:$4 sm:$0xff]  }
 0x834   :  { %6622 = vmatprep.subr.bf16.mxu0 %v14047_v8  ;;  %6663 = vmatprep.subr.bf16.mxu1 %v14050_v30 }
 0x837   :  { %6623 = vmatpush2.bf16.msra.mxu0 %v14045_v4  ;;  %6664 = vmatpush2.bf16.msra.mxu1 %v14048_v11  ;;  %v14086_v4 = vld [vmem:[#allocation2 + $0xad4] ss:$20 sps:$4 sm:$0xff]  }
 0x838   :  { %6624 = vmatprep.subr.bf16.mxu0 %v14053_v19  ;;  %6665 = vmatprep.subr.bf16.mxu1 %v14056_v20  ;;  %v14081_v20 = vld [vmem:[#allocation2 + $0x850] ss:$20 sps:$4 sm:$0xff]  }
 0x83b   :  { %6625 = vmatpush2.bf16.msra.mxu0 %v14051_v22  ;;  %6666 = vmatpush2.bf16.msra.mxu1 %v14054_v56  ;;  %v14084_v56 = vld [vmem:[#allocation2 + $0xad0] ss:$20 sps:$4 sm:$0xff]  }
 0x83c   :  { %6626 = vmatprep.subr.bf16.mxu0 %v14059_v37  ;;  %6667 = vmatprep.subr.bf16.mxu1 %v14062_v40 }
 0x83f   :  { %6627 = vmatpush2.bf16.msra.mxu0 %v14057_v41  ;;  %6668 = vmatpush2.bf16.msra.mxu1 %v14060_v35  ;;  %v14089_v41 = vld [vmem:[#allocation2 + $0x82c] ss:$20 sps:$4 sm:$0xff]  }
 0x840   :  { %6628 = vmatprep.subr.bf16.mxu0 %v14065_v49  ;;  %6669 = vmatprep.subr.bf16.mxu1 %v14068_v36  ;;  %v14092_v49 = vld [vmem:[#allocation2 + $0xaac] ss:$20 sps:$4 sm:$0xff]  }
 0x843   :  { %6629 = vmatpush2.bf16.msra.mxu0 %v14063_v57  ;;  %6670 = vmatpush2.bf16.msra.mxu1 %v14066_v38  ;;  %v14087_v57 = vld [vmem:[#allocation2 + $0x828] ss:$20 sps:$4 sm:$0xff]  }
 0x844   :  { %6680 = vmatprep.subr.bf16.mxu0 %v14071_v29  ;;  %6721 = vmatprep.subr.bf16.mxu1 %v14074_v21  ;;  %v14090_v38 = vld [vmem:[#allocation2 + $0xaa8] ss:$20 sps:$4 sm:$0xff]   ;;  %v14098_v29 = vld [vmem:[#allocation2 + $0xa84] ss:$20 sps:$4 sm:$0xff]   ;;  %v14093_v21 = vld [vmem:[#allocation2 + $0x800] ss:$20 sps:$4 sm:$0xff]  }
 0x846   :  { %v6386_v54 = vpop.f32.mrf.mxu0  ;;  %6631 = vmatmul.mubr.bf16.vlgmr.msra.gmra.mxu0 %v18800_v2  ;;  %6672 = vmatmul.mubr.bf16.vlgmr.msra.gmra.mxu1 %v18828_v25  ;;  %v6427_v1 = vpop.f32.mrf.mxu1 }
 0x847   :  { %v6387_v61 = vadd.f32 %v6386_v54, %v4250_v28  ;;  %6681 = vmatpush1.bf16.msra.mxu0 %v14069_v16  ;;  %6722 = vmatpush1.bf16.msra.mxu1 %v14072_v14  ;;  %v14096_v16 = vld [vmem:[#allocation2 + $0xa80] ss:$20 sps:$4 sm:$0xff]   ;;  %v14101_v14 = vld [vmem:[#allocation2 + $0x7dc] ss:$20 sps:$4 sm:$0xff]  }
 0x848   :  { %v6388_v8 = vpop.f32.mrf.mxu0  ;;  %v6429_v30 = vpop.f32.mrf.mxu1  ;;  %6682 = vmatprep.subr.bf16.mxu0 %v14077_v48  ;;  %6723 = vmatprep.subr.bf16.mxu1 %v14080_v50  ;;  %v14104_v28 = vld [vmem:[#allocation2 + $0xa5c] ss:$20 sps:$4 sm:$0xff]   ;;  %v14099_v48 = vld [vmem:[#allocation2 + $0x7d8] ss:$20 sps:$4 sm:$0xff]  }
 0x849   :  { %v6389_v11 = vadd.f32 %v6388_v8, %v4254_v59  ;;  %v18865_v19 = vadd.f32 %v6427_v1, %v6387_v61  ;;  %6712 = vmatprep.mubr.bf16.mxu0 %v18808_v6  ;;  %6753 = vmatprep.mubr.bf16.mxu1 %v18836_v58  ;;  %v14102_v50 = vld [vmem:[#allocation2 + $0xa58] ss:$20 sps:$4 sm:$0xff]   ;;  %v14107_v59 = vld [vmem:[#allocation2 + $0x7b4] ss:$20 sps:$4 sm:$0xff]   ;;  %v14105_v54 = vld [vmem:[#allocation2 + $0x7b0] ss:$20 sps:$4 sm:$0xff]  }
 0x84a   :  { %v6390_v22 = vpop.f32.mrf.mxu0  ;;  %v6431_v37 = vpop.f32.mrf.mxu1  ;;  %v14108_v1 = vld [vmem:[#allocation2 + $0xa30] ss:$20 sps:$4 sm:$0xff]   ;;  %v14116_v61 = vld [vmem:[#allocation2 + $0xa0c] ss:$20 sps:$4 sm:$0xff]   ;;  %v14114_v8 = vld [vmem:[#allocation2 + $0xa08] ss:$20 sps:$4 sm:$0xff]  }
 0x84b   :  { %v18869_v40 = vadd.f32 %v6429_v30, %v6389_v11  ;;  %6683 = vmatpush1.bf16.msra.mxu0 %v14075_v51  ;;  %6724 = vmatpush1.bf16.msra.mxu1 %v14078_v5  ;;  %v14110_v51 = vld [vmem:[#allocation2 + $0xa34] ss:$20 sps:$4 sm:$0xff]   ;;  %v14113_v5 = vld [vmem:[#allocation2 + $0x78c] ss:$20 sps:$4 sm:$0xff]   ;;  %v14119_v30 = vld [vmem:[#allocation2 + $0x9e4] ss:$20 sps:$4 sm:$0xff]  }
 0x84c   :  { %v6391_v35 = vpop.f32.mrf.mxu0  ;;  %6684 = vmatprep.subr.bf16.mxu0 %v14083_v18  ;;  %6725 = vmatprep.subr.bf16.mxu1 %v14086_v4  ;;  %v6432_v36 = vpop.f32.mrf.mxu1  ;;  %v14111_v18 = vld [vmem:[#allocation2 + $0x788] ss:$20 sps:$4 sm:$0xff]   ;;  %v14122_v4 = vld [vmem:[#allocation2 + $0xc64] ss:$20 sps:$4 sm:$0xff]   ;;  %v14117_v11 = vld [vmem:[#allocation2 + $0x9e0] ss:$20 sps:$4 sm:$0xff]  }
 0x84d   :  { %v14125_v22 = vld [vmem:[#allocation2 + $0x9bc] ss:$20 sps:$4 sm:$0xff]   ;;  %v14123_v37 = vld [vmem:[#allocation2 + $0x9b8] ss:$20 sps:$4 sm:$0xff]   ;;  %v14131_v35 = vld [vmem:[#allocation2 + $0x994] ss:$20 sps:$4 sm:$0xff]  }
 0x84e   :  { %v14129_v36 = vld [vmem:[#allocation2 + $0x990] ss:$20 sps:$4 sm:$0xff]  }
 0x84f   :  { %6685 = vmatpush1.bf16.msra.mxu0 %v14081_v20  ;;  %6726 = vmatpush1.bf16.msra.mxu1 %v14084_v56  ;;  %v14120_v20 = vld [vmem:[#allocation2 + $0xc60] ss:$20 sps:$4 sm:$0xff]   ;;  %v14128_v56 = vld [vmem:[#allocation2 + $0xc3c] ss:$20 sps:$4 sm:$0xff]  }
 0x850   :  { %6686 = vmatprep.subr.bf16.mxu0 %v14089_v41  ;;  %6727 = vmatprep.subr.bf16.mxu1 %v14092_v49  ;;  %v14126_v41 = vld [vmem:[#allocation2 + $0xc38] ss:$20 sps:$4 sm:$0xff]   ;;  %v14134_v49 = vld [vmem:[#allocation2 + $0xc14] ss:$20 sps:$4 sm:$0xff]  }
 0x853   :  { %6687 = vmatpush1.bf16.msra.mxu0 %v14087_v57  ;;  %6728 = vmatpush1.bf16.msra.mxu1 %v14090_v38  ;;  %v14132_v57 = vld [vmem:[#allocation2 + $0xc10] ss:$20 sps:$4 sm:$0xff]   ;;  %v14137_v38 = vld [vmem:[#allocation2 + $0x96c] ss:$20 sps:$4 sm:$0xff]  }
 0x854   :  { %6688 = vmatprep.subr.bf16.mxu0 %v14095_v10  ;;  %6729 = vmatprep.subr.bf16.mxu1 %v14098_v29  ;;  %v14140_v10 = vld [vmem:[#allocation2 + $0xbec] ss:$20 sps:$4 sm:$0xff]   ;;  %v14135_v29 = vld [vmem:[#allocation2 + $0x968] ss:$20 sps:$4 sm:$0xff]  }
 0x857   :  { %6689 = vmatpush1.bf16.msra.mxu0 %v14093_v21  ;;  %6730 = vmatpush1.bf16.msra.mxu1 %v14096_v16  ;;  %v14138_v21 = vld [vmem:[#allocation2 + $0xbe8] ss:$20 sps:$4 sm:$0xff]   ;;  %v14143_v16 = vld [vmem:[#allocation2 + $0x944] ss:$20 sps:$4 sm:$0xff]  }
 0x858   :  { %6690 = vmatprep.subr.bf16.mxu0 %v14101_v14  ;;  %6731 = vmatprep.subr.bf16.mxu1 %v14104_v28  ;;  %v14146_v14 = vld [vmem:[#allocation2 + $0xbc4] ss:$20 sps:$4 sm:$0xff]   ;;  %v14141_v28 = vld [vmem:[#allocation2 + $0x940] ss:$20 sps:$4 sm:$0xff]  }
 0x85b   :  { %6691 = vmatpush1.bf16.msra.mxu0 %v14099_v48  ;;  %6732 = vmatpush1.bf16.msra.mxu1 %v14102_v50  ;;  %v14144_v48 = vld [vmem:[#allocation2 + $0xbc0] ss:$20 sps:$4 sm:$0xff]   ;;  %v14149_v50 = vld [vmem:[#allocation2 + $0x91c] ss:$20 sps:$4 sm:$0xff]  }
 0x85c   :  { %6692 = vmatprep.subr.bf16.mxu0 %v14107_v59  ;;  %6733 = vmatprep.subr.bf16.mxu1 %v14110_v51  ;;  %v14152_v59 = vld [vmem:[#allocation2 + $0xb9c] ss:$20 sps:$4 sm:$0xff]   ;;  %v14147_v51 = vld [vmem:[#allocation2 + $0x918] ss:$20 sps:$4 sm:$0xff]  }
 0x85f   :  { %6693 = vmatpush1.bf16.msra.mxu0 %v14105_v54  ;;  %6734 = vmatpush1.bf16.msra.mxu1 %v14108_v1  ;;  %v14150_v54 = vld [vmem:[#allocation2 + $0xb98] ss:$20 sps:$4 sm:$0xff]   ;;  %v14155_v1 = vld [vmem:[#allocation2 + $0x8f4] ss:$20 sps:$4 sm:$0xff]  }
 0x860   :  { %6694 = vmatprep.subr.bf16.mxu0 %v14113_v5  ;;  %6735 = vmatprep.subr.bf16.mxu1 %v14116_v61  ;;  %v14158_v5 = vld [vmem:[#allocation2 + $0xb74] ss:$20 sps:$4 sm:$0xff]   ;;  %v14153_v61 = vld [vmem:[#allocation2 + $0x8f0] ss:$20 sps:$4 sm:$0xff]  }
 0x863   :  { %6695 = vmatpush1.bf16.msra.mxu0 %v14111_v18  ;;  %6736 = vmatpush1.bf16.msra.mxu1 %v14114_v8  ;;  %v14156_v18 = vld [vmem:[#allocation2 + $0xb70] ss:$20 sps:$4 sm:$0xff]   ;;  %v14161_v8 = vld [vmem:[#allocation2 + $0x8cc] ss:$20 sps:$4 sm:$0xff]  }
 0x864   :  { %6696 = vmatprep.subr.bf16.mxu0 %v14119_v30  ;;  %6737 = vmatprep.subr.bf16.mxu1 %v14122_v4  ;;  %v14164_v30 = vld [vmem:[#allocation2 + $0xb4c] ss:$20 sps:$4 sm:$0xff]   ;;  %v14159_v4 = vld [vmem:[#allocation2 + $0x8c8] ss:$20 sps:$4 sm:$0xff]  }
 0x867   :  { %6697 = vmatpush2.bf16.msra.mxu0 %v14117_v11  ;;  %6738 = vmatpush2.bf16.msra.mxu1 %v14120_v20  ;;  %v14162_v11 = vld [vmem:[#allocation2 + $0xb48] ss:$20 sps:$4 sm:$0xff]  }
 0x868   :  { %6698 = vmatprep.subr.bf16.mxu0 %v14125_v22  ;;  %6739 = vmatprep.subr.bf16.mxu1 %v14128_v56  ;;  %v14165_v20 = vld [vmem:[#allocation2 + $0x268] ss:$20 sps:$4 sm:$0xff]  }
 0x869   :  { %v14166_v22 = vld [vmem:[#allocation2 + $0x4e8] ss:$20 sps:$4 sm:$0xff]  }
 0x86a   :  { %v14167_v56 = vld [vmem:[#allocation2 + $0x128] ss:$20 sps:$4 sm:$0xff]  }
 0x86b   :  { %6699 = vmatpush2.bf16.msra.mxu0 %v14123_v37  ;;  %6740 = vmatpush2.bf16.msra.mxu1 %v14126_v41  ;;  %v14168_v37 = vld [vmem:[#allocation2 + $0x3a8] ss:$20 sps:$4 sm:$0xff]   ;;  %v14169_v41 = vld [vmem:[#allocation2 + $0x240] ss:$20 sps:$4 sm:$0xff]  }
 0x86c   :  { %6700 = vmatprep.subr.bf16.mxu0 %v14131_v35  ;;  %6741 = vmatprep.subr.bf16.mxu1 %v14134_v49  ;;  %v14170_v35 = vld [vmem:[#allocation2 + $0x4c0] ss:$20 sps:$4 sm:$0xff]  }
 0x86d   :  { %v14171_v49 = vld [vmem:[#allocation2 + $0x100] ss:$20 sps:$4 sm:$0xff]  }
 0x86f   :  { %6701 = vmatpush2.bf16.msra.mxu0 %v14129_v36  ;;  %6742 = vmatpush2.bf16.msra.mxu1 %v14132_v57  ;;  %v14172_v36 = vld [vmem:[#allocation2 + $0x380] ss:$20 sps:$4 sm:$0xff]  }
 0x870   :  { %6702 = vmatprep.subr.bf16.mxu0 %v14137_v38  ;;  %6743 = vmatprep.subr.bf16.mxu1 %v14140_v10  ;;  %v14173_v10 = vld [vmem:[#allocation2 + $0x218] ss:$20 sps:$4 sm:$0xff]  }
 0x873   :  { %6703 = vmatpush2.bf16.msra.mxu0 %v14135_v29  ;;  %6744 = vmatpush2.bf16.msra.mxu1 %v14138_v21  ;;  %v14174_v29 = vld [vmem:[#allocation2 + $0x498] ss:$20 sps:$4 sm:$0xff]  }
 0x874   :  { %6704 = vmatprep.subr.bf16.mxu0 %v14143_v16  ;;  %6745 = vmatprep.subr.bf16.mxu1 %v14146_v14 }
 0x877   :  { %6705 = vmatpush2.bf16.msra.mxu0 %v14141_v28  ;;  %6746 = vmatpush2.bf16.msra.mxu1 %v14144_v48  ;;  %v14175_v48 = vld [vmem:[#allocation2 + $0xd8] ss:$20 sps:$4 sm:$0xff]  }
 0x878   :  { %6706 = vmatprep.subr.bf16.mxu0 %v14149_v50  ;;  %6747 = vmatprep.subr.bf16.mxu1 %v14152_v59  ;;  %v14176_v50 = vld [vmem:[#allocation2 + $0x358] ss:$20 sps:$4 sm:$0xff]  }
 0x87b   :  { %6707 = vmatpush2.bf16.msra.mxu0 %v14147_v51  ;;  %6748 = vmatpush2.bf16.msra.mxu1 %v14150_v54  ;;  %v14177_v54 = vld [vmem:[#allocation2 + $0x1f0] ss:$20 sps:$4 sm:$0xff]  }
 0x87c   :  { %6708 = vmatprep.subr.bf16.mxu0 %v14155_v1  ;;  %6749 = vmatprep.subr.bf16.mxu1 %v14158_v5  ;;  %v14178_v1 = vld [vmem:[#allocation2 + $0x470] ss:$20 sps:$4 sm:$0xff]  }
 0x87f   :  { %6709 = vmatpush2.bf16.msra.mxu0 %v14153_v61  ;;  %6750 = vmatpush2.bf16.msra.mxu1 %v14156_v18  ;;  %v14179_v61 = vld [vmem:[#allocation2 + $0xb0] ss:$20 sps:$4 sm:$0xff]  }
 0x880   :  { %6710 = vmatprep.subr.bf16.mxu0 %v14161_v8  ;;  %6751 = vmatprep.subr.bf16.mxu1 %v14164_v30  ;;  %v14180_v18 = vld [vmem:[#allocation2 + $0x330] ss:$20 sps:$4 sm:$0xff]   ;;  %v14181_v8 = vld [vmem:[#allocation2 + $0x1c8] ss:$20 sps:$4 sm:$0xff]  }
 0x881   :  { %v14184_v30 = vld [vmem:[#allocation2 + $0x308] ss:$20 sps:$4 sm:$0xff]  }
 0x883   :  { %6711 = vmatpush2.bf16.msra.mxu0 %v14159_v4  ;;  %6752 = vmatpush2.bf16.msra.mxu1 %v14162_v11  ;;  %v14185_v4 = vld [vmem:[#allocation2 + $0x1a0] ss:$20 sps:$4 sm:$0xff]  }
 0x884   :  { %13308 = vmatprep.subr.bf16.mxu0 %v14165_v20  ;;  %13330 = vmatprep.subr.bf16.mxu1 %v14166_v22  ;;  %v14186_v11 = vld [vmem:[#allocation2 + $0x420] ss:$20 sps:$4 sm:$0xff]  }
 0x885   :  { %v14187_v20 = vld [vmem:[#allocation2 + $0x60] ss:$20 sps:$4 sm:$0xff]  }
 0x886   :  { %v6468_v57 = vpop.f32.mrf.mxu0  ;;  %6713 = vmatmul.mubr.bf16.vlgmr.msra.gmra.mxu0 %v18832_v47  ;;  %6754 = vmatmul.mubr.bf16.vlgmr.msra.gmra.mxu1 %v18848_v43  ;;  %v6509_v38 = vpop.f32.mrf.mxu1  ;;  %v14188_v22 = vld [vmem:[#allocation2 + $0x2e0] ss:$20 sps:$4 sm:$0xff]  }
 0x887   :  { %v6469_v21 = vadd.f32 %v6468_v57, %v18865_v19  ;;  %13309 = vmatpush3.bf16.msra.mxu0 %v14167_v56  ;;  %13331 = vmatpush3.bf16.msra.mxu1 %v14168_v37  ;;  %v14189_v56 = vld [vmem:[#allocation2 + $0x178] ss:$20 sps:$4 sm:$0xff]   ;;  %v14195_v57 = vld [vmem:[#allocation2 + $0x10] ss:$20 sps:$4 sm:$0xff]  }
 0x888   :  { %v18874_v16 = vpop.f32.mrf.mxu0  ;;  %v18876_v14 = vpop.f32.mrf.mxu1  ;;  %13310 = vmatprep.subr.bf16.mxu0 %v14169_v41  ;;  %13332 = vmatprep.subr.bf16.mxu1 %v14170_v35  ;;  %v14190_v37 = vld [vmem:[#allocation2 + $0x3f8] ss:$20 sps:$4 sm:$0xff]  }
 0x889   :  { %v18878_v28 = vadd.f32 %v6509_v38, %v6469_v21  ;;  %6794 = vmatprep.mubr.bf16.mxu0 %v18770_v46  ;;  %6834 = vmatprep.mubr.bf16.mxu1 %v18774_v13  ;;  %v14182_v46 = vld [vmem:[#allocation2 + $0x448] ss:$20 sps:$4 sm:$0xff]   ;;  %v14191_v41 = vld [vmem:[#allocation2 + $0x38] ss:$20 sps:$4 sm:$0xff]   ;;  %v14196_v38 = vld [vmem:[#allocation2 + $0x290] ss:$20 sps:$4 sm:$0xff]  }
 0x88a   :  { %v6472_v59 = vpop.f32.mrf.mxu0  ;;  %v6513_v51 = vpop.f32.mrf.mxu1  ;;  %v14183_v13 = vld [vmem:[#allocation2 + $0x88] ss:$20 sps:$4 sm:$0xff]   ;;  %v14192_v35 = vld [vmem:[#allocation2 + $0x2b8] ss:$20 sps:$4 sm:$0xff]  }
 0x88b   :  { %13311 = vmatpush3.bf16.msra.mxu0 %v14171_v49  ;;  %13333 = vmatpush3.bf16.msra.mxu1 %v14172_v36  ;;  %v14193_v49 = vld [vmem:[#allocation2 + $0x150] ss:$20 sps:$4 sm:$0xff]   ;;  %v14199_v21 = vld [vmem:[#allocation2 + $0x628] ss:$20 sps:$4 sm:$0xff]   ;;  %v14202_v59 = vld [vmem:[#allocation2 + $0x9c0] ss:$20 sps:$4 sm:$0xff]  }
 0x88c   :  { %v6473_v19 = vpop.f32.mrf.mxu0  ;;  %13312 = vmatprep.subr.bf16.mxu0 %v14173_v10  ;;  %13334 = vmatprep.subr.bf16.mxu1 %v14174_v29  ;;  %v6514_v5 = vpop.f32.mrf.mxu1  ;;  %v14194_v36 = vld [vmem:[#allocation2 + $0x3d0] ss:$20 sps:$4 sm:$0xff]   ;;  %v14197_v10 = vld [vmem:[#allocation2 + $0x768] ss:$20 sps:$4 sm:$0xff]   ;;  %v14203_v51 = vld [vmem:[#allocation2 + $0x600] ss:$20 sps:$4 sm:$0xff]  }
 0x88d   :  { %v14198_v29 = vld [vmem:[#allocation2 + $0x9e8] ss:$20 sps:$4 sm:$0xff]   ;;  %v14204_v19 = vld [vmem:[#allocation2 + $0x880] ss:$20 sps:$4 sm:$0xff]   ;;  %v14207_v5 = vld [vmem:[#allocation2 + $0x5d8] ss:$20 sps:$4 sm:$0xff]  }
 0x88f   :  { %13313 = vmatpush3.bf16.msra.mxu0 %v14175_v48  ;;  %13335 = vmatpush3.bf16.msra.mxu1 %v14176_v50  ;;  %v14200_v48 = vld [vmem:[#allocation2 + $0x8a8] ss:$20 sps:$4 sm:$0xff]   ;;  %v14201_v50 = vld [vmem:[#allocation2 + $0x740] ss:$20 sps:$4 sm:$0xff]  }
 0x890   :  { %13314 = vmatprep.subr.bf16.mxu0 %v14177_v54  ;;  %13336 = vmatprep.subr.bf16.mxu1 %v14178_v1  ;;  %v14205_v54 = vld [vmem:[#allocation2 + $0x718] ss:$20 sps:$4 sm:$0xff]  }
 0x891   :  { %v14206_v1 = vld [vmem:[#allocation2 + $0x998] ss:$20 sps:$4 sm:$0xff]  }
 0x893   :  { %13315 = vmatpush3.bf16.msra.mxu0 %v14179_v61  ;;  %13337 = vmatpush3.bf16.msra.mxu1 %v14180_v18  ;;  %v14208_v61 = vld [vmem:[#allocation2 + $0x858] ss:$20 sps:$4 sm:$0xff]   ;;  %v14209_v18 = vld [vmem:[#allocation2 + $0x6f0] ss:$20 sps:$4 sm:$0xff]  }
 0x894   :  { %13316 = vmatprep.subr.bf16.mxu0 %v14181_v8  ;;  %13338 = vmatprep.subr.bf16.mxu1 %v14182_v46  ;;  %v14210_v8 = vld [vmem:[#allocation2 + $0x970] ss:$20 sps:$4 sm:$0xff]   ;;  %v14213_v46 = vld [vmem:[#allocation2 + $0x6c8] ss:$20 sps:$4 sm:$0xff]  }
 0x897   :  { %13317 = vmatpush3.bf16.msra.mxu0 %v14183_v13  ;;  %13339 = vmatpush3.bf16.msra.mxu1 %v14184_v30  ;;  %v14214_v13 = vld [vmem:[#allocation2 + $0x948] ss:$20 sps:$4 sm:$0xff]  }
 0x898   :  { %13318 = vmatprep.subr.bf16.mxu0 %v14185_v4  ;;  %13340 = vmatprep.subr.bf16.mxu1 %v14186_v11  ;;  %v14215_v30 = vld [vmem:[#allocation2 + $0x588] ss:$20 sps:$4 sm:$0xff]   ;;  %v14217_v11 = vld [vmem:[#allocation2 + $0x6a0] ss:$20 sps:$4 sm:$0xff]  }
 0x899   :  { %v14216_v4 = vld [vmem:[#allocation2 + $0x808] ss:$20 sps:$4 sm:$0xff]  }
 0x89b   :  { %13319 = vmatpush3.bf16.msra.mxu0 %v14187_v20  ;;  %13341 = vmatpush3.bf16.msra.mxu1 %v14188_v22  ;;  %v14220_v20 = vld [vmem:[#allocation2 + $0x7e0] ss:$20 sps:$4 sm:$0xff]   ;;  %v14221_v22 = vld [vmem:[#allocation2 + $0x678] ss:$20 sps:$4 sm:$0xff]  }
 0x89c   :  { %13320 = vmatprep.subr.bf16.mxu0 %v14189_v56  ;;  %13342 = vmatprep.subr.bf16.mxu1 %v14190_v37  ;;  %v14222_v56 = vld [vmem:[#allocation2 + $0x8f8] ss:$20 sps:$4 sm:$0xff]  }
 0x89d   :  { %v14223_v37 = vld [vmem:[#allocation2 + $0x538] ss:$20 sps:$4 sm:$0xff]  }
 0x89f   :  { %13321 = vmatpush3.bf16.msra.mxu0 %v14191_v41  ;;  %13343 = vmatpush3.bf16.msra.mxu1 %v14192_v35  ;;  %v14224_v41 = vld [vmem:[#allocation2 + $0x7b8] ss:$20 sps:$4 sm:$0xff]   ;;  %v14225_v35 = vld [vmem:[#allocation2 + $0x650] ss:$20 sps:$4 sm:$0xff]  }
 0x8a0   :  { %13322 = vmatprep.subr.bf16.mxu0 %v14193_v49  ;;  %13344 = vmatprep.subr.bf16.mxu1 %v14194_v36  ;;  %v14226_v49 = vld [vmem:[#allocation2 + $0x8d0] ss:$20 sps:$4 sm:$0xff]  }
 0x8a1   :  { %v14227_v36 = vld [vmem:[#allocation2 + $0x510] ss:$20 sps:$4 sm:$0xff]  }
 0x8a3   :  { %13323 = vmatpush3.bf16.msra.mxu0 %v14195_v57  ;;  %13345 = vmatpush3.bf16.msra.mxu1 %v14196_v38  ;;  %v14228_v57 = vld [vmem:[#allocation2 + $0x790] ss:$20 sps:$4 sm:$0xff]   ;;  %v14229_v38 = vld [vmem:[#allocation2 + $0xc68] ss:$20 sps:$4 sm:$0xff]  }
 0x8a4   :  { %13352 = vmatprep.subr.bf16.mxu0 %v14197_v10  ;;  %13374 = vmatprep.subr.bf16.mxu1 %v14198_v29  ;;  %v14232_v10 = vld [vmem:[#allocation3 + $0x11c] ss:$20 sps:$4 sm:$0xff]   ;;  %v14230_v29 = vld [vmem:[#allocation3 + $0x118] ss:$20 sps:$4 sm:$0xff]  }
 0x8a6   :  { %6795 = vmatmul.mubr.bf16.vlgmr.msra.gmra.mxu0 %v18796_v15  ;;  %6835 = vmatmul.mubr.bf16.vlgmr.msra.gmra.mxu1 %v18800_v2  ;;  %v14211_v15 = vld [vmem:[#allocation2 + $0x5b0] ss:$20 sps:$4 sm:$0xff]  }
 0x8a7   :  { %13353 = vmatpush3.bf16.msra.mxu0 %v14199_v21  ;;  %13375 = vmatpush3.bf16.msra.mxu1 %v14200_v48  ;;  %v14212_v2 = vld [vmem:[#allocation2 + $0x830] ss:$20 sps:$4 sm:$0xff]   ;;  %v14233_v21 = vld [vmem:[#allocation2 + $0xb28] ss:$20 sps:$4 sm:$0xff]   ;;  %v14234_v48 = vld [vmem:[#allocation2 + $0xc40] ss:$20 sps:$4 sm:$0xff]  }
 0x8a8   :  { %13354 = vmatprep.subr.bf16.mxu0 %v14201_v50  ;;  %13376 = vmatprep.subr.bf16.mxu1 %v14202_v59  ;;  %v14237_v50 = vld [vmem:[#allocation3 + $0xf4] ss:$20 sps:$4 sm:$0xff]   ;;  %v6471_v59 = vadd.f32 %v18874_v16, %v18869_v40  ;;  %v14242_v16 = vld [vmem:[#allocation3 + $0xcc] ss:$20 sps:$4 sm:$0xff]  }
 0x8a9   :  { %6874 = vmatprep.mubr.bf16.mxu0 %v18804_v12  ;;  %6914 = vmatprep.mubr.bf16.mxu1 %v18808_v6  ;;  %v14218_v12 = vld [vmem:[#allocation2 + $0x920] ss:$20 sps:$4 sm:$0xff]  }
 0x8aa   :  { %v14219_v6 = vld [vmem:[#allocation2 + $0x560] ss:$20 sps:$4 sm:$0xff]  }
 0x8ab   :  { %13355 = vmatpush3.bf16.msra.mxu0 %v14203_v51  ;;  %13377 = vmatpush3.bf16.msra.mxu1 %v14204_v19  ;;  %v14235_v51 = vld [vmem:[#allocation3 + $0xf0] ss:$20 sps:$4 sm:$0xff]   ;;  %v14238_v19 = vld [vmem:[#allocation2 + $0xb00] ss:$20 sps:$4 sm:$0xff]  }
 0x8ac   :  { %13356 = vmatprep.subr.bf16.mxu0 %v14205_v54  ;;  %13378 = vmatprep.subr.bf16.mxu1 %v14206_v1  ;;  %v14239_v1 = vld [vmem:[#allocation2 + $0xc18] ss:$20 sps:$4 sm:$0xff]  }
 0x8af   :  { %13357 = vmatpush3.bf16.msra.mxu0 %v14207_v5  ;;  %13379 = vmatpush3.bf16.msra.mxu1 %v14208_v61  ;;  %v6512_v61 = vadd.f32 %v18876_v14, %v6471_v59  ;;  %v14271_v59 = vld [vmem:[#allocation3 + $0x25c] ss:$20 sps:$4 sm:$0xff]  }
 0x8b0   :  { %13358 = vmatprep.subr.bf16.mxu0 %v14209_v18  ;;  %13380 = vmatprep.subr.bf16.mxu1 %v14210_v8 }
 0x8b3   :  { %13359 = vmatpush3.bf16.msra.mxu0 %v14211_v15  ;;  %13381 = vmatpush3.bf16.msra.mxu1 %v14212_v2  ;;  %v14240_v15 = vld [vmem:[#allocation3 + $0xc8] ss:$20 sps:$4 sm:$0xff]   ;;  %v14243_v2 = vld [vmem:[#allocation2 + $0xad8] ss:$20 sps:$4 sm:$0xff]  }
 0x8b4   :  { %13360 = vmatprep.subr.bf16.mxu0 %v14213_v46  ;;  %13382 = vmatprep.subr.bf16.mxu1 %v14214_v13 }
 0x8b7   :  { %13361 = vmatpush3.bf16.msra.mxu0 %v14215_v30  ;;  %13383 = vmatpush3.bf16.msra.mxu1 %v14216_v4  ;;  %v14247_v30 = vld [vmem:[#allocation3 + $0xa4] ss:$20 sps:$4 sm:$0xff]  }
 0x8b8   :  { %13362 = vmatprep.subr.bf16.mxu0 %v14217_v11  ;;  %13384 = vmatprep.subr.bf16.mxu1 %v14218_v12  ;;  %v14245_v12 = vld [vmem:[#allocation3 + $0xa0] ss:$20 sps:$4 sm:$0xff]  }
 0x8bb   :  { %13363 = vmatpush3.bf16.msra.mxu0 %v14219_v6  ;;  %13385 = vmatpush3.bf16.msra.mxu1 %v14220_v20  ;;  %v14248_v6 = vld [vmem:[#allocation2 + $0xab0] ss:$20 sps:$4 sm:$0xff]   ;;  %v14249_v20 = vld [vmem:[#allocation2 + $0xbc8] ss:$20 sps:$4 sm:$0xff]  }
 0x8bc   :  { %13364 = vmatprep.subr.bf16.mxu0 %v14221_v22  ;;  %13386 = vmatprep.subr.bf16.mxu1 %v14222_v56  ;;  %v14250_v22 = vld [vmem:[#allocation3 + $0x78] ss:$20 sps:$4 sm:$0xff]   ;;  %v14253_v56 = vld [vmem:[#allocation2 + $0xa88] ss:$20 sps:$4 sm:$0xff]  }
 0x8bf   :  { %13365 = vmatpush3.bf16.msra.mxu0 %v14223_v37  ;;  %13387 = vmatpush3.bf16.msra.mxu1 %v14224_v41  ;;  %v14254_v37 = vld [vmem:[#allocation2 + $0xba0] ss:$20 sps:$4 sm:$0xff]  }
 0x8c0   :  { %13366 = vmatprep.subr.bf16.mxu0 %v14225_v35  ;;  %13388 = vmatprep.subr.bf16.mxu1 %v14226_v49  ;;  %v14257_v41 = vld [vmem:[#allocation3 + $0x54] ss:$20 sps:$4 sm:$0xff]   ;;  %v14255_v35 = vld [vmem:[#allocation3 + $0x50] ss:$20 sps:$4 sm:$0xff]  }
 0x8c1   :  { %v14258_v49 = vld [vmem:[#allocation2 + $0xa60] ss:$20 sps:$4 sm:$0xff]  }
 0x8c3   :  { %13367 = vmatpush3.bf16.msra.mxu0 %v14227_v36  ;;  %13389 = vmatpush3.bf16.msra.mxu1 %v14228_v57  ;;  %v14259_v36 = vld [vmem:[#allocation2 + $0xb78] ss:$20 sps:$4 sm:$0xff]  }
 0x8c4   :  { %13396 = vmatprep.subr.bf16.mxu0 %v14229_v38  ;;  %8279 = vmatprep.subr.bf16.mxu1 %v14232_v10  ;;  %v14262_v57 = vld [vmem:[#allocation3 + $0x2c] ss:$20 sps:$4 sm:$0xff]   ;;  %v14260_v38 = vld [vmem:[#allocation3 + $0x28] ss:$20 sps:$4 sm:$0xff]  }
 0x8c5   :  { %v14263_v10 = vld [vmem:[#allocation2 + $0xa38] ss:$20 sps:$4 sm:$0xff]  }
 0x8c6   :  { %v18888_v54 = vpop.f32.mrf.mxu0  ;;  %6875 = vmatmul.mubr.bf16.vlgmr.msra.gmra.mxu0 %v18828_v25  ;;  %6915 = vmatmul.mubr.bf16.vlgmr.msra.gmra.mxu1 %v18832_v47  ;;  %v18892_v5 = vpop.f32.mrf.mxu1  ;;  %v14244_v47 = vld [vmem:[#allocation2 + $0xbf0] ss:$20 sps:$4 sm:$0xff]  }
 0x8c7   :  { %13397 = vmatpush3.bf16.msra.mxu0 %v14233_v21  ;;  %8280 = vmatpush1.bf16.msra.mxu1 %v14230_v29  ;;  %v14264_v29 = vld [vmem:[#allocation2 + $0xb50] ss:$20 sps:$4 sm:$0xff]  }
 0x8c8   :  { %v6552_v40 = vpop.f32.mrf.mxu0  ;;  %13398 = vmatprep.subr.bf16.mxu0 %v14234_v48  ;;  %8281 = vmatprep.subr.bf16.mxu1 %v14237_v50  ;;  %v18895_v18 = vpop.f32.mrf.mxu1  ;;  %v14267_v21 = vld [vmem:[#allocation3 + $0x4] ss:$20 sps:$4 sm:$0xff]   ;;  %v14265_v48 = vld [vmem:[#allocation3] ss:$20 sps:$4 sm:$0xff]  }
 0x8c9   :  { %v6553_v8 = vadd.f32 %v6552_v40, %v6512_v61  ;;  %6954 = vmatprep.mubr.bf16.mxu0 %v18836_v58  ;;  %v14252_v58 = vld [vmem:[#allocation3 + $0x7c] ss:$20 sps:$4 sm:$0xff]   ;;  %v14293_v61 = vld [vmem:[#allocation3 + $0x398] ss:$20 sps:$4 sm:$0xff]   ;;  %v14298_v40 = vld [vmem:[#allocation3 + $0x374] ss:$20 sps:$4 sm:$0xff]  }
 0x8ca   :  { %v6554_v25 = vpop.f32.mrf.mxu0  ;;  %v6595_v46 = vpop.f32.mrf.mxu1  ;;  %v14268_v50 = vld [vmem:[#allocation2 + $0xa10] ss:$20 sps:$4 sm:$0xff]  }
 0x8cb   :  { %v6963_v13 = vmax.f32 %v6553_v8, 0.0  ;;  %13399 = vmatpush3.bf16.msra.mxu0 %v14238_v19  ;;  %8282 = vmatpush1.bf16.msra.mxu1 %v14235_v51  ;;  %v14295_v51 = vld [vmem:[#allocation3 + $0x39c] ss:$20 sps:$4 sm:$0xff]   ;;  %v14269_v19 = vld [vmem:[#allocation3 + $0x258] ss:$20 sps:$4 sm:$0xff]  }
 0x8cc   :  { %v6555_v14 = vpop.f32.mrf.mxu0  ;;  %13400 = vmatprep.subr.bf16.mxu0 %v14239_v1  ;;  %8283 = vmatprep.subr.bf16.mxu1 %v14242_v16  ;;  %v6596_v4 = vpop.f32.mrf.mxu1  ;;  %v14274_v1 = vld [vmem:[#allocation3 + $0x234] ss:$20 sps:$4 sm:$0xff]   ;;  %v14272_v16 = vld [vmem:[#allocation3 + $0x230] ss:$20 sps:$4 sm:$0xff]  }
 0x8cd   :  { %v18898_v11 = vpack.c.bf16 %v6963_v13, %v6963_v13  ;;  %v14296_v8 = vld [vmem:[#allocation3 + $0x370] ss:$20 sps:$4 sm:$0xff]   ;;  %v14275_v25 = vld [vmem:[#allocation3 + $0x208] ss:$20 sps:$4 sm:$0xff]   ;;  %v14278_v14 = vld [vmem:[#allocation3 + $0x1e0] ss:$20 sps:$4 sm:$0xff]  }
 0x8ce   :  { %v14280_v46 = vld [vmem:[#allocation3 + $0x1e4] ss:$20 sps:$4 sm:$0xff]   ;;  %v14302_v4 = vld [vmem:[#allocation3 + $0x320] ss:$20 sps:$4 sm:$0xff]  }
 0x8cf   :  { %13401 = vmatpush3.bf16.msra.mxu0 %v14243_v2  ;;  %8284 = vmatpush1.bf16.msra.mxu1 %v14240_v15  ;;  %v14277_v15 = vld [vmem:[#allocation3 + $0x20c] ss:$20 sps:$4 sm:$0xff]   ;;  %v14304_v13 = vld [vmem:[#allocation3 + $0x324] ss:$20 sps:$4 sm:$0xff]  }
 0x8d0   :  { %8311 = vmatprep.mubr.bf16.mxu1 %v18898_v11  ;;  %13402 = vmatprep.subr.bf16.mxu0 %v14244_v47  ;;  %v14301_v2 = vld [vmem:[#allocation3 + $0x34c] ss:$20 sps:$4 sm:$0xff]   ;;  %v14299_v47 = vld [vmem:[#allocation3 + $0x348] ss:$20 sps:$4 sm:$0xff]  }
 0x8d1   :  { %8285 = vmatprep.subr.bf16.mxu1 %v14247_v30  ;;  %v14283_v30 = vld [vmem:[#allocation3 + $0x1bc] ss:$20 sps:$4 sm:$0xff]  }
 0x8d3   :  { %13403 = vmatpush3.bf16.msra.mxu0 %v14248_v6  ;;  %8286 = vmatpush1.bf16.msra.mxu1 %v14245_v12  ;;  %v14281_v12 = vld [vmem:[#allocation3 + $0x1b8] ss:$20 sps:$4 sm:$0xff]   ;;  %v14286_v6 = vld [vmem:[#allocation3 + $0x194] ss:$20 sps:$4 sm:$0xff]  }
 0x8d4   :  { %13404 = vmatprep.subr.bf16.mxu0 %v14249_v20  ;;  %8287 = vmatprep.subr.bf16.mxu1 %v14252_v58  ;;  %v14305_v20 = vld [vmem:[#allocation3 + $0x2f8] ss:$20 sps:$4 sm:$0xff]   ;;  %v14310_v58 = vld [vmem:[#allocation3 + $0x2d4] ss:$20 sps:$4 sm:$0xff]  }
 0x8d7   :  { %13405 = vmatpush3.bf16.msra.mxu0 %v14253_v56  ;;  %8288 = vmatpush1.bf16.msra.mxu1 %v14250_v22  ;;  %v14284_v22 = vld [vmem:[#allocation3 + $0x190] ss:$20 sps:$4 sm:$0xff]   ;;  %v14289_v56 = vld [vmem:[#allocation3 + $0x16c] ss:$20 sps:$4 sm:$0xff]  }
 0x8d8   :  { %13406 = vmatprep.subr.bf16.mxu0 %v14254_v37  ;;  %8289 = vmatprep.subr.bf16.mxu1 %v14257_v41  ;;  %v14308_v37 = vld [vmem:[#allocation3 + $0x2d0] ss:$20 sps:$4 sm:$0xff]   ;;  %v14313_v41 = vld [vmem:[#allocation3 + $0x2ac] ss:$20 sps:$4 sm:$0xff]  }
 0x8db   :  { %13407 = vmatpush3.bf16.msra.mxu0 %v14258_v49  ;;  %8290 = vmatpush1.bf16.msra.mxu1 %v14255_v35  ;;  %v14287_v35 = vld [vmem:[#allocation3 + $0x168] ss:$20 sps:$4 sm:$0xff]   ;;  %v14292_v49 = vld [vmem:[#allocation3 + $0x144] ss:$20 sps:$4 sm:$0xff]  }
 0x8dc   :  { %13408 = vmatprep.subr.bf16.mxu0 %v14259_v36  ;;  %8291 = vmatprep.subr.bf16.mxu1 %v14262_v57  ;;  %v14311_v36 = vld [vmem:[#allocation3 + $0x2a8] ss:$20 sps:$4 sm:$0xff]   ;;  %v14316_v57 = vld [vmem:[#allocation3 + $0x284] ss:$20 sps:$4 sm:$0xff]  }
 0x8df   :  { %13409 = vmatpush3.bf16.msra.mxu0 %v14263_v10  ;;  %8292 = vmatpush1.bf16.msra.mxu1 %v14260_v38  ;;  %v6551_v38 = vadd.f32 %v18888_v54, %v18878_v28  ;;  %v4257_v10 = vsub.s32 2, %v18720_v34  ;;  %v14317_v54 = vld [vmem:[#allocation3 + $0x4d8] ss:$20 sps:$4 sm:$0xff]  }
 0x8e0   :  { %13410 = vmatprep.subr.bf16.mxu0 %v14264_v29  ;;  %8293 = vmatprep.subr.bf16.mxu1 %v14267_v21  ;;  %v14290_v29 = vld [vmem:[#allocation3 + $0x140] ss:$20 sps:$4 sm:$0xff]  }
 0x8e1   :  { %v14314_v21 = vld [vmem:[#allocation3 + $0x280] ss:$20 sps:$4 sm:$0xff]  }
 0x8e3   :  { %13411 = vmatpush3.bf16.msra.mxu0 %v14268_v50  ;;  %8294 = vmatpush1.bf16.msra.mxu1 %v14265_v48  ;;  %v14319_v48 = vld [vmem:[#allocation3 + $0x4dc] ss:$20 sps:$4 sm:$0xff]   ;;  %v6962_v50 = vmax.f32 %v6551_v38, 0.0  ;;  %v14407_v38 = vld [vmem:[#allocation3 + $0x5a0] ss:$20 sps:$4 sm:$0xff]  }
 0x8e4   :  { %8295 = vmatprep.subr.bf16.mxu1 %v14271_v59  ;;  %8320 = vmatprep.subr.bf16.mxu0 %v14295_v51  ;;  %v18908_v59 = vld [vmem:[%s19149_s4] sm:$0x1f]  ;;  %v14322_v51 = vld [vmem:[#allocation3 + $0x4b4] ss:$20 sps:$4 sm:$0xff]  }
 0x8e5   :  { %v4258_v28 = vrot.slane %v18908_v59, %v4257_v10 }
 0x8e6   :  { %6955 = vmatmul.mubr.bf16.vlgmr.msra.gmra.mxu0 %v18848_v43  ;;  %v14307_v43 = vld [vmem:[#allocation3 + $0x2fc] ss:$20 sps:$4 sm:$0xff]  }
 0x8e7   :  { %8296 = vmatpush2.bf16.msra.mxu1 %v14269_v19  ;;  %8321 = vmatpush1.bf16.msra.mxu0 %v14293_v61  ;;  %v18913_v19 = vpack.c.bf16 %v6962_v50, %v6962_v50  ;;  %v14320_v61 = vld [vmem:[#allocation3 + $0x4b0] ss:$20 sps:$4 sm:$0xff]   ;;  %v14413_v50 = vld [vmem:[#allocation3 + $0x578] ss:$20 sps:$4 sm:$0xff]  }
 0x8e8   :  { %8297 = vmatprep.subr.bf16.mxu1 %v14274_v1  ;;  %8322 = vmatprep.subr.bf16.mxu0 %v14298_v40  ;;  %v6592_v1 = vadd.f32 %v18892_v5, %v4258_v28  ;;  %v14415_v28 = vld [vmem:[#allocation3 + $0x57c] ss:$20 sps:$4 sm:$0xff]  }
 0x8eb   :  { %8298 = vmatpush2.bf16.msra.mxu1 %v14272_v16  ;;  %8323 = vmatpush1.bf16.msra.mxu0 %v14296_v8 }
 0x8ec   :  { %8299 = vmatprep.subr.bf16.mxu1 %v14277_v15  ;;  %8324 = vmatprep.subr.bf16.mxu0 %v14301_v2 }
 0x8ef   :  { %8300 = vmatpush2.bf16.msra.mxu1 %v14275_v25  ;;  %8325 = vmatpush1.bf16.msra.mxu0 %v14299_v47  ;;  %v14325_v25 = vld [vmem:[#allocation3 + $0x48c] ss:$20 sps:$4 sm:$0xff]  }
 0x8f0   :  { %8301 = vmatprep.subr.bf16.mxu1 %v14280_v46  ;;  %8326 = vmatprep.subr.bf16.mxu0 %v14304_v13  ;;  %v14323_v46 = vld [vmem:[#allocation3 + $0x488] ss:$20 sps:$4 sm:$0xff]  }
 0x8f3   :  { %8302 = vmatpush2.bf16.msra.mxu1 %v14278_v14  ;;  %8327 = vmatpush1.bf16.msra.mxu0 %v14302_v4  ;;  %v14328_v4 = vld [vmem:[#allocation3 + $0x464] ss:$20 sps:$4 sm:$0xff]  }
 0x8f4   :  { %8303 = vmatprep.subr.bf16.mxu1 %v14283_v30  ;;  %8328 = vmatprep.subr.bf16.mxu0 %v14307_v43  ;;  %v14326_v43 = vld [vmem:[#allocation3 + $0x460] ss:$20 sps:$4 sm:$0xff]  }
 0x8f7   :  { %8304 = vmatpush2.bf16.msra.mxu1 %v14281_v12  ;;  %8329 = vmatpush1.bf16.msra.mxu0 %v14305_v20  ;;  %v14389_v12 = vld [vmem:[#allocation3 + $0x618] ss:$20 sps:$4 sm:$0xff]   ;;  %v14331_v20 = vld [vmem:[#allocation3 + $0x43c] ss:$20 sps:$4 sm:$0xff]  }
 0x8f8   :  { %8305 = vmatprep.subr.bf16.mxu1 %v14286_v6  ;;  %8330 = vmatprep.subr.bf16.mxu0 %v14310_v58  ;;  %v14391_v6 = vld [vmem:[#allocation3 + $0x61c] ss:$20 sps:$4 sm:$0xff]   ;;  %v14329_v58 = vld [vmem:[#allocation3 + $0x438] ss:$20 sps:$4 sm:$0xff]  }
 0x8fb   :  { %8306 = vmatpush2.bf16.msra.mxu1 %v14284_v22  ;;  %8331 = vmatpush1.bf16.msra.mxu0 %v14308_v37  ;;  %v14395_v22 = vld [vmem:[#allocation3 + $0x5f0] ss:$20 sps:$4 sm:$0xff]   ;;  %v14334_v37 = vld [vmem:[#allocation3 + $0x414] ss:$20 sps:$4 sm:$0xff]  }
 0x8fc   :  { %8307 = vmatprep.subr.bf16.mxu1 %v14289_v56  ;;  %8332 = vmatprep.subr.bf16.mxu0 %v14313_v41  ;;  %v14397_v56 = vld [vmem:[#allocation3 + $0x5f4] ss:$20 sps:$4 sm:$0xff]   ;;  %v14332_v41 = vld [vmem:[#allocation3 + $0x410] ss:$20 sps:$4 sm:$0xff]  }
 0x8ff   :  { %8308 = vmatpush2.bf16.msra.mxu1 %v14287_v35  ;;  %8333 = vmatpush1.bf16.msra.mxu0 %v14311_v36  ;;  %v14401_v35 = vld [vmem:[#allocation3 + $0x5c8] ss:$20 sps:$4 sm:$0xff]   ;;  %v14337_v36 = vld [vmem:[#allocation3 + $0x3ec] ss:$20 sps:$4 sm:$0xff]  }
 0x900   :  { %8309 = vmatprep.subr.bf16.mxu1 %v14292_v49  ;;  %8334 = vmatprep.subr.bf16.mxu0 %v14316_v57  ;;  %v14403_v49 = vld [vmem:[#allocation3 + $0x5cc] ss:$20 sps:$4 sm:$0xff]   ;;  %v14335_v57 = vld [vmem:[#allocation3 + $0x3e8] ss:$20 sps:$4 sm:$0xff]  }
 0x903   :  { %8310 = vmatpush2.bf16.msra.mxu1 %v14290_v29  ;;  %8335 = vmatpush1.bf16.msra.mxu0 %v14314_v21  ;;  %v14409_v29 = vld [vmem:[#allocation3 + $0x5a4] ss:$20 sps:$4 sm:$0xff]  }
 0x904   :  { %8336 = vmatprep.subr.bf16.mxu0 %v14319_v48  ;;  %8361 = vmatprep.subr.bf16.mxu1 %v14391_v6  ;;  %v14340_v21 = vld [vmem:[#allocation3 + $0x3c4] ss:$20 sps:$4 sm:$0xff]   ;;  %v14338_v48 = vld [vmem:[#allocation3 + $0x3c0] ss:$20 sps:$4 sm:$0xff]  }
 0x906   :  { %v6632_v40 = vpop.f32.mrf.mxu0  ;;  %8312 = vmatmul.mubr.bf16.vlgmr.msra.gmra.mxu1 %v18913_v19  ;;  %v6673_v16 = vpop.f32.mrf.mxu1 }
 0x907   :  { %v6633_v8 = vadd.f32 %v6632_v40, %v6592_v1  ;;  %8337 = vmatpush2.bf16.msra.mxu0 %v14317_v54  ;;  %8393 = vmatprep.mubr.bf16.mxu1 %v15180_v45  ;;  %v14343_v54 = vld [vmem:[#allocation3 + $0x124] ss:$20 sps:$4 sm:$0xff]   ;;  %v14421_v1 = vld [vmem:[#allocation3 + $0x554] ss:$20 sps:$4 sm:$0xff]  }
 0x908   :  { %v18918_v15 = vpop.f32.mrf.mxu0  ;;  %v18920_v2 = vpop.f32.mrf.mxu1  ;;  %8338 = vmatprep.subr.bf16.mxu0 %v14322_v51  ;;  %8362 = vmatpush1.bf16.msra.mxu1 %v14389_v12  ;;  %v14419_v51 = vld [vmem:[#allocation3 + $0x550] ss:$20 sps:$4 sm:$0xff]   ;;  %v14425_v40 = vld [vmem:[#allocation3 + $0x528] ss:$20 sps:$4 sm:$0xff]  }
 0x909   :  { %v18922_v47 = vadd.f32 %v6673_v16, %v6633_v8  ;;  %8363 = vmatprep.subr.bf16.mxu1 %v14397_v56  ;;  %v14433_v16 = vld [vmem:[#allocation3 + $0x504] ss:$20 sps:$4 sm:$0xff]   ;;  %v14431_v8 = vld [vmem:[#allocation3 + $0x500] ss:$20 sps:$4 sm:$0xff]  }
 0x90a   :  { %v6636_v13 = vpop.f32.mrf.mxu0  ;;  %v6677_v5 = vpop.f32.mrf.mxu1 }
 0x90b   :  { %8339 = vmatpush2.bf16.msra.mxu0 %v14320_v61  ;;  %v14427_v61 = vld [vmem:[#allocation3 + $0x52c] ss:$20 sps:$4 sm:$0xff]  }
 0x90c   :  { %v6637_v14 = vpop.f32.mrf.mxu0  ;;  %v6678_v30 = vpop.f32.mrf.mxu1  ;;  %8340 = vmatprep.subr.bf16.mxu0 %v14325_v25  ;;  %8364 = vmatpush1.bf16.msra.mxu1 %v14395_v22  ;;  %v14439_v25 = vld [vmem:[#allocation3 + $0x3a4] ss:$20 sps:$4 sm:$0xff]  }
 0x90d   :  { %8365 = vmatprep.subr.bf16.mxu1 %v14403_v49 }
 0x90f   :  { %8341 = vmatpush2.bf16.msra.mxu0 %v14323_v46  ;;  %v4261_v46 = vsub.s32 3, %v18720_v34 }
 0x910   :  { %8342 = vmatprep.subr.bf16.mxu0 %v14328_v4  ;;  %8366 = vmatpush1.bf16.msra.mxu1 %v14401_v35 }
 0x911   :  { %8367 = vmatprep.subr.bf16.mxu1 %v14409_v29  ;;  %v4262_v13 = vrot.slane %v18908_v59, %v4261_v46  ;;  %v14347_v29 = vld [vmem:[#allocation3 + $0xd0] ss:$20 sps:$4 sm:$0xff]  }
 0x913   :  { %8343 = vmatpush2.bf16.msra.mxu0 %v14326_v43  ;;  %v6594_v5 = vadd.f32 %v18895_v18, %v4262_v13 }
 0x914   :  { %8344 = vmatprep.subr.bf16.mxu0 %v14331_v20  ;;  %8368 = vmatpush1.bf16.msra.mxu1 %v14407_v38 }
 0x915   :  { %8369 = vmatprep.subr.bf16.mxu1 %v14415_v28  ;;  %v6635_v14 = vadd.f32 %v18918_v15, %v6594_v5  ;;  %v14341_v15 = vld [vmem:[#allocation3 + $0x120] ss:$20 sps:$4 sm:$0xff]  }
 0x916   :  { %v14353_v28 = vld [vmem:[#allocation3 + $0x80] ss:$20 sps:$4 sm:$0xff]  }
 0x917   :  { %8345 = vmatpush2.bf16.msra.mxu0 %v14329_v58  ;;  %v6676_v43 = vadd.f32 %v18920_v2, %v6635_v14  ;;  %v14344_v2 = vld [vmem:[#allocation3 + $0xf8] ss:$20 sps:$4 sm:$0xff]  }
 0x918   :  { %8346 = vmatprep.subr.bf16.mxu0 %v14334_v37  ;;  %8370 = vmatpush1.bf16.msra.mxu1 %v14413_v50  ;;  %v14355_v50 = vld [vmem:[#allocation3 + $0x84] ss:$20 sps:$4 sm:$0xff]  }
 0x919   :  { %8371 = vmatprep.subr.bf16.mxu1 %v14421_v1  ;;  %v14361_v1 = vld [vmem:[#allocation3 + $0x34] ss:$20 sps:$4 sm:$0xff]  }
 0x91b   :  { %8347 = vmatpush2.bf16.msra.mxu0 %v14332_v41 }
 0x91c   :  { %8348 = vmatprep.subr.bf16.mxu0 %v14337_v36  ;;  %8372 = vmatpush1.bf16.msra.mxu1 %v14419_v51  ;;  %v14356_v51 = vld [vmem:[#allocation3 + $0x58] ss:$20 sps:$4 sm:$0xff]  }
 0x91d   :  { %8373 = vmatprep.subr.bf16.mxu1 %v14427_v61 }
 0x91f   :  { %8349 = vmatpush2.bf16.msra.mxu0 %v14335_v57  ;;  %v14346_v57 = vld [vmem:[#allocation3 + $0xfc] ss:$20 sps:$4 sm:$0xff]  }
 0x920   :  { %8350 = vmatprep.subr.bf16.mxu0 %v14340_v21  ;;  %8374 = vmatpush1.bf16.msra.mxu1 %v14425_v40  ;;  %v14352_v21 = vld [vmem:[#allocation3 + $0xac] ss:$20 sps:$4 sm:$0xff]  }
 0x921   :  { %8375 = vmatprep.subr.bf16.mxu1 %v14433_v16  ;;  %v14359_v16 = vld [vmem:[#allocation3 + $0x30] ss:$20 sps:$4 sm:$0xff]  }
 0x923   :  { %8351 = vmatpush2.bf16.msra.mxu0 %v14338_v48  ;;  %v14350_v48 = vld [vmem:[#allocation3 + $0xa8] ss:$20 sps:$4 sm:$0xff]  }
 0x924   :  { %8402 = vmatprep.subr.bf16.mxu0 %v14343_v54  ;;  %8376 = vmatpush1.bf16.msra.mxu1 %v14431_v8  ;;  %v14358_v54 = vld [vmem:[#allocation3 + $0x5c] ss:$20 sps:$4 sm:$0xff]   ;;  %v14364_v8 = vld [vmem:[#allocation3 + $0xc] ss:$20 sps:$4 sm:$0xff]  }
 0x925   :  { %8443 = vmatprep.subr.bf16.mxu1 %v14439_v25 }
 0x946   :  { %v6714_v30 = vpop.f32.mrf.mxu0  ;;  %v6755_v4 = vpop.f32.mrf.mxu1 }
 0x947   :  { %v6715_v12 = vadd.f32 %v6714_v30, %v18922_v47  ;;  %v14349_v47 = vld [vmem:[#allocation3 + $0xd4] ss:$20 sps:$4 sm:$0xff]  }
 0x948   :  { %v6716_v6 = vpop.f32.mrf.mxu0  ;;  %v6757_v20 = vpop.f32.mrf.mxu1  ;;  %v14362_v30 = vld [vmem:[#allocation3 + $0x8] ss:$20 sps:$4 sm:$0xff]  }
 0x949   :  { %v6717_v58 = vadd.f32 %v6716_v6, %v6676_v43  ;;  %v6756_v22 = vadd.f32 %v6755_v4, %v6715_v12  ;;  %v14367_v4 = vld [vmem:[#allocation3 + $0x264] ss:$20 sps:$4 sm:$0xff]   ;;  %v14365_v6 = vld [vmem:[#allocation3 + $0x260] ss:$20 sps:$4 sm:$0xff]  }
 0x94a   :  { %v6718_v56 = vpop.f32.mrf.mxu0  ;;  %v6759_v37 = vpop.f32.mrf.mxu1 }
 0x94b   :  { %v6758_v41 = vadd.f32 %v6757_v20, %v6717_v58  ;;  %v6964_v35 = vmax.f32 %v6756_v22, 0.0  ;;  %v14370_v20 = vld [vmem:[#allocation3 + $0x23c] ss:$20 sps:$4 sm:$0xff]   ;;  %v14368_v58 = vld [vmem:[#allocation3 + $0x238] ss:$20 sps:$4 sm:$0xff]  }
 0x94c   :  { %v6719_v49 = vpop.f32.mrf.mxu0  ;;  %v6760_v59 = vpop.f32.mrf.mxu1  ;;  %v14373_v22 = vld [vmem:[#allocation3 + $0x214] ss:$20 sps:$4 sm:$0xff]   ;;  %v14371_v56 = vld [vmem:[#allocation3 + $0x210] ss:$20 sps:$4 sm:$0xff]   ;;  %v14376_v37 = vld [vmem:[#allocation3 + $0x1ec] ss:$20 sps:$4 sm:$0xff]  }
 0x94d   :  { %v6965_v36 = vmax.f32 %v6758_v41, 0.0  ;;  %v18934_v38 = vpack.c.bf16 %v6964_v35, %v6964_v35  ;;  %v14374_v41 = vld [vmem:[#allocation3 + $0x1e8] ss:$20 sps:$4 sm:$0xff]   ;;  %v14379_v35 = vld [vmem:[#allocation3 + $0x1c4] ss:$20 sps:$4 sm:$0xff]  }
 0x94e   :  { %v14377_v49 = vld [vmem:[#allocation3 + $0x1c0] ss:$20 sps:$4 sm:$0xff]   ;;  %v14382_v59 = vld [vmem:[#allocation3 + $0x19c] ss:$20 sps:$4 sm:$0xff]  }
 0x94f   :  { %v18932_v18 = vpack.c.bf16 %v6965_v36, %v6965_v36  ;;  %v14380_v36 = vld [vmem:[#allocation3 + $0x198] ss:$20 sps:$4 sm:$0xff]  }
 0x951   :  { %8352 = vmatprep.mubr.bf16.mxu0 %v18932_v18 }
 0x952   :  { %8353 = vmatmul.mubr.bf16.vlgmr.msra.gmra.mxu0 %v18934_v38 }
 0x953   :  { %8403 = vmatpush1.bf16.msra.mxu0 %v14341_v15  ;;  %8434 = vmatprep.mubr.bf16.mxu0 %v18898_v11  ;;  %v14385_v15 = vld [vmem:[#allocation3 + $0x174] ss:$20 sps:$4 sm:$0xff]  }
 0x954   :  { %8404 = vmatprep.subr.bf16.mxu0 %v14346_v57 }
 0x957   :  { %8405 = vmatpush1.bf16.msra.mxu0 %v14344_v2 }
 0x958   :  { %8406 = vmatprep.subr.bf16.mxu0 %v14349_v47  ;;  %v14383_v47 = vld [vmem:[#allocation3 + $0x170] ss:$20 sps:$4 sm:$0xff]  }
 0x95b   :  { %8407 = vmatpush1.bf16.msra.mxu0 %v14347_v29  ;;  %v14388_v29 = vld [vmem:[#allocation3 + $0x14c] ss:$20 sps:$4 sm:$0xff]  }
 0x95c   :  { %8408 = vmatprep.subr.bf16.mxu0 %v14352_v21 }
 0x95f   :  { %8409 = vmatpush1.bf16.msra.mxu0 %v14350_v48 }
 0x960   :  { %8410 = vmatprep.subr.bf16.mxu0 %v14355_v50 }
 0x963   :  { %8411 = vmatpush1.bf16.msra.mxu0 %v14353_v28 }
 0x964   :  { %8412 = vmatprep.subr.bf16.mxu0 %v14358_v54  ;;  %v14386_v54 = vld [vmem:[#allocation3 + $0x148] ss:$20 sps:$4 sm:$0xff]  }
 0x966   :  { %v18939_v61 = vpop.f32.mrf.mxu0  ;;  %v18941_v40 = vpop.f32.mrf.mxu1 }
 0x967   :  { %8413 = vmatpush1.bf16.msra.mxu0 %v14356_v51  ;;  %v14394_v51 = vld [vmem:[#allocation3 + $0x624] ss:$20 sps:$4 sm:$0xff]  }
 0x968   :  { %v18943_v25 = vpop.f32.mrf.mxu0  ;;  %8414 = vmatprep.subr.bf16.mxu0 %v14361_v1  ;;  %v18945_v13 = vpop.f32.mrf.mxu1 }
 0x96a   :  { %v13327_v5 = vpop.f32.mrf.mxu0  ;;  %v13349_v14 = vpop.f32.mrf.mxu1 }
 0x96b   :  { %8415 = vmatpush1.bf16.msra.mxu0 %v14359_v16  ;;  %v14400_v5 = vld [vmem:[#allocation3 + $0x5fc] ss:$20 sps:$4 sm:$0xff]   ;;  %v14398_v14 = vld [vmem:[#allocation3 + $0x5f8] ss:$20 sps:$4 sm:$0xff]  }
 0x96c   :  { %v13328_v43 = vpop.f32.mrf.mxu0  ;;  %8416 = vmatprep.subr.bf16.mxu0 %v14364_v8  ;;  %v13350_v12 = vpop.f32.mrf.mxu1  ;;  %v14392_v8 = vld [vmem:[#allocation3 + $0x620] ss:$20 sps:$4 sm:$0xff]  }
 0x96d   :  { %v14404_v43 = vld [vmem:[#allocation3 + $0x5d0] ss:$20 sps:$4 sm:$0xff]   ;;  %v14412_v12 = vld [vmem:[#allocation3 + $0x5ac] ss:$20 sps:$4 sm:$0xff]  }
 0x96f   :  { %8417 = vmatpush1.bf16.msra.mxu0 %v14362_v30  ;;  %v14406_v30 = vld [vmem:[#allocation3 + $0x5d4] ss:$20 sps:$4 sm:$0xff]  }
 0x970   :  { %8418 = vmatprep.subr.bf16.mxu0 %v14367_v4  ;;  %v4265_v4 = vsub.s32 4, %v18720_v34 }
 0x973   :  { %8419 = vmatpush2.bf16.msra.mxu0 %v14365_v6  ;;  %v14410_v6 = vld [vmem:[#allocation3 + $0x5a8] ss:$20 sps:$4 sm:$0xff]  }
 0x974   :  { %8420 = vmatprep.subr.bf16.mxu0 %v14370_v20  ;;  %v15102_v20 = vld [vmem:[%s19149_s4] sm:$0x1f] }
 0x977   :  { %8421 = vmatpush2.bf16.msra.mxu0 %v14368_v58  ;;  %v4266_v58 = vrot.slane %v15102_v20, %v4265_v4  ;;  %v14447_v20 = vld [vmem:[#allocation3 + $0x350] ss:$20 sps:$4 sm:$0xff]  }
 0x978   :  { %8422 = vmatprep.subr.bf16.mxu0 %v14373_v22  ;;  %v13326_v22 = vadd.f32 %v18943_v25, %v18939_v61  ;;  %v14428_v25 = vld [vmem:[#allocation3 + $0x530] ss:$20 sps:$4 sm:$0xff]  }
 0x97b   :  { %8423 = vmatpush2.bf16.msra.mxu0 %v14371_v56  ;;  %v14416_v56 = vld [vmem:[#allocation3 + $0x580] ss:$20 sps:$4 sm:$0xff]  }
 0x97c   :  { %8424 = vmatprep.subr.bf16.mxu0 %v14376_v37  ;;  %v6797_v37 = vadd.f32 %v13326_v22, %v4266_v58  ;;  %v14451_v58 = vld [vmem:[#allocation3 + $0x358] ss:$20 sps:$4 sm:$0xff]  }
 0x97d   :  { %v14454_v22 = vld [vmem:[#allocation3 + $0x32c] ss:$20 sps:$4 sm:$0xff]  }
 0x97f   :  { %8425 = vmatpush2.bf16.msra.mxu0 %v14374_v41  ;;  %v13348_v41 = vadd.f32 %v18945_v13, %v18941_v40 }
 0x980   :  { %8426 = vmatprep.subr.bf16.mxu0 %v14379_v35  ;;  %v14424_v35 = vld [vmem:[#allocation3 + $0x55c] ss:$20 sps:$4 sm:$0xff]  }
 0x983   :  { %8427 = vmatpush2.bf16.msra.mxu0 %v14377_v49 }
 0x984   :  { %8428 = vmatprep.subr.bf16.mxu0 %v14382_v59  ;;  %v14422_v59 = vld [vmem:[#allocation3 + $0x558] ss:$20 sps:$4 sm:$0xff]  }
 0x986   :  { %v13368_v57 = vpop.f32.mrf.mxu0  ;;  %v13390_v2 = vpop.f32.mrf.mxu1 }
 0x987   :  { %8429 = vmatpush2.bf16.msra.mxu0 %v14380_v36  ;;  %v6837_v36 = vadd.f32 %v13348_v41, %v6797_v37  ;;  %v14456_v37 = vld [vmem:[#allocation3 + $0x330] ss:$20 sps:$4 sm:$0xff]  }
 0x988   :  { %v13369_v21 = vpop.f32.mrf.mxu0  ;;  %8430 = vmatprep.subr.bf16.mxu0 %v14385_v15  ;;  %v13391_v48 = vpop.f32.mrf.mxu1  ;;  %v14430_v15 = vld [vmem:[#allocation3 + $0x534] ss:$20 sps:$4 sm:$0xff]   ;;  %v14459_v41 = vld [vmem:[#allocation3 + $0x304] ss:$20 sps:$4 sm:$0xff]  }
 0x989   :  { %v13370_v49 = vadd.f32 %v13369_v21, %v13368_v57  ;;  %v14440_v21 = vld [vmem:[#allocation3 + $0x4e8] ss:$20 sps:$4 sm:$0xff]  }
 0x98a   :  { %v13371_v50 = vpop.f32.mrf.mxu0  ;;  %v13393_v28 = vpop.f32.mrf.mxu1 }
 0x98b   :  { %8431 = vmatpush2.bf16.msra.mxu0 %v14383_v47  ;;  %v6877_v47 = vadd.f32 %v13370_v49, %v6837_v36  ;;  %v14436_v50 = vld [vmem:[#allocation3 + $0x50c] ss:$20 sps:$4 sm:$0xff]   ;;  %v14461_v49 = vld [vmem:[#allocation3 + $0x308] ss:$20 sps:$4 sm:$0xff]  }
 0x98c   :  { %v13372_v1 = vpop.f32.mrf.mxu0  ;;  %8432 = vmatprep.subr.bf16.mxu0 %v14388_v29  ;;  %v13394_v16 = vpop.f32.mrf.mxu1  ;;  %v13392_v29 = vadd.f32 %v13391_v48, %v13390_v2  ;;  %v14441_v2 = vld [vmem:[#allocation3 + $0x3a8] ss:$20 sps:$4 sm:$0xff]   ;;  %v14465_v36 = vld [vmem:[#allocation3 + $0x420] ss:$20 sps:$4 sm:$0xff]  }
 0x98d   :  { %v14434_v1 = vld [vmem:[#allocation3 + $0x508] ss:$20 sps:$4 sm:$0xff]  }
 0x98e   :  { %v14444_v48 = vld [vmem:[#allocation3 + $0x37c] ss:$20 sps:$4 sm:$0xff]  }
 0x98f   :  { %8433 = vmatpush2.bf16.msra.mxu0 %v14386_v54  ;;  %v6917_v54 = vadd.f32 %v13392_v29, %v6877_v47  ;;  %v14466_v47 = vld [vmem:[#allocation3 + $0x2e0] ss:$20 sps:$4 sm:$0xff]  }
 0x990   :  { %8484 = vmatprep.subr.bf16.mxu0 %v14394_v51  ;;  %v14469_v29 = vld [vmem:[#allocation3 + $0x2b4] ss:$20 sps:$4 sm:$0xff]  }
 0x992   :  { %8435 = vmatmul.mubr.bf16.vlgmr.msra.gmra.mxu0 %v18913_v19 }
 0x993   :  { %8485 = vmatpush1.bf16.msra.mxu0 %v14392_v8  ;;  %8516 = vmatprep.mubr.bf16.mxu0 %v15180_v45  ;;  %v14418_v45 = vld [vmem:[#allocation3 + $0x584] ss:$20 sps:$4 sm:$0xff]   ;;  %v14437_v8 = vld [vmem:[#allocation3 + $0x3a0] ss:$20 sps:$4 sm:$0xff]  }
 0x994   :  { %8486 = vmatprep.subr.bf16.mxu0 %v14400_v5 }
 0x997   :  { %8487 = vmatpush1.bf16.msra.mxu0 %v14398_v14  ;;  %v14445_v14 = vld [vmem:[#allocation3 + $0x4c0] ss:$20 sps:$4 sm:$0xff]  }
 0x998   :  { %8488 = vmatprep.subr.bf16.mxu0 %v14406_v30  ;;  %v14442_v30 = vld [vmem:[#allocation3 + $0x378] ss:$20 sps:$4 sm:$0xff]  }
 0x99b   :  { %8489 = vmatpush1.bf16.msra.mxu0 %v14404_v43  ;;  %v14446_v43 = vld [vmem:[#allocation3 + $0x380] ss:$20 sps:$4 sm:$0xff]  }
 0x99c   :  { %8490 = vmatprep.subr.bf16.mxu0 %v14412_v12  ;;  %v14449_v12 = vld [vmem:[#allocation3 + $0x354] ss:$20 sps:$4 sm:$0xff]  }
 0x99f   :  { %8491 = vmatpush1.bf16.msra.mxu0 %v14410_v6  ;;  %v14450_v6 = vld [vmem:[#allocation3 + $0x498] ss:$20 sps:$4 sm:$0xff]  }
 0x9a0   :  { %8492 = vmatprep.subr.bf16.mxu0 %v14418_v45  ;;  %v14455_v45 = vld [vmem:[#allocation3 + $0x470] ss:$20 sps:$4 sm:$0xff]  }
 0x9a3   :  { %8493 = vmatpush1.bf16.msra.mxu0 %v14416_v56  ;;  %v14452_v56 = vld [vmem:[#allocation3 + $0x328] ss:$20 sps:$4 sm:$0xff]  }
 0x9a4   :  { %8494 = vmatprep.subr.bf16.mxu0 %v14424_v35  ;;  %v14460_v35 = vld [vmem:[#allocation3 + $0x448] ss:$20 sps:$4 sm:$0xff]  }
 0x9a6   :  { %v13412_v61 = vpop.f32.mrf.mxu0 }
 0x9a7   :  { %8495 = vmatpush1.bf16.msra.mxu0 %v14422_v59  ;;  %v14464_v59 = vld [vmem:[#allocation3 + $0x2dc] ss:$20 sps:$4 sm:$0xff]  }
 0x9a8   :  { %v13413_v28 = vpop.f32.mrf.mxu0  ;;  %8496 = vmatprep.subr.bf16.mxu0 %v14430_v15  ;;  %v14462_v15 = vld [vmem:[#allocation3 + $0x2d8] ss:$20 sps:$4 sm:$0xff]  }
 0x9a9   :  { %v13414_v51 = vadd.f32 %v13413_v28, %v13412_v61  ;;  %v14470_v61 = vld [vmem:[#allocation3 + $0x3f8] ss:$20 sps:$4 sm:$0xff]  }
 0x9aa   :  { %v13415_v40 = vpop.f32.mrf.mxu0  ;;  %v14471_v28 = vld [vmem:[#allocation3 + $0x2b8] ss:$20 sps:$4 sm:$0xff]  }
 0x9ab   :  { %v6957_v13 = vadd.f32 %v13414_v51, %v6917_v54  ;;  %8497 = vmatpush1.bf16.msra.mxu0 %v14428_v25  ;;  %v14474_v54 = vld [vmem:[#allocation3 + $0x28c] ss:$20 sps:$4 sm:$0xff]   ;;  %v14475_v40 = vld [vmem:[#allocation3 + $0x3d0] ss:$20 sps:$4 sm:$0xff]  }
 0x9ac   :  { %v13416_v57 = vpop.f32.mrf.mxu0  ;;  %8498 = vmatprep.subr.bf16.mxu0 %v14436_v50  ;;  %v14467_v50 = vld [vmem:[#allocation3 + $0x2b0] ss:$20 sps:$4 sm:$0xff]  }
 0x9ad   :  { %v6966_v16 = vmax.f32 %v6957_v13, 0.0  ;;  %v14476_v57 = vld [vmem:[#allocation3 + $0x290] ss:$20 sps:$4 sm:$0xff]  }
 0x9af   :  { %v18959_v5 = vpack.c.bf16 %v6966_v16, %v6966_v16  ;;  %8499 = vmatpush1.bf16.msra.mxu0 %v14434_v1  ;;  %v14472_v1 = vld [vmem:[#allocation3 + $0x288] ss:$20 sps:$4 sm:$0xff]  }
 0x9b0   :  { %13440 = vmatprep.subr.bf16.mxu0 %v14440_v21  ;;  %v14479_v21 = vld [vmem:[#allocation3 + $0x4e4] ss:$20 sps:$4 sm:$0xff]  }
 0x9b1   :  { %8394 = vmatmul.mubr.bf16.vlgmr.msra.gmra.mxu1 %v18959_v5 }
 0x9b2   :  { %8444 = vmatpush1.bf16.msra.mxu1 %v14437_v8  ;;  %8517 = vmatmul.mubr.bf16.vlgmr.msra.gmra.mxu0 %v18959_v5  ;;  %v14482_v8 = vld [vmem:[#allocation4 + $0x11c] ss:$20 sps:$4 sm:$0xff]  }
 0x9b3   :  { %8475 = vmatprep.mubr.bf16.mxu1 %v18932_v18  ;;  %13441 = vmatpush3.bf16.msra.mxu0 %v14441_v2  ;;  %v14477_v2 = vld [vmem:[#allocation3 + $0x4e0] ss:$20 sps:$4 sm:$0xff]  }
 0x9b4   :  { %8597 = vmatprep.mubr.bf16.mxu0 %v18932_v18  ;;  %8445 = vmatprep.subr.bf16.mxu1 %v14444_v48  ;;  %v14457_v18 = vld [vmem:[#allocation3 + $0x300] ss:$20 sps:$4 sm:$0xff]   ;;  %v14480_v48 = vld [vmem:[#allocation4 + $0x118] ss:$20 sps:$4 sm:$0xff]  }
 0x9b5   :  { %13442 = vmatprep.subr.bf16.mxu0 %v14445_v14  ;;  %v14485_v14 = vld [vmem:[#allocation3 + $0x4bc] ss:$20 sps:$4 sm:$0xff]  }
 0x9b6   :  { %8446 = vmatpush1.bf16.msra.mxu1 %v14442_v30  ;;  %v14488_v30 = vld [vmem:[#allocation4 + $0xf4] ss:$20 sps:$4 sm:$0xff]  }
 0x9b7   :  { %13443 = vmatpush3.bf16.msra.mxu0 %v14446_v43  ;;  %8447 = vmatprep.subr.bf16.mxu1 %v14449_v12  ;;  %v14483_v43 = vld [vmem:[#allocation3 + $0x4b8] ss:$20 sps:$4 sm:$0xff]   ;;  %v14486_v12 = vld [vmem:[#allocation4 + $0xf0] ss:$20 sps:$4 sm:$0xff]  }
 0x9b8   :  { %13444 = vmatprep.subr.bf16.mxu0 %v14450_v6  ;;  %v14491_v6 = vld [vmem:[#allocation3 + $0x494] ss:$20 sps:$4 sm:$0xff]  }
 0x9ba   :  { %8448 = vmatpush1.bf16.msra.mxu1 %v14447_v20  ;;  %v14494_v20 = vld [vmem:[#allocation4 + $0xcc] ss:$20 sps:$4 sm:$0xff]  }
 0x9bb   :  { %13445 = vmatpush3.bf16.msra.mxu0 %v14451_v58  ;;  %8449 = vmatprep.subr.bf16.mxu1 %v14454_v22  ;;  %v14489_v58 = vld [vmem:[#allocation3 + $0x490] ss:$20 sps:$4 sm:$0xff]   ;;  %v14492_v22 = vld [vmem:[#allocation4 + $0xc8] ss:$20 sps:$4 sm:$0xff]  }
 0x9bc   :  { %13446 = vmatprep.subr.bf16.mxu0 %v14455_v45  ;;  %v14497_v45 = vld [vmem:[#allocation3 + $0x46c] ss:$20 sps:$4 sm:$0xff]  }
 0x9be   :  { %8450 = vmatpush1.bf16.msra.mxu1 %v14452_v56  ;;  %v14500_v56 = vld [vmem:[#allocation4 + $0xa4] ss:$20 sps:$4 sm:$0xff]  }
 0x9bf   :  { %13447 = vmatpush3.bf16.msra.mxu0 %v14456_v37  ;;  %8451 = vmatprep.subr.bf16.mxu1 %v14459_v41  ;;  %v14495_v37 = vld [vmem:[#allocation3 + $0x468] ss:$20 sps:$4 sm:$0xff]   ;;  %v14498_v41 = vld [vmem:[#allocation4 + $0xa0] ss:$20 sps:$4 sm:$0xff]  }
 0x9c0   :  { %13448 = vmatprep.subr.bf16.mxu0 %v14460_v35  ;;  %v14503_v35 = vld [vmem:[#allocation3 + $0x444] ss:$20 sps:$4 sm:$0xff]  }
 0x9c2   :  { %8452 = vmatpush1.bf16.msra.mxu1 %v14457_v18  ;;  %v14506_v18 = vld [vmem:[#allocation4 + $0x7c] ss:$20 sps:$4 sm:$0xff]  }
 0x9c3   :  { %13449 = vmatpush3.bf16.msra.mxu0 %v14461_v49  ;;  %8453 = vmatprep.subr.bf16.mxu1 %v14464_v59  ;;  %v14501_v49 = vld [vmem:[#allocation3 + $0x440] ss:$20 sps:$4 sm:$0xff]   ;;  %v14504_v59 = vld [vmem:[#allocation4 + $0x78] ss:$20 sps:$4 sm:$0xff]  }
 0x9c4   :  { %13450 = vmatprep.subr.bf16.mxu0 %v14465_v36  ;;  %v14509_v36 = vld [vmem:[#allocation3 + $0x41c] ss:$20 sps:$4 sm:$0xff]  }
 0x9c6   :  { %8454 = vmatpush1.bf16.msra.mxu1 %v14462_v15  ;;  %v18965_v25 = vpop.f32.mrf.mxu1  ;;  %v14512_v15 = vld [vmem:[#allocation4 + $0x54] ss:$20 sps:$4 sm:$0xff]  }
 0x9c7   :  { %13451 = vmatpush3.bf16.msra.mxu0 %v14466_v47  ;;  %8455 = vmatprep.subr.bf16.mxu1 %v14469_v29  ;;  %v14507_v47 = vld [vmem:[#allocation3 + $0x418] ss:$20 sps:$4 sm:$0xff]   ;;  %v14510_v29 = vld [vmem:[#allocation4 + $0x50] ss:$20 sps:$4 sm:$0xff]  }
 0x9c8   :  { %v18967_v51 = vpop.f32.mrf.mxu1  ;;  %13452 = vmatprep.subr.bf16.mxu0 %v14470_v61  ;;  %v14515_v61 = vld [vmem:[#allocation3 + $0x3f4] ss:$20 sps:$4 sm:$0xff]  }
 0x9ca   :  { %8456 = vmatpush1.bf16.msra.mxu1 %v14467_v50  ;;  %v8317_v13 = vpop.f32.mrf.mxu1  ;;  %v14518_v50 = vld [vmem:[#allocation4 + $0x2c] ss:$20 sps:$4 sm:$0xff]  }
 0x9cb   :  { %13453 = vmatpush3.bf16.msra.mxu0 %v14471_v28  ;;  %8457 = vmatprep.subr.bf16.mxu1 %v14474_v54  ;;  %v14513_v28 = vld [vmem:[#allocation3 + $0x3f0] ss:$20 sps:$4 sm:$0xff]   ;;  %v14516_v54 = vld [vmem:[#allocation4 + $0x28] ss:$20 sps:$4 sm:$0xff]  }
 0x9cc   :  { %v8318_v16 = vpop.f32.mrf.mxu1  ;;  %13454 = vmatprep.subr.bf16.mxu0 %v14475_v40  ;;  %v14521_v40 = vld [vmem:[#allocation3 + $0x3cc] ss:$20 sps:$4 sm:$0xff]   ;;  %v14524_v13 = vld [vmem:[#allocation4 + $0x4] ss:$20 sps:$4 sm:$0xff]  }
 0x9cd   :  { %v14529_v16 = vld [vmem:[#allocation4 + $0x25c] ss:$20 sps:$4 sm:$0xff]  }
 0x9ce   :  { %8458 = vmatpush1.bf16.msra.mxu1 %v14472_v1  ;;  %v14519_v1 = vld [vmem:[#allocation3 + $0x3c8] ss:$20 sps:$4 sm:$0xff]  }
 0x9cf   :  { %13455 = vmatpush3.bf16.msra.mxu0 %v14476_v57  ;;  %8459 = vmatprep.subr.bf16.mxu1 %v14479_v21  ;;  %v14522_v57 = vld [vmem:[#allocation4] ss:$20 sps:$4 sm:$0xff]   ;;  %v14525_v21 = vld [vmem:[#allocation3 + $0x268] ss:$20 sps:$4 sm:$0xff]  }
 0x9d0   :  { %11205 = vmatprep.subr.bf16.mxu0 %v14482_v8  ;;  %v14526_v8 = vld [vmem:[#allocation3 + $0x128] ss:$20 sps:$4 sm:$0xff]  }
 0x9d2   :  { %8460 = vmatpush2.bf16.msra.mxu1 %v14477_v2  ;;  %8598 = vmatmul.mubr.bf16.vlgmr.msra.gmra.mxu0 %v18934_v38  ;;  %v14527_v2 = vld [vmem:[#allocation4 + $0x258] ss:$20 sps:$4 sm:$0xff]  }
 0x9d3   :  { %11206 = vmatpush1.bf16.msra.mxu0 %v14480_v48  ;;  %8461 = vmatprep.subr.bf16.mxu1 %v14485_v14  ;;  %v14530_v48 = vld [vmem:[#allocation3 + $0x240] ss:$20 sps:$4 sm:$0xff]  }
 0x9d4   :  { %11207 = vmatprep.subr.bf16.mxu0 %v14488_v30  ;;  %11237 = vmatprep.mubr.bf16.mxu0 %v18759_v17  ;;  %v14534_v14 = vld [vmem:[#allocation4 + $0x234] ss:$20 sps:$4 sm:$0xff]  }
 0x9d5   :  { %v14531_v30 = vld [vmem:[#allocation3 + $0x100] ss:$20 sps:$4 sm:$0xff]  }
 0x9d6   :  { %8462 = vmatpush2.bf16.msra.mxu1 %v14483_v43  ;;  %v14532_v43 = vld [vmem:[#allocation4 + $0x230] ss:$20 sps:$4 sm:$0xff]  }
 0x9d7   :  { %11208 = vmatpush1.bf16.msra.mxu0 %v14486_v12  ;;  %8463 = vmatprep.subr.bf16.mxu1 %v14491_v6  ;;  %v14535_v12 = vld [vmem:[#allocation3 + $0x218] ss:$20 sps:$4 sm:$0xff]  }
 0x9d8   :  { %11209 = vmatprep.subr.bf16.mxu0 %v14494_v20  ;;  %v14539_v6 = vld [vmem:[#allocation4 + $0x20c] ss:$20 sps:$4 sm:$0xff]  }
 0x9d9   :  { %v14536_v20 = vld [vmem:[#allocation3 + $0xd8] ss:$20 sps:$4 sm:$0xff]  }
 0x9da   :  { %8464 = vmatpush2.bf16.msra.mxu1 %v14489_v58  ;;  %v14537_v58 = vld [vmem:[#allocation4 + $0x208] ss:$20 sps:$4 sm:$0xff]  }
 0x9db   :  { %11210 = vmatpush1.bf16.msra.mxu0 %v14492_v22  ;;  %8465 = vmatprep.subr.bf16.mxu1 %v14497_v45  ;;  %v14540_v22 = vld [vmem:[#allocation3 + $0x1f0] ss:$20 sps:$4 sm:$0xff]  }
 0x9dc   :  { %11211 = vmatprep.subr.bf16.mxu0 %v14500_v56  ;;  %v14544_v45 = vld [vmem:[#allocation4 + $0x1e4] ss:$20 sps:$4 sm:$0xff]   ;;  %v14545_v56 = vld [vmem:[#allocation3 + $0x1c8] ss:$20 sps:$4 sm:$0xff]  }
 0x9de   :  { %8466 = vmatpush2.bf16.msra.mxu1 %v14495_v37  ;;  %v14549_v37 = vld [vmem:[#allocation4 + $0x1bc] ss:$20 sps:$4 sm:$0xff]  }
 0x9df   :  { %11212 = vmatpush1.bf16.msra.mxu0 %v14498_v41  ;;  %8467 = vmatprep.subr.bf16.mxu1 %v14503_v35  ;;  %v14546_v41 = vld [vmem:[#allocation3 + $0x88] ss:$20 sps:$4 sm:$0xff]   ;;  %v14547_v35 = vld [vmem:[#allocation4 + $0x1b8] ss:$20 sps:$4 sm:$0xff]  }
 0x9e0   :  { %11213 = vmatprep.subr.bf16.mxu0 %v14506_v18  ;;  %v14550_v18 = vld [vmem:[#allocation3 + $0x1a0] ss:$20 sps:$4 sm:$0xff]  }
 0x9e2   :  { %8468 = vmatpush2.bf16.msra.mxu1 %v14501_v49  ;;  %v14554_v49 = vld [vmem:[#allocation4 + $0x194] ss:$20 sps:$4 sm:$0xff]  }
 0x9e3   :  { %11214 = vmatpush1.bf16.msra.mxu0 %v14504_v59  ;;  %8469 = vmatprep.subr.bf16.mxu1 %v14509_v36  ;;  %v14551_v59 = vld [vmem:[#allocation3 + $0x60] ss:$20 sps:$4 sm:$0xff]   ;;  %v14552_v36 = vld [vmem:[#allocation4 + $0x190] ss:$20 sps:$4 sm:$0xff]  }
 0x9e4   :  { %11215 = vmatprep.subr.bf16.mxu0 %v14512_v15  ;;  %v14555_v15 = vld [vmem:[#allocation3 + $0x178] ss:$20 sps:$4 sm:$0xff]  }
 0x9e6   :  { %8470 = vmatpush2.bf16.msra.mxu1 %v14507_v47  ;;  %v14559_v47 = vld [vmem:[#allocation4 + $0x16c] ss:$20 sps:$4 sm:$0xff]  }
 0x9e7   :  { %11216 = vmatpush1.bf16.msra.mxu0 %v14510_v29  ;;  %8471 = vmatprep.subr.bf16.mxu1 %v14515_v61  ;;  %v14556_v29 = vld [vmem:[#allocation3 + $0x38] ss:$20 sps:$4 sm:$0xff]   ;;  %v14557_v61 = vld [vmem:[#allocation4 + $0x168] ss:$20 sps:$4 sm:$0xff]  }
 0x9e8   :  { %11217 = vmatprep.subr.bf16.mxu0 %v14518_v50  ;;  %v14560_v50 = vld [vmem:[#allocation3 + $0x150] ss:$20 sps:$4 sm:$0xff]  }
 0x9ea   :  { %8472 = vmatpush2.bf16.msra.mxu1 %v14513_v28  ;;  %v14564_v28 = vld [vmem:[#allocation4 + $0x144] ss:$20 sps:$4 sm:$0xff]  }
 0x9eb   :  { %11218 = vmatpush1.bf16.msra.mxu0 %v14516_v54  ;;  %8473 = vmatprep.subr.bf16.mxu1 %v14521_v40  ;;  %v18976_v54 = vld [vmem:[%s19150_s5] sm:$0x1f]  ;;  %s15181_s5 = smov [#allocation8]  }
 0x9ec   :  { %11219 = vmatprep.subr.bf16.mxu0 %v14524_v13  ;;  %v14561_v40 = vld [vmem:[#allocation3 + $0x10] ss:$20 sps:$4 sm:$0xff]   ;;  %v14562_v13 = vld [vmem:[#allocation4 + $0x140] ss:$20 sps:$4 sm:$0xff]   ;;  %s11937_s21 = sshll.u32 %s15181_s5, 4  ;;  %s11938_s21 = int_to_ptr.vmem [resolvable:$true] %s11937_s21 }
 0x9ed   :  { %s15108_s22 = scalar_lea.vmem %s11938_s21, 640  ;;  %p15113_p1 = scmp.lt.s32.totalorder %s11938_s21, %s11938_s21 }
 0x9ee   :  { %8474 = vmatpush2.bf16.msra.mxu1 %v14519_v1  ;;  %v14568_v1 = vld [vmem:[#allocation4 + $0x61c] ss:$20 sps:$4 sm:$0xff]   ;;  %p15109_p0 = scmp.ne.s32.totalorder %s11938_s21, %s15108_s22  ;;  %p15114_p2 = scmp.lt.s32.totalorder %s15108_s22, %s15108_s22 }
 0x9ef   :  { %11220 = vmatpush1.bf16.msra.mxu0 %v14522_v57  ;;  %13418 = vmatprep.subr.bf16.mxu1 %v14525_v21  ;;  %v7217_v57 = vrot.slane %v18976_v54, %v4249_v24  ;;  %v14565_v21 = vld [vmem:[#allocation3 + $0x628] ss:$20 sps:$4 sm:$0xff]  }
 0x9f0   :  { %11221 = vmatprep.subr.bf16.mxu0 %v14529_v16  ;;  %v7221_v16 = vrot.slane %v18976_v54, %v4253_v26  ;;  %v14570_v26 = vld [vmem:[#allocation4 + $0x5f0] ss:$20 sps:$4 sm:$0xff]   ;;  %p15115_p3 = por %p15114_p2, %p15113_p1 }
 0x9f1   :  { %8476 = vmatmul.mubr.bf16.vlgmr.msra.gmra.mxu1 %v18934_v38  ;;  %v14541_v38 = vld [vmem:[#allocation3 + $0xb0] ss:$20 sps:$4 sm:$0xff]  }
 0x9f2   :  { %13419 = vmatpush3.bf16.msra.mxu1 %v14526_v8  ;;  %8557 = vmatprep.mubr.bf16.mxu1 %v18898_v11  ;;  %v14542_v11 = vld [vmem:[#allocation4 + $0x1e0] ss:$20 sps:$4 sm:$0xff]   ;;  %v14566_v8 = vld [vmem:[#allocation4 + $0x618] ss:$20 sps:$4 sm:$0xff]   ;;  %p15116_p4 = pnand %p15115_p3, %p15109_p0 }
 0x9f3   :  { %11222 = vmatpush2.bf16.msra.mxu0 %v14527_v2  ;;  %13420 = vmatprep.subr.bf16.mxu1 %v14530_v48  ;;  %v14572_v2 = vld [vmem:[#allocation4 + $0x5f4] ss:$20 sps:$4 sm:$0xff]   ;;  %v8314_v48 = vadd.f32 %v18965_v25, %v7217_v57  ;;  %v14603_v57 = vld [vmem:[#allocation4 + $0x370] ss:$20 sps:$4 sm:$0xff]  }
 0x9f4   :  { %11223 = vmatprep.subr.bf16.mxu0 %v14534_v14  ;;  %v14569_v14 = vld [vmem:[#allocation3 + $0x600] ss:$20 sps:$4 sm:$0xff]  }
 0x9f6   :  { %13421 = vmatpush3.bf16.msra.mxu1 %v14531_v30  ;;  %v8316_v30 = vadd.f32 %v18967_v51, %v7221_v16  ;;  %v14574_v51 = vld [vmem:[#allocation4 + $0x5c8] ss:$20 sps:$4 sm:$0xff]   ;;  %v14614_v16 = vld [vmem:[#allocation4 + $0x70c] ss:$20 sps:$4 sm:$0xff]  }
 0x9f7   :  { %11224 = vmatpush2.bf16.msra.mxu0 %v14532_v43  ;;  %13422 = vmatprep.subr.bf16.mxu1 %v14535_v12 }
 0x9f8   :  { %11225 = vmatprep.subr.bf16.mxu0 %v14539_v6  ;;  %v14576_v6 = vld [vmem:[#allocation4 + $0x5cc] ss:$20 sps:$4 sm:$0xff]  }
 0x9fa   :  { %13423 = vmatpush3.bf16.msra.mxu1 %v14536_v20  ;;  %v14573_v20 = vld [vmem:[#allocation3 + $0x5d8] ss:$20 sps:$4 sm:$0xff]  }
 0x9fb   :  { %11226 = vmatpush2.bf16.msra.mxu0 %v14537_v58  ;;  %13424 = vmatprep.subr.bf16.mxu1 %v14540_v22  ;;  %v14580_v22 = vld [vmem:[#allocation4 + $0x5a4] ss:$20 sps:$4 sm:$0xff]  }
 0x9fc   :  { %11227 = vmatprep.subr.bf16.mxu0 %v14544_v45  ;;  %v14577_v45 = vld [vmem:[#allocation3 + $0x5b0] ss:$20 sps:$4 sm:$0xff]  }
 0x9fe   :  { %13425 = vmatpush3.bf16.msra.mxu1 %v14541_v38  ;;  %v14578_v38 = vld [vmem:[#allocation4 + $0x5a0] ss:$20 sps:$4 sm:$0xff]  }
 0x9ff   :  { %11228 = vmatpush2.bf16.msra.mxu0 %v14542_v11  ;;  %13426 = vmatprep.subr.bf16.mxu1 %v14545_v56  ;;  %v14584_v11 = vld [vmem:[#allocation4 + $0x57c] ss:$20 sps:$4 sm:$0xff]  }
 0xa00   :  { %11229 = vmatprep.subr.bf16.mxu0 %v14549_v37  ;;  %v14581_v56 = vld [vmem:[#allocation3 + $0x588] ss:$20 sps:$4 sm:$0xff]   ;;  %v14582_v37 = vld [vmem:[#allocation4 + $0x578] ss:$20 sps:$4 sm:$0xff]  }
 0xa02   :  { %13427 = vmatpush3.bf16.msra.mxu1 %v14546_v41  ;;  %v14588_v41 = vld [vmem:[#allocation4 + $0x554] ss:$20 sps:$4 sm:$0xff]  }
 0xa03   :  { %11230 = vmatpush2.bf16.msra.mxu0 %v14547_v35  ;;  %13428 = vmatprep.subr.bf16.mxu1 %v14550_v18  ;;  %v14585_v35 = vld [vmem:[#allocation3 + $0x560] ss:$20 sps:$4 sm:$0xff]   ;;  %v14586_v18 = vld [vmem:[#allocation4 + $0x550] ss:$20 sps:$4 sm:$0xff]  }
 0xa04   :  { %11231 = vmatprep.subr.bf16.mxu0 %v14554_v49  ;;  %v14592_v49 = vld [vmem:[#allocation4 + $0x52c] ss:$20 sps:$4 sm:$0xff]  }
 0xa06   :  { %13429 = vmatpush3.bf16.msra.mxu1 %v14551_v59  ;;  %v14589_v59 = vld [vmem:[#allocation3 + $0x538] ss:$20 sps:$4 sm:$0xff]  }
 0xa07   :  { %11232 = vmatpush2.bf16.msra.mxu0 %v14552_v36  ;;  %13430 = vmatprep.subr.bf16.mxu1 %v14555_v15  ;;  %v14590_v36 = vld [vmem:[#allocation4 + $0x528] ss:$20 sps:$4 sm:$0xff]   ;;  %v14596_v15 = vld [vmem:[#allocation4 + $0x504] ss:$20 sps:$4 sm:$0xff]  }
 0xa08   :  { %11233 = vmatprep.subr.bf16.mxu0 %v14559_v47  ;;  %v14593_v47 = vld [vmem:[#allocation3 + $0x510] ss:$20 sps:$4 sm:$0xff]  }
 0xa0a   :  { %13431 = vmatpush3.bf16.msra.mxu1 %v14556_v29  ;;  %v14594_v29 = vld [vmem:[#allocation4 + $0x500] ss:$20 sps:$4 sm:$0xff]  }
 0xa0b   :  { %11234 = vmatpush2.bf16.msra.mxu0 %v14557_v61  ;;  %13432 = vmatprep.subr.bf16.mxu1 %v14560_v50  ;;  %v14599_v61 = vld [vmem:[#allocation4 + $0x39c] ss:$20 sps:$4 sm:$0xff]  }
 0xa0c   :  { %11235 = vmatprep.subr.bf16.mxu0 %v14564_v28  ;;  %v14602_v50 = vld [vmem:[#allocation4 + $0x75c] ss:$20 sps:$4 sm:$0xff]   ;;  %v14597_v28 = vld [vmem:[#allocation4 + $0x398] ss:$20 sps:$4 sm:$0xff]  }
 0xa0e   :  { %13433 = vmatpush3.bf16.msra.mxu1 %v14561_v40  ;;  %v14600_v40 = vld [vmem:[#allocation4 + $0x758] ss:$20 sps:$4 sm:$0xff]  }
 0xa0f   :  { %11236 = vmatpush2.bf16.msra.mxu0 %v14562_v13  ;;  %13591 = vmatprep.subr.bf16.mxu1 %v15178_v32  ;;  %v14605_v13 = vld [vmem:[#allocation4 + $0x374] ss:$20 sps:$4 sm:$0xff]  }
 0xa10   :  { %11287 = vmatprep.subr.bf16.mxu0 %v14568_v1  ;;  %v14608_v1 = vld [vmem:[#allocation4 + $0x734] ss:$20 sps:$4 sm:$0xff]  }
 0xa11   :  { %8558 = vmatmul.mubr.bf16.vlgmr.msra.gmra.mxu1 %v18913_v19 }
 0xa12   :  { %13592 = vmatpush3.bf16.msra.mxu1 %v14565_v21  ;;  %11238 = vmatmul.mubr.bf16.vlgmr.msra.gmra.mxu0 %v18780_v63  ;;  %v8354_v24 = vpop.f32.mrf.mxu0  ;;  %v14611_v21 = vld [vmem:[#allocation4 + $0x34c] ss:$20 sps:$4 sm:$0xff]  }
 0xa13   :  { %v18989_v43 = vadd.f32 %v8354_v24, %v8314_v48  ;;  %11288 = vmatpush1.bf16.msra.mxu0 %v14566_v8  ;;  %13593 = vmatprep.subr.bf16.mxu1 %v15178_v32  ;;  %v14609_v8 = vld [vmem:[#allocation4 + $0x348] ss:$20 sps:$4 sm:$0xff]   ;;  %v14617_v48 = vld [vmem:[#allocation4 + $0x324] ss:$20 sps:$4 sm:$0xff]  }
 0xa14   :  { %v8356_v12 = vpop.f32.mrf.mxu0  ;;  %11289 = vmatprep.subr.bf16.mxu0 %v14572_v2  ;;  %13607 = vmatprep.mubr.msk.bf16.mxu1 %vm15179_vm0, %v15178_v32  ;;  %v14612_v2 = vld [vmem:[#allocation4 + $0x708] ss:$20 sps:$4 sm:$0xff]   ;;  %v14620_v24 = vld [vmem:[#allocation4 + $0x6e4] ss:$20 sps:$4 sm:$0xff]  }
 0xa15   :  { %v18994_v19 = vadd.f32 %v8356_v12, %v8316_v30  ;;  %11319 = vmatprep.mubr.bf16.mxu0 %v18788_v9  ;;  %v14623_v30 = vld [vmem:[#allocation4 + $0x2fc] ss:$20 sps:$4 sm:$0xff]   ;;  %v14621_v12 = vld [vmem:[#allocation4 + $0x2f8] ss:$20 sps:$4 sm:$0xff]  }
 0xa16   :  { %13594 = vmatpush3.bf16.msra.mxu1 %v14569_v14  ;;  %v8358_v25 = vpop.f32.mrf.mxu0  ;;  %v14618_v14 = vld [vmem:[#allocation4 + $0x6e0] ss:$20 sps:$4 sm:$0xff]  }
 0xa17   :  { %11290 = vmatpush1.bf16.msra.mxu0 %v14570_v26  ;;  %13595 = vmatprep.subr.bf16.mxu1 %v15178_v32  ;;  %v14626_v26 = vld [vmem:[#allocation4 + $0x6bc] ss:$20 sps:$4 sm:$0xff]   ;;  %v14629_v25 = vld [vmem:[#allocation4 + $0x2d4] ss:$20 sps:$4 sm:$0xff]  }
 0xa18   :  { %v8359_v58 = vpop.f32.mrf.mxu0  ;;  %11291 = vmatprep.subr.bf16.mxu0 %v14576_v6  ;;  %v14624_v6 = vld [vmem:[#allocation4 + $0x6b8] ss:$20 sps:$4 sm:$0xff]  }
 0xa19   :  { %v14630_v58 = vld [vmem:[#allocation4 + $0x690] ss:$20 sps:$4 sm:$0xff]  }
 0xa1a   :  { %13596 = vmatpush3.bf16.msra.mxu1 %v14573_v20  ;;  %v14632_v20 = vld [vmem:[#allocation4 + $0x694] ss:$20 sps:$4 sm:$0xff]  }
 0xa1b   :  { %11292 = vmatpush1.bf16.msra.mxu0 %v14574_v51  ;;  %13597 = vmatprep.subr.bf16.mxu1 %v15178_v32  ;;  %v14627_v51 = vld [vmem:[#allocation4 + $0x2d0] ss:$20 sps:$4 sm:$0xff]  }
 0xa1c   :  { %11293 = vmatprep.subr.bf16.mxu0 %v14580_v22  ;;  %v14635_v22 = vld [vmem:[#allocation4 + $0x2ac] ss:$20 sps:$4 sm:$0xff]  }
 0xa1e   :  { %13598 = vmatpush3.bf16.msra.mxu1 %v14577_v45  ;;  %v14638_v45 = vld [vmem:[#allocation4 + $0x66c] ss:$20 sps:$4 sm:$0xff]  }
 0xa1f   :  { %11294 = vmatpush1.bf16.msra.mxu0 %v14578_v38  ;;  %13599 = vmatprep.subr.bf16.mxu1 %v15178_v32  ;;  %v14633_v38 = vld [vmem:[#allocation4 + $0x2a8] ss:$20 sps:$4 sm:$0xff]  }
 0xa20   :  { %11295 = vmatprep.subr.bf16.mxu0 %v14584_v11  ;;  %v14636_v11 = vld [vmem:[#allocation4 + $0x668] ss:$20 sps:$4 sm:$0xff]  }
 0xa22   :  { %13600 = vmatpush3.bf16.msra.mxu1 %v14581_v56  ;;  %v14641_v56 = vld [vmem:[#allocation4 + $0x284] ss:$20 sps:$4 sm:$0xff]  }
 0xa23   :  { %11296 = vmatpush1.bf16.msra.mxu0 %v14582_v37  ;;  %13601 = vmatprep.subr.bf16.mxu1 %v15178_v32  ;;  %v14644_v37 = vld [vmem:[#allocation4 + $0x644] ss:$20 sps:$4 sm:$0xff]  }
 0xa24   :  { %11297 = vmatprep.subr.bf16.mxu0 %v14588_v41  ;;  %v14639_v41 = vld [vmem:[#allocation4 + $0x280] ss:$20 sps:$4 sm:$0xff]  }
 0xa26   :  { %13602 = vmatpush3.bf16.msra.mxu1 %v14585_v35  ;;  %v14642_v35 = vld [vmem:[#allocation4 + $0x640] ss:$20 sps:$4 sm:$0xff]  }
 0xa27   :  { %11298 = vmatpush1.bf16.msra.mxu0 %v14586_v18  ;;  %13603 = vmatprep.subr.bf16.mxu1 %v15178_v32  ;;  %v14647_v18 = vld [vmem:[#allocation4 + $0x4dc] ss:$20 sps:$4 sm:$0xff]  }
 0xa28   :  { %11299 = vmatprep.subr.bf16.mxu0 %v14592_v49  ;;  %v14650_v49 = vld [vmem:[#allocation4 + $0xb1c] ss:$20 sps:$4 sm:$0xff]  }
 0xa2a   :  { %13604 = vmatpush3.bf16.msra.mxu1 %v14589_v59  ;;  %v14645_v59 = vld [vmem:[#allocation4 + $0x4d8] ss:$20 sps:$4 sm:$0xff]  }
 0xa2b   :  { %11300 = vmatpush1.bf16.msra.mxu0 %v14590_v36  ;;  %13605 = vmatprep.subr.bf16.mxu1 %v15178_v32  ;;  %v14606_v32 = vld [vmem:[#allocation4 + $0x730] ss:$20 sps:$4 sm:$0xff]   ;;  %v14648_v36 = vld [vmem:[#allocation4 + $0xb18] ss:$20 sps:$4 sm:$0xff]  }
 0xa2c   :  { %11301 = vmatprep.subr.bf16.mxu0 %v14596_v15  ;;  %v14653_v15 = vld [vmem:[#allocation4 + $0x4b4] ss:$20 sps:$4 sm:$0xff]  }
 0xa2e   :  { %13606 = vmatpush3.bf16.msra.mxu1 %v14593_v47  ;;  %v14656_v47 = vld [vmem:[#allocation4 + $0xaf4] ss:$20 sps:$4 sm:$0xff]  }
 0xa2f   :  { %11302 = vmatpush1.bf16.msra.mxu0 %v14594_v29  ;;  %11246 = vmatprep.subr.bf16.mxu1 %v14599_v61  ;;  %v14651_v61 = vld [vmem:[#allocation4 + $0x4b0] ss:$20 sps:$4 sm:$0xff]  }
 0xa30   :  { %11303 = vmatprep.subr.bf16.mxu0 %v14602_v50  ;;  %v14654_v50 = vld [vmem:[#allocation4 + $0xaf0] ss:$20 sps:$4 sm:$0xff]  }
 0xa31   :  { %13608 = vmatmul.mubr.bf16.vlgmr.msra.gmra.mxu1 %v18959_v5  ;;  %v14615_v5 = vld [vmem:[#allocation4 + $0x320] ss:$20 sps:$4 sm:$0xff]  }
 0xa32   :  { %11247 = vmatpush1.bf16.msra.mxu1 %v14597_v28  ;;  %11278 = vmatprep.mubr.bf16.mxu1 %v18761_v60  ;;  %v14659_v28 = vld [vmem:[#allocation4 + $0x48c] ss:$20 sps:$4 sm:$0xff]  }
 0xa33   :  { %11304 = vmatpush2.bf16.msra.mxu0 %v14600_v40  ;;  %11248 = vmatprep.subr.bf16.mxu1 %v14605_v13  ;;  %v14662_v13 = vld [vmem:[#allocation4 + $0xacc] ss:$20 sps:$4 sm:$0xff]  }
 0xa34   :  { %11305 = vmatprep.subr.bf16.mxu0 %v14608_v1 }
 0xa36   :  { %11249 = vmatpush1.bf16.msra.mxu1 %v14603_v57  ;;  %v14657_v57 = vld [vmem:[#allocation4 + $0x488] ss:$20 sps:$4 sm:$0xff]  }
 0xa37   :  { %11306 = vmatpush2.bf16.msra.mxu0 %v14606_v32  ;;  %11250 = vmatprep.subr.bf16.mxu1 %v14611_v21  ;;  %v14660_v32 = vld [vmem:[#allocation4 + $0xac8] ss:$20 sps:$4 sm:$0xff]   ;;  %v14665_v21 = vld [vmem:[#allocation4 + $0x464] ss:$20 sps:$4 sm:$0xff]  }
 0xa38   :  { %11307 = vmatprep.subr.bf16.mxu0 %v14614_v16 }
 0xa3a   :  { %11251 = vmatpush1.bf16.msra.mxu1 %v14609_v8  ;;  %v14668_v8 = vld [vmem:[#allocation4 + $0xaa4] ss:$20 sps:$4 sm:$0xff]  }
 0xa3b   :  { %11308 = vmatpush2.bf16.msra.mxu0 %v14612_v2  ;;  %11252 = vmatprep.subr.bf16.mxu1 %v14617_v48  ;;  %v14663_v2 = vld [vmem:[#allocation4 + $0x460] ss:$20 sps:$4 sm:$0xff]  }
 0xa3c   :  { %11309 = vmatprep.subr.bf16.mxu0 %v14620_v24  ;;  %v14666_v48 = vld [vmem:[#allocation4 + $0xaa0] ss:$20 sps:$4 sm:$0xff]   ;;  %v14671_v24 = vld [vmem:[#allocation4 + $0x43c] ss:$20 sps:$4 sm:$0xff]  }
 0xa3e   :  { %11253 = vmatpush1.bf16.msra.mxu1 %v14615_v5  ;;  %v14674_v5 = vld [vmem:[#allocation4 + $0xa7c] ss:$20 sps:$4 sm:$0xff]  }
 0xa3f   :  { %11310 = vmatpush2.bf16.msra.mxu0 %v14618_v14  ;;  %11254 = vmatprep.subr.bf16.mxu1 %v14623_v30  ;;  %v14669_v14 = vld [vmem:[#allocation4 + $0x438] ss:$20 sps:$4 sm:$0xff]  }
 0xa40   :  { %11311 = vmatprep.subr.bf16.mxu0 %v14626_v26  ;;  %v14672_v30 = vld [vmem:[#allocation4 + $0xa78] ss:$20 sps:$4 sm:$0xff]   ;;  %v14677_v26 = vld [vmem:[#allocation4 + $0x414] ss:$20 sps:$4 sm:$0xff]  }
 0xa42   :  { %11255 = vmatpush1.bf16.msra.mxu1 %v14621_v12  ;;  %v14680_v12 = vld [vmem:[#allocation4 + $0xa54] ss:$20 sps:$4 sm:$0xff]  }
 0xa43   :  { %11312 = vmatpush2.bf16.msra.mxu0 %v14624_v6  ;;  %11256 = vmatprep.subr.bf16.mxu1 %v14629_v25  ;;  %v14675_v6 = vld [vmem:[#allocation4 + $0x410] ss:$20 sps:$4 sm:$0xff]  }
 0xa44   :  { %11313 = vmatprep.subr.bf16.mxu0 %v14632_v20  ;;  %v14678_v25 = vld [vmem:[#allocation4 + $0xa50] ss:$20 sps:$4 sm:$0xff]   ;;  %v14683_v20 = vld [vmem:[#allocation4 + $0x3ec] ss:$20 sps:$4 sm:$0xff]  }
 0xa46   :  { %11257 = vmatpush1.bf16.msra.mxu1 %v14627_v51  ;;  %v14686_v51 = vld [vmem:[#allocation4 + $0xa2c] ss:$20 sps:$4 sm:$0xff]  }
 0xa47   :  { %11314 = vmatpush2.bf16.msra.mxu0 %v14630_v58  ;;  %11258 = vmatprep.subr.bf16.mxu1 %v14635_v22  ;;  %v14681_v58 = vld [vmem:[#allocation4 + $0x3e8] ss:$20 sps:$4 sm:$0xff]  }
 0xa48   :  { %11315 = vmatprep.subr.bf16.mxu0 %v14638_v45  ;;  %v14684_v22 = vld [vmem:[#allocation4 + $0xa28] ss:$20 sps:$4 sm:$0xff]   ;;  %v14689_v45 = vld [vmem:[#allocation4 + $0x3c4] ss:$20 sps:$4 sm:$0xff]  }
 0xa4a   :  { %11259 = vmatpush1.bf16.msra.mxu1 %v14633_v38  ;;  %v14692_v38 = vld [vmem:[#allocation4 + $0xa04] ss:$20 sps:$4 sm:$0xff]  }
 0xa4b   :  { %11316 = vmatpush2.bf16.msra.mxu0 %v14636_v11  ;;  %11260 = vmatprep.subr.bf16.mxu1 %v14641_v56  ;;  %v14687_v11 = vld [vmem:[#allocation4 + $0x3c0] ss:$20 sps:$4 sm:$0xff]  }
 0xa4c   :  { %11317 = vmatprep.subr.bf16.mxu0 %v14644_v37  ;;  %v14690_v56 = vld [vmem:[#allocation4 + $0xa00] ss:$20 sps:$4 sm:$0xff]   ;;  %v14695_v37 = vld [vmem:[#allocation4 + $0x89c] ss:$20 sps:$4 sm:$0xff]  }
 0xa4e   :  { %11261 = vmatpush1.bf16.msra.mxu1 %v14639_v41  ;;  %v14698_v41 = vld [vmem:[#allocation4 + $0xc5c] ss:$20 sps:$4 sm:$0xff]  }
 0xa4f   :  { %11318 = vmatpush2.bf16.msra.mxu0 %v14642_v35  ;;  %11262 = vmatprep.subr.bf16.mxu1 %v14647_v18  ;;  %v14693_v35 = vld [vmem:[#allocation4 + $0x898] ss:$20 sps:$4 sm:$0xff]  }
 0xa50   :  { %11369 = vmatprep.subr.bf16.mxu0 %v14650_v49  ;;  %v14696_v18 = vld [vmem:[#allocation4 + $0xc58] ss:$20 sps:$4 sm:$0xff]   ;;  %v14701_v49 = vld [vmem:[#allocation4 + $0x874] ss:$20 sps:$4 sm:$0xff]  }
 0xa52   :  { %v19005_v29 = vpop.f32.mrf.mxu0  ;;  %11263 = vmatpush2.bf16.msra.mxu1 %v14645_v59  ;;  %11320 = vmatmul.mubr.bf16.vlgmr.msra.gmra.mxu0 %v18816_v53  ;;  %v14704_v59 = vld [vmem:[#allocation4 + $0xc34] ss:$20 sps:$4 sm:$0xff]  }
 0xa53   :  { %11370 = vmatpush1.bf16.msra.mxu0 %v14648_v36  ;;  %11264 = vmatprep.subr.bf16.mxu1 %v14653_v15 }
 0xa54   :  { %v19008_v40 = vpop.f32.mrf.mxu0  ;;  %11371 = vmatprep.subr.bf16.mxu0 %v14656_v47  ;;  %11401 = vmatprep.mubr.bf16.mxu0 %v18824_v39 }
 0xa56   :  { %v8440_v1 = vpop.f32.mrf.mxu0  ;;  %11265 = vmatpush2.bf16.msra.mxu1 %v14651_v61  ;;  %v14699_v61 = vld [vmem:[#allocation4 + $0x870] ss:$20 sps:$4 sm:$0xff]  }
 0xa57   :  { %11372 = vmatpush1.bf16.msra.mxu0 %v14654_v50  ;;  %11266 = vmatprep.subr.bf16.mxu1 %v14659_v28  ;;  %v14702_v28 = vld [vmem:[#allocation4 + $0xc30] ss:$20 sps:$4 sm:$0xff]  }
 0xa58   :  { %v8441_v16 = vpop.f32.mrf.mxu0  ;;  %11373 = vmatprep.subr.bf16.mxu0 %v14662_v13  ;;  %v14707_v13 = vld [vmem:[#allocation4 + $0x84c] ss:$20 sps:$4 sm:$0xff]  }
 0xa59   :  { %v14705_v16 = vld [vmem:[#allocation4 + $0x848] ss:$20 sps:$4 sm:$0xff]  }
 0xa5a   :  { %11267 = vmatpush2.bf16.msra.mxu1 %v14657_v57 }
 0xa5b   :  { %11374 = vmatpush1.bf16.msra.mxu0 %v14660_v32  ;;  %11268 = vmatprep.subr.bf16.mxu1 %v14665_v21  ;;  %v14710_v32 = vld [vmem:[#allocation4 + $0xc0c] ss:$20 sps:$4 sm:$0xff]  }
 0xa5c   :  { %11375 = vmatprep.subr.bf16.mxu0 %v14668_v8 }
 0xa5e   :  { %11269 = vmatpush2.bf16.msra.mxu1 %v14663_v2  ;;  %v14708_v2 = vld [vmem:[#allocation4 + $0xc08] ss:$20 sps:$4 sm:$0xff]  }
 0xa5f   :  { %11376 = vmatpush1.bf16.msra.mxu0 %v14666_v48  ;;  %11270 = vmatprep.subr.bf16.mxu1 %v14671_v24  ;;  %v14713_v48 = vld [vmem:[#allocation4 + $0x824] ss:$20 sps:$4 sm:$0xff]  }
 0xa60   :  { %11377 = vmatprep.subr.bf16.mxu0 %v14674_v5  ;;  %v14716_v5 = vld [vmem:[#allocation4 + $0xbe4] ss:$20 sps:$4 sm:$0xff]  }
 0xa62   :  { %11271 = vmatpush2.bf16.msra.mxu1 %v14669_v14  ;;  %v14711_v14 = vld [vmem:[#allocation4 + $0x820] ss:$20 sps:$4 sm:$0xff]  }
 0xa63   :  { %11378 = vmatpush1.bf16.msra.mxu0 %v14672_v30  ;;  %11272 = vmatprep.subr.bf16.mxu1 %v14677_v26  ;;  %v14719_v30 = vld [vmem:[#allocation4 + $0x7fc] ss:$20 sps:$4 sm:$0xff]  }
 0xa64   :  { %11379 = vmatprep.subr.bf16.mxu0 %v14680_v12  ;;  %v14722_v26 = vld [vmem:[#allocation4 + $0xbbc] ss:$20 sps:$4 sm:$0xff]   ;;  %v14717_v12 = vld [vmem:[#allocation4 + $0x7f8] ss:$20 sps:$4 sm:$0xff]  }
 0xa66   :  { %11273 = vmatpush2.bf16.msra.mxu1 %v14675_v6  ;;  %v14720_v6 = vld [vmem:[#allocation4 + $0xbb8] ss:$20 sps:$4 sm:$0xff]  }
 0xa67   :  { %11380 = vmatpush1.bf16.msra.mxu0 %v14678_v25  ;;  %11274 = vmatprep.subr.bf16.mxu1 %v14683_v20  ;;  %v14725_v25 = vld [vmem:[#allocation4 + $0x7d4] ss:$20 sps:$4 sm:$0xff]  }
 0xa68   :  { %11381 = vmatprep.subr.bf16.mxu0 %v14686_v51  ;;  %v14728_v20 = vld [vmem:[#allocation4 + $0xb94] ss:$20 sps:$4 sm:$0xff]   ;;  %v14723_v51 = vld [vmem:[#allocation4 + $0x7d0] ss:$20 sps:$4 sm:$0xff]  }
 0xa6a   :  { %11275 = vmatpush2.bf16.msra.mxu1 %v14681_v58  ;;  %v14726_v58 = vld [vmem:[#allocation4 + $0xb90] ss:$20 sps:$4 sm:$0xff]  }
 0xa6b   :  { %11382 = vmatpush1.bf16.msra.mxu0 %v14684_v22  ;;  %11276 = vmatprep.subr.bf16.mxu1 %v14689_v45  ;;  %v14731_v22 = vld [vmem:[#allocation4 + $0x7ac] ss:$20 sps:$4 sm:$0xff]  }
 0xa6c   :  { %11383 = vmatprep.subr.bf16.mxu0 %v14692_v38  ;;  %v14734_v45 = vld [vmem:[#allocation4 + $0xb6c] ss:$20 sps:$4 sm:$0xff]   ;;  %v14729_v38 = vld [vmem:[#allocation4 + $0x7a8] ss:$20 sps:$4 sm:$0xff]  }
 0xa6e   :  { %11277 = vmatpush2.bf16.msra.mxu1 %v14687_v11  ;;  %v14732_v11 = vld [vmem:[#allocation4 + $0xb68] ss:$20 sps:$4 sm:$0xff]  }
 0xa6f   :  { %11384 = vmatpush1.bf16.msra.mxu0 %v14690_v56  ;;  %11328 = vmatprep.subr.bf16.mxu1 %v14695_v37  ;;  %v14737_v56 = vld [vmem:[#allocation4 + $0x784] ss:$20 sps:$4 sm:$0xff]  }
 0xa70   :  { %11385 = vmatprep.subr.bf16.mxu0 %v14698_v41  ;;  %v14740_v37 = vld [vmem:[#allocation4 + $0xb44] ss:$20 sps:$4 sm:$0xff]   ;;  %v14735_v41 = vld [vmem:[#allocation4 + $0x780] ss:$20 sps:$4 sm:$0xff]  }
 0xa71   :  { %11279 = vmatmul.mubr.bf16.vlgmr.msra.gmra.mxu1 %v18784_v0  ;;  %v8395_v36 = vpop.f32.mrf.mxu1 }
 0xa72   :  { %v19013_v15 = vadd.f32 %v8395_v36, %v18989_v43  ;;  %v19015_v47 = vpop.f32.mrf.mxu0  ;;  %11329 = vmatpush1.bf16.msra.mxu1 %v14693_v35  ;;  %11360 = vmatprep.mubr.bf16.mxu1 %v18792_v27  ;;  %v14738_v35 = vld [vmem:[#allocation4 + $0xb40] ss:$20 sps:$4 sm:$0xff]  }
 0xa73   :  { %11386 = vmatpush2.bf16.msra.mxu0 %v14696_v18  ;;  %v8397_v50 = vpop.f32.mrf.mxu1  ;;  %11330 = vmatprep.subr.bf16.mxu1 %v14701_v49  ;;  %v14743_v18 = vld [vmem:[#allocation4 + $0x9dc] ss:$20 sps:$4 sm:$0xff]   ;;  %v14746_v49 = vld [vmem:[#allocation4 + $0x3a4] ss:$20 sps:$4 sm:$0xff]   ;;  %v14744_v36 = vld [vmem:[#allocation4 + $0x3a0] ss:$20 sps:$4 sm:$0xff]  }
 0xa74   :  { %v19019_v1 = vadd.f32 %v8397_v50, %v18994_v19  ;;  %v19021_v57 = vpop.f32.mrf.mxu0  ;;  %11387 = vmatprep.subr.bf16.mxu0 %v14704_v59  ;;  %v14714_v19 = vld [vmem:[#allocation4 + $0xbe0] ss:$20 sps:$4 sm:$0xff]   ;;  %v14741_v59 = vld [vmem:[#allocation4 + $0x9d8] ss:$20 sps:$4 sm:$0xff]   ;;  %v14752_v50 = vld [vmem:[#allocation4 + $0x37c] ss:$20 sps:$4 sm:$0xff]  }
 0xa75   :  { %v8399_v43 = vpop.f32.mrf.mxu1 }
 0xa76   :  { %v8522_v21 = vpop.f32.mrf.mxu0  ;;  %11331 = vmatpush1.bf16.msra.mxu1 %v14699_v61  ;;  %v14749_v61 = vld [vmem:[#allocation4 + $0x9b4] ss:$20 sps:$4 sm:$0xff]   ;;  %v14755_v43 = vld [vmem:[#allocation4 + $0x98c] ss:$20 sps:$4 sm:$0xff]  }
 0xa77   :  { %11388 = vmatpush2.bf16.msra.mxu0 %v14702_v28  ;;  %v8400_v8 = vpop.f32.mrf.mxu1  ;;  %11332 = vmatprep.subr.bf16.mxu1 %v14707_v13  ;;  %v14747_v13 = vld [vmem:[#allocation4 + $0x9b0] ss:$20 sps:$4 sm:$0xff]  }
 0xa78   :  { %v8523_v24 = vpop.f32.mrf.mxu0  ;;  %11389 = vmatprep.subr.bf16.mxu0 %v14710_v32  ;;  %v14750_v32 = vld [vmem:[#allocation4 + $0x378] ss:$20 sps:$4 sm:$0xff]  }
 0xa79   :  { %v14756_v24 = vld [vmem:[#allocation4 + $0x350] ss:$20 sps:$4 sm:$0xff]  }
 0xa7a   :  { %11333 = vmatpush1.bf16.msra.mxu1 %v14705_v16  ;;  %v14758_v16 = vld [vmem:[#allocation4 + $0x354] ss:$20 sps:$4 sm:$0xff]  }
 0xa7b   :  { %11390 = vmatpush2.bf16.msra.mxu0 %v14708_v2  ;;  %11334 = vmatprep.subr.bf16.mxu1 %v14713_v48  ;;  %v14753_v48 = vld [vmem:[#allocation4 + $0x988] ss:$20 sps:$4 sm:$0xff]  }
 0xa7c   :  { %11391 = vmatprep.subr.bf16.mxu0 %v14716_v5  ;;  %v14761_v5 = vld [vmem:[#allocation4 + $0x964] ss:$20 sps:$4 sm:$0xff]  }
 0xa7e   :  { %11335 = vmatpush1.bf16.msra.mxu1 %v14711_v14 }
 0xa7f   :  { %11392 = vmatpush2.bf16.msra.mxu0 %v14714_v19  ;;  %11336 = vmatprep.subr.bf16.mxu1 %v14719_v30  ;;  %v14764_v19 = vld [vmem:[#allocation4 + $0x32c] ss:$20 sps:$4 sm:$0xff]  }
 0xa80   :  { %11393 = vmatprep.subr.bf16.mxu0 %v14722_v26  ;;  %v14759_v30 = vld [vmem:[#allocation4 + $0x960] ss:$20 sps:$4 sm:$0xff]   ;;  %v14762_v26 = vld [vmem:[#allocation4 + $0x328] ss:$20 sps:$4 sm:$0xff]  }
 0xa82   :  { %11337 = vmatpush1.bf16.msra.mxu1 %v14717_v12  ;;  %v14767_v12 = vld [vmem:[#allocation4 + $0x93c] ss:$20 sps:$4 sm:$0xff]  }
 0xa83   :  { %11394 = vmatpush2.bf16.msra.mxu0 %v14720_v6  ;;  %11338 = vmatprep.subr.bf16.mxu1 %v14725_v25  ;;  %v14770_v6 = vld [vmem:[#allocation4 + $0x304] ss:$20 sps:$4 sm:$0xff]  }
 0xa84   :  { %11395 = vmatprep.subr.bf16.mxu0 %v14728_v20  ;;  %v14765_v25 = vld [vmem:[#allocation4 + $0x938] ss:$20 sps:$4 sm:$0xff]   ;;  %v14768_v20 = vld [vmem:[#allocation4 + $0x300] ss:$20 sps:$4 sm:$0xff]  }
 0xa86   :  { %11339 = vmatpush1.bf16.msra.mxu1 %v14723_v51  ;;  %v14773_v51 = vld [vmem:[#allocation4 + $0x914] ss:$20 sps:$4 sm:$0xff]  }
 0xa87   :  { %11396 = vmatpush2.bf16.msra.mxu0 %v14726_v58  ;;  %11340 = vmatprep.subr.bf16.mxu1 %v14731_v22  ;;  %v14776_v58 = vld [vmem:[#allocation4 + $0x2dc] ss:$20 sps:$4 sm:$0xff]  }
 0xa88   :  { %11397 = vmatprep.subr.bf16.mxu0 %v14734_v45  ;;  %v14771_v22 = vld [vmem:[#allocation4 + $0x910] ss:$20 sps:$4 sm:$0xff]   ;;  %v14774_v45 = vld [vmem:[#allocation4 + $0x2d8] ss:$20 sps:$4 sm:$0xff]  }
 0xa8a   :  { %11341 = vmatpush1.bf16.msra.mxu1 %v14729_v38  ;;  %v14779_v38 = vld [vmem:[#allocation4 + $0x8ec] ss:$20 sps:$4 sm:$0xff]  }
 0xa8b   :  { %11398 = vmatpush2.bf16.msra.mxu0 %v14732_v11  ;;  %11342 = vmatprep.subr.bf16.mxu1 %v14737_v56  ;;  %v14782_v11 = vld [vmem:[#allocation4 + $0x2b4] ss:$20 sps:$4 sm:$0xff]  }
 0xa8c   :  { %11399 = vmatprep.subr.bf16.mxu0 %v14740_v37  ;;  %v14777_v56 = vld [vmem:[#allocation4 + $0x8e8] ss:$20 sps:$4 sm:$0xff]   ;;  %v14780_v37 = vld [vmem:[#allocation4 + $0x2b0] ss:$20 sps:$4 sm:$0xff]  }
 0xa8e   :  { %11343 = vmatpush1.bf16.msra.mxu1 %v14735_v41  ;;  %v14785_v41 = vld [vmem:[#allocation4 + $0x8c4] ss:$20 sps:$4 sm:$0xff]  }
 0xa8f   :  { %11400 = vmatpush2.bf16.msra.mxu0 %v14738_v35  ;;  %11344 = vmatprep.subr.bf16.mxu1 %v14743_v18  ;;  %v14788_v35 = vld [vmem:[#allocation4 + $0x28c] ss:$20 sps:$4 sm:$0xff]  }
 0xa90   :  { %11451 = vmatprep.subr.bf16.mxu0 %v14746_v49  ;;  %v14783_v18 = vld [vmem:[#allocation4 + $0x8c0] ss:$20 sps:$4 sm:$0xff]   ;;  %v14786_v49 = vld [vmem:[#allocation4 + $0x288] ss:$20 sps:$4 sm:$0xff]  }
 0xa92   :  { %v13456_v28 = vpop.f32.mrf.mxu0  ;;  %11345 = vmatpush2.bf16.msra.mxu1 %v14741_v59  ;;  %11402 = vmatmul.mubr.bf16.vlgmr.msra.gmra.mxu0 %v18844_v52  ;;  %v14791_v59 = vld [vmem:[#allocation4 + $0x124] ss:$20 sps:$4 sm:$0xff]  }
 0xa93   :  { %11452 = vmatpush1.bf16.msra.mxu0 %v14744_v36  ;;  %11346 = vmatprep.subr.bf16.mxu1 %v14749_v61  ;;  %v7225_v36 = vrot.slane %v18976_v54, %v4257_v10  ;;  %v14794_v61 = vld [vmem:[#allocation4 + $0x4e4] ss:$20 sps:$4 sm:$0xff]  }
 0xa94   :  { %v13457_v21 = vpop.f32.mrf.mxu0  ;;  %11453 = vmatprep.subr.bf16.mxu0 %v14752_v50  ;;  %11483 = vmatprep.mubr.bf16.mxu0 %v18761_v60  ;;  %v7229_v50 = vrot.slane %v18976_v54, %v4261_v46 }
 0xa95   :  { %v19025_v8 = vadd.f32 %v13457_v21, %v13456_v28  ;;  %v14789_v28 = vld [vmem:[#allocation4 + $0x120] ss:$20 sps:$4 sm:$0xff]   ;;  %v14800_v21 = vld [vmem:[#allocation4 + $0x4bc] ss:$20 sps:$4 sm:$0xff]  }
 0xa96   :  { %v13459_v2 = vpop.f32.mrf.mxu0  ;;  %11347 = vmatpush2.bf16.msra.mxu1 %v14747_v13  ;;  %v14792_v13 = vld [vmem:[#allocation4 + $0x4e0] ss:$20 sps:$4 sm:$0xff]   ;;  %v8439_v10 = vadd.f32 %v19008_v40, %v7229_v50  ;;  %v14834_v50 = vld [vmem:[#allocation4 + $0x3c8] ss:$20 sps:$4 sm:$0xff]  }
 0xa97   :  { %11454 = vmatpush1.bf16.msra.mxu0 %v14750_v32  ;;  %11348 = vmatprep.subr.bf16.mxu1 %v14755_v43  ;;  %v14797_v32 = vld [vmem:[#allocation4 + $0xfc] ss:$20 sps:$4 sm:$0xff]   ;;  %v8437_v43 = vadd.f32 %v19005_v29, %v7225_v36  ;;  %v14806_v29 = vld [vmem:[#allocation4 + $0x494] ss:$20 sps:$4 sm:$0xff]   ;;  %v14836_v36 = vld [vmem:[#allocation4 + $0x3cc] ss:$20 sps:$4 sm:$0xff]  }
 0xa98   :  { %v13460_v14 = vpop.f32.mrf.mxu0  ;;  %11455 = vmatprep.subr.bf16.mxu0 %v14758_v16 }
 0xa9a   :  { %11349 = vmatpush2.bf16.msra.mxu1 %v14753_v48  ;;  %v14795_v48 = vld [vmem:[#allocation4 + $0xf8] ss:$20 sps:$4 sm:$0xff]  }
 0xa9b   :  { %11456 = vmatpush1.bf16.msra.mxu0 %v14756_v24  ;;  %11350 = vmatprep.subr.bf16.mxu1 %v14761_v5  ;;  %v14798_v24 = vld [vmem:[#allocation4 + $0x4b8] ss:$20 sps:$4 sm:$0xff]   ;;  %v14803_v5 = vld [vmem:[#allocation4 + $0xd4] ss:$20 sps:$4 sm:$0xff]  }
 0xa9c   :  { %11457 = vmatprep.subr.bf16.mxu0 %v14764_v19 }
 0xa9e   :  { %11351 = vmatpush2.bf16.msra.mxu1 %v14759_v30 }
 0xa9f   :  { %11458 = vmatpush1.bf16.msra.mxu0 %v14762_v26  ;;  %11352 = vmatprep.subr.bf16.mxu1 %v14767_v12  ;;  %v14801_v26 = vld [vmem:[#allocation4 + $0xd0] ss:$20 sps:$4 sm:$0xff]  }
 0xaa0   :  { %11459 = vmatprep.subr.bf16.mxu0 %v14770_v6  ;;  %v14804_v6 = vld [vmem:[#allocation4 + $0x490] ss:$20 sps:$4 sm:$0xff]  }
 0xaa2   :  { %11353 = vmatpush2.bf16.msra.mxu1 %v14765_v25  ;;  %v14809_v25 = vld [vmem:[#allocation4 + $0xac] ss:$20 sps:$4 sm:$0xff]  }
 0xaa3   :  { %11460 = vmatpush1.bf16.msra.mxu0 %v14768_v20  ;;  %11354 = vmatprep.subr.bf16.mxu1 %v14773_v51  ;;  %v14812_v20 = vld [vmem:[#allocation4 + $0x46c] ss:$20 sps:$4 sm:$0xff]   ;;  %v14807_v51 = vld [vmem:[#allocation4 + $0xa8] ss:$20 sps:$4 sm:$0xff]  }
 0xaa4   :  { %11461 = vmatprep.subr.bf16.mxu0 %v14776_v58  ;;  %v14810_v58 = vld [vmem:[#allocation4 + $0x468] ss:$20 sps:$4 sm:$0xff]  }
 0xaa6   :  { %11355 = vmatpush2.bf16.msra.mxu1 %v14771_v22  ;;  %v14818_v22 = vld [vmem:[#allocation4 + $0x444] ss:$20 sps:$4 sm:$0xff]  }
 0xaa7   :  { %11462 = vmatpush1.bf16.msra.mxu0 %v14774_v45  ;;  %11356 = vmatprep.subr.bf16.mxu1 %v14779_v38  ;;  %v14813_v45 = vld [vmem:[#allocation4 + $0x80] ss:$20 sps:$4 sm:$0xff]   ;;  %v14821_v38 = vld [vmem:[#allocation4 + $0x5c] ss:$20 sps:$4 sm:$0xff]  }
 0xaa8   :  { %11463 = vmatprep.subr.bf16.mxu0 %v14782_v11  ;;  %v14824_v11 = vld [vmem:[#allocation4 + $0x41c] ss:$20 sps:$4 sm:$0xff]  }
 0xaaa   :  { %11357 = vmatpush2.bf16.msra.mxu1 %v14777_v56  ;;  %v14819_v56 = vld [vmem:[#allocation4 + $0x58] ss:$20 sps:$4 sm:$0xff]  }
 0xaab   :  { %11464 = vmatpush1.bf16.msra.mxu0 %v14780_v37  ;;  %11358 = vmatprep.subr.bf16.mxu1 %v14785_v41  ;;  %v14822_v37 = vld [vmem:[#allocation4 + $0x418] ss:$20 sps:$4 sm:$0xff]   ;;  %v14827_v41 = vld [vmem:[#allocation4 + $0x34] ss:$20 sps:$4 sm:$0xff]  }
 0xaac   :  { %11465 = vmatprep.subr.bf16.mxu0 %v14788_v35  ;;  %v14830_v35 = vld [vmem:[#allocation4 + $0x3f4] ss:$20 sps:$4 sm:$0xff]  }
 0xaae   :  { %11359 = vmatpush2.bf16.msra.mxu1 %v14783_v18  ;;  %v14825_v18 = vld [vmem:[#allocation4 + $0x30] ss:$20 sps:$4 sm:$0xff]  }
 0xaaf   :  { %11466 = vmatpush1.bf16.msra.mxu0 %v14786_v49  ;;  %11410 = vmatprep.subr.bf16.mxu1 %v14791_v59  ;;  %v14828_v49 = vld [vmem:[#allocation4 + $0x3f0] ss:$20 sps:$4 sm:$0xff]   ;;  %v14833_v59 = vld [vmem:[#allocation4 + $0xc] ss:$20 sps:$4 sm:$0xff]  }
 0xab0   :  { %11467 = vmatprep.subr.bf16.mxu0 %v14794_v61  ;;  %v14831_v61 = vld [vmem:[#allocation4 + $0x8] ss:$20 sps:$4 sm:$0xff]  }
 0xab1   :  { %v8477_v16 = vpop.f32.mrf.mxu1  ;;  %11361 = vmatmul.mubr.bf16.vlgmr.msra.gmra.mxu1 %v18820_v62 }
 0xab2   :  { %v8478_v2 = vadd.f32 %v8477_v16, %v8437_v43  ;;  %11411 = vmatpush1.bf16.msra.mxu1 %v14789_v28  ;;  %11442 = vmatprep.mubr.bf16.mxu1 %v18759_v17  ;;  %v14839_v28 = vld [vmem:[#allocation4 + $0x264] ss:$20 sps:$4 sm:$0xff]   ;;  %v14840_v43 = vld [vmem:[#allocation4 + $0x8a0] ss:$20 sps:$4 sm:$0xff]   ;;  %v14848_v16 = vld [vmem:[#allocation4 + $0x87c] ss:$20 sps:$4 sm:$0xff]  }
 0xab3   :  { %v8479_v46 = vpop.f32.mrf.mxu1  ;;  %11468 = vmatpush2.bf16.msra.mxu0 %v14792_v13  ;;  %11412 = vmatprep.subr.bf16.mxu1 %v14797_v32  ;;  %v14842_v13 = vld [vmem:[#allocation4 + $0x8a4] ss:$20 sps:$4 sm:$0xff]   ;;  %v14837_v32 = vld [vmem:[#allocation4 + $0x260] ss:$20 sps:$4 sm:$0xff]  }
 0xab4   :  { %v8480_v14 = vadd.f32 %v8479_v46, %v8439_v10  ;;  %11469 = vmatprep.subr.bf16.mxu0 %v14800_v21  ;;  %v19038_v19 = vadd.f32 %v19015_v47, %v8478_v2  ;;  %v14815_v47 = vld [vmem:[#allocation4 + $0x84] ss:$20 sps:$4 sm:$0xff]   ;;  %v14845_v21 = vld [vmem:[#allocation4 + $0x23c] ss:$20 sps:$4 sm:$0xff]  }
 0xab5   :  { %v8481_v30 = vpop.f32.mrf.mxu1  ;;  %v14843_v46 = vld [vmem:[#allocation4 + $0x238] ss:$20 sps:$4 sm:$0xff]  }
 0xab6   :  { %11413 = vmatpush1.bf16.msra.mxu1 %v14795_v48  ;;  %v19041_v40 = vadd.f32 %v19021_v57, %v8480_v14  ;;  %v14816_v57 = vld [vmem:[#allocation4 + $0x440] ss:$20 sps:$4 sm:$0xff]   ;;  %v7233_v48 = vrot.slane %v18976_v54, %v4265_v4  ;;  %v14846_v14 = vld [vmem:[#allocation4 + $0x878] ss:$20 sps:$4 sm:$0xff]  }
 0xab7   :  { %v8482_v12 = vpop.f32.mrf.mxu1  ;;  %11470 = vmatpush2.bf16.msra.mxu0 %v14798_v24  ;;  %11414 = vmatprep.subr.bf16.mxu1 %v14803_v5 }
 0xab8   :  { %11471 = vmatprep.subr.bf16.mxu0 %v14806_v29  ;;  %v14851_v29 = vld [vmem:[#allocation4 + $0x214] ss:$20 sps:$4 sm:$0xff]  }
 0xab9   :  { %v14854_v12 = vld [vmem:[#allocation4 + $0x854] ss:$20 sps:$4 sm:$0xff]  }
 0xaba   :  { %11415 = vmatpush1.bf16.msra.mxu1 %v14801_v26 }
 0xabb   :  { %11472 = vmatpush2.bf16.msra.mxu0 %v14804_v6  ;;  %11416 = vmatprep.subr.bf16.mxu1 %v14809_v25  ;;  %v14849_v6 = vld [vmem:[#allocation4 + $0x210] ss:$20 sps:$4 sm:$0xff]  }
 0xabc   :  { %11473 = vmatprep.subr.bf16.mxu0 %v14812_v20  ;;  %v14852_v20 = vld [vmem:[#allocation4 + $0x850] ss:$20 sps:$4 sm:$0xff]  }
 0xabe   :  { %11417 = vmatpush1.bf16.msra.mxu1 %v14807_v51  ;;  %v14857_v51 = vld [vmem:[#allocation4 + $0x1ec] ss:$20 sps:$4 sm:$0xff]  }
 0xabf   :  { %11474 = vmatpush2.bf16.msra.mxu0 %v14810_v58  ;;  %11418 = vmatprep.subr.bf16.mxu1 %v14815_v47  ;;  %v14860_v58 = vld [vmem:[#allocation4 + $0x82c] ss:$20 sps:$4 sm:$0xff]  }
 0xac0   :  { %11475 = vmatprep.subr.bf16.mxu0 %v14818_v22 }
 0xac2   :  { %11419 = vmatpush1.bf16.msra.mxu1 %v14813_v45  ;;  %v14855_v45 = vld [vmem:[#allocation4 + $0x1e8] ss:$20 sps:$4 sm:$0xff]  }
 0xac3   :  { %11476 = vmatpush2.bf16.msra.mxu0 %v14816_v57  ;;  %11420 = vmatprep.subr.bf16.mxu1 %v14821_v38  ;;  %v14863_v57 = vld [vmem:[#allocation4 + $0x1c4] ss:$20 sps:$4 sm:$0xff]  }
 0xac4   :  { %11477 = vmatprep.subr.bf16.mxu0 %v14824_v11  ;;  %v14866_v38 = vld [vmem:[#allocation4 + $0x804] ss:$20 sps:$4 sm:$0xff]   ;;  %v14861_v11 = vld [vmem:[#allocation4 + $0x1c0] ss:$20 sps:$4 sm:$0xff]  }
 0xac6   :  { %11421 = vmatpush1.bf16.msra.mxu1 %v14819_v56  ;;  %v14864_v56 = vld [vmem:[#allocation4 + $0x800] ss:$20 sps:$4 sm:$0xff]  }
 0xac7   :  { %11478 = vmatpush2.bf16.msra.mxu0 %v14822_v37  ;;  %11422 = vmatprep.subr.bf16.mxu1 %v14827_v41  ;;  %v14869_v37 = vld [vmem:[#allocation4 + $0x19c] ss:$20 sps:$4 sm:$0xff]  }
 0xac8   :  { %11479 = vmatprep.subr.bf16.mxu0 %v14830_v35  ;;  %v14872_v41 = vld [vmem:[#allocation4 + $0x7dc] ss:$20 sps:$4 sm:$0xff]   ;;  %v14867_v35 = vld [vmem:[#allocation4 + $0x198] ss:$20 sps:$4 sm:$0xff]  }
 0xaca   :  { %11423 = vmatpush1.bf16.msra.mxu1 %v14825_v18  ;;  %v14875_v18 = vld [vmem:[#allocation4 + $0x174] ss:$20 sps:$4 sm:$0xff]  }
 0xacb   :  { %11480 = vmatpush2.bf16.msra.mxu0 %v14828_v49  ;;  %11424 = vmatprep.subr.bf16.mxu1 %v14833_v59  ;;  %v14878_v49 = vld [vmem:[#allocation4 + $0x7b4] ss:$20 sps:$4 sm:$0xff]   ;;  %v14873_v59 = vld [vmem:[#allocation4 + $0x170] ss:$20 sps:$4 sm:$0xff]  }
 0xacc   :  { %11481 = vmatprep.subr.bf16.mxu0 %v14836_v36  ;;  %v14876_v36 = vld [vmem:[#allocation4 + $0x7b0] ss:$20 sps:$4 sm:$0xff]  }
 0xace   :  { %11425 = vmatpush1.bf16.msra.mxu1 %v14831_v61  ;;  %v14881_v61 = vld [vmem:[#allocation4 + $0x14c] ss:$20 sps:$4 sm:$0xff]  }
 0xacf   :  { %11482 = vmatpush2.bf16.msra.mxu0 %v14834_v50  ;;  %11426 = vmatprep.subr.bf16.mxu1 %v14839_v28  ;;  %v14884_v50 = vld [vmem:[#allocation4 + $0x78c] ss:$20 sps:$4 sm:$0xff]   ;;  %v14879_v28 = vld [vmem:[#allocation4 + $0x148] ss:$20 sps:$4 sm:$0xff]  }
 0xad0   :  { %11533 = vmatprep.subr.bf16.mxu0 %v14842_v13  ;;  %v14882_v13 = vld [vmem:[#allocation4 + $0x788] ss:$20 sps:$4 sm:$0xff]  }
 0xad1   :  { %v13434_v10 = vpop.f32.mrf.mxu1 }
 0xad2   :  { %v11239_v2 = vpop.f32.mrf.mxu0  ;;  %11427 = vmatpush2.bf16.msra.mxu1 %v14837_v32  ;;  %11484 = vmatmul.mubr.bf16.vlgmr.msra.gmra.mxu0 %v18784_v0  ;;  %v14887_v32 = vld [vmem:[#allocation4 + $0x624] ss:$20 sps:$4 sm:$0xff]  }
 0xad3   :  { %v19048_v24 = vadd.f32 %v11239_v2, %v19013_v15  ;;  %v13435_v5 = vpop.f32.mrf.mxu1  ;;  %11534 = vmatpush1.bf16.msra.mxu0 %v14840_v43  ;;  %11428 = vmatprep.subr.bf16.mxu1 %v14845_v21  ;;  %v14890_v43 = vld [vmem:[#allocation4 + $0x9e4] ss:$20 sps:$4 sm:$0xff]   ;;  %v14885_v21 = vld [vmem:[#allocation4 + $0x620] ss:$20 sps:$4 sm:$0xff]   ;;  %v14896_v2 = vld [vmem:[#allocation4 + $0x9bc] ss:$20 sps:$4 sm:$0xff]  }
 0xad4   :  { %v13436_v30 = vadd.f32 %v13435_v5, %v13434_v10  ;;  %v11241_v26 = vpop.f32.mrf.mxu0  ;;  %11535 = vmatprep.subr.bf16.mxu0 %v14848_v16  ;;  %11565 = vmatprep.mubr.bf16.mxu0 %v18792_v27  ;;  %v14888_v16 = vld [vmem:[#allocation4 + $0x9e0] ss:$20 sps:$4 sm:$0xff]   ;;  %v14893_v10 = vld [vmem:[#allocation4 + $0x5fc] ss:$20 sps:$4 sm:$0xff]   ;;  %v14891_v5 = vld [vmem:[#allocation4 + $0x5f8] ss:$20 sps:$4 sm:$0xff]  }
 0xad5   :  { %v19052_v34 = vadd.f32 %v11241_v26, %v19019_v1  ;;  %v13437_v4 = vpop.f32.mrf.mxu1  ;;  %v14858_v1 = vld [vmem:[#allocation4 + $0x828] ss:$20 sps:$4 sm:$0xff]  }
 0xad6   :  { %v8560_v54 = vadd.f32 %v13436_v30, %v7233_v48  ;;  %11429 = vmatpush2.bf16.msra.mxu1 %v14843_v46  ;;  %v11243_v15 = vpop.f32.mrf.mxu0  ;;  %v14899_v30 = vld [vmem:[#allocation4 + $0x5d4] ss:$20 sps:$4 sm:$0xff]  }
 0xad7   :  { %v13438_v25 = vpop.f32.mrf.mxu1  ;;  %11536 = vmatpush1.bf16.msra.mxu0 %v14846_v14  ;;  %11430 = vmatprep.subr.bf16.mxu1 %v14851_v29  ;;  %v14894_v29 = vld [vmem:[#allocation4 + $0x9b8] ss:$20 sps:$4 sm:$0xff]   ;;  %v14902_v26 = vld [vmem:[#allocation4 + $0x994] ss:$20 sps:$4 sm:$0xff]  }
 0xad8   :  { %11537 = vmatprep.subr.bf16.mxu0 %v14854_v12  ;;  %v8600_v47 = vadd.f32 %v19025_v8, %v8560_v54  ;;  %v11244_v22 = vpop.f32.mrf.mxu0  ;;  %v14870_v8 = vld [vmem:[#allocation4 + $0x7d8] ss:$20 sps:$4 sm:$0xff]   ;;  %v15103_v12 = vld [vmem:[#allocation10] sm:$0xff] }
 0xad9   :  { %v19060_v4 = vsub.f32 %v15103_v12, %v18650_v31  ;;  %v14900_v25 = vld [vmem:[#allocation4 + $0x990] ss:$20 sps:$4 sm:$0xff]   ;;  %v14903_v31 = vld [vmem:[#allocation4 + $0x5a8] ss:$20 sps:$4 sm:$0xff]   ;;  %v14950_v12 = vld [vmem:[#allocation4 + $0x6ec] ss:$20 sps:$4 sm:$0xff]  }
 0xada   :  { %11431 = vmatpush2.bf16.msra.mxu1 %v14849_v6  ;;  %v14897_v6 = vld [vmem:[#allocation4 + $0x5d0] ss:$20 sps:$4 sm:$0xff]   ;;  %v14906_v22 = vld [vmem:[#allocation4 + $0x968] ss:$20 sps:$4 sm:$0xff]  }
 0xadb   :  { %11538 = vmatpush1.bf16.msra.mxu0 %v14852_v20  ;;  %11432 = vmatprep.subr.bf16.mxu1 %v14857_v51  ;;  %11909 = vst [vmem:[#allocation8] sm:$0xff] %v19060_v4  ;;  %v14905_v20 = vld [vmem:[#allocation4 + $0x5ac] ss:$20 sps:$4 sm:$0xff]   ;;  %v15104_v51 = vld [vmem:[#allocation10 + $0x8] sm:$0xff] }
 0xadc   :  { %11539 = vmatprep.subr.bf16.mxu0 %v14860_v58  ;;  %v19064_v58 = vsub.f32 %v15104_v51, %v18658_v55  ;;  %v14920_v55 = vld [vmem:[#allocation4 + $0x91c] ss:$20 sps:$4 sm:$0xff]   ;;  %v14953_v51 = vld [vmem:[#allocation4 + $0x6c0] ss:$20 sps:$4 sm:$0xff]  }
 0xade   :  { %11433 = vmatpush2.bf16.msra.mxu1 %v14855_v45  ;;  %11910 = vst [vmem:[#allocation8 + $0x8] sm:$0xff] %v19064_v58  ;;  %v14911_v45 = vld [vmem:[#allocation4 + $0x584] ss:$20 sps:$4 sm:$0xff]  }
 0xadf   :  { %11540 = vmatpush1.bf16.msra.mxu0 %v14858_v1  ;;  %11434 = vmatprep.subr.bf16.mxu1 %v14863_v57  ;;  %v14914_v1 = vld [vmem:[#allocation4 + $0x944] ss:$20 sps:$4 sm:$0xff]   ;;  %v14909_v57 = vld [vmem:[#allocation4 + $0x580] ss:$20 sps:$4 sm:$0xff]  }
 0xae0   :  { %11541 = vmatprep.subr.bf16.mxu0 %v14866_v38  ;;  %v14912_v38 = vld [vmem:[#allocation4 + $0x940] ss:$20 sps:$4 sm:$0xff]  }
 0xae2   :  { %11435 = vmatpush2.bf16.msra.mxu1 %v14861_v11  ;;  %v14917_v11 = vld [vmem:[#allocation4 + $0x55c] ss:$20 sps:$4 sm:$0xff]  }
 0xae3   :  { %11542 = vmatpush1.bf16.msra.mxu0 %v14864_v56  ;;  %11436 = vmatprep.subr.bf16.mxu1 %v14869_v37  ;;  %v14915_v56 = vld [vmem:[#allocation4 + $0x558] ss:$20 sps:$4 sm:$0xff]  }
 0xae4   :  { %11543 = vmatprep.subr.bf16.mxu0 %v14872_v41  ;;  %v14918_v37 = vld [vmem:[#allocation4 + $0x918] ss:$20 sps:$4 sm:$0xff]   ;;  %v14923_v41 = vld [vmem:[#allocation4 + $0x534] ss:$20 sps:$4 sm:$0xff]  }
 0xae6   :  { %11437 = vmatpush2.bf16.msra.mxu1 %v14867_v35  ;;  %v14926_v35 = vld [vmem:[#allocation4 + $0x8f4] ss:$20 sps:$4 sm:$0xff]  }
 0xae7   :  { %11544 = vmatpush1.bf16.msra.mxu0 %v14870_v8  ;;  %11438 = vmatprep.subr.bf16.mxu1 %v14875_v18  ;;  %v14921_v8 = vld [vmem:[#allocation4 + $0x530] ss:$20 sps:$4 sm:$0xff]  }
 0xae8   :  { %11545 = vmatprep.subr.bf16.mxu0 %v14878_v49  ;;  %v14924_v18 = vld [vmem:[#allocation4 + $0x8f0] ss:$20 sps:$4 sm:$0xff]   ;;  %v14929_v49 = vld [vmem:[#allocation4 + $0x50c] ss:$20 sps:$4 sm:$0xff]  }
 0xaea   :  { %11439 = vmatpush2.bf16.msra.mxu1 %v14873_v59  ;;  %v14932_v59 = vld [vmem:[#allocation4 + $0x8cc] ss:$20 sps:$4 sm:$0xff]  }
 0xaeb   :  { %11546 = vmatpush1.bf16.msra.mxu0 %v14876_v36  ;;  %11440 = vmatprep.subr.bf16.mxu1 %v14881_v61  ;;  %v14927_v36 = vld [vmem:[#allocation4 + $0x508] ss:$20 sps:$4 sm:$0xff]  }
 0xaec   :  { %11547 = vmatprep.subr.bf16.mxu0 %v14884_v50  ;;  %v14930_v61 = vld [vmem:[#allocation4 + $0x8c8] ss:$20 sps:$4 sm:$0xff]   ;;  %v14935_v50 = vld [vmem:[#allocation4 + $0x764] ss:$20 sps:$4 sm:$0xff]  }
 0xaee   :  { %11441 = vmatpush2.bf16.msra.mxu1 %v14879_v28  ;;  %v14936_v28 = vld [vmem:[#allocation4 + $0x268] ss:$20 sps:$4 sm:$0xff]  }
 0xaef   :  { %11548 = vmatpush1.bf16.msra.mxu0 %v14882_v13  ;;  %11492 = vmatprep.subr.bf16.mxu1 %v14887_v32  ;;  %v14933_v13 = vld [vmem:[#allocation4 + $0x760] ss:$20 sps:$4 sm:$0xff]   ;;  %v14937_v32 = vld [vmem:[#allocation4 + $0x128] ss:$20 sps:$4 sm:$0xff]  }
 0xaf0   :  { %11549 = vmatprep.subr.bf16.mxu0 %v14890_v43  ;;  %v14940_v43 = vld [vmem:[#allocation4 + $0x73c] ss:$20 sps:$4 sm:$0xff]  }
 0xaf1   :  { %v8639_v48 = vpop.f32.mrf.mxu1  ;;  %11443 = vmatmul.mubr.bf16.vlgmr.msra.gmra.mxu1 %v18780_v63 }
 0xaf2   :  { %v19056_v46 = vadd.f32 %v8639_v48, %v8600_v47  ;;  %11493 = vmatpush1.bf16.msra.mxu1 %v14885_v21  ;;  %11524 = vmatprep.mubr.bf16.mxu1 %v18788_v9  ;;  %v14908_v47 = vld [vmem:[#allocation4 + $0x96c] ss:$20 sps:$4 sm:$0xff]   ;;  %v14945_v48 = vld [vmem:[#allocation4 + $0x714] ss:$20 sps:$4 sm:$0xff]  }
 0xaf3   :  { %v13609_v14 = vpop.f32.mrf.mxu1  ;;  %11550 = vmatpush2.bf16.msra.mxu0 %v14888_v16  ;;  %11494 = vmatprep.subr.bf16.mxu1 %v14893_v10  ;;  %v14941_v21 = vld [vmem:[#allocation4 + $0x240] ss:$20 sps:$4 sm:$0xff]   ;;  %v14938_v16 = vld [vmem:[#allocation4 + $0x738] ss:$20 sps:$4 sm:$0xff]  }
 0xaf4   :  { %11551 = vmatprep.subr.bf16.mxu0 %v14896_v2  ;;  %v14942_v2 = vld [vmem:[#allocation4 + $0x100] ss:$20 sps:$4 sm:$0xff]  }
 0xaf5   :  { %v8642_v54 = vpop.f32.mrf.mxu1 }
 0xaf6   :  { %11495 = vmatpush1.bf16.msra.mxu1 %v14891_v5  ;;  %v14946_v5 = vld [vmem:[#allocation4 + $0x218] ss:$20 sps:$4 sm:$0xff]   ;;  %v14951_v54 = vld [vmem:[#allocation4 + $0x1f0] ss:$20 sps:$4 sm:$0xff]  }
 0xaf7   :  { %v13610_v15 = vpop.f32.mrf.mxu1  ;;  %11552 = vmatpush2.bf16.msra.mxu0 %v14894_v29  ;;  %11496 = vmatprep.subr.bf16.mxu1 %v14899_v30  ;;  %v14943_v29 = vld [vmem:[#allocation4 + $0x710] ss:$20 sps:$4 sm:$0xff]  }
 0xaf8   :  { %11553 = vmatprep.subr.bf16.mxu0 %v14902_v26  ;;  %v14947_v26 = vld [vmem:[#allocation4 + $0xd8] ss:$20 sps:$4 sm:$0xff]   ;;  %v14948_v15 = vld [vmem:[#allocation4 + $0x6e8] ss:$20 sps:$4 sm:$0xff]  }
 0xafa   :  { %11497 = vmatpush1.bf16.msra.mxu1 %v14897_v6 }
 0xafb   :  { %11554 = vmatpush2.bf16.msra.mxu0 %v14900_v25  ;;  %11498 = vmatprep.subr.bf16.mxu1 %v14905_v20  ;;  %v14952_v25 = vld [vmem:[#allocation4 + $0xb0] ss:$20 sps:$4 sm:$0xff]  }
 0xafc   :  { %11555 = vmatprep.subr.bf16.mxu0 %v14908_v47  ;;  %v14955_v20 = vld [vmem:[#allocation4 + $0x6c4] ss:$20 sps:$4 sm:$0xff]   ;;  %v14957_v47 = vld [vmem:[#allocation4 + $0x88] ss:$20 sps:$4 sm:$0xff]  }
 0xafe   :  { %11499 = vmatpush1.bf16.msra.mxu1 %v14903_v31  ;;  %v14960_v31 = vld [vmem:[#allocation4 + $0x69c] ss:$20 sps:$4 sm:$0xff]  }
 0xaff   :  { %11556 = vmatpush2.bf16.msra.mxu0 %v14906_v22  ;;  %11500 = vmatprep.subr.bf16.mxu1 %v14911_v45  ;;  %v14961_v22 = vld [vmem:[#allocation4 + $0x1a0] ss:$20 sps:$4 sm:$0xff]   ;;  %v14958_v45 = vld [vmem:[#allocation4 + $0x698] ss:$20 sps:$4 sm:$0xff]  }
 0xb00   :  { %11557 = vmatprep.subr.bf16.mxu0 %v14914_v1  ;;  %v14962_v1 = vld [vmem:[#allocation4 + $0x60] ss:$20 sps:$4 sm:$0xff]  }
 0xb02   :  { %11501 = vmatpush1.bf16.msra.mxu1 %v14909_v57  ;;  %v14965_v57 = vld [vmem:[#allocation4 + $0x674] ss:$20 sps:$4 sm:$0xff]  }
 0xb03   :  { %11558 = vmatpush2.bf16.msra.mxu0 %v14912_v38  ;;  %11502 = vmatprep.subr.bf16.mxu1 %v14917_v11  ;;  %v14966_v38 = vld [vmem:[#allocation4 + $0x178] ss:$20 sps:$4 sm:$0xff]   ;;  %v14963_v11 = vld [vmem:[#allocation4 + $0x670] ss:$20 sps:$4 sm:$0xff]  }
 0xb04   :  { %11559 = vmatprep.subr.bf16.mxu0 %v14920_v55  ;;  %v14967_v55 = vld [vmem:[#allocation4 + $0x38] ss:$20 sps:$4 sm:$0xff]  }
 0xb06   :  { %11503 = vmatpush1.bf16.msra.mxu1 %v14915_v56  ;;  %v14970_v56 = vld [vmem:[#allocation4 + $0x64c] ss:$20 sps:$4 sm:$0xff]  }
 0xb07   :  { %11560 = vmatpush2.bf16.msra.mxu0 %v14918_v37  ;;  %11504 = vmatprep.subr.bf16.mxu1 %v14923_v41  ;;  %v14971_v37 = vld [vmem:[#allocation4 + $0x150] ss:$20 sps:$4 sm:$0xff]   ;;  %v14968_v41 = vld [vmem:[#allocation4 + $0x648] ss:$20 sps:$4 sm:$0xff]  }
 0xb08   :  { %11561 = vmatprep.subr.bf16.mxu0 %v14926_v35  ;;  %v14972_v35 = vld [vmem:[#allocation4 + $0x10] ss:$20 sps:$4 sm:$0xff]  }
 0xb0a   :  { %11505 = vmatpush1.bf16.msra.mxu1 %v14921_v8  ;;  %v14975_v8 = vld [vmem:[#allocation4 + $0xb24] ss:$20 sps:$4 sm:$0xff]  }
 0xb0b   :  { %11562 = vmatpush2.bf16.msra.mxu0 %v14924_v18  ;;  %11506 = vmatprep.subr.bf16.mxu1 %v14929_v49  ;;  %v15021_v18 = vld [vmem:[#allocation4 + $0x768] ss:$20 sps:$4 sm:$0xff]   ;;  %v14973_v49 = vld [vmem:[#allocation4 + $0xb20] ss:$20 sps:$4 sm:$0xff]  }
 0xb0c   :  { %11563 = vmatprep.subr.bf16.mxu0 %v14932_v59  ;;  %v14978_v59 = vld [vmem:[#allocation4 + $0xafc] ss:$20 sps:$4 sm:$0xff]  }
 0xb0e   :  { %11507 = vmatpush1.bf16.msra.mxu1 %v14927_v36  ;;  %v15022_v36 = vld [vmem:[#allocation4 + $0x628] ss:$20 sps:$4 sm:$0xff]  }
 0xb0f   :  { %11564 = vmatpush2.bf16.msra.mxu0 %v14930_v61  ;;  %11508 = vmatprep.subr.bf16.mxu1 %v14935_v50  ;;  %v15024_v61 = vld [vmem:[#allocation4 + $0x740] ss:$20 sps:$4 sm:$0xff]  }
 0xb10   :  { %13471 = vmatprep.subr.bf16.mxu0 %v14936_v28 }
 0xb12   :  { %11509 = vmatpush2.bf16.msra.mxu1 %v14933_v13  ;;  %11566 = vmatmul.mubr.bf16.vlgmr.msra.gmra.mxu0 %v18820_v62  ;;  %v19068_v10 = vpop.f32.mrf.mxu0  ;;  %v14976_v13 = vld [vmem:[#allocation4 + $0xaf8] ss:$20 sps:$4 sm:$0xff]  }
 0xb13   :  { %13472 = vmatpush3.bf16.msra.mxu0 %v14937_v32  ;;  %11510 = vmatprep.subr.bf16.mxu1 %v14940_v43  ;;  %v14981_v43 = vld [vmem:[#allocation4 + $0xad4] ss:$20 sps:$4 sm:$0xff]  }
 0xb14   :  { %13473 = vmatprep.subr.bf16.mxu0 %v14941_v21  ;;  %11647 = vmatprep.mubr.bf16.mxu0 %v18759_v17  ;;  %v19071_v14 = vpop.f32.mrf.mxu0  ;;  %v14956_v17 = vld [vmem:[#allocation4 + $0x1c8] ss:$20 sps:$4 sm:$0xff]   ;;  %v15026_v21 = vld [vmem:[#allocation4 + $0x600] ss:$20 sps:$4 sm:$0xff]  }
 0xb16   :  { %11511 = vmatpush2.bf16.msra.mxu1 %v14938_v16  ;;  %v11325_v30 = vpop.f32.mrf.mxu0 }
 0xb17   :  { %13474 = vmatpush3.bf16.msra.mxu0 %v14942_v2  ;;  %11512 = vmatprep.subr.bf16.mxu1 %v14945_v48  ;;  %v15028_v48 = vld [vmem:[#allocation4 + $0x718] ss:$20 sps:$4 sm:$0xff]  }
 0xb18   :  { %13475 = vmatprep.subr.bf16.mxu0 %v14946_v5  ;;  %v11326_v6 = vpop.f32.mrf.mxu0  ;;  %v14984_v30 = vld [vmem:[#allocation4 + $0xaac] ss:$20 sps:$4 sm:$0xff]  }
 0xb19   :  { %v14990_v6 = vld [vmem:[#allocation4 + $0xa5c] ss:$20 sps:$4 sm:$0xff]  }
 0xb1a   :  { %11513 = vmatpush2.bf16.msra.mxu1 %v14943_v29 }
 0xb1b   :  { %13476 = vmatpush3.bf16.msra.mxu0 %v14947_v26  ;;  %11514 = vmatprep.subr.bf16.mxu1 %v14950_v12  ;;  %v14982_v26 = vld [vmem:[#allocation4 + $0xaa8] ss:$20 sps:$4 sm:$0xff]   ;;  %v14987_v12 = vld [vmem:[#allocation4 + $0xa84] ss:$20 sps:$4 sm:$0xff]  }
 0xb1c   :  { %13477 = vmatprep.subr.bf16.mxu0 %v14951_v54  ;;  %v15034_v54 = vld [vmem:[#allocation4 + $0x5b0] ss:$20 sps:$4 sm:$0xff]  }
 0xb1e   :  { %11515 = vmatpush2.bf16.msra.mxu1 %v14948_v15  ;;  %v15038_v15 = vld [vmem:[#allocation4 + $0x588] ss:$20 sps:$4 sm:$0xff]  }
 0xb1f   :  { %13478 = vmatpush3.bf16.msra.mxu0 %v14952_v25  ;;  %11516 = vmatprep.subr.bf16.mxu1 %v14955_v20  ;;  %v15040_v25 = vld [vmem:[#allocation4 + $0x6a0] ss:$20 sps:$4 sm:$0xff]   ;;  %v14988_v20 = vld [vmem:[#allocation4 + $0xa58] ss:$20 sps:$4 sm:$0xff]  }
 0xb20   :  { %13479 = vmatprep.subr.bf16.mxu0 %v14956_v17  ;;  %v14993_v17 = vld [vmem:[#allocation4 + $0xa34] ss:$20 sps:$4 sm:$0xff]  }
 0xb22   :  { %11517 = vmatpush2.bf16.msra.mxu1 %v14953_v51  ;;  %v15042_v51 = vld [vmem:[#allocation4 + $0x560] ss:$20 sps:$4 sm:$0xff]  }
 0xb23   :  { %13480 = vmatpush3.bf16.msra.mxu0 %v14957_v47  ;;  %11518 = vmatprep.subr.bf16.mxu1 %v14960_v31  ;;  %v15044_v47 = vld [vmem:[#allocation4 + $0x678] ss:$20 sps:$4 sm:$0xff]   ;;  %v14991_v31 = vld [vmem:[#allocation4 + $0xa30] ss:$20 sps:$4 sm:$0xff]  }
 0xb24   :  { %13481 = vmatprep.subr.bf16.mxu0 %v14961_v22  ;;  %v14996_v22 = vld [vmem:[#allocation4 + $0xa0c] ss:$20 sps:$4 sm:$0xff]  }
 0xb26   :  { %11519 = vmatpush2.bf16.msra.mxu1 %v14958_v45  ;;  %v15046_v45 = vld [vmem:[#allocation4 + $0x538] ss:$20 sps:$4 sm:$0xff]  }
 0xb27   :  { %13482 = vmatpush3.bf16.msra.mxu0 %v14962_v1  ;;  %11520 = vmatprep.subr.bf16.mxu1 %v14965_v57  ;;  %v15048_v1 = vld [vmem:[#allocation4 + $0x650] ss:$20 sps:$4 sm:$0xff]   ;;  %v14994_v57 = vld [vmem:[#allocation4 + $0xa08] ss:$20 sps:$4 sm:$0xff]  }
 0xb28   :  { %13483 = vmatprep.subr.bf16.mxu0 %v14966_v38  ;;  %v14999_v38 = vld [vmem:[#allocation4 + $0xc64] ss:$20 sps:$4 sm:$0xff]  }
 0xb2a   :  { %11521 = vmatpush2.bf16.msra.mxu1 %v14963_v11  ;;  %v15050_v11 = vld [vmem:[#allocation4 + $0x510] ss:$20 sps:$4 sm:$0xff]  }
 0xb2b   :  { %13484 = vmatpush3.bf16.msra.mxu0 %v14967_v55  ;;  %11522 = vmatprep.subr.bf16.mxu1 %v14970_v56  ;;  %v15052_v55 = vld [vmem:[#allocation4 + $0xc68] ss:$20 sps:$4 sm:$0xff]   ;;  %v14997_v56 = vld [vmem:[#allocation4 + $0xc60] ss:$20 sps:$4 sm:$0xff]  }
 0xb2c   :  { %13485 = vmatprep.subr.bf16.mxu0 %v14971_v37  ;;  %v15002_v37 = vld [vmem:[#allocation4 + $0xc3c] ss:$20 sps:$4 sm:$0xff]  }
 0xb2e   :  { %11523 = vmatpush2.bf16.msra.mxu1 %v14968_v41  ;;  %v15054_v41 = vld [vmem:[#allocation4 + $0xb28] ss:$20 sps:$4 sm:$0xff]  }
 0xb2f   :  { %13486 = vmatpush3.bf16.msra.mxu0 %v14972_v35  ;;  %11574 = vmatprep.subr.bf16.mxu1 %v14975_v8  ;;  %v15056_v35 = vld [vmem:[#allocation4 + $0xc40] ss:$20 sps:$4 sm:$0xff]   ;;  %v15000_v8 = vld [vmem:[#allocation4 + $0xc38] ss:$20 sps:$4 sm:$0xff]  }
 0xb30   :  { %13515 = vmatprep.subr.bf16.mxu0 %v15021_v18 }
 0xb31   :  { %v11280_v50 = vpop.f32.mrf.mxu1  ;;  %11525 = vmatmul.mubr.bf16.vlgmr.msra.gmra.mxu1 %v18816_v53 }
 0xb32   :  { %v11281_v28 = vadd.f32 %v11280_v50, %v19048_v24  ;;  %11575 = vmatpush1.bf16.msra.mxu1 %v14973_v49  ;;  %11648 = vmatmul.mubr.bf16.vlgmr.msra.gmra.mxu0 %v18780_v63  ;;  %v14979_v24 = vld [vmem:[#allocation4 + $0xad0] ss:$20 sps:$4 sm:$0xff]   ;;  %v15005_v49 = vld [vmem:[#allocation4 + $0xc14] ss:$20 sps:$4 sm:$0xff]  }
 0xb33   :  { %v11282_v32 = vpop.f32.mrf.mxu1  ;;  %11576 = vmatprep.subr.bf16.mxu1 %v14978_v59  ;;  %13516 = vmatpush3.bf16.msra.mxu0 %v15022_v36  ;;  %v15058_v59 = vld [vmem:[#allocation4 + $0xb00] ss:$20 sps:$4 sm:$0xff]   ;;  %v15003_v50 = vld [vmem:[#allocation4 + $0xc10] ss:$20 sps:$4 sm:$0xff]  }
 0xb34   :  { %v11283_v16 = vadd.f32 %v11282_v32, %v19052_v34  ;;  %v19078_v2 = vadd.f32 %v19068_v10, %v11281_v28  ;;  %11606 = vmatprep.mubr.bf16.mxu1 %v18824_v39  ;;  %13517 = vmatprep.subr.bf16.mxu0 %v15024_v61  ;;  %v15030_v34 = vld [vmem:[#allocation4 + $0x5d8] ss:$20 sps:$4 sm:$0xff]   ;;  %v15032_v10 = vld [vmem:[#allocation4 + $0x6f0] ss:$20 sps:$4 sm:$0xff]  }
 0xb35   :  { %v11284_v5 = vpop.f32.mrf.mxu1  ;;  %11727 = vmatprep.mubr.bf16.mxu0 %v18788_v9  ;;  %v15036_v9 = vld [vmem:[#allocation4 + $0x6c8] ss:$20 sps:$4 sm:$0xff]   ;;  %v15060_v61 = vld [vmem:[#allocation4 + $0xc18] ss:$20 sps:$4 sm:$0xff]  }
 0xb36   :  { %v19083_v63 = vadd.f32 %v19071_v14, %v11283_v16  ;;  %11577 = vmatpush1.bf16.msra.mxu1 %v14976_v13  ;;  %v14985_v14 = vld [vmem:[#allocation4 + $0xa80] ss:$20 sps:$4 sm:$0xff]   ;;  %v15062_v32 = vld [vmem:[#allocation4 + $0xad8] ss:$20 sps:$4 sm:$0xff]   ;;  %v15068_v5 = vld [vmem:[#allocation4 + $0xbc8] ss:$20 sps:$4 sm:$0xff]  }
 0xb37   :  { %v11285_v29 = vpop.f32.mrf.mxu1  ;;  %11578 = vmatprep.subr.bf16.mxu1 %v14981_v43  ;;  %13518 = vmatpush3.bf16.msra.mxu0 %v15026_v21  ;;  %v15008_v13 = vld [vmem:[#allocation4 + $0xbec] ss:$20 sps:$4 sm:$0xff]   ;;  %v15006_v21 = vld [vmem:[#allocation4 + $0xbe8] ss:$20 sps:$4 sm:$0xff]   ;;  %v15011_v16 = vld [vmem:[#allocation4 + $0xbc4] ss:$20 sps:$4 sm:$0xff]  }
 0xb38   :  { %13519 = vmatprep.subr.bf16.mxu0 %v15028_v48  ;;  %v15066_v48 = vld [vmem:[#allocation4 + $0xab0] ss:$20 sps:$4 sm:$0xff]   ;;  %v15070_v29 = vld [vmem:[#allocation4 + $0xa88] ss:$20 sps:$4 sm:$0xff]  }
 0xb3a   :  { %11579 = vmatpush1.bf16.msra.mxu1 %v14979_v24  ;;  %v15014_v24 = vld [vmem:[#allocation4 + $0xb9c] ss:$20 sps:$4 sm:$0xff]  }
 0xb3b   :  { %11580 = vmatprep.subr.bf16.mxu1 %v14984_v30  ;;  %13520 = vmatpush3.bf16.msra.mxu0 %v15030_v34  ;;  %v15072_v30 = vld [vmem:[#allocation4 + $0xba0] ss:$20 sps:$4 sm:$0xff]   ;;  %v15012_v34 = vld [vmem:[#allocation4 + $0xb98] ss:$20 sps:$4 sm:$0xff]  }
 0xb3c   :  { %13521 = vmatprep.subr.bf16.mxu0 %v15032_v10  ;;  %v15017_v10 = vld [vmem:[#allocation4 + $0xb74] ss:$20 sps:$4 sm:$0xff]  }
 0xb3e   :  { %11581 = vmatpush1.bf16.msra.mxu1 %v14982_v26  ;;  %v15074_v26 = vld [vmem:[#allocation4 + $0xa60] ss:$20 sps:$4 sm:$0xff]  }
 0xb3f   :  { %11582 = vmatprep.subr.bf16.mxu1 %v14987_v12  ;;  %13522 = vmatpush3.bf16.msra.mxu0 %v15034_v54  ;;  %v15076_v12 = vld [vmem:[#allocation4 + $0xb78] ss:$20 sps:$4 sm:$0xff]   ;;  %v15015_v54 = vld [vmem:[#allocation4 + $0xb70] ss:$20 sps:$4 sm:$0xff]  }
 0xb40   :  { %13523 = vmatprep.subr.bf16.mxu0 %v15036_v9  ;;  %v15020_v9 = vld [vmem:[#allocation4 + $0xb4c] ss:$20 sps:$4 sm:$0xff]  }
 0xb42   :  { %11583 = vmatpush1.bf16.msra.mxu1 %v14985_v14  ;;  %v15078_v14 = vld [vmem:[#allocation4 + $0xa38] ss:$20 sps:$4 sm:$0xff]  }
 0xb43   :  { %11584 = vmatprep.subr.bf16.mxu1 %v14990_v6  ;;  %13524 = vmatpush3.bf16.msra.mxu0 %v15038_v15  ;;  %v15080_v6 = vld [vmem:[#allocation4 + $0xb50] ss:$20 sps:$4 sm:$0xff]   ;;  %v15018_v15 = vld [vmem:[#allocation4 + $0xb48] ss:$20 sps:$4 sm:$0xff]  }
 0xb44   :  { %13525 = vmatprep.subr.bf16.mxu0 %v15040_v25  ;;  %v15023_v25 = vld [vmem:[#allocation4 + $0x4e8] ss:$20 sps:$4 sm:$0xff]  }
 0xb46   :  { %11585 = vmatpush1.bf16.msra.mxu1 %v14988_v20  ;;  %v15082_v20 = vld [vmem:[#allocation4 + $0xa10] ss:$20 sps:$4 sm:$0xff]  }
 0xb47   :  { %11586 = vmatprep.subr.bf16.mxu1 %v14993_v17  ;;  %13526 = vmatpush3.bf16.msra.mxu0 %v15042_v51  ;;  %v15025_v17 = vld [vmem:[#allocation4 + $0x3a8] ss:$20 sps:$4 sm:$0xff]   ;;  %v15027_v51 = vld [vmem:[#allocation4 + $0x4c0] ss:$20 sps:$4 sm:$0xff]  }
 0xb48   :  { %13527 = vmatprep.subr.bf16.mxu0 %v15044_v47 }
 0xb4a   :  { %11587 = vmatpush1.bf16.msra.mxu1 %v14991_v31 }
 0xb4b   :  { %11588 = vmatprep.subr.bf16.mxu1 %v14996_v22  ;;  %13528 = vmatpush3.bf16.msra.mxu0 %v15046_v45  ;;  %v15029_v22 = vld [vmem:[#allocation4 + $0x380] ss:$20 sps:$4 sm:$0xff]  }
 0xb4c   :  { %13529 = vmatprep.subr.bf16.mxu0 %v15048_v1  ;;  %v15031_v1 = vld [vmem:[#allocation4 + $0x498] ss:$20 sps:$4 sm:$0xff]  }
 0xb4e   :  { %11589 = vmatpush1.bf16.msra.mxu1 %v14994_v57 }
 0xb4f   :  { %11590 = vmatprep.subr.bf16.mxu1 %v14999_v38  ;;  %13530 = vmatpush3.bf16.msra.mxu0 %v15050_v11 }
 0xb50   :  { %13559 = vmatprep.subr.bf16.mxu0 %v15052_v55 }
 0xb52   :  { %11591 = vmatpush2.bf16.msra.mxu1 %v14997_v56  ;;  %v19085_v18 = vpop.f32.mrf.mxu0  ;;  %11728 = vmatmul.mubr.bf16.vlgmr.msra.gmra.mxu0 %v18816_v53  ;;  %v15064_v53 = vld [vmem:[#allocation4 + $0xbf0] ss:$20 sps:$4 sm:$0xff]  }
 0xb53   :  { %11592 = vmatprep.subr.bf16.mxu1 %v15002_v37  ;;  %13560 = vmatpush3.bf16.msra.mxu0 %v15054_v41  ;;  %v15035_v37 = vld [vmem:[#allocation4 + $0x470] ss:$20 sps:$4 sm:$0xff]   ;;  %v15039_v41 = vld [vmem:[#allocation4 + $0x448] ss:$20 sps:$4 sm:$0xff]  }
 0xb54   :  { %v19088_v36 = vpop.f32.mrf.mxu0  ;;  %13561 = vmatprep.subr.bf16.mxu0 %v15056_v35  ;;  %11807 = vmatprep.mubr.bf16.mxu0 %v18824_v39  ;;  %v15009_v39 = vld [vmem:[#allocation4 + $0xbc0] ss:$20 sps:$4 sm:$0xff]  }
 0xb55   :  { %v15045_v35 = vld [vmem:[#allocation4 + $0x2e0] ss:$20 sps:$4 sm:$0xff]  }
 0xb56   :  { %11593 = vmatpush2.bf16.msra.mxu1 %v15000_v8  ;;  %v11407_v28 = vpop.f32.mrf.mxu0  ;;  %v15047_v8 = vld [vmem:[#allocation4 + $0x3f8] ss:$20 sps:$4 sm:$0xff]  }
 0xb57   :  { %11594 = vmatprep.subr.bf16.mxu1 %v15005_v49  ;;  %13562 = vmatpush3.bf16.msra.mxu0 %v15058_v59  ;;  %v15051_v49 = vld [vmem:[#allocation4 + $0x3d0] ss:$20 sps:$4 sm:$0xff]   ;;  %v15061_v28 = vld [vmem:[#allocation4 + $0x880] ss:$20 sps:$4 sm:$0xff]  }
 0xb58   :  { %v11408_v43 = vpop.f32.mrf.mxu0  ;;  %13563 = vmatprep.subr.bf16.mxu0 %v15060_v61  ;;  %v15053_v59 = vld [vmem:[#allocation4 + $0x290] ss:$20 sps:$4 sm:$0xff]   ;;  %v15057_v61 = vld [vmem:[#allocation4 + $0x8a8] ss:$20 sps:$4 sm:$0xff]  }
 0xb5a   :  { %11595 = vmatpush2.bf16.msra.mxu1 %v15003_v50  ;;  %v15059_v50 = vld [vmem:[#allocation4 + $0x9c0] ss:$20 sps:$4 sm:$0xff]  }
 0xb5b   :  { %11596 = vmatprep.subr.bf16.mxu1 %v15008_v13  ;;  %13564 = vmatpush3.bf16.msra.mxu0 %v15062_v32  ;;  %v15063_v32 = vld [vmem:[#allocation4 + $0x998] ss:$20 sps:$4 sm:$0xff]  }
 0xb5c   :  { %13565 = vmatprep.subr.bf16.mxu0 %v15064_v53  ;;  %v15065_v53 = vld [vmem:[#allocation4 + $0x858] ss:$20 sps:$4 sm:$0xff]  }
 0xb5e   :  { %11597 = vmatpush2.bf16.msra.mxu1 %v15006_v21 }
 0xb5f   :  { %11598 = vmatprep.subr.bf16.mxu1 %v15011_v16  ;;  %13566 = vmatpush3.bf16.msra.mxu0 %v15066_v48  ;;  %v15067_v16 = vld [vmem:[#allocation4 + $0x970] ss:$20 sps:$4 sm:$0xff]  }
 0xb60   :  { %13567 = vmatprep.subr.bf16.mxu0 %v15068_v5  ;;  %v15069_v5 = vld [vmem:[#allocation4 + $0x830] ss:$20 sps:$4 sm:$0xff]  }
 0xb62   :  { %11599 = vmatpush2.bf16.msra.mxu1 %v15009_v39  ;;  %v15071_v39 = vld [vmem:[#allocation4 + $0x948] ss:$20 sps:$4 sm:$0xff]  }
 0xb63   :  { %11600 = vmatprep.subr.bf16.mxu1 %v15014_v24  ;;  %13568 = vmatpush3.bf16.msra.mxu0 %v15070_v29  ;;  %v15075_v24 = vld [vmem:[#allocation4 + $0x920] ss:$20 sps:$4 sm:$0xff]   ;;  %v15079_v29 = vld [vmem:[#allocation4 + $0x8f8] ss:$20 sps:$4 sm:$0xff]  }
 0xb64   :  { %13569 = vmatprep.subr.bf16.mxu0 %v15072_v30  ;;  %v15081_v30 = vld [vmem:[#allocation4 + $0x7b8] ss:$20 sps:$4 sm:$0xff]  }
 0xb66   :  { %11601 = vmatpush2.bf16.msra.mxu1 %v15012_v34  ;;  %v15083_v34 = vld [vmem:[#allocation4 + $0x8d0] ss:$20 sps:$4 sm:$0xff]  }
 0xb67   :  { %11602 = vmatprep.subr.bf16.mxu1 %v15017_v10  ;;  %13570 = vmatpush3.bf16.msra.mxu0 %v15074_v26  ;;  %v15084_v10 = vld [vmem:[#allocation4 + $0x790] ss:$20 sps:$4 sm:$0xff]  }
 0xb68   :  { %13571 = vmatprep.subr.bf16.mxu0 %v15076_v12 }
 0xb6a   :  { %11603 = vmatpush2.bf16.msra.mxu1 %v15015_v54  ;;  %v15105_v54 = vld [vmem:[#allocation10 + $0x10] sm:$0xff] }
 0xb6b   :  { %11604 = vmatprep.subr.bf16.mxu1 %v15020_v9  ;;  %13572 = vmatpush3.bf16.msra.mxu0 %v15078_v14  ;;  %v19107_v9 = vsub.f32 %v15105_v54, %v18671_v23 }
 0xb6c   :  { %13573 = vmatprep.subr.bf16.mxu0 %v15080_v6 }
 0xb6d   :  { %11911 = vst [vmem:[#allocation8 + $0x10] sm:$0xff] %v19107_v9 }
 0xb6e   :  { %11605 = vmatpush2.bf16.msra.mxu1 %v15018_v15 }
 0xb6f   :  { %13493 = vmatprep.subr.bf16.mxu1 %v15023_v25  ;;  %13574 = vmatpush3.bf16.msra.mxu0 %v15082_v20  ;;  %v15106_v20 = vld [vmem:[#allocation10 + $0x18] sm:$0xff] }
 0xb71   :  { %v11362_v47 = vpop.f32.mrf.mxu1  ;;  %11607 = vmatmul.mubr.bf16.vlgmr.msra.gmra.mxu1 %v18844_v52 }
 0xb72   :  { %v11363_v31 = vadd.f32 %v11362_v47, %v19078_v2  ;;  %13494 = vmatpush3.bf16.msra.mxu1 %v15025_v17  ;;  %11687 = vmatprep.mubr.bf16.mxu1 %v18761_v60  ;;  %v15033_v2 = vld [vmem:[#allocation4 + $0x358] ss:$20 sps:$4 sm:$0xff]   ;;  %v15037_v60 = vld [vmem:[#allocation4 + $0x330] ss:$20 sps:$4 sm:$0xff]   ;;  %v19112_v17 = vsub.f32 %v15106_v20, %v18684_v42 }
 0xb73   :  { %v11364_v45 = vpop.f32.mrf.mxu1  ;;  %13495 = vmatprep.subr.bf16.mxu1 %v15027_v51  ;;  %11808 = vmatmul.mubr.bf16.vlgmr.msra.gmra.mxu0 %v18844_v52  ;;  %v15041_v52 = vld [vmem:[#allocation4 + $0x308] ss:$20 sps:$4 sm:$0xff]  }
 0xb74   :  { %v11365_v57 = vadd.f32 %v11364_v45, %v19083_v63  ;;  %v19097_v38 = vadd.f32 %v19085_v18, %v11363_v31  ;;  %v15043_v63 = vld [vmem:[#allocation4 + $0x420] ss:$20 sps:$4 sm:$0xff]   ;;  %v15049_v18 = vld [vmem:[#allocation4 + $0x2b8] ss:$20 sps:$4 sm:$0xff]   ;;  %11912 = vst [vmem:[#allocation8 + $0x18] sm:$0xff] %v19112_v17 }
 0xb75   :  { %v11366_v11 = vpop.f32.mrf.mxu1 }
 0xb76   :  { %v19100_v55 = vadd.f32 %v19088_v36, %v11365_v57  ;;  %13496 = vmatpush3.bf16.msra.mxu1 %v15029_v22  ;;  %v15055_v36 = vld [vmem:[#allocation4 + $0x9e8] ss:$20 sps:$4 sm:$0xff]  }
 0xb77   :  { %v11367_v56 = vpop.f32.mrf.mxu1  ;;  %13497 = vmatprep.subr.bf16.mxu1 %v15031_v1 }
 0xb7a   :  { %13498 = vmatpush3.bf16.msra.mxu1 %v15033_v2 }
 0xb7b   :  { %13499 = vmatprep.subr.bf16.mxu1 %v15035_v37 }
 0xb7e   :  { %13500 = vmatpush3.bf16.msra.mxu1 %v15037_v60 }
 0xb7f   :  { %13501 = vmatprep.subr.bf16.mxu1 %v15039_v41 }
 0xb82   :  { %13502 = vmatpush3.bf16.msra.mxu1 %v15041_v52 }
 0xb83   :  { %13503 = vmatprep.subr.bf16.mxu1 %v15043_v63 }
 0xb86   :  { %13504 = vmatpush3.bf16.msra.mxu1 %v15045_v35  ;;  %v15107_v35 = vld [vmem:[#allocation10 + $0x20] sm:$0xff] }
 0xb87   :  { %13505 = vmatprep.subr.bf16.mxu1 %v15047_v8  ;;  %v11819_v8 = vsub.f32 %v15107_v35, %v18702_v7 }
 0xb89   :  { %11913 = vst [vmem:[#allocation8 + $0x20] sm:$0xff] %v11819_v8 }
 0xb8a   :  { %13506 = vmatpush3.bf16.msra.mxu1 %v15049_v18  ;;  %v11847_v18 = vsel %vm3469_vm1, %v18729_v3, 0.0 }
 0xb8b   :  { %13507 = vmatprep.subr.bf16.mxu1 %v15051_v49  ;;  %v11848_v49 = vrot.slane %v11847_v18, 4 }
 0xb8e   :  { %13508 = vmatpush3.bf16.msra.mxu1 %v15053_v59  ;;  %v11849_v59 = vadd.f32 %v11848_v49, %v11847_v18 }
 0xb8f   :  { %13537 = vmatprep.subr.bf16.mxu1 %v15055_v36 }
 0xb90   :  { %v11850_v36 = vrot.slane %v11849_v59, 2 }
 0xb91   :  { %11688 = vmatmul.mubr.bf16.vlgmr.msra.gmra.mxu1 %v18784_v0  ;;  %v15073_v0 = vld [vmem:[#allocation4 + $0x808] ss:$20 sps:$4 sm:$0xff]  }
 0xb92   :  { %13538 = vmatpush3.bf16.msra.mxu1 %v15057_v61  ;;  %11767 = vmatprep.mubr.bf16.mxu1 %v18792_v27  ;;  %v11485_v13 = vpop.f32.mrf.mxu0  ;;  %v15077_v27 = vld [vmem:[#allocation4 + $0x7e0] ss:$20 sps:$4 sm:$0xff]   ;;  %v11851_v61 = vadd.f32 %v11850_v36, %v11849_v59 }
 0xb93   :  { %13539 = vmatprep.subr.bf16.mxu1 %v15059_v50 }
 0xb94   :  { %v11487_v43 = vpop.f32.mrf.mxu0  ;;  %v11852_v50 = vrot.slane %v11851_v61, 1 }
 0xb96   :  { %13540 = vmatpush3.bf16.msra.mxu1 %v15061_v28  ;;  %v11489_v21 = vpop.f32.mrf.mxu0  ;;  %v11853_v28 = vadd.f32 %v11852_v50, %v11851_v61 }
 0xb97   :  { %13541 = vmatprep.subr.bf16.mxu1 %v15063_v32 }
 0xb98   :  { %v11490_v48 = vpop.f32.mrf.mxu0 }
 0xb9a   :  { %13542 = vmatpush3.bf16.msra.mxu1 %v15065_v53 }
 0xb9b   :  { %13543 = vmatprep.subr.bf16.mxu1 %v15067_v16 }
 0xb9e   :  { %13544 = vmatpush3.bf16.msra.mxu1 %v15069_v5 }
 0xb9f   :  { %13545 = vmatprep.subr.bf16.mxu1 %v15071_v39 }
 0xba2   :  { %13546 = vmatpush3.bf16.msra.mxu1 %v15073_v0 }
 0xba3   :  { %13547 = vmatprep.subr.bf16.mxu1 %v15075_v24 }
 0xba6   :  { %13548 = vmatpush3.bf16.msra.mxu1 %v15077_v27 }
 0xba7   :  { %13549 = vmatprep.subr.bf16.mxu1 %v15079_v29 }
 0xbaa   :  { %13550 = vmatpush3.bf16.msra.mxu1 %v15081_v30 }
 0xbab   :  { %13551 = vmatprep.subr.bf16.mxu1 %v15083_v34 }
 0xbae   :  { %13552 = vmatpush3.bf16.msra.mxu1 %v15084_v10 }
 0xbb1   :  { %v11444_v26 = vpop.f32.mrf.mxu1  ;;  %11768 = vmatmul.mubr.bf16.vlgmr.msra.gmra.mxu1 %v18820_v62 }
 0xbb2   :  { %v11445_v12 = vadd.f32 %v11444_v26, %v19038_v19 }
 0xbb3   :  { %v11446_v14 = vpop.f32.mrf.mxu1 }
 0xbb4   :  { %v11447_v6 = vadd.f32 %v11446_v14, %v19041_v40  ;;  %v11486_v15 = vadd.f32 %v11485_v13, %v11445_v12  ;;  %v11855_v13 = vmul.f32 0.125, %v11853_v28 }
 0xbb5   :  { %v11448_v25 = vpop.f32.mrf.mxu1 }
 0xbb6   :  { %v11488_v51 = vadd.f32 %v11487_v43, %v11447_v6  ;;  %v11856_v43 = vadd.f32 1e-10, %v11855_v13 }
 0xbb7   :  { %v11449_v47 = vpop.f32.mrf.mxu1 }
 0xbb8   :  { %15085 = vlog2.f32 %v11856_v43 }
 0xbc5   :  { %v15086_v48 = vpop.eup %15085 }
 0xbc6   :  { %v11858_v7 = vmul.f32 0.6931472, %v15086_v48 }
 0xbc8   :  { %v11859_v5 = vmul.f32 %v11858_v7, %v11855_v13 }
 0xbca   :  { %v11860_v39 = vsel %vm3469_vm1, %v11859_v5, 0.0 }
 0xbcb   :  { %11861 = vadd.xlane.f32.xlu1 %v11860_v39 }
 0xbd2   :  { %v11567_v62 = vpop.f32.mrf.mxu0 }
 0xbd4   :  { %v11569_v19 = vpop.f32.mrf.mxu0 }
 0xbd6   :  { %v11571_v31 = vpop.f32.mrf.mxu0 }
 0xbd8   :  { %v11572_v23 = vpop.f32.mrf.mxu0 }
 0xbd9   :  { %v11820_v23 = vsub.f32 %v19097_v38, %v19060_v4 }
 0xbf1   :  { %v11526_v22 = vpop.f32.mrf.mxu1 }
 0xbf2   :  { %v11527_v45 = vadd.f32 %v11526_v22, %v11486_v15  ;;  %v13487_v1 = vpop.f32.mrf.mxu0 }
 0xbf3   :  { %v11528_v40 = vpop.f32.mrf.mxu1 }
 0xbf4   :  { %v11529_v57 = vadd.f32 %v11528_v40, %v11488_v51  ;;  %v13488_v11 = vpop.f32.mrf.mxu0  ;;  %v11568_v2 = vadd.f32 %v11567_v62, %v11527_v45 }
 0xbf5   :  { %v13489_v56 = vadd.f32 %v13488_v11, %v13487_v1  ;;  %v11530_v37 = vpop.f32.mrf.mxu1 }
 0xbf6   :  { %v13490_v60 = vpop.f32.mrf.mxu0  ;;  %v11570_v42 = vadd.f32 %v11569_v19, %v11529_v57  ;;  %v11821_v19 = vsub.f32 %v19100_v55, %v19064_v58 }
 0xbf7   :  { %v11650_v41 = vadd.f32 %v13489_v56, %v19056_v46  ;;  %v11531_v52 = vpop.f32.mrf.mxu1 }
 0xbf8   :  { %v13491_v63 = vpop.f32.mrf.mxu0  ;;  %v11826_v40 = vmul.f32 %v11821_v19, %v11821_v19 }
 0xc12   :  { %v13531_v32 = vpop.f32.mrf.mxu0 }
 0xc14   :  { %v13532_v53 = vpop.f32.mrf.mxu0 }
 0xc15   :  { %v13533_v46 = vadd.f32 %v13532_v53, %v13531_v32 }
 0xc16   :  { %v13534_v21 = vpop.f32.mrf.mxu0 }
 0xc18   :  { %v13535_v16 = vpop.f32.mrf.mxu0 }
 0xc31   :  { %v11608_v3 = vpop.f32.mrf.mxu1 }
 0xc32   :  { %v11609_v0 = vadd.f32 %v11608_v3, %v11568_v2  ;;  %v11825_v2 = vmul.f32 %v11820_v23, %v11820_v23 }
 0xc33   :  { %v11610_v24 = vpop.f32.mrf.mxu1  ;;  %v13575_v27 = vpop.f32.mrf.mxu0 }
 0xc34   :  { %v11611_v29 = vadd.f32 %v11610_v24, %v11570_v42  ;;  %v11822_v22 = vsub.f32 %v11609_v0, %v19107_v9  ;;  %v11830_v58 = vadd.f32 %v11826_v40, %v11825_v2 }
 0xc35   :  { %v11612_v30 = vpop.f32.mrf.mxu1  ;;  %v13576_v34 = vpop.f32.mrf.mxu0 }
 0xc36   :  { %v13577_v10 = vadd.f32 %v13576_v34, %v13575_v27  ;;  %v11827_v56 = vmul.f32 %v11822_v22, %v11822_v22  ;;  %v11823_v37 = vsub.f32 %v11611_v29, %v19112_v17  ;;  %v11873_v63 = vmax.f32 %v11609_v0, %v11611_v29 }
 0xc37   :  { %v11613_v26 = vpop.f32.mrf.mxu1  ;;  %v13578_v12 = vpop.f32.mrf.mxu0 }
 0xc38   :  { %v11828_v4 = vmul.f32 %v11823_v37, %v11823_v37  ;;  %v11831_v35 = vadd.f32 %v11830_v58, %v11827_v56 }
 0xc39   :  { %v13579_v54 = vpop.f32.mrf.mxu0 }
 0xc3a   :  { %v11832_v49 = vadd.f32 %v11831_v35, %v11828_v4 }
 0xc51   :  { %v13509_v14 = vpop.f32.mrf.mxu1 }
 0xc53   :  { %v13510_v6 = vpop.f32.mrf.mxu1 }
 0xc54   :  { %v13511_v15 = vadd.f32 %v13510_v6, %v13509_v14 }
 0xc55   :  { %v13512_v25 = vpop.f32.mrf.mxu1 }
 0xc56   :  { %v11690_v20 = vadd.f32 %v13511_v15, %v11650_v41 }
 0xc57   :  { %v13513_v51 = vpop.f32.mrf.mxu1 }
 0xc58   :  { %v11730_v47 = vadd.f32 %v13533_v46, %v11690_v20 }
 0xc71   :  { %v13553_v62 = vpop.f32.mrf.mxu1 }
 0xc73   :  { %v13554_v31 = vpop.f32.mrf.mxu1 }
 0xc74   :  { %v13555_v45 = vadd.f32 %v13554_v31, %v13553_v62 }
 0xc75   :  { %v13556_v1 = vpop.f32.mrf.mxu1 }
 0xc76   :  { %v11770_v57 = vadd.f32 %v13555_v45, %v11730_v47 }
 0xc77   :  { %v13557_v11 = vpop.f32.mrf.mxu1 }
 0xc78   :  { %v11810_v60 = vadd.f32 %v13577_v10, %v11770_v57 }
 0xc7a   :  { %v11871_v42 = vmax.f32 %v19097_v38, %v11810_v60  ;;  %v11824_v41 = vsub.f32 %v11810_v60, %v11819_v8 }
 0xc7c   :  { %v11872_v52 = vmax.f32 %v11871_v42, %v19100_v55  ;;  %v11829_v18 = vmul.f32 %v11824_v41, %v11824_v41 }
 0xc7e   :  { %v11874_v9 = vmax.f32 %v11872_v52, %v11873_v63  ;;  %v11833_v59 = vadd.f32 %v11832_v49, %v11829_v18 }
 0xc80   :  { %11875 = vmax.xlane.f32.xlu0 %v11874_v9 }
 0xc84   :  { %11834 = vadd.xlane.f32.xlu0 %v11833_v59 }
 0xd09   :  { %v11876_v36 = vpop.xlane.xlu0 %11875 }
 0xd0a   :  { %v11877_v61 = vsub.f32 %v19097_v38, %v11876_v36  ;;  %v11878_v17 = vsub.f32 %v19100_v55, %v11876_v36  ;;  %v11879_v50 = vsub.f32 %v11609_v0, %v11876_v36  ;;  %v11880_v28 = vsub.f32 %v11611_v29, %v11876_v36 }
 0xd0b   :  { %v11881_v32 = vsub.f32 %v11810_v60, %v11876_v36 }
 0xd0c   :  { %v11882_v8 = vmul.f32 1.442695, %v11877_v61  ;;  %v11884_v13 = vmul.f32 1.442695, %v11878_v17  ;;  %v11886_v43 = vmul.f32 1.442695, %v11879_v50 }
 0xd0d   :  { %v11835_v53 = vpop.xlane.xlu0 %11834  ;;  %v11888_v21 = vmul.f32 1.442695, %v11880_v28  ;;  %v11890_v48 = vmul.f32 1.442695, %v11881_v32 }
 0xd0e   :  { %15087 = vpow2.f32 %v11882_v8  ;;  %v11836_v46 = vrot.slane %v11835_v53, 4 }
 0xd0f   :  { %15089 = vpow2.f32 %v11884_v13 }
 0xd10   :  { %v11837_v16 = vadd.f32 %v11836_v46, %v11835_v53  ;;  %15091 = vpow2.f32 %v11886_v43 }
 0xd11   :  { %15093 = vpow2.f32 %v11888_v21 }
 0xd12   :  { %v11838_v7 = vrot.slane %v11837_v16, 2  ;;  %15095 = vpow2.f32 %v11890_v48 }
 0xd14   :  { %v11839_v5 = vadd.f32 %v11838_v7, %v11837_v16 }
 0xd16   :  { %v11840_v38 = vrot.slane %v11839_v5, 1 }
 0xd18   :  { %v11841_v55 = vadd.f32 %v11840_v38, %v11839_v5 }
 0xd1a   :  { %13613 = vpush %v11841_v55 }
 0xd1b   :  { %v15088_v39 = vpop.eup %15087 }
 0xd1c   :  { %v15090_v3 = vpop.eup %15089 }
 0xd1d   :  { %v11892_v0 = vadd.f32 %v15090_v3, %v15088_v39  ;;  %v15092_v24 = vpop.eup %15091 }
 0xd1e   :  { %v15094_v29 = vpop.eup %15093 }
 0xd1f   :  { %v11893_v27 = vadd.f32 %v15092_v24, %v11892_v0  ;;  %v15096_v34 = vpop.eup %15095 }
 0xd21   :  { %v11894_v30 = vadd.f32 %v15094_v29, %v11893_v27 }
 0xd23   :  { %v11895_v10 = vadd.f32 %v15096_v34, %v11894_v30 }
 0xd25   :  { %11896 = vadd.xlane.f32.xlu1 %v11895_v10 }
 0xd26   :  { %15119 = shalt.err (!%p15116_p4)
}
 0xd27   :  { %11940 = dma.vmem_to_hbm [thread:$0]  %s11938_s21, 640, %s19156_s11, [#allocation9]   ;;  %v11862_v26 = vpop.xlane.xlu1 %11861 }
 0xd28   :  { %v11863_v12 = vsub.f32 0.0, %v11862_v26  ;;  %s15182_s25 = smov [#allocation10]  }
 0xd29   :  { %s11947_s26 = sshll.u32 %s15182_s25, 4  ;;  %s11948_s26 = int_to_ptr.vmem [resolvable:$true] %s11947_s26 }
 0xd2a   :  { %v11864_v54 = vmul.f32 1.442695, %v11863_v12  ;;  %s15128_s27 = scalar_lea.vmem %s11948_s26, 640  ;;  %p15133_p6 = scmp.lt.s32.totalorder %s11948_s26, %s11948_s26 }
 0xd2b   :  { %p15129_p5 = scmp.ne.s32.totalorder %s11948_s26, %s15128_s27  ;;  %p15134_p7 = scmp.lt.s32.totalorder %s15128_s27, %s15128_s27 }
 0xd2c   :  { %15097 = vpow2.f32 %v11864_v54 }
 0xd2d   :  { %p15135_p8 = por %p15134_p7, %p15133_p6 }
 0xd2f   :  { %p15136_p9 = pnand %p15135_p8, %p15129_p5 }
 0xd31   :  { %15139 = shalt.err (!%p15136_p9)
}
 0xd32   :  { %11950 = dma.vmem_to_hbm [thread:$0]  %s11948_s26, 640, %s19157_s12, [#allocation9]   ;;  %vm11867_vm5 = vcmp.eq.s32.totalorder %v18718_v33, 1  ;;  %vm11866_vm6 = vcmp.eq.s32.totalorder %v18718_v33, 0 }
 0xd33   :  { %s15183_s12 = smov [#allocation6]  }
 0xd34   :  { %s11927_s13 = sshll.u32 %s15183_s12, 4  ;;  %s11928_s13 = int_to_ptr.vmem [resolvable:$true] %s11927_s13 }
 0xd35   :  { %s15148_s14 = scalar_lea.vmem %s11928_s13, 640  ;;  %p15153_p11 = scmp.lt.s32.totalorder %s11928_s13, %s11928_s13 }
 0xd36   :  { %p15149_p10 = scmp.ne.s32.totalorder %s11928_s13, %s15148_s14  ;;  %p15154_p12 = scmp.lt.s32.totalorder %s15148_s14, %s15148_s14 }
 0xd38   :  { %p15155_p13 = por %p15154_p12, %p15153_p11 }
 0xd39   :  { %v15098_v6 = vpop.eup %15097 }
 0xd3a   :  { %v11868_v20 = vsel %vm11867_vm5, %v15098_v6, 0.0  ;;  %p15156_p0 = pnand %p15155_p13, %p15149_p10 }
 0xd4b   :  { %s13614_s29 = spop %13613 }
 0xd4c   :  { %v11843_v14 = vstv %s13614_s29 }
 0xd4d   :  { %v11844_v15 = vmul.f32 0.0001953125, %v11843_v14 }
 0xd4f   :  { %v11845_v25 = vmul.f32 10.0, %v11844_v15 }
 0xd51   :  { %v11846_v51 = vadd.f32 %v11845_v25, %v18757_v44 }
 0xd53   :  { %v11869_v47 = vsel %vm11866_vm6, %v11846_v51, %v11868_v20 }
 0xd54   :  { %11870 = vst [vmem:[%s19154_s9] sm:$0x1] %v11869_v47 }
 0xdae   :  { %v11897_v62 = vpop.xlane.xlu1 %11896 }
 0xdaf   :  { %15099 = vrcp.f32 %v11897_v62 }
 0xdbc   :  { %v15100_v19 = vpop.eup %15099 }
 0xdbd   :  { %v11899_v31 = vmul.f32 %v15100_v19, %v15088_v39  ;;  %v11900_v23 = vmul.f32 %v15100_v19, %v15090_v3  ;;  %v11901_v22 = vmul.f32 %v15100_v19, %v15092_v24  ;;  %v11902_v45 = vmul.f32 %v15100_v19, %v15094_v29 }
 0xdbe   :  { %v11903_v1 = vmul.f32 %v15100_v19, %v15096_v34 }
 0xdbf   :  { %11904 = vst [vmem:[#allocation6] sm:$0xff] %v11899_v31  ;;  %11905 = vst [vmem:[#allocation6 + $0x8] sm:$0xff] %v11900_v23 }
 0xdc0   :  { %11906 = vst [vmem:[#allocation6 + $0x10] sm:$0xff] %v11901_v22  ;;  %11907 = vst [vmem:[#allocation6 + $0x18] sm:$0xff] %v11902_v45 }
 0xdc1   :  { %11908 = vst [vmem:[#allocation6 + $0x20] sm:$0xff] %v11903_v1 }
 0xdc2   :  { %15159 = shalt.err (!%p15156_p0)
}
 0xdc3   :  { %11930 = dma.vmem_to_hbm [thread:$0]  %s11928_s13, 640, %s19155_s10, [#allocation7]  }
 0xdc4   :  { %15174 = dma.done.wait [#allocation7], 640  }
 0xdc5   :  { %15175 = vsyncadd [#allocation7], 4294966656 }
 0xdc6   :  { %15176 = dma.done.wait [#allocation9], 1280  }
 0xdc7   :  { %15177 = vsyncadd [#allocation9], 4294966016 }
 0xdc8   :  { %11962 = vsyncpa [#allocation7], 1 }
 0xdc9   :  { %11963 = vsyncpa [#allocation9], 1 }
 0xdca   :  { %11964 = vsyncmov [#allocation5] }
 0xdcd   :  { %s11965_s16 = vpop.sfrf %11964 }
 0xdce   :  { %p13117_p1 = scmp.ne.s32.totalorder %s11965_s16, 0 }
 0xdd0   :  { %11969 = shalt.err (%p13117_p1)  }
 0xdd1   :  { %11971 = vsyncmov [#allocation5 + $0x1] }
 0xdd4   :  { %s11972_s17 = vpop.sfrf %11971 }
 0xdd5   :  { %p13118_p2 = scmp.ne.s32.totalorder %s11972_s17, 0 }
 0xdd7   :  { %11976 = shalt.err (%p13118_p2)  }
 0xdd8   :  { %11978 = vsyncmov [#allocation5 + $0x2] }
 0xddb   :  { %s11979_s18 = vpop.sfrf %11978 }
 0xddc   :  { %p13119_p3 = scmp.ne.s32.totalorder %s11979_s18, 0 }
 0xdde   :  { %11983 = shalt.err (%p13119_p3)  }

</bundles_post_ra>
